<compile_context>
chip_gen: v5e
topology: v5e:2x2
jax: 0.10.0
libtpu: 0.0.40
codegen_flags: <defaults>
</compile_context>

<pallas_src>
import functools

import jax
import jax.numpy as jnp
from jax.experimental import pallas as pl
from jax.experimental.pallas import tpu as pltpu

SEQ_LEN = 128  # hard-coded in the PyTorch forward


def _self_attention_kernel(x_ref, wq_ref, bq_ref, wk_ref, bk_ref,
                           wv_ref, bv_ref, wo_ref, bo_ref, o_ref, *, scale):
    bb, s, d = x_ref.shape

    # Flatten the batch block so the projection matmuls see M = bb * 128.
    # The reshape only merges leading (sublane-major) dims -> layout no-op.
    x2 = x_ref[...].astype(jnp.float32).reshape(bb * s, d)

    # TODO(synk): a fused (D, 3D) QKV matmul would cut MXU launches 3x, but
    # slicing the (tokens, 3D) result at lane offsets D / 2D (D=32, not a
    # multiple of 128) is not a supported Mosaic relayout, so the three
    # projections stay separate.
    q = jnp.dot(x2, wq_ref[...], preferred_element_type=jnp.float32) + bq_ref[...]
    k = jnp.dot(x2, wk_ref[...], preferred_element_type=jnp.float32) + bk_ref[...]
    v = jnp.dot(x2, wv_ref[...], preferred_element_type=jnp.float32) + bv_ref[...]

    # Fold the softmax scale into Q (cheaper than scaling the (s, s) scores).
    q3 = (q * scale).reshape(bb, s, d)
    k3 = k.reshape(bb, s, d)
    v3 = v.reshape(bb, s, d)

    # scores: batched contraction over the feature axis of both q and k
    # (transposed-RHS dot_general; no explicit k.T).
    scores = jnp.einsum("bqd,bkd->bqk", q3, k3,
                        preferred_element_type=jnp.float32)

    # Numerically-stable softmax, normalization deferred past the PV matmul.
    m = jnp.max(scores, axis=-1, keepdims=True)
    e = jnp.exp(scores - m)                              # EUP
    denom = jnp.sum(e, axis=-1, keepdims=True)           # (bb, s, 1), XLU

    # Unnormalized attended values, then one cheap rescale over d=32 columns.
    att = jnp.einsum("bqk,bkd->bqd", e, v3,
                     preferred_element_type=jnp.float32)
    att = att * pl.reciprocal(denom, approx=True)        # EUP slot, nearly free

    # Output projection back at M = bb * 128.
    out = jnp.dot(att.reshape(bb * s, d), wo_ref[...],
                  preferred_element_type=jnp.float32) + bo_ref[...]

    # TODO(synk): output last dim is D=32 (< 128 lanes); presenting a
    # lane-dense (bb, s*d) slab would need an in-kernel minor-dim merge
    # (relayout), so the natural (bb, s, d) layout is kept.
    o_ref[...] = out.reshape(bb, s, d).astype(o_ref.dtype)


def self_attention_forward(x, params, *, block_b=8):
    """x: (batch, input_size) with input_size = 128 * embed_dim."""
    batch, input_size = x.shape
    embed_dim = input_size // SEQ_LEN
    assert SEQ_LEN * embed_dim == input_size

    wq, bq, wk, bk, wv, bv, wo, bo = params
    scale = 1.0 / float(embed_dim) ** 0.5

    # Several batch elements per grid step: amortizes per-step overhead and
    # keeps the projection matmul M >= 256 (MXU fill); the grid still has
    # >= 2 steps for the demo shapes so both v7x TensorCores get work.
    bb = max(1, min(block_b, batch))
    padded_batch = pl.cdiv(batch, bb) * bb

    x3 = x.reshape(batch, SEQ_LEN, embed_dim)
    if padded_batch != batch:
        x3 = jnp.pad(x3, ((0, padded_batch - batch), (0, 0), (0, 0)))

    grid = (padded_batch // bb,)

    x_spec = pl.BlockSpec((bb, SEQ_LEN, embed_dim), lambda b: (b, 0, 0))
    # Constant block index -> weights/biases DMA'd once, reused every step.
    w_spec = pl.BlockSpec((embed_dim, embed_dim), lambda b: (0, 0))
    b_spec = pl.BlockSpec((1, embed_dim), lambda b: (0, 0))

    kernel = functools.partial(_self_attention_kernel, scale=scale)

    flops = padded_batch * (4 * 2 * SEQ_LEN * embed_dim * embed_dim
                            + 2 * 2 * SEQ_LEN * SEQ_LEN * embed_dim)
    bytes_accessed = (2 * padded_batch * SEQ_LEN * embed_dim * 4
                      + 4 * embed_dim * embed_dim * 4 + 4 * embed_dim * 4)
    cost = pl.CostEstimate(
        flops=flops,
        transcendentals=padded_batch * SEQ_LEN * (SEQ_LEN + 1),
        bytes_accessed=bytes_accessed)

    out3 = pl.pallas_call(
        kernel,
        out_shape=jax.ShapeDtypeStruct((padded_batch, SEQ_LEN, embed_dim),
                                       x.dtype),
        grid_spec=pltpu.PrefetchScalarGridSpec(
            num_scalar_prefetch=0,
            grid=grid,
            in_specs=[x_spec,
                      w_spec, b_spec,   # query
                      w_spec, b_spec,   # key
                      w_spec, b_spec,   # value
                      w_spec, b_spec],  # out
            out_specs=x_spec,
        ),
        compiler_params=pltpu.CompilerParams(
            dimension_semantics=("parallel",)),
        cost_estimate=cost,
    )(x3, wq, bq.reshape(1, -1), wk, bk.reshape(1, -1),
      wv, bv.reshape(1, -1), wo, bo.reshape(1, -1))

    out3 = out3[:batch]
    return out3.reshape(batch, -1)


def init_params(key, embed_dim):
    """Deterministic synthetic init.  Weights stored as (in_dim, out_dim)
    (already transposed relative to torch.nn.Linear.weight)."""
    keys = jax.random.split(key, 8)
    bound = 1.0 / float(embed_dim) ** 0.5
    def w(k):
        return jax.random.uniform(k, (embed_dim, embed_dim), jnp.float32,
                                  minval=-bound, maxval=bound)
    def b(k):
        return jax.random.uniform(k, (embed_dim,), jnp.float32,
                                  minval=-bound, maxval=bound)
    return (w(keys[0]), b(keys[1]),   # query
            w(keys[2]), b(keys[3]),   # key
            w(keys[4]), b(keys[5]),   # value
            w(keys[6]), b(keys[7]))   # out


def _reference(x, params):
    """Pure-JAX reference mirroring the PyTorch forward."""
    wq, bq, wk, bk, wv, bv, wo, bo = params
    batch, input_size = x.shape
    embed_dim = input_size // SEQ_LEN
    x3 = x.reshape(batch, SEQ_LEN, embed_dim)
    q = x3 @ wq + bq
    k = x3 @ wk + bk
    v = x3 @ wv + bv
    scores = jnp.einsum("bsd,btd->bst", q, k) / float(embed_dim) ** 0.5
    wts = jax.nn.softmax(scores, axis=-1)
    att = jnp.einsum("bst,btd->bsd", wts, v)
    out = att @ wo + bo
    return out.reshape(batch, -1)


if __name__ == "__main__":
    key = jax.random.PRNGKey(0)
    k_x, k_p = jax.random.split(key)

    embed_dim = 32                       # small embed_dim; seq_len fixed at 128
    batch = 16                           # 2 grid steps at block_b=8
    input_size = SEQ_LEN * embed_dim     # 4096

    x = jax.random.normal(k_x, (batch, input_size), jnp.float32)
    params = init_params(k_p, embed_dim)

    out = self_attention_forward(x, params, block_b=8)
    out = jax.block_until_ready(out)

    ref = _reference(x, params)
    assert out.shape == (batch, input_size)
    # slightly looser than 1e-4 to allow the EUP approx-reciprocal softmax.
    assert jnp.allclose(out, ref, atol=2e-3, rtol=2e-3), \
        float(jnp.max(jnp.abs(out - ref)))

    print("KERNEL_OK")
</pallas_src>

<mosaic_0001>
module attributes {stable_mosaic.version = 11 : i64} {
  func.func @_self_attention_kernel(%arg0: i32, %arg1: memref<8x128x32xf32, #tpu.memory_space<vmem>>, %arg2: memref<32x32xf32, #tpu.memory_space<vmem>>, %arg3: memref<1x32xf32, #tpu.memory_space<vmem>>, %arg4: memref<32x32xf32, #tpu.memory_space<vmem>>, %arg5: memref<1x32xf32, #tpu.memory_space<vmem>>, %arg6: memref<32x32xf32, #tpu.memory_space<vmem>>, %arg7: memref<1x32xf32, #tpu.memory_space<vmem>>, %arg8: memref<32x32xf32, #tpu.memory_space<vmem>>, %arg9: memref<1x32xf32, #tpu.memory_space<vmem>>, %arg10: memref<8x128x32xf32, #tpu.memory_space<vmem>>) attributes {dimension_semantics = [#tpu.dimension_semantics<parallel>], iteration_bounds = array<i64: 2>, scalar_prefetch = 0 : i64, scratch_operands = 0 : i64, tpu.core_type = #tpu.core_type<tc>, window_params = [{transform_indices = @transform_0, window_bounds = array<i64: 8, 128, 32>}, {pipeline_mode = #tpu.pipeline_mode<synchronous>, transform_indices = @transform_1, window_bounds = array<i64: 32, 32>}, {pipeline_mode = #tpu.pipeline_mode<synchronous>, transform_indices = @transform_2, window_bounds = array<i64: 1, 32>}, {pipeline_mode = #tpu.pipeline_mode<synchronous>, transform_indices = @transform_3, window_bounds = array<i64: 32, 32>}, {pipeline_mode = #tpu.pipeline_mode<synchronous>, transform_indices = @transform_4, window_bounds = array<i64: 1, 32>}, {pipeline_mode = #tpu.pipeline_mode<synchronous>, transform_indices = @transform_5, window_bounds = array<i64: 32, 32>}, {pipeline_mode = #tpu.pipeline_mode<synchronous>, transform_indices = @transform_6, window_bounds = array<i64: 1, 32>}, {pipeline_mode = #tpu.pipeline_mode<synchronous>, transform_indices = @transform_7, window_bounds = array<i64: 32, 32>}, {pipeline_mode = #tpu.pipeline_mode<synchronous>, transform_indices = @transform_8, window_bounds = array<i64: 1, 32>}, {transform_indices = @transform_9, window_bounds = array<i64: 8, 128, 32>}]} {
    %c0 = arith.constant 0 : index
    %c0_0 = arith.constant 0 : index
    %c0_1 = arith.constant 0 : index
    %0 = vector.load %arg1[%c0, %c0_0, %c0_1] : memref<8x128x32xf32, #tpu.memory_space<vmem>>, vector<8x128x32xf32>
    %1 = vector.shape_cast %0 : vector<8x128x32xf32> to vector<1024x32xf32>
    %c0_2 = arith.constant 0 : index
    %c0_3 = arith.constant 0 : index
    %2 = vector.load %arg2[%c0_2, %c0_3] : memref<32x32xf32, #tpu.memory_space<vmem>>, vector<32x32xf32>
    %cst = arith.constant dense<0.000000e+00> : vector<1024x32xf32>
    %3 = tpu.matmul %1, %2, %cst {dimension_numbers = #tpu.dot_dimension_numbers<[1], [0], [0], [1], [0, 0, 1, 1], [], []>} : vector<1024x32xf32>, vector<32x32xf32>, vector<1024x32xf32> -> vector<1024x32xf32>
    %c0_4 = arith.constant 0 : index
    %c0_5 = arith.constant 0 : index
    %4 = vector.load %arg3[%c0_4, %c0_5] : memref<1x32xf32, #tpu.memory_space<vmem>>, vector<1x32xf32>
    %5 = vector.broadcast %4 : vector<1x32xf32> to vector<1024x32xf32>
    %6 = arith.addf %3, %5 : vector<1024x32xf32>
    %c0_6 = arith.constant 0 : index
    %c0_7 = arith.constant 0 : index
    %7 = vector.load %arg4[%c0_6, %c0_7] : memref<32x32xf32, #tpu.memory_space<vmem>>, vector<32x32xf32>
    %cst_8 = arith.constant dense<0.000000e+00> : vector<1024x32xf32>
    %8 = tpu.matmul %1, %7, %cst_8 {dimension_numbers = #tpu.dot_dimension_numbers<[1], [0], [0], [1], [0, 0, 1, 1], [], []>} : vector<1024x32xf32>, vector<32x32xf32>, vector<1024x32xf32> -> vector<1024x32xf32>
    %c0_9 = arith.constant 0 : index
    %c0_10 = arith.constant 0 : index
    %9 = vector.load %arg5[%c0_9, %c0_10] : memref<1x32xf32, #tpu.memory_space<vmem>>, vector<1x32xf32>
    %10 = vector.broadcast %9 : vector<1x32xf32> to vector<1024x32xf32>
    %11 = arith.addf %8, %10 : vector<1024x32xf32>
    %c0_11 = arith.constant 0 : index
    %c0_12 = arith.constant 0 : index
    %12 = vector.load %arg6[%c0_11, %c0_12] : memref<32x32xf32, #tpu.memory_space<vmem>>, vector<32x32xf32>
    %cst_13 = arith.constant dense<0.000000e+00> : vector<1024x32xf32>
    %13 = tpu.matmul %1, %12, %cst_13 {dimension_numbers = #tpu.dot_dimension_numbers<[1], [0], [0], [1], [0, 0, 1, 1], [], []>} : vector<1024x32xf32>, vector<32x32xf32>, vector<1024x32xf32> -> vector<1024x32xf32>
    %c0_14 = arith.constant 0 : index
    %c0_15 = arith.constant 0 : index
    %14 = vector.load %arg7[%c0_14, %c0_15] : memref<1x32xf32, #tpu.memory_space<vmem>>, vector<1x32xf32>
    %15 = vector.broadcast %14 : vector<1x32xf32> to vector<1024x32xf32>
    %16 = arith.addf %13, %15 : vector<1024x32xf32>
    %cst_16 = arith.constant 0.176776692 : f32
    %17 = vector.broadcast %cst_16 : f32 to vector<1024x32xf32>
    %18 = arith.mulf %6, %17 : vector<1024x32xf32>
    %19 = vector.shape_cast %18 : vector<1024x32xf32> to vector<8x128x32xf32>
    %20 = vector.shape_cast %11 : vector<1024x32xf32> to vector<8x128x32xf32>
    %21 = vector.shape_cast %16 : vector<1024x32xf32> to vector<8x128x32xf32>
    "tpu.trace_start"() <{level = 10 : i32, message = "bqd,bkd->bqk"}> : () -> ()
    %cst_17 = arith.constant dense<0.000000e+00> : vector<8x128x128xf32>
    %22 = tpu.matmul %19, %20, %cst_17 {dimension_numbers = #tpu.dot_dimension_numbers<[2], [2], [1], [1], [0, 0, 0, 1, 1, 1], [0], [0]>} : vector<8x128x32xf32>, vector<8x128x32xf32>, vector<8x128x128xf32> -> vector<8x128x128xf32>
    "tpu.trace_stop"() : () -> ()
    %cst_18 = arith.constant dense<0xFF800000> : vector<8x128xf32>
    %23 = vector.multi_reduction <maximumf>, %22, %cst_18 [2] : vector<8x128x128xf32> to vector<8x128xf32>
    %24 = vector.shape_cast %23 : vector<8x128xf32> to vector<8x128x1xf32>
    %25 = vector.broadcast %24 : vector<8x128x1xf32> to vector<8x128x128xf32>
    %26 = arith.subf %22, %25 : vector<8x128x128xf32>
    %27 = math.exp %26 : vector<8x128x128xf32>
    %cst_19 = arith.constant dense<0.000000e+00> : vector<8x128xf32>
    %28 = vector.multi_reduction <add>, %27, %cst_19 [2] : vector<8x128x128xf32> to vector<8x128xf32>
    %29 = vector.shape_cast %28 : vector<8x128xf32> to vector<8x128x1xf32>
    "tpu.trace_start"() <{level = 10 : i32, message = "bqk,bkd->bqd"}> : () -> ()
    %cst_20 = arith.constant dense<0.000000e+00> : vector<8x128x32xf32>
    %30 = tpu.matmul %27, %21, %cst_20 {dimension_numbers = #tpu.dot_dimension_numbers<[2], [1], [1], [2], [0, 0, 0, 1, 1, 2], [0], [0]>} : vector<8x128x128xf32>, vector<8x128x32xf32>, vector<8x128x32xf32> -> vector<8x128x32xf32>
    "tpu.trace_stop"() : () -> ()
    %31 = tpu.reciprocal %29 {approx = true} : vector<8x128x1xf32> -> vector<8x128x1xf32>
    %32 = vector.broadcast %31 : vector<8x128x1xf32> to vector<8x128x32xf32>
    %33 = arith.mulf %30, %32 : vector<8x128x32xf32>
    %34 = vector.shape_cast %33 : vector<8x128x32xf32> to vector<1024x32xf32>
    %c0_21 = arith.constant 0 : index
    %c0_22 = arith.constant 0 : index
    %35 = vector.load %arg8[%c0_21, %c0_22] : memref<32x32xf32, #tpu.memory_space<vmem>>, vector<32x32xf32>
    %cst_23 = arith.constant dense<0.000000e+00> : vector<1024x32xf32>
    %36 = tpu.matmul %34, %35, %cst_23 {dimension_numbers = #tpu.dot_dimension_numbers<[1], [0], [0], [1], [0, 0, 1, 1], [], []>} : vector<1024x32xf32>, vector<32x32xf32>, vector<1024x32xf32> -> vector<1024x32xf32>
    %c0_24 = arith.constant 0 : index
    %c0_25 = arith.constant 0 : index
    %37 = vector.load %arg9[%c0_24, %c0_25] : memref<1x32xf32, #tpu.memory_space<vmem>>, vector<1x32xf32>
    %38 = vector.broadcast %37 : vector<1x32xf32> to vector<1024x32xf32>
    %39 = arith.addf %36, %38 : vector<1024x32xf32>
    %40 = vector.shape_cast %39 : vector<1024x32xf32> to vector<8x128x32xf32>
    %c0_26 = arith.constant 0 : index
    %c0_27 = arith.constant 0 : index
    %c0_28 = arith.constant 0 : index
    %41 = vector.load %arg10[%c0_26, %c0_27, %c0_28] : memref<8x128x32xf32, #tpu.memory_space<vmem>>, vector<8x128x32xf32>
    tpu.vector_store %arg10[%c0_26, %c0_27, %c0_28], %40 {strides = array<i32>} : memref<8x128x32xf32, #tpu.memory_space<vmem>>, vector<8x128x32xf32>,
    return
  }
  func.func @transform_0(%arg0: i32) -> (i32, i32, i32) {
    %c0_i32 = arith.constant 0 : i32
    %c0_i32_0 = arith.constant 0 : i32
    %c0_i32_1 = arith.constant 0 : i32
    return %arg0, %c0_i32, %c0_i32_0 : i32, i32, i32
  }
  func.func @transform_1(%arg0: i32) -> (i32, i32) {
    %c0_i32 = arith.constant 0 : i32
    %c0_i32_0 = arith.constant 0 : i32
    %c0_i32_1 = arith.constant 0 : i32
    return %c0_i32, %c0_i32_0 : i32, i32
  }
  func.func @transform_2(%arg0: i32) -> (i32, i32) {
    %c0_i32 = arith.constant 0 : i32
    %c0_i32_0 = arith.constant 0 : i32
    %c0_i32_1 = arith.constant 0 : i32
    return %c0_i32, %c0_i32_0 : i32, i32
  }
  func.func @transform_3(%arg0: i32) -> (i32, i32) {
    %c0_i32 = arith.constant 0 : i32
    %c0_i32_0 = arith.constant 0 : i32
    %c0_i32_1 = arith.constant 0 : i32
    return %c0_i32, %c0_i32_0 : i32, i32
  }
  func.func @transform_4(%arg0: i32) -> (i32, i32) {
    %c0_i32 = arith.constant 0 : i32
    %c0_i32_0 = arith.constant 0 : i32
    %c0_i32_1 = arith.constant 0 : i32
    return %c0_i32, %c0_i32_0 : i32, i32
  }
  func.func @transform_5(%arg0: i32) -> (i32, i32) {
    %c0_i32 = arith.constant 0 : i32
    %c0_i32_0 = arith.constant 0 : i32
    %c0_i32_1 = arith.constant 0 : i32
    return %c0_i32, %c0_i32_0 : i32, i32
  }
  func.func @transform_6(%arg0: i32) -> (i32, i32) {
    %c0_i32 = arith.constant 0 : i32
    %c0_i32_0 = arith.constant 0 : i32
    %c0_i32_1 = arith.constant 0 : i32
    return %c0_i32, %c0_i32_0 : i32, i32
  }
  func.func @transform_7(%arg0: i32) -> (i32, i32) {
    %c0_i32 = arith.constant 0 : i32
    %c0_i32_0 = arith.constant 0 : i32
    %c0_i32_1 = arith.constant 0 : i32
    return %c0_i32, %c0_i32_0 : i32, i32
  }
  func.func @transform_8(%arg0: i32) -> (i32, i32) {
    %c0_i32 = arith.constant 0 : i32
    %c0_i32_0 = arith.constant 0 : i32
    %c0_i32_1 = arith.constant 0 : i32
    return %c0_i32, %c0_i32_0 : i32, i32
  }
  func.func @transform_9(%arg0: i32) -> (i32, i32, i32) {
    %c0_i32 = arith.constant 0 : i32
    %c0_i32_0 = arith.constant 0 : i32
    %c0_i32_1 = arith.constant 0 : i32
    return %arg0, %c0_i32, %c0_i32_0 : i32, i32, i32
  }
}

</mosaic_0001>

<bundles_post_ra>
// kernel: tpu_custom_call.1
= control target key start
LH: loop header
LB: loop body
LE: loop exit
PB: predicated region body
PF: predicated region fallthrough
CT: control target
= control target key end

     0   :  { %s7635_s30 = smov 0   ;;  %s11899_s0 = inlined_call_operand.vmem [shape: f32[16,128,32], index: 0, kind: input, shape index: {}]   ;;  %s11900_s1 = inlined_call_operand.vmem [shape: f32[32,32], index: 1, kind: input, shape index: {}]   ;;  %s11901_s2 = inlined_call_operand.vmem [shape: f32[1,32], index: 2, kind: input, shape index: {}]   ;;  %s11902_s3 = inlined_call_operand.vmem [shape: f32[32,32], index: 3, kind: input, shape index: {}]   ;;  %s11903_s4 = inlined_call_operand.vmem [shape: f32[1,32], index: 4, kind: input, shape index: {}]   ;;  %s11904_s5 = inlined_call_operand.vmem [shape: f32[32,32], index: 5, kind: input, shape index: {}]   ;;  %s11905_s6 = inlined_call_operand.vmem [shape: f32[1,32], index: 6, kind: input, shape index: {}]   ;;  %s11906_s7 = inlined_call_operand.vmem [shape: f32[32,32], index: 7, kind: input, shape index: {}]   ;;  %s11907_s8 = inlined_call_operand.vmem [shape: f32[1,32], index: 8, kind: input, shape index: {}]   ;;  %s11908_s9 = inlined_call_operand.vmem [shape: f32[16,128,32], index: 9, kind: output, shape index: {}]  }
   0x1 LB: > { %s6148_s10 = sadd.s32 4294967295, %s7583_s30   ;;  %p6152_p0 = scmp.ge.s32.totalorder %s7583_s30, 1  ;;  %s7583_s30 = sphi %s7635_s30, %s19_s30  }
   0x2   : > { %p289_p1 = scmp.lt.s32.totalorder %s7583_s30, 3 }
   0x4   : > { %p290_p2 = pnand %p6152_p0, %p289_p1 }
   0x6   : > { %293 = sbr.rel (%p290_p2) target bundleno = 2634 (0xa4a), region = 56 }
   0xb   : > { %v472_v0 = vld [vmem:[%s11900_s1 + $0x18] sm:$0xff]  ;;  %v471_v1 = vld [vmem:[%s11900_s1 + $0x10] sm:$0xff]  ;;  %s6153_s15 = sshll.u32 %s6148_s10, 3  ;;  %v470_v2 = vld [vmem:[%s11900_s1 + $0x8] sm:$0xff]  ;;  %vm477_vm0 = vcmask 261120  }
   0xc   : > { %6931 = vmatpush.msra.mxu1 %v472_v0  ;;  %6932 = vmatpush.msra.mxu2 %v472_v0  ;;  %p328_p3 = scmp.lt.s32.totalorder %s6153_s15, 15  ;;  %v469_v3 = vld [vmem:[%s11900_s1] sm:$0xff]  ;;  %v1266_v51 = vld [vmem:[%s11902_s3 + $0x18] sm:$0xff] }
   0xd   : > { %6933 = vmatpush.msra.mxu3 %v472_v0  ;;  %874 = vmatpush.msra.mxu0 %v472_v0 }
   0xe   : > { %6934 = vmatpush.msra.mxu1 %v471_v1  ;;  %6935 = vmatpush.msra.mxu2 %v471_v1  ;;  %s12472_s15 = smov (!%p328_p3, %s6153_s15), 15 }
   0xf   : > { %6936 = vmatpush.msra.mxu3 %v471_v1  ;;  %875 = vmatpush.msra.mxu0 %v471_v1  ;;  %s6929_s20 = sshll.u32 %s12472_s15, 7 }
  0x10   : > { %6937 = vmatpush.msra.mxu1 %v470_v2  ;;  %6938 = vmatpush.msra.mxu2 %v470_v2  ;;  %s7663_s23 = scalar_lea.vmem %s11899_s0, %s6929_s20 }
  0x11   : > { %6939 = vmatpush.msra.mxu3 %v470_v2  ;;  %876 = vmatpush.msra.mxu0 %v470_v2  ;;  %v7666_v4 = vld [vmem:[%s7663_s23 + $0x110] sm:$0xff]  ;;  %v409_v5 = vld [vmem:[%s7663_s23 + $0x220] sm:$0xff]  ;;  %v7673_v6 = vld [vmem:[%s7663_s23 + $0x118] sm:$0xff] }
  0x12   : > { %6940 = vmatpush.msra.mxu1 %v469_v3  ;;  %6941 = vmatpush.msra.mxu2 %v469_v3  ;;  %v410_v7 = vld [vmem:[%s7663_s23 + $0x228] sm:$0xff]  ;;  %v7680_v8 = vld [vmem:[%s7663_s23 + $0x120] sm:$0xff]  ;;  %v411_v9 = vld [vmem:[%s7663_s23 + $0x230] sm:$0xff] }
  0x13   : > { %6193 = vmatmul.msk.f32.vlgmr.msra.gmra.mxu1 %vm477_vm0, %v7666_v4  ;;  %6227 = vmatmul.msk.f32.vlgmr.msra.gmra.mxu2 %vm477_vm0, %v409_v5  ;;  %v7687_v10 = vld [vmem:[%s7663_s23 + $0x128] sm:$0xff]  ;;  %v412_v11 = vld [vmem:[%s7663_s23 + $0x238] sm:$0xff]  ;;  %v7694_v12 = vld [vmem:[%s7663_s23 + $0x130] sm:$0xff] }
  0x14   : > { %6942 = vmatpush.msra.mxu3 %v469_v3  ;;  %877 = vmatpush.msra.mxu0 %v469_v3  ;;  %v413_v13 = vld [vmem:[%s7663_s23 + $0x240] sm:$0xff]  ;;  %v7701_v14 = vld [vmem:[%s7663_s23 + $0x138] sm:$0xff]  ;;  %v414_v15 = vld [vmem:[%s7663_s23 + $0x248] sm:$0xff] }
  0x15   : > { %v381_v16 = vld [vmem:[%s7663_s23 + $0x140] sm:$0xff]  ;;  %v415_v17 = vld [vmem:[%s7663_s23 + $0x250] sm:$0xff]  ;;  %v382_v18 = vld [vmem:[%s7663_s23 + $0x148] sm:$0xff]  ;;  %1283 = vmatpush.msrb.mxu1 %v1266_v51 }
  0x16   : > { %v416_v19 = vld [vmem:[%s7663_s23 + $0x258] sm:$0xff]  ;;  %v383_v20 = vld [vmem:[%s7663_s23 + $0x150] sm:$0xff]  ;;  %v417_v21 = vld [vmem:[%s7663_s23 + $0x260] sm:$0xff] }
  0x17   : > { %v384_v22 = vld [vmem:[%s7663_s23 + $0x158] sm:$0xff]  ;;  %v418_v23 = vld [vmem:[%s7663_s23 + $0x268] sm:$0xff]  ;;  %v385_v24 = vld [vmem:[%s7663_s23 + $0x160] sm:$0xff] }
  0x18   : > { %v419_v25 = vld [vmem:[%s7663_s23 + $0x270] sm:$0xff]  ;;  %v386_v26 = vld [vmem:[%s7663_s23 + $0x168] sm:$0xff]  ;;  %v420_v27 = vld [vmem:[%s7663_s23 + $0x278] sm:$0xff] }
  0x19   : > { %v387_v28 = vld [vmem:[%s7663_s23 + $0x170] sm:$0xff]  ;;  %v421_v29 = vld [vmem:[%s7663_s23 + $0x280] sm:$0xff]  ;;  %v388_v30 = vld [vmem:[%s7663_s23 + $0x178] sm:$0xff] }
  0x1a   : > { %v422_v31 = vld [vmem:[%s7663_s23 + $0x288] sm:$0xff]  ;;  %v389_v32 = vld [vmem:[%s7663_s23 + $0x180] sm:$0xff]  ;;  %v423_v33 = vld [vmem:[%s7663_s23 + $0x290] sm:$0xff] }
  0x1b   : > { %6194 = vmatmul.msk.f32.gmra.mxu1 %vm477_vm0, %v7673_v6  ;;  %6228 = vmatmul.msk.f32.gmra.mxu2 %vm477_vm0, %v410_v7  ;;  %v390_v34 = vld [vmem:[%s7663_s23 + $0x188] sm:$0xff]  ;;  %v424_v35 = vld [vmem:[%s7663_s23 + $0x298] sm:$0xff]  ;;  %v391_v37 = vld [vmem:[%s7663_s23 + $0x190] sm:$0xff] }
  0x1c   : > { %v425_v38 = vld [vmem:[%s7663_s23 + $0x2a0] sm:$0xff]  ;;  %v392_v41 = vld [vmem:[%s7663_s23 + $0x198] sm:$0xff]  ;;  %v426_v42 = vld [vmem:[%s7663_s23 + $0x2a8] sm:$0xff] }
  0x1d   : > { %v393_v45 = vld [vmem:[%s7663_s23 + $0x1a0] sm:$0xff]  ;;  %v427_v46 = vld [vmem:[%s7663_s23 + $0x2b0] sm:$0xff]  ;;  %v394_v49 = vld [vmem:[%s7663_s23 + $0x1a8] sm:$0xff] }
  0x1e   : > { %v428_v50 = vld [vmem:[%s7663_s23 + $0x2b8] sm:$0xff]  ;;  %v395_v54 = vld [vmem:[%s7663_s23 + $0x1b0] sm:$0xff]  ;;  %v429_v55 = vld [vmem:[%s7663_s23 + $0x2c0] sm:$0xff] }
  0x1f   : > { %v396_v58 = vld [vmem:[%s7663_s23 + $0x1b8] sm:$0xff]  ;;  %v430_v59 = vld [vmem:[%s7663_s23 + $0x2c8] sm:$0xff]  ;;  %v397_v62 = vld [vmem:[%s7663_s23 + $0x1c0] sm:$0xff] }
  0x20   : > { %v431_v63 = vld [vmem:[%s7663_s23 + $0x2d0] sm:$0xff]  ;;  %v398_v2 = vld [vmem:[%s7663_s23 + $0x1c8] sm:$0xff]  ;;  %v432_v3 = vld [vmem:[%s7663_s23 + $0x2d8] sm:$0xff] }
  0x21   : > { %v405_v51 = vld [vmem:[%s7663_s23 + $0x200] sm:$0xff] }
  0x23   : > { %6195 = vmatmul.msk.f32.gmra.mxu1 %vm477_vm0, %v7680_v8  ;;  %6229 = vmatmul.msk.f32.gmra.mxu2 %vm477_vm0, %v411_v9  ;;  %v399_v9 = vld [vmem:[%s7663_s23 + $0x1d0] sm:$0xff] }
  0x2b   : > { %6196 = vmatmul.msk.f32.gmra.mxu1 %vm477_vm0, %v7687_v10  ;;  %6230 = vmatmul.msk.f32.gmra.mxu2 %vm477_vm0, %v412_v11  ;;  %v433_v11 = vld [vmem:[%s7663_s23 + $0x2e0] sm:$0xff] }
  0x33   : > { %6197 = vmatmul.msk.f32.gmra.mxu1 %vm477_vm0, %v7694_v12  ;;  %6231 = vmatmul.msk.f32.gmra.mxu2 %vm477_vm0, %v413_v13 }
  0x3b   : > { %6198 = vmatmul.msk.f32.gmra.mxu1 %vm477_vm0, %v7701_v14  ;;  %6232 = vmatmul.msk.f32.gmra.mxu2 %vm477_vm0, %v414_v15 }
  0x43   : > { %6199 = vmatmul.msk.f32.gmra.mxu1 %vm477_vm0, %v381_v16  ;;  %6233 = vmatmul.msk.f32.gmra.mxu2 %vm477_vm0, %v415_v17  ;;  %v400_v16 = vld [vmem:[%s7663_s23 + $0x1d8] sm:$0xff]  ;;  %v434_v17 = vld [vmem:[%s7663_s23 + $0x2e8] sm:$0xff] }
  0x4b   : > { %6200 = vmatmul.msk.f32.gmra.mxu1 %vm477_vm0, %v382_v18  ;;  %6234 = vmatmul.msk.f32.gmra.mxu2 %vm477_vm0, %v416_v19 }
  0x53   : > { %6201 = vmatmul.msk.f32.gmra.mxu1 %vm477_vm0, %v383_v20  ;;  %6235 = vmatmul.msk.f32.gmra.mxu2 %vm477_vm0, %v417_v21  ;;  %v401_v20 = vld [vmem:[%s7663_s23 + $0x1e0] sm:$0xff]  ;;  %v435_v21 = vld [vmem:[%s7663_s23 + $0x2f0] sm:$0xff] }
  0x5b   : > { %6202 = vmatmul.msk.f32.gmra.mxu1 %vm477_vm0, %v384_v22  ;;  %6236 = vmatmul.msk.f32.gmra.mxu2 %vm477_vm0, %v418_v23 }
  0x63   : > { %6203 = vmatmul.msk.f32.gmra.mxu1 %vm477_vm0, %v385_v24  ;;  %6237 = vmatmul.msk.f32.gmra.mxu2 %vm477_vm0, %v419_v25  ;;  %v402_v24 = vld [vmem:[%s7663_s23 + $0x1e8] sm:$0xff]  ;;  %v436_v25 = vld [vmem:[%s7663_s23 + $0x2f8] sm:$0xff] }
  0x6b   : > { %6204 = vmatmul.msk.f32.gmra.mxu1 %vm477_vm0, %v386_v26  ;;  %6238 = vmatmul.msk.f32.gmra.mxu2 %vm477_vm0, %v420_v27  ;;  %v1675_v26 = vld [vmem:[%s11904_s5 + $0x18] sm:$0xff] }
  0x6c   : > { %1692 = vmatpush.msrb.mxu2 %v1675_v26 }
  0x73   : > { %6205 = vmatmul.msk.f32.gmra.mxu1 %vm477_vm0, %v387_v28  ;;  %6239 = vmatmul.msk.f32.gmra.mxu2 %vm477_vm0, %v421_v29  ;;  %v403_v29 = vld [vmem:[%s7663_s23 + $0x1f0] sm:$0xff] }
  0x7b   : > { %6206 = vmatmul.msk.f32.gmra.mxu1 %vm477_vm0, %v388_v30  ;;  %6240 = vmatmul.msk.f32.gmra.mxu2 %vm477_vm0, %v422_v31  ;;  %v437_v30 = vld [vmem:[%s7663_s23 + $0x300] sm:$0xff]  ;;  %v1674_v31 = vld [vmem:[%s11904_s5 + $0x10] sm:$0xff] }
  0x7c   : > { %1693 = vmatpush.msrb.mxu2 %v1674_v31 }
  0x83   : > { %6207 = vmatmul.msk.f32.gmra.mxu1 %vm477_vm0, %v389_v32  ;;  %6241 = vmatmul.msk.f32.gmra.mxu2 %vm477_vm0, %v423_v33  ;;  %v1673_v32 = vld [vmem:[%s11904_s5 + $0x8] sm:$0xff]  ;;  %v1265_v33 = vld [vmem:[%s11902_s3 + $0x10] sm:$0xff] }
  0x84   : > { %1694 = vmatpush.msrb.mxu2 %v1673_v32  ;;  %1284 = vmatpush.msrb.mxu1 %v1265_v33  ;;  %v348_v33 = vld [vmem:[%s7663_s23 + $0x38] sm:$0xff] }
  0x8b   : > { %6208 = vmatmul.msk.f32.gmra.mxu1 %vm477_vm0, %v390_v34  ;;  %6242 = vmatmul.msk.f32.gmra.mxu2 %vm477_vm0, %v424_v35  ;;  %v1672_v34 = vld [vmem:[%s11904_s5] sm:$0xff] }
  0x8c   : > { %v341_v35 = vld [vmem:[%s7663_s23] sm:$0xff]  ;;  %1695 = vmatpush.msrb.mxu2 %v1672_v34 }
  0x8d   : > { %6159 = vmatmul.msk.f32.vlgmr.msra.gmra.mxu0 %vm477_vm0, %v341_v35 }
  0x90   : > { %v7747_v36 = vpop.f32.mrf.mxu1 }
  0x93   : > { %6209 = vmatmul.msk.f32.gmra.mxu1 %vm477_vm0, %v391_v37  ;;  %6243 = vmatmul.msk.f32.gmra.mxu2 %vm477_vm0, %v425_v38 }
  0x96   : > { %v7753_v39 = vpop.f32.mrf.mxu2 }
  0x97   : > { %12013 = vst [vmem:[#allocation2_spill] sm:$0xff] %v7753_v39 }
  0x98   : > { %v7755_v40 = vpop.f32.mrf.mxu1 }
  0x9b   : > { %6210 = vmatmul.msk.f32.gmra.mxu1 %vm477_vm0, %v392_v41  ;;  %6244 = vmatmul.msk.f32.gmra.mxu2 %vm477_vm0, %v426_v42  ;;  %v404_v41 = vld [vmem:[%s7663_s23 + $0x1f8] sm:$0xff]  ;;  %v438_v42 = vld [vmem:[%s7663_s23 + $0x308] sm:$0xff] }
  0x9e   : > { %v7761_v43 = vpop.f32.mrf.mxu2 }
  0x9f   : > { %12014 = vst [vmem:[#allocation3_spill] sm:$0xff] %v7761_v43  ;;  %v8139_v43 = vld [vmem:[%s7663_s23 + $0xc8] sm:$0xff] }
  0xa0   : > { %v7763_v44 = vpop.f32.mrf.mxu1 }
  0xa3   : > { %6211 = vmatmul.msk.f32.gmra.mxu1 %vm477_vm0, %v393_v45  ;;  %6245 = vmatmul.msk.f32.gmra.mxu2 %vm477_vm0, %v427_v46  ;;  %v342_v45 = vld [vmem:[%s7663_s23 + $0x8] sm:$0xff] }
  0xa4   : > { %6160 = vmatmul.msk.f32.gmra.mxu0 %vm477_vm0, %v342_v45 }
  0xa6   : > { %v7769_v47 = vpop.f32.mrf.mxu2 }
  0xa7   : > { %12015 = vst [vmem:[#allocation4_spill] sm:$0xff] %v7769_v47  ;;  %v457_v47 = vld [vmem:[%s7663_s23 + $0x3a0] sm:$0xff] }
  0xa8   : > { %v7771_v48 = vpop.f32.mrf.mxu1 }
  0xab   : > { %6212 = vmatmul.msk.f32.gmra.mxu1 %vm477_vm0, %v394_v49  ;;  %6246 = vmatmul.msk.f32.gmra.mxu2 %vm477_vm0, %v428_v50  ;;  %v1264_v49 = vld [vmem:[%s11902_s3 + $0x8] sm:$0xff] }
  0xac   : > { %1285 = vmatpush.msrb.mxu1 %v1264_v49  ;;  %v350_v49 = vld [vmem:[%s7663_s23 + $0x48] sm:$0xff] }
  0xae   : > { %v7780_v52 = vpop.f32.mrf.mxu2 }
  0xaf   : > { %12016 = vst [vmem:[#allocation5_spill] sm:$0xff] %v7780_v52  ;;  %v8127_v52 = vld [vmem:[%s7663_s23 + $0xc0] sm:$0xff] }
  0xb0   : > { %v7782_v53 = vpop.f32.mrf.mxu1 }
  0xb3   : > { %6213 = vmatmul.msk.f32.gmra.mxu1 %vm477_vm0, %v395_v54  ;;  %6247 = vmatmul.msk.f32.gmra.mxu2 %vm477_vm0, %v429_v55  ;;  %v439_v54 = vld [vmem:[%s7663_s23 + $0x310] sm:$0xff]  ;;  %v1263_v55 = vld [vmem:[%s11902_s3] sm:$0xff] }
  0xb4   : > { %1286 = vmatpush.msrb.mxu1 %v1263_v55  ;;  %v351_v55 = vld [vmem:[%s7663_s23 + $0x50] sm:$0xff] }
  0xb6   : > { %v7788_v56 = vpop.f32.mrf.mxu2 }
  0xb7   : > { %12017 = vst [vmem:[#allocation6_spill] sm:$0xff] %v7788_v56 }
  0xb8   : > { %v7790_v57 = vpop.f32.mrf.mxu1 }
  0xbb   : > { %6214 = vmatmul.msk.f32.gmra.mxu1 %vm477_vm0, %v396_v58  ;;  %6248 = vmatmul.msk.f32.gmra.mxu2 %vm477_vm0, %v430_v59  ;;  %v343_v58 = vld [vmem:[%s7663_s23 + $0x10] sm:$0xff] }
  0xbc   : > { %6161 = vmatmul.msk.f32.gmra.mxu0 %vm477_vm0, %v343_v58 }
  0xbe   : > { %v7796_v60 = vpop.f32.mrf.mxu2 }
  0xbf   : > { %12018 = vst [vmem:[#allocation7_spill] sm:$0xff] %v7796_v60 }
  0xc0   : > { %v7798_v61 = vpop.f32.mrf.mxu1 }
  0xc3   : > { %6215 = vmatmul.msk.f32.gmra.mxu1 %vm477_vm0, %v397_v62  ;;  %6249 = vmatmul.msk.f32.gmra.mxu2 %vm477_vm0, %v431_v63  ;;  %v406_v63 = vld [vmem:[%s7663_s23 + $0x208] sm:$0xff] }
  0xc6   : > { %v7804_v0 = vpop.f32.mrf.mxu2 }
  0xc7   : > { %12019 = vst [vmem:[#allocation8_spill] sm:$0xff] %v7804_v0 }
  0xc8   : > { %v7806_v1 = vpop.f32.mrf.mxu1 }
  0xcb   : > { %6216 = vmatmul.msk.f32.gmra.mxu1 %vm477_vm0, %v398_v2  ;;  %6250 = vmatmul.msk.f32.gmra.mxu2 %vm477_vm0, %v432_v3  ;;  %v440_v2 = vld [vmem:[%s7663_s23 + $0x318] sm:$0xff] }
  0xcc   : > { %v344_v3 = vld [vmem:[%s7663_s23 + $0x18] sm:$0xff] }
  0xcd   : > { %6162 = vmatmul.msk.f32.gmra.mxu0 %vm477_vm0, %v344_v3 }
  0xce   : > { %v7812_v5 = vpop.f32.mrf.mxu2 }
  0xcf   : > { %12020 = vst [vmem:[#allocation9_spill] sm:$0xff] %v7812_v5  ;;  %v453_v5 = vld [vmem:[%s7663_s23 + $0x380] sm:$0xff] }
  0xd0   : > { %v7814_v7 = vpop.f32.mrf.mxu1 }
  0xd3   : > { %6217 = vmatmul.msk.f32.gmra.mxu1 %vm477_vm0, %v399_v9  ;;  %6251 = vmatmul.msk.f32.gmra.mxu2 %vm477_vm0, %v433_v11 }
  0xd6   : > { %v7820_v13 = vpop.f32.mrf.mxu2 }
  0xd7   : > { %12021 = vst [vmem:[#allocation10_spill] sm:$0xff] %v7820_v13  ;;  %v452_v13 = vld [vmem:[%s7663_s23 + $0x378] sm:$0xff] }
  0xd8   : > { %v7822_v15 = vpop.f32.mrf.mxu1 }
  0xdb   : > { %6218 = vmatmul.msk.f32.gmra.mxu1 %vm477_vm0, %v400_v16  ;;  %6252 = vmatmul.msk.f32.gmra.mxu2 %vm477_vm0, %v434_v17  ;;  %v407_v16 = vld [vmem:[%s7663_s23 + $0x210] sm:$0xff]  ;;  %v345_v17 = vld [vmem:[%s7663_s23 + $0x20] sm:$0xff] }
  0xdc   : > { %6163 = vmatmul.msk.f32.gmra.mxu0 %vm477_vm0, %v345_v17 }
  0xde   : > { %v7828_v18 = vpop.f32.mrf.mxu2 }
  0xdf   : > { %12022 = vst [vmem:[#allocation11_spill] sm:$0xff] %v7828_v18 }
  0xe0   : > { %v7830_v19 = vpop.f32.mrf.mxu1 }
  0xe3   : > { %6219 = vmatmul.msk.f32.gmra.mxu1 %vm477_vm0, %v401_v20  ;;  %6253 = vmatmul.msk.f32.gmra.mxu2 %vm477_vm0, %v435_v21 }
  0xe6   : > { %v7836_v22 = vpop.f32.mrf.mxu2 }
  0xe7   : > { %12023 = vst [vmem:[#allocation12_spill] sm:$0xff] %v7836_v22  ;;  %v451_v22 = vld [vmem:[%s7663_s23 + $0x370] sm:$0xff] }
  0xe8   : > { %v7838_v23 = vpop.f32.mrf.mxu1 }
  0xe9   : > { %12024 = vst [vmem:[#allocation13_spill] sm:$0xff] %v7838_v23 }
  0xeb   : > { %6220 = vmatmul.msk.f32.gmra.mxu1 %vm477_vm0, %v402_v24  ;;  %6254 = vmatmul.msk.f32.gmra.mxu2 %vm477_vm0, %v436_v25  ;;  %v408_v24 = vld [vmem:[%s7663_s23 + $0x218] sm:$0xff]  ;;  %v346_v25 = vld [vmem:[%s7663_s23 + $0x28] sm:$0xff] }
  0xec   : > { %6164 = vmatmul.msk.f32.gmra.mxu0 %vm477_vm0, %v346_v25 }
  0xee   : > { %v7847_v27 = vpop.f32.mrf.mxu2 }
  0xef   : > { %12025 = vst [vmem:[#allocation14_spill] sm:$0xff] %v7847_v27 }
  0xf0   : > { %v7849_v28 = vpop.f32.mrf.mxu1 }
  0xf1   : > { %12026 = vst [vmem:[#allocation15_spill] sm:$0xff] %v7849_v28  ;;  %v8234_v28 = vld [vmem:[%s7663_s23 + $0x100] sm:$0xff] }
  0xf3   : > { %6221 = vmatmul.msk.f32.gmra.mxu1 %vm477_vm0, %v403_v29  ;;  %6255 = vmatmul.msk.f32.gmra.mxu2 %vm477_vm0, %v437_v30  ;;  %v347_v30 = vld [vmem:[%s7663_s23 + $0x30] sm:$0xff] }
  0xf4   : > { %6165 = vmatmul.msk.f32.gmra.mxu0 %vm477_vm0, %v347_v30 }
  0xf6   : > { %v7869_v37 = vpop.f32.mrf.mxu2 }
  0xf7   : > { %12027 = vst [vmem:[#allocation16_spill] sm:$0xff] %v7869_v37  ;;  %v450_v37 = vld [vmem:[%s7663_s23 + $0x368] sm:$0xff] }
  0xf8   : > { %v7871_v38 = vpop.f32.mrf.mxu1 }
  0xf9   : > { %12028 = vst [vmem:[#allocation17_spill] sm:$0xff] %v7871_v38  ;;  %v464_v38 = vld [vmem:[%s7663_s23 + $0x3d8] sm:$0xff] }
  0xfb   : > { %6222 = vmatmul.msk.f32.gmra.mxu1 %vm477_vm0, %v404_v41  ;;  %6256 = vmatmul.msk.f32.gmra.mxu2 %vm477_vm0, %v438_v42  ;;  %v349_v41 = vld [vmem:[%s7663_s23 + $0x40] sm:$0xff] }
  0xfc   : > { %6166 = vmatmul.msk.f32.gmra.mxu0 %vm477_vm0, %v348_v33 }
  0xfe   : > { %v7879_v46 = vpop.f32.mrf.mxu2 }
  0xff   : > { %12029 = vst [vmem:[#allocation18_spill] sm:$0xff] %v7879_v46  ;;  %v449_v46 = vld [vmem:[%s7663_s23 + $0x360] sm:$0xff] }
 0x100   : > { %v7884_v50 = vpop.f32.mrf.mxu1 }
 0x101   : > { %12030 = vst [vmem:[#allocation19_spill] sm:$0xff] %v7884_v50 }
 0x103   : > { %6223 = vmatmul.msk.f32.gmra.mxu1 %vm477_vm0, %v405_v51  ;;  %6257 = vmatmul.msk.f32.gmra.mxu2 %vm477_vm0, %v439_v54 }
 0x104   : > { %6167 = vmatmul.msk.f32.gmra.mxu0 %vm477_vm0, %v349_v41 }
 0x106   : > { %v7895_v59 = vpop.f32.mrf.mxu2 }
 0x107   : > { %12031 = vst [vmem:[#allocation20_spill] sm:$0xff] %v7895_v59  ;;  %v448_v59 = vld [vmem:[%s7663_s23 + $0x358] sm:$0xff] }
 0x108   : > { %v7897_v62 = vpop.f32.mrf.mxu1 }
 0x109   : > { %12032 = vst [vmem:[#allocation21_spill] sm:$0xff] %v7897_v62 }
 0x10b   : > { %6224 = vmatmul.msk.f32.gmra.mxu1 %vm477_vm0, %v406_v63  ;;  %6258 = vmatmul.msk.f32.gmra.mxu2 %vm477_vm0, %v440_v2  ;;  %v352_v2 = vld [vmem:[%s7663_s23 + $0x58] sm:$0xff] }
 0x10c   : > { %6168 = vmatmul.msk.f32.gmra.mxu0 %vm477_vm0, %v350_v49 }
 0x10e   : > { %v7905_v9 = vpop.f32.mrf.mxu2 }
 0x10f   : > { %12033 = vst [vmem:[#allocation22_spill] sm:$0xff] %v7905_v9  ;;  %v447_v9 = vld [vmem:[%s7663_s23 + $0x350] sm:$0xff] }
 0x110   : > { %v7907_v11 = vpop.f32.mrf.mxu1 }
 0x111   : > { %12034 = vst [vmem:[#allocation23_spill] sm:$0xff] %v7907_v11 }
 0x113   : > { %6225 = vmatmul.msk.f32.gmra.mxu1 %vm477_vm0, %v407_v16  ;;  %6415 = vmatmul.msk.f32.vlgmr.msrb.gmra.mxu2 %vm477_vm0, %v341_v35 }
 0x114   : > { %6169 = vmatmul.msk.f32.gmra.mxu0 %vm477_vm0, %v351_v55 }
 0x116   : > { %v7914_v20 = vpop.f32.mrf.mxu2 }
 0x117   : > { %12035 = vst [vmem:[#allocation24_spill] sm:$0xff] %v7914_v20  ;;  %v446_v20 = vld [vmem:[%s7663_s23 + $0x348] sm:$0xff] }
 0x118   : > { %v7916_v21 = vpop.f32.mrf.mxu1 }
 0x119   : > { %12036 = vst [vmem:[#allocation25_spill] sm:$0xff] %v7916_v21  ;;  %v8225_v21 = vld [vmem:[%s11905_s6] ss:$0 sm:$0xff] }
 0x11b   : > { %6226 = vmatmul.msk.f32.gmra.mxu1 %vm477_vm0, %v408_v24  ;;  %6416 = vmatmul.msk.f32.gmra.mxu2 %vm477_vm0, %v342_v45 }
 0x11c   : > { %6170 = vmatmul.msk.f32.gmra.mxu0 %vm477_vm0, %v352_v2 }
 0x11e   : > { %v7923_v26 = vpop.f32.mrf.mxu2 }
 0x11f   : > { %12037 = vst [vmem:[#allocation26_spill] sm:$0xff] %v7923_v26  ;;  %v445_v26 = vld [vmem:[%s7663_s23 + $0x340] sm:$0xff] }
 0x120   : > { %v7925_v29 = vpop.f32.mrf.mxu1 }
 0x121   : > { %12038 = vst [vmem:[#allocation27_spill] sm:$0xff] %v7925_v29  ;;  %v463_v29 = vld [vmem:[%s7663_s23 + $0x3d0] sm:$0xff] }
 0x123   : > { %6287 = vmatmul.msk.f32.vlgmr.msrb.gmra.mxu1 %vm477_vm0, %v341_v35  ;;  %6417 = vmatmul.msk.f32.gmra.mxu2 %vm477_vm0, %v343_v58 }
 0x126   : > { %v7931_v31 = vpop.f32.mrf.mxu2 }
 0x127   : > { %12039 = vst [vmem:[#allocation28_spill] sm:$0xff] %v7931_v31  ;;  %v444_v31 = vld [vmem:[%s7663_s23 + $0x338] sm:$0xff] }
 0x128   : > { %v7933_v32 = vpop.f32.mrf.mxu1 }
 0x129   : > { %12040 = vst [vmem:[#allocation29_spill] sm:$0xff] %v7933_v32  ;;  %v8215_v32 = vld [vmem:[%s7663_s23 + $0xf8] sm:$0xff] }
 0x12b   : > { %6288 = vmatmul.msk.f32.gmra.mxu1 %vm477_vm0, %v342_v45  ;;  %6418 = vmatmul.msk.f32.gmra.mxu2 %vm477_vm0, %v344_v3 }
 0x12e   : > { %v7939_v34 = vpop.f32.mrf.mxu2 }
 0x12f   : > { %12041 = vst [vmem:[#allocation30_spill] sm:$0xff] %v7939_v34  ;;  %v443_v34 = vld [vmem:[%s7663_s23 + $0x330] sm:$0xff] }
 0x130   : > { %v7941_v35 = vpop.f32.mrf.mxu1 }
 0x131   : > { %12042 = vst [vmem:[#allocation31_spill] sm:$0xff] %v7941_v35 }
 0x133   : > { %6289 = vmatmul.msk.f32.gmra.mxu1 %vm477_vm0, %v343_v58  ;;  %6419 = vmatmul.msk.f32.gmra.mxu2 %vm477_vm0, %v345_v17 }
 0x136   : > { %v7947_v42 = vpop.f32.mrf.mxu2 }
 0x137   : > { %12043 = vst [vmem:[#allocation32_spill] sm:$0xff] %v7947_v42  ;;  %v442_v42 = vld [vmem:[%s7663_s23 + $0x328] sm:$0xff] }
 0x138   : > { %v7949_v45 = vpop.f32.mrf.mxu1 }
 0x139   : > { %12044 = vst [vmem:[#allocation33_spill] sm:$0xff] %v7949_v45  ;;  %v462_v45 = vld [vmem:[%s7663_s23 + $0x3c8] sm:$0xff] }
 0x13b   : > { %6290 = vmatmul.msk.f32.gmra.mxu1 %vm477_vm0, %v344_v3  ;;  %6420 = vmatmul.msk.f32.gmra.mxu2 %vm477_vm0, %v346_v25 }
 0x13e   : > { %v7955_v51 = vpop.f32.mrf.mxu2 }
 0x13f   : > { %12045 = vst [vmem:[#allocation34_spill] sm:$0xff] %v7955_v51 }
 0x140   : > { %v7957_v54 = vpop.f32.mrf.mxu1 }
 0x141   : > { %12046 = vst [vmem:[#allocation35_spill] sm:$0xff] %v7957_v54  ;;  %v8204_v54 = vld [vmem:[%s7663_s23 + $0xf0] sm:$0xff] }
 0x143   : > { %6291 = vmatmul.msk.f32.gmra.mxu1 %vm477_vm0, %v345_v17  ;;  %6421 = vmatmul.msk.f32.gmra.mxu2 %vm477_vm0, %v347_v30  ;;  %v353_v17 = vld [vmem:[%s7663_s23 + $0x60] sm:$0xff] }
 0x144   : > { %6171 = vmatmul.msk.f32.gmra.mxu0 %vm477_vm0, %v353_v17 }
 0x146   : > { %v7963_v58 = vpop.f32.mrf.mxu2 }
 0x147   : > { %12047 = vst [vmem:[#allocation36_spill] sm:$0xff] %v7963_v58  ;;  %v441_v58 = vld [vmem:[%s7663_s23 + $0x320] sm:$0xff] }
 0x148   : > { %v7965_v63 = vpop.f32.mrf.mxu1  ;;  %6259 = vmatmul.msk.f32.vlgmr.msra.gmra.mxu3 %vm477_vm0, %v441_v58  ;;  %v355_v58 = vld [vmem:[%s7663_s23 + $0x70] sm:$0xff] }
 0x149   : > { %12048 = vst [vmem:[#allocation37_spill] sm:$0xff] %v7965_v63 }
 0x14b   : > { %6292 = vmatmul.msk.f32.gmra.mxu1 %vm477_vm0, %v346_v25  ;;  %6422 = vmatmul.msk.f32.gmra.mxu2 %vm477_vm0, %v348_v33 }
 0x14e   : > { %v7971_v3 = vpop.f32.mrf.mxu2 }
 0x14f   : > { %12049 = vst [vmem:[#allocation38_spill] sm:$0xff] %v7971_v3  ;;  %v354_v3 = vld [vmem:[%s7663_s23 + $0x68] sm:$0xff] }
 0x150   : > { %v7973_v16 = vpop.f32.mrf.mxu1  ;;  %6172 = vmatmul.msk.f32.gmra.mxu0 %vm477_vm0, %v354_v3  ;;  %6260 = vmatmul.msk.f32.gmra.mxu3 %vm477_vm0, %v442_v42  ;;  %v356_v42 = vld [vmem:[%s7663_s23 + $0x78] sm:$0xff] }
 0x151   : > { %12050 = vst [vmem:[#allocation39_spill] sm:$0xff] %v7973_v16  ;;  %v8192_v16 = vld [vmem:[%s7663_s23 + $0xe8] sm:$0xff] }
 0x153   : > { %6293 = vmatmul.msk.f32.gmra.mxu1 %vm477_vm0, %v347_v30  ;;  %6423 = vmatmul.msk.f32.gmra.mxu2 %vm477_vm0, %v349_v41 }
 0x156   : > { %v7979_v24 = vpop.f32.mrf.mxu2 }
 0x157   : > { %12051 = vst [vmem:[#allocation40_spill] sm:$0xff] %v7979_v24 }
 0x158   : > { %v7981_v25 = vpop.f32.mrf.mxu1  ;;  %6173 = vmatmul.msk.f32.gmra.mxu0 %vm477_vm0, %v355_v58  ;;  %6261 = vmatmul.msk.f32.gmra.mxu3 %vm477_vm0, %v443_v34  ;;  %v357_v34 = vld [vmem:[%s7663_s23 + $0x80] sm:$0xff] }
 0x159   : > { %12052 = vst [vmem:[#allocation41_spill] sm:$0xff] %v7981_v25  ;;  %v461_v25 = vld [vmem:[%s7663_s23 + $0x3c0] sm:$0xff] }
 0x15b   : > { %6294 = vmatmul.msk.f32.gmra.mxu1 %vm477_vm0, %v348_v33  ;;  %6424 = vmatmul.msk.f32.gmra.mxu2 %vm477_vm0, %v350_v49 }
 0x15e   : > { %v7989_v30 = vpop.f32.mrf.mxu2 }
 0x15f   : > { %12053 = vst [vmem:[#allocation42_spill] sm:$0xff] %v7989_v30 }
 0x160   : > { %v7991_v51 = vpop.f32.mrf.mxu1  ;;  %6174 = vmatmul.msk.f32.gmra.mxu0 %vm477_vm0, %v356_v42  ;;  %6262 = vmatmul.msk.f32.gmra.mxu3 %vm477_vm0, %v444_v31  ;;  %v358_v31 = vld [vmem:[%s7663_s23 + $0x88] sm:$0xff] }
 0x161   : > { %12054 = vst [vmem:[#allocation43_spill] sm:$0xff] %v7991_v51 }
 0x163   : > { %6295 = vmatmul.msk.f32.gmra.mxu1 %vm477_vm0, %v349_v41  ;;  %6425 = vmatmul.msk.f32.gmra.mxu2 %vm477_vm0, %v351_v55 }
 0x166   : > { %v7999_v33 = vpop.f32.mrf.mxu2 }
 0x167   : > { %12055 = vst [vmem:[#allocation44_spill] sm:$0xff] %v7999_v33 }
 0x168   : > { %v8001_v24 = vpop.f32.mrf.mxu1  ;;  %6175 = vmatmul.msk.f32.gmra.mxu0 %vm477_vm0, %v357_v34  ;;  %6263 = vmatmul.msk.f32.gmra.mxu3 %vm477_vm0, %v445_v26  ;;  %v359_v26 = vld [vmem:[%s7663_s23 + $0x90] sm:$0xff] }
 0x169   : > { %12056 = vst [vmem:[#allocation45_spill] sm:$0xff] %v8001_v24  ;;  %v8179_v24 = vld [vmem:[%s7663_s23 + $0xe0] sm:$0xff] }
 0x16b   : > { %6296 = vmatmul.msk.f32.gmra.mxu1 %vm477_vm0, %v350_v49  ;;  %6426 = vmatmul.msk.f32.gmra.mxu2 %vm477_vm0, %v352_v2 }
 0x16e   : > { %v8009_v41 = vpop.f32.mrf.mxu2 }
 0x16f   : > { %12057 = vst [vmem:[#allocation46_spill] sm:$0xff] %v8009_v41 }
 0x170   : > { %v8011_v30 = vpop.f32.mrf.mxu1  ;;  %6176 = vmatmul.msk.f32.gmra.mxu0 %vm477_vm0, %v358_v31  ;;  %6264 = vmatmul.msk.f32.gmra.mxu3 %vm477_vm0, %v446_v20  ;;  %v360_v20 = vld [vmem:[%s7663_s23 + $0x98] sm:$0xff] }
 0x171   : > { %12058 = vst [vmem:[#allocation47_spill] sm:$0xff] %v8011_v30  ;;  %v460_v30 = vld [vmem:[%s7663_s23 + $0x3b8] sm:$0xff] }
 0x173   : > { %6297 = vmatmul.msk.f32.gmra.mxu1 %vm477_vm0, %v351_v55  ;;  %6427 = vmatmul.msk.f32.gmra.mxu2 %vm477_vm0, %v353_v17 }
 0x176   : > { %v8019_v49 = vpop.f32.mrf.mxu2 }
 0x177   : > { %12059 = vst [vmem:[#allocation48_spill] sm:$0xff] %v8019_v49 }
 0x178   : > { %v8021_v33 = vpop.f32.mrf.mxu1  ;;  %6177 = vmatmul.msk.f32.gmra.mxu0 %vm477_vm0, %v359_v26  ;;  %6265 = vmatmul.msk.f32.gmra.mxu3 %vm477_vm0, %v447_v9  ;;  %v361_v9 = vld [vmem:[%s7663_s23 + $0xa0] sm:$0xff] }
 0x179   : > { %12060 = vst [vmem:[#allocation49_spill] sm:$0xff] %v8021_v33 }
 0x17b   : > { %6298 = vmatmul.msk.f32.gmra.mxu1 %vm477_vm0, %v352_v2  ;;  %6428 = vmatmul.msk.f32.gmra.mxu2 %vm477_vm0, %v354_v3 }
 0x17e   : > { %v8029_v55 = vpop.f32.mrf.mxu2 }
 0x17f   : > { %12061 = vst [vmem:[#allocation50_spill] sm:$0xff] %v8029_v55 }
 0x180   : > { %v8031_v41 = vpop.f32.mrf.mxu1  ;;  %6178 = vmatmul.msk.f32.gmra.mxu0 %vm477_vm0, %v360_v20  ;;  %6266 = vmatmul.msk.f32.gmra.mxu3 %vm477_vm0, %v448_v59  ;;  %v362_v59 = vld [vmem:[%s7663_s23 + $0xa8] sm:$0xff] }
 0x181   : > { %12062 = vst [vmem:[#allocation51_spill] sm:$0xff] %v8031_v41  ;;  %v8166_v41 = vld [vmem:[%s7663_s23 + $0xd8] sm:$0xff] }
 0x183   : > { %6299 = vmatmul.msk.f32.gmra.mxu1 %vm477_vm0, %v353_v17  ;;  %6429 = vmatmul.msk.f32.gmra.mxu2 %vm477_vm0, %v355_v58 }
 0x186   : > { %v8039_v2 = vpop.f32.mrf.mxu2 }
 0x187   : > { %12063 = vst [vmem:[#allocation52_spill] sm:$0xff] %v8039_v2 }
 0x188   : > { %v8041_v49 = vpop.f32.mrf.mxu1  ;;  %6179 = vmatmul.msk.f32.gmra.mxu0 %vm477_vm0, %v361_v9  ;;  %6267 = vmatmul.msk.f32.gmra.mxu3 %vm477_vm0, %v449_v46  ;;  %v363_v46 = vld [vmem:[%s7663_s23 + $0xb0] sm:$0xff] }
 0x189   : > { %12064 = vst [vmem:[#allocation53_spill] sm:$0xff] %v8041_v49  ;;  %v459_v49 = vld [vmem:[%s7663_s23 + $0x3b0] sm:$0xff] }
 0x18b   : > { %6300 = vmatmul.msk.f32.gmra.mxu1 %vm477_vm0, %v354_v3  ;;  %6430 = vmatmul.msk.f32.gmra.mxu2 %vm477_vm0, %v356_v42 }
 0x18e   : > { %v8049_v17 = vpop.f32.mrf.mxu2 }
 0x18f   : > { %12065 = vst [vmem:[#allocation54_spill] sm:$0xff] %v8049_v17 }
 0x190   : > { %v8051_v55 = vpop.f32.mrf.mxu1  ;;  %6180 = vmatmul.msk.f32.gmra.mxu0 %vm477_vm0, %v362_v59  ;;  %6268 = vmatmul.msk.f32.gmra.mxu3 %vm477_vm0, %v450_v37  ;;  %v364_v37 = vld [vmem:[%s7663_s23 + $0xb8] sm:$0xff] }
 0x191   : > { %12066 = vst [vmem:[#allocation55_spill] sm:$0xff] %v8051_v55  ;;  %v8153_v55 = vld [vmem:[%s7663_s23 + $0xd0] sm:$0xff] }
 0x193   : > { %6301 = vmatmul.msk.f32.gmra.mxu1 %vm477_vm0, %v355_v58  ;;  %6431 = vmatmul.msk.f32.gmra.mxu2 %vm477_vm0, %v357_v34 }
 0x196   : > { %v8059_v3 = vpop.f32.mrf.mxu2 }
 0x198   : > { %v8061_v2 = vpop.f32.mrf.mxu1  ;;  %6181 = vmatmul.msk.f32.gmra.mxu0 %vm477_vm0, %v363_v46  ;;  %6269 = vmatmul.msk.f32.gmra.mxu3 %vm477_vm0, %v451_v22 }
 0x199   : > { %12067 = vst [vmem:[#allocation56_spill] sm:$0xff] %v8061_v2  ;;  %v458_v2 = vld [vmem:[%s7663_s23 + $0x3a8] sm:$0xff] }
 0x19b   : > { %6302 = vmatmul.msk.f32.gmra.mxu1 %vm477_vm0, %v356_v42  ;;  %6432 = vmatmul.msk.f32.gmra.mxu2 %vm477_vm0, %v358_v31 }
 0x19e   : > { %v8069_v58 = vpop.f32.mrf.mxu2 }
 0x1a0   : > { %v8071_v17 = vpop.f32.mrf.mxu1  ;;  %6182 = vmatmul.msk.f32.gmra.mxu0 %vm477_vm0, %v364_v37  ;;  %6270 = vmatmul.msk.f32.gmra.mxu3 %vm477_vm0, %v452_v13 }
 0x1a3   : > { %6303 = vmatmul.msk.f32.gmra.mxu1 %vm477_vm0, %v357_v34  ;;  %6433 = vmatmul.msk.f32.gmra.mxu2 %vm477_vm0, %v359_v26 }
 0x1a6   : > { %v8079_v42 = vpop.f32.mrf.mxu2 }
 0x1a8   : > { %v8081_v27 = vpop.f32.mrf.mxu1  ;;  %6271 = vmatmul.msk.f32.gmra.mxu3 %vm477_vm0, %v453_v5 }
 0x1ab   : > { %6304 = vmatmul.msk.f32.gmra.mxu1 %vm477_vm0, %v358_v31  ;;  %6434 = vmatmul.msk.f32.gmra.mxu2 %vm477_vm0, %v360_v20 }
 0x1ae   : > { %v8089_v34 = vpop.f32.mrf.mxu2 }
 0x1b0   : > { %v8091_v18 = vpop.f32.mrf.mxu1 }
 0x1b3   : > { %6305 = vmatmul.msk.f32.gmra.mxu1 %vm477_vm0, %v359_v26  ;;  %6435 = vmatmul.msk.f32.gmra.mxu2 %vm477_vm0, %v361_v9  ;;  %v454_v26 = vld [vmem:[%s7663_s23 + $0x388] sm:$0xff] }
 0x1b4   : > { %6272 = vmatmul.msk.f32.gmra.mxu3 %vm477_vm0, %v454_v26 }
 0x1b6   : > { %v8097_v22 = vpop.f32.mrf.mxu2 }
 0x1b8   : > { %v8099_v31 = vpop.f32.mrf.mxu1 }
 0x1bb   : > { %6306 = vmatmul.msk.f32.gmra.mxu1 %vm477_vm0, %v360_v20  ;;  %6436 = vmatmul.msk.f32.gmra.mxu2 %vm477_vm0, %v362_v59  ;;  %v455_v20 = vld [vmem:[%s7663_s23 + $0x390] sm:$0xff] }
 0x1bc   : > { %6273 = vmatmul.msk.f32.gmra.mxu3 %vm477_vm0, %v455_v20 }
 0x1be   : > { %v8105_v0 = vpop.f32.mrf.mxu2 }
 0x1c0   : > { %v8107_v13 = vpop.f32.mrf.mxu1 }
 0x1c3   : > { %6307 = vmatmul.msk.f32.gmra.mxu1 %vm477_vm0, %v361_v9  ;;  %6437 = vmatmul.msk.f32.gmra.mxu2 %vm477_vm0, %v363_v46  ;;  %v456_v9 = vld [vmem:[%s7663_s23 + $0x398] sm:$0xff] }
 0x1c4   : > { %6274 = vmatmul.msk.f32.gmra.mxu3 %vm477_vm0, %v456_v9 }
 0x1c6   : > { %v8113_v60 = vpop.f32.mrf.mxu2 }
 0x1c8   : > { %v8115_v5 = vpop.f32.mrf.mxu1 }
 0x1cb   : > { %6308 = vmatmul.msk.f32.gmra.mxu1 %vm477_vm0, %v362_v59  ;;  %6438 = vmatmul.msk.f32.gmra.mxu2 %vm477_vm0, %v364_v37 }
 0x1cc   : > { %6275 = vmatmul.msk.f32.gmra.mxu3 %vm477_vm0, %v457_v47 }
 0x1ce   : > { %v8121_v56 = vpop.f32.mrf.mxu2 }
 0x1d0   : > { %v8123_v26 = vpop.f32.mrf.mxu1 }
 0x1d3   : > { %6309 = vmatmul.msk.f32.gmra.mxu1 %vm477_vm0, %v363_v46  ;;  %6439 = vmatmul.msk.f32.gmra.mxu2 %vm477_vm0, %v8127_v52  ;;  %v8145_v46 = vpop.f32.mrf.mxu3 }
 0x1d4   : > { %12068 = vst [vmem:[#allocation57_spill] sm:$0xff] %v8145_v46  ;;  %6276 = vmatmul.msk.f32.gmra.mxu3 %vm477_vm0, %v458_v2 }
 0x1d6   : > { %v8133_v20 = vpop.f32.mrf.mxu2 }
 0x1d8   : > { %v8135_v59 = vpop.f32.mrf.mxu1 }
 0x1db   : > { %6310 = vmatmul.msk.f32.gmra.mxu1 %vm477_vm0, %v364_v37  ;;  %6440 = vmatmul.msk.f32.gmra.mxu2 %vm477_vm0, %v8139_v43  ;;  %v8160_v47 = vpop.f32.mrf.mxu3 }
 0x1dc   : > { %12069 = vst [vmem:[#allocation58_spill] sm:$0xff] %v8160_v47  ;;  %6277 = vmatmul.msk.f32.gmra.mxu3 %vm477_vm0, %v459_v49 }
 0x1de   : > { %v8147_v9 = vpop.f32.mrf.mxu2 }
 0x1e0   : > { %v8149_v39 = vpop.f32.mrf.mxu1 }
 0x1e3   : > { %6311 = vmatmul.msk.f32.gmra.mxu1 %vm477_vm0, %v8127_v52  ;;  %6441 = vmatmul.msk.f32.gmra.mxu2 %vm477_vm0, %v8153_v55  ;;  %v8173_v2 = vpop.f32.mrf.mxu3 }
 0x1e4   : > { %12070 = vst [vmem:[#allocation59_spill] sm:$0xff] %v8173_v2  ;;  %6278 = vmatmul.msk.f32.gmra.mxu3 %vm477_vm0, %v460_v30 }
 0x1e6   : > { %v1727_v37 = vpop.f32.mrf.mxu2 }
 0x1e8   : > { %v8162_v46 = vpop.f32.mrf.mxu1 }
 0x1eb   : > { %6312 = vmatmul.msk.f32.gmra.mxu1 %vm477_vm0, %v8139_v43  ;;  %6442 = vmatmul.msk.f32.gmra.mxu2 %vm477_vm0, %v8166_v41  ;;  %v8186_v49 = vpop.f32.mrf.mxu3 }
 0x1ec   : > { %12071 = vst [vmem:[#allocation60_spill] sm:$0xff] %v8186_v49  ;;  %6279 = vmatmul.msk.f32.gmra.mxu3 %vm477_vm0, %v461_v25 }
 0x1ee   : > { %v1730_v33 = vpop.f32.mrf.mxu2 }
 0x1f0   : > { %v8175_v47 = vpop.f32.mrf.mxu1 }
 0x1f3   : > { %6313 = vmatmul.msk.f32.gmra.mxu1 %vm477_vm0, %v8153_v55  ;;  %6443 = vmatmul.msk.f32.gmra.mxu2 %vm477_vm0, %v8179_v24  ;;  %v8199_v30 = vpop.f32.mrf.mxu3 }
 0x1f4   : > { %12072 = vst [vmem:[#allocation61_spill] sm:$0xff] %v8199_v30  ;;  %6280 = vmatmul.msk.f32.gmra.mxu3 %vm477_vm0, %v462_v45 }
 0x1f6   : > { %v1733_v51 = vpop.f32.mrf.mxu2 }
 0x1f8   : > { %v8188_v2 = vpop.f32.mrf.mxu1 }
 0x1fb   : > { %6314 = vmatmul.msk.f32.gmra.mxu1 %vm477_vm0, %v8166_v41  ;;  %6444 = vmatmul.msk.f32.gmra.mxu2 %vm477_vm0, %v8192_v16  ;;  %v8212_v25 = vpop.f32.mrf.mxu3 }
 0x1fc   : > { %12073 = vst [vmem:[#allocation62_spill] sm:$0xff] %v8212_v25  ;;  %6281 = vmatmul.msk.f32.gmra.mxu3 %vm477_vm0, %v463_v29  ;;  %v1734_v29 = vadd.f32 %v8225_v21, %v1733_v51 }
 0x1fe   : > { %v1736_v63 = vpop.f32.mrf.mxu2 }
 0x1ff   : > { %v1737_v23 = vadd.f32 %v8225_v21, %v1736_v63  ;;  %v1731_v63 = vadd.f32 %v8225_v21, %v1730_v33  ;;  %v1722_v33 = vadd.f32 %v8225_v21, %v8133_v20  ;;  %v1716_v20 = vadd.f32 %v8225_v21, %v8113_v60 }
 0x200   : > { %v8201_v49 = vpop.f32.mrf.mxu1 }
 0x203   : > { %6315 = vmatmul.msk.f32.gmra.mxu1 %vm477_vm0, %v8179_v24  ;;  %6445 = vmatmul.msk.f32.gmra.mxu2 %vm477_vm0, %v8204_v54  ;;  %v8228_v45 = vpop.f32.mrf.mxu3 }
 0x204   : > { %12074 = vst [vmem:[#allocation63_spill] sm:$0xff] %v8228_v45  ;;  %6282 = vmatmul.msk.f32.gmra.mxu3 %vm477_vm0, %v464_v38  ;;  %v8256_v38 = vld [vmem:[%s7663_s23 + $0x108] sm:$0xff] }
 0x206   : > { %v1739_v35 = vpop.f32.mrf.mxu2 }
 0x207   : > { %v1740_v50 = vadd.f32 %v8225_v21, %v1739_v35 }
 0x208   : > { %v1327_v30 = vpop.f32.mrf.mxu1 }
 0x20b   : > { %6316 = vmatmul.msk.f32.gmra.mxu1 %vm477_vm0, %v8192_v16  ;;  %6446 = vmatmul.msk.f32.gmra.mxu2 %vm477_vm0, %v8215_v32  ;;  %v8243_v35 = vpop.f32.mrf.mxu3 }
 0x20c   : > { %12075 = vst [vmem:[#allocation64_spill] sm:$0xff] %v8243_v35  ;;  %v465_v35 = vld [vmem:[%s7663_s23 + $0x3e0] sm:$0xff] }
 0x20d   : > { %6283 = vmatmul.msk.f32.gmra.mxu3 %vm477_vm0, %v465_v35 }
 0x20e   : > { %v1742_v25 = vpop.f32.mrf.mxu2 }
 0x20f   : > { %v1743_v11 = vadd.f32 %v8225_v21, %v1742_v25  ;;  %v8251_v25 = vld [vmem:[%s11903_s4] ss:$0 sm:$0xff] }
 0x210   : > { %v1330_v62 = vpop.f32.mrf.mxu1  ;;  %v1328_v35 = vadd.f32 %v8251_v25, %v1327_v30 }
 0x211   : > { %4393 = vmatpush.msrb.mxu0 %v1743_v11 }
 0x213   : > { %6317 = vmatmul.msk.f32.gmra.mxu1 %vm477_vm0, %v8204_v54  ;;  %6447 = vmatmul.msk.f32.gmra.mxu2 %vm477_vm0, %v8234_v28 }
 0x214   : > { %4394 = vmatpush.msrb.mxu0 %v1740_v50  ;;  %v1728_v50 = vadd.f32 %v8225_v21, %v1727_v37  ;;  %v8269_v37 = vpop.f32.mrf.mxu3 }
 0x215   : > { %12076 = vst [vmem:[#allocation65_spill] sm:$0xff] %v8269_v37  ;;  %v7498_v37 = vld [vmem:[%s7663_s23 + $0x200] sm:$0xff] }
 0x216   : > { %4395 = vmatpush.msrb.mxu0 %v1737_v23  ;;  %v8245_v11 = vpop.f32.mrf.mxu2  ;;  %v1725_v23 = vadd.f32 %v8225_v21, %v8147_v9  ;;  %v1331_v9 = vadd.f32 %v8251_v25, %v1330_v62  ;;  %v1713_v62 = vadd.f32 %v8225_v21, %v8105_v0  ;;  %v1325_v0 = vadd.f32 %v8251_v25, %v8201_v49 }
 0x217   : > { %v1701_v49 = vadd.f32 %v8225_v21, %v8069_v58  ;;  %v1319_v58 = vadd.f32 %v8251_v25, %v8175_v47 }
 0x218   : > { %4396 = vmatpush.msrb.mxu0 %v1734_v29  ;;  %v1333_v45 = vpop.f32.mrf.mxu1  ;;  %v1719_v29 = vadd.f32 %v8225_v21, %v8121_v56  ;;  %v1710_v56 = vadd.f32 %v8225_v21, %v8097_v22  ;;  %v1704_v22 = vadd.f32 %v8225_v21, %v8079_v42  ;;  %v1698_v42 = vadd.f32 %v8225_v21, %v8059_v3  ;;  %v879_v3 = vpop.f32.mrf.mxu0 }
 0x219   : > { %v1334_v51 = vadd.f32 %v8251_v25, %v1333_v45  ;;  %6183 = vmatmul.msk.f32.gmra.mxu0 %vm477_vm0, %v8127_v52 }
 0x21a   : > { %4397 = vmatpush.msrb.mxu0 %v1731_v63 }
 0x21b   : > { %6318 = vmatmul.msk.f32.gmra.mxu1 %vm477_vm0, %v8215_v32  ;;  %6448 = vmatmul.msk.f32.gmra.mxu2 %vm477_vm0, %v8256_v38 }
 0x21c   : > { %6543 = vmatpush.xpose.msk.msrb.mxu3 %vm477_vm0, %v1334_v51  ;;  %4398 = vmatpush.msrb.mxu0 %v1728_v50  ;;  %v466_v50 = vld [vmem:[%s7663_s23 + $0x3e8] sm:$0xff]  ;;  %v8293_v60 = vpop.f32.mrf.mxu3  ;;  %v1707_v51 = vadd.f32 %v8225_v21, %v8089_v34 }
 0x21d   : > { %6284 = vmatmul.msk.f32.gmra.mxu3 %vm477_vm0, %v466_v50  ;;  %12077 = vst [vmem:[#allocation66_spill] sm:$0xff] %v8293_v60  ;;  %v1310_v50 = vadd.f32 %v8251_v25, %v8135_v59 }
 0x21e   : > { %4399 = vmatpush.msrb.mxu0 %v1725_v23  ;;  %v8272_v45 = vpop.f32.mrf.mxu2 }
 0x220   : > { %6544 = vmatpush.xpose.msk.msrb.mxu3 %vm477_vm0, %v1331_v9  ;;  %4400 = vmatpush.msrb.mxu0 %v1722_v33  ;;  %v8277_v63 = vpop.f32.mrf.mxu1  ;;  %v1322_v33 = vadd.f32 %v8251_v25, %v8188_v2  ;;  %v467_v9 = vld [vmem:[%s7663_s23 + $0x3f0] sm:$0xff]  ;;  %v882_v52 = vpop.f32.mrf.mxu0 }
 0x221   : > { %6184 = vmatmul.msk.f32.gmra.mxu0 %vm477_vm0, %v8139_v43 }
 0x222   : > { %4401 = vmatpush.msrb.mxu0 %v1719_v29 }
 0x223   : > { %6319 = vmatmul.msk.f32.gmra.mxu1 %vm477_vm0, %v8234_v28  ;;  %6449 = vmatmul.msk.f32.gmra.mxu2 %vm477_vm0, %v7666_v4 }
 0x224   : > { %6545 = vmatpush.xpose.msk.msrb.mxu3 %vm477_vm0, %v1328_v35  ;;  %4402 = vmatpush.msrb.mxu0 %v1716_v20  ;;  %v8319_v34 = vpop.f32.mrf.mxu3  ;;  %v1316_v20 = vadd.f32 %v8251_v25, %v8162_v46  ;;  %v468_v35 = vld [vmem:[%s7663_s23 + $0x3f8] sm:$0xff]  ;;  %v1313_v46 = vadd.f32 %v8251_v25, %v8149_v39  ;;  %v1307_v39 = vadd.f32 %v8251_v25, %v8123_v26 }
 0x225   : > { %6285 = vmatmul.msk.f32.gmra.mxu3 %vm477_vm0, %v467_v9  ;;  %12078 = vst [vmem:[#allocation67_spill] sm:$0xff] %v8319_v34  ;;  %v1301_v26 = vadd.f32 %v8251_v25, %v8107_v13  ;;  %v1295_v13 = vadd.f32 %v8251_v25, %v8091_v18  ;;  %v7473_v18 = vld [vmem:[%s7663_s23 + $0x140] sm:$0xff] }
 0x226   : > { %4403 = vmatpush.msrb.mxu0 %v1713_v62  ;;  %v8297_v30 = vpop.f32.mrf.mxu2 }
 0x228   : > { %6546 = vmatpush.xpose.msk.msrb.mxu3 %vm477_vm0, %v1325_v0  ;;  %4404 = vmatpush.msrb.mxu0 %v1710_v56  ;;  %v8302_v23 = vpop.f32.mrf.mxu1  ;;  %v885_v43 = vpop.f32.mrf.mxu0 }
 0x229   : > { %6185 = vmatmul.msk.f32.gmra.mxu0 %vm477_vm0, %v8153_v55 }
 0x22a   : > { %4405 = vmatpush.msrb.mxu0 %v1707_v51  ;;  %v7471_v51 = vld [vmem:[%s7663_s23 + $0x128] sm:$0xff] }
 0x22b   : > { %6320 = vmatmul.msk.f32.gmra.mxu1 %vm477_vm0, %v8256_v38  ;;  %6450 = vmatmul.msk.f32.gmra.mxu2 %vm477_vm0, %v7673_v6 }
 0x22c   : > { %6547 = vmatpush.xpose.msk.msrb.mxu3 %vm477_vm0, %v1322_v33  ;;  %4406 = vmatpush.msrb.mxu0 %v1704_v22  ;;  %v8339_v47 = vpop.f32.mrf.mxu3  ;;  %v8403_v33 = vld [vmem:[%s11901_s2] ss:$0 sm:$0xff] }
 0x22d   : > { %6286 = vmatmul.msk.f32.gmra.mxu3 %vm477_vm0, %v468_v35  ;;  %12079 = vst [vmem:[#allocation68_spill] sm:$0xff] %v8339_v47  ;;  %v880_v9 = vadd.f32 %v8403_v33, %v879_v3  ;;  %v7474_v3 = vld [vmem:[%s7663_s23 + $0x138] sm:$0xff] }
 0x22e   : > { %4407 = vmatpush.msrb.mxu0 %v1701_v49  ;;  %v8323_v2 = vpop.f32.mrf.mxu2 }
 0x230   : > { %6548 = vmatpush.xpose.msk.msrb.mxu3 %vm477_vm0, %v1319_v58  ;;  %4408 = vmatpush.msrb.mxu0 %v1698_v42  ;;  %v8326_v29 = vpop.f32.mrf.mxu1  ;;  %v888_v55 = vpop.f32.mrf.mxu0 }
 0x231   : > { %6186 = vmatmul.msk.f32.gmra.mxu0 %vm477_vm0, %v8166_v41  ;;  %v7472_v41 = vld [vmem:[%s7663_s23 + $0x130] sm:$0xff] }
 0x233   : > { %6321 = vmatmul.msk.f32.gmra.mxu1 %vm477_vm0, %v7666_v4  ;;  %6451 = vmatmul.msk.f32.gmra.mxu2 %vm477_vm0, %v7680_v8 }
 0x234   : > { %6549 = vmatpush.xpose.msk.msrb.mxu3 %vm477_vm0, %v1316_v20  ;;  %v8361_v0 = vpop.f32.mrf.mxu3  ;;  %v2081_v20 = vmul.f32 0.17677669, %v880_v9 }
 0x235   : > { %12080 = vst [vmem:[#allocation69_spill] sm:$0xff] %v8361_v0 }
 0x236   : > { %v8343_v62 = vpop.f32.mrf.mxu2 }
 0x238   : > { %6550 = vmatpush.xpose.msk.msrb.mxu3 %vm477_vm0, %v1313_v46  ;;  %v8346_v4 = vpop.f32.mrf.mxu1  ;;  %v891_v42 = vpop.f32.mrf.mxu0  ;;  %v883_v46 = vadd.f32 %v8403_v33, %v882_v52  ;;  %v886_v52 = vadd.f32 %v8403_v33, %v885_v43  ;;  %v889_v43 = vadd.f32 %v8403_v33, %v888_v55 }
 0x239   : > { %6187 = vmatmul.msk.f32.gmra.mxu0 %vm477_vm0, %v8179_v24  ;;  %v892_v55 = vadd.f32 %v8403_v33, %v891_v42 }
 0x23b   : > { %6322 = vmatmul.msk.f32.gmra.mxu1 %vm477_vm0, %v7673_v6  ;;  %6452 = vmatmul.msk.f32.gmra.mxu2 %vm477_vm0, %v7687_v10  ;;  %v1304_v10 = vadd.f32 %v8251_v25, %v8115_v5 }
 0x23c   : > { %6551 = vmatpush.xpose.msk.msrb.mxu3 %vm477_vm0, %v1310_v50  ;;  %v7475_v50 = vld [vmem:[%s7663_s23 + $0x148] sm:$0xff] }
 0x23e   : > { %v8359_v56 = vpop.f32.mrf.mxu2 }
 0x240   : > { %6552 = vmatpush.xpose.msk.msrb.mxu3 %vm477_vm0, %v1307_v39  ;;  %v8364_v6 = vpop.f32.mrf.mxu1 }
 0x243   : > { %6323 = vmatmul.msk.f32.gmra.mxu1 %vm477_vm0, %v7680_v8  ;;  %6453 = vmatmul.msk.f32.gmra.mxu2 %vm477_vm0, %v7694_v12  ;;  %v8382_v8 = vpop.f32.mrf.mxu3  ;;  %v1298_v12 = vadd.f32 %v8251_v25, %v8099_v31 }
 0x244   : > { %6553 = vmatpush.xpose.msk.msrb.mxu3 %vm477_vm0, %v1304_v10  ;;  %12081 = vst [vmem:[#allocation70_spill] sm:$0xff] %v8382_v8  ;;  %v2082_v10 = vmul.f32 0.17677669, %v883_v46  ;;  %v7478_v46 = vld [vmem:[%s7663_s23 + $0x160] sm:$0xff] }
 0x246   : > { %v8377_v59 = vpop.f32.mrf.mxu2 }
 0x248   : > { %6554 = vmatpush.xpose.msk.msrb.mxu3 %vm477_vm0, %v1301_v26  ;;  %v8380_v5 = vpop.f32.mrf.mxu1 }
 0x24b   : > { %6324 = vmatmul.msk.f32.gmra.mxu1 %vm477_vm0, %v7471_v51  ;;  %6454 = vmatmul.msk.f32.gmra.mxu2 %vm477_vm0, %v7701_v14  ;;  %v1292_v14 = vadd.f32 %v8251_v25, %v8081_v27  ;;  %v8407_v49 = vpop.f32.mrf.mxu3  ;;  %v1289_v27 = vadd.f32 %v8251_v25, %v8071_v17  ;;  %v894_v17 = vpop.f32.mrf.mxu0 }
 0x24c   : > { %6555 = vmatpush.xpose.msk.msrb.mxu3 %vm477_vm0, %v1298_v12  ;;  %12082 = vst [vmem:[#allocation71_spill] sm:$0xff] %v8407_v49  ;;  %6188 = vmatmul.msk.f32.gmra.mxu0 %vm477_vm0, %v8192_v16  ;;  %v7476_v12 = vld [vmem:[%s7663_s23 + $0x150] sm:$0xff]  ;;  %v895_v42 = vadd.f32 %v8403_v33, %v894_v17 }
 0x24e   : > { %v8395_v22 = vpop.f32.mrf.mxu2 }
 0x250   : > { %6556 = vmatpush.xpose.msk.msrb.mxu3 %vm477_vm0, %v1295_v13  ;;  %v8398_v31 = vpop.f32.mrf.mxu1 }
 0x253   : > { %6325 = vmatmul.msk.f32.gmra.mxu1 %vm477_vm0, %v7472_v41  ;;  %6455 = vmatmul.msk.f32.gmra.mxu2 %vm477_vm0, %v7473_v18  ;;  %v8430_v24 = vpop.f32.mrf.mxu3  ;;  %v897_v51 = vpop.f32.mrf.mxu0 }
 0x254   : > { %6557 = vmatpush.xpose.msk.msrb.mxu3 %vm477_vm0, %v1292_v14  ;;  %12083 = vst [vmem:[#allocation72_spill] sm:$0xff] %v8430_v24  ;;  %6189 = vmatmul.msk.f32.gmra.mxu0 %vm477_vm0, %v8204_v54  ;;  %v2083_v14 = vmul.f32 0.17677669, %v886_v52 }
 0x256   : > { %v8419_v58 = vpop.f32.mrf.mxu2 }
 0x258   : > { %6558 = vmatpush.xpose.msk.msrb.mxu3 %vm477_vm0, %v1289_v27  ;;  %v8422_v35 = vpop.f32.mrf.mxu1  ;;  %v2084_v27 = vmul.f32 0.17677669, %v889_v43 }
 0x25b   : > { %6559 = vmatmul.msk.f32.vlgmr.msrb.gmra.mxu3 %vm477_vm0, %v2081_v20  ;;  %6326 = vmatmul.msk.f32.gmra.mxu1 %vm477_vm0, %v7474_v3  ;;  %v8447_v13 = vpop.f32.mrf.mxu3  ;;  %v900_v9 = vpop.f32.mrf.mxu0 }
 0x25c   : > { %6456 = vmatmul.msk.f32.gmra.mxu2 %vm477_vm0, %v7475_v50  ;;  %12084 = vst [vmem:[#allocation73_spill] sm:$0xff] %v8447_v13  ;;  %6190 = vmatmul.msk.f32.gmra.mxu0 %vm477_vm0, %v8215_v32 }
 0x25e   : > { %v8434_v39 = vpop.f32.mrf.mxu2 }
 0x260   : > { %v8436_v26 = vpop.f32.mrf.mxu1 }
 0x263   : > { %6560 = vmatmul.msk.f32.gmra.mxu3 %vm477_vm0, %v2082_v10  ;;  %6327 = vmatmul.msk.f32.gmra.mxu1 %vm477_vm0, %v7473_v18  ;;  %v7477_v18 = vld [vmem:[%s7663_s23 + $0x158] sm:$0xff]  ;;  %v8460_v3 = vpop.f32.mrf.mxu3  ;;  %v2085_v10 = vmul.f32 0.17677669, %v892_v55 }
 0x264   : > { %6457 = vmatmul.msk.f32.gmra.mxu2 %vm477_vm0, %v7476_v12  ;;  %12085 = vst [vmem:[#allocation74_spill] sm:$0xff] %v8460_v3 }
 0x266   : > { %v8445_v16 = vpop.f32.mrf.mxu2 }
 0x268   : > { %v8449_v41 = vpop.f32.mrf.mxu1 }
 0x26b   : > { %6561 = vmatmul.msk.f32.gmra.mxu3 %vm477_vm0, %v2083_v14  ;;  %6328 = vmatmul.msk.f32.gmra.mxu1 %vm477_vm0, %v7475_v50  ;;  %v903_v50 = vpop.f32.mrf.mxu0  ;;  %v8471_v14 = vpop.f32.mrf.mxu3 }
 0x26c   : > { %6458 = vmatmul.msk.f32.gmra.mxu2 %vm477_vm0, %v7477_v18  ;;  %6191 = vmatmul.msk.f32.gmra.mxu0 %vm477_vm0, %v8234_v28  ;;  %12086 = vst [vmem:[#allocation75_spill] sm:$0xff] %v8471_v14 }
 0x26e   : > { %v1778_v54 = vpop.f32.mrf.mxu2 }
 0x270   : > { %v8458_v20 = vpop.f32.mrf.mxu1 }
 0x273   : > { %6562 = vmatmul.msk.f32.gmra.mxu3 %vm477_vm0, %v2084_v27  ;;  %6329 = vmatmul.msk.f32.gmra.mxu1 %vm477_vm0, %v7476_v12  ;;  %v7479_v12 = vld [vmem:[%s7663_s23 + $0x168] sm:$0xff]  ;;  %v906_v43 = vpop.f32.mrf.mxu0  ;;  %v2086_v27 = vmul.f32 0.17677669, %v895_v42  ;;  %v8487_v17 = vpop.f32.mrf.mxu3  ;;  %v901_v42 = vadd.f32 %v8403_v33, %v900_v9  ;;  %v904_v9 = vadd.f32 %v8403_v33, %v903_v50 }
 0x274   : > { %6459 = vmatmul.msk.f32.gmra.mxu2 %vm477_vm0, %v7478_v46  ;;  %6192 = vmatmul.msk.f32.gmra.mxu0 %vm477_vm0, %v8256_v38  ;;  %12087 = vst [vmem:[#allocation76_spill] sm:$0xff] %v8487_v17 }
 0x275   : > { %v2088_v17 = vmul.f32 0.17677669, %v901_v42  ;;  %v7482_v42 = vld [vmem:[%s7663_s23 + $0x180] sm:$0xff] }
 0x276   : > { %v1781_v32 = vpop.f32.mrf.mxu2 }
 0x278   : > { %v8469_v52 = vpop.f32.mrf.mxu1 }
 0x27b   : > { %6563 = vmatmul.msk.f32.gmra.mxu3 %vm477_vm0, %v2085_v10  ;;  %6330 = vmatmul.msk.f32.gmra.mxu1 %vm477_vm0, %v7477_v18  ;;  %v898_v18 = vadd.f32 %v8403_v33, %v897_v51  ;;  %v7480_v10 = vld [vmem:[%s7663_s23 + $0x170] sm:$0xff]  ;;  %v909_v14 = vpop.f32.mrf.mxu0  ;;  %v8496_v24 = vpop.f32.mrf.mxu3 }
 0x27c   : > { %6460 = vmatmul.msk.f32.gmra.mxu2 %vm477_vm0, %v7479_v12  ;;  %12088 = vst [vmem:[#allocation77_spill] sm:$0xff] %v8496_v24 }
 0x27d   : > { %v2087_v13 = vmul.f32 0.17677669, %v898_v18 }
 0x27e   : > { %v1784_v28 = vpop.f32.mrf.mxu2 }
 0x280   : > { %v8480_v55 = vpop.f32.mrf.mxu1 }
 0x283   : > { %6564 = vmatmul.msk.f32.gmra.mxu3 %vm477_vm0, %v2086_v27  ;;  %6331 = vmatmul.msk.f32.gmra.mxu1 %vm477_vm0, %v7478_v46  ;;  %v7481_v27 = vld [vmem:[%s7663_s23 + $0x178] sm:$0xff]  ;;  %v8494_v51 = vpop.f32.mrf.mxu0 }
 0x284   : > { %6461 = vmatmul.msk.f32.gmra.mxu2 %vm477_vm0, %v7480_v10 }
 0x286   : > { %v1787_v3 = vpop.f32.mrf.mxu2 }
 0x287   : > { %v1788_v18 = vadd.f32 %v8225_v21, %v1787_v3  ;;  %v1779_v3 = vadd.f32 %v8225_v21, %v1778_v54  ;;  %v907_v54 = vadd.f32 %v8403_v33, %v906_v43 }
 0x288   : > { %v1375_v38 = vpop.f32.mrf.mxu1 }
 0x289   : > { %v2090_v43 = vmul.f32 0.17677669, %v907_v54 }
 0x28b   : > { %6565 = vmatmul.msk.f32.gmra.mxu3 %vm477_vm0, %v2087_v13  ;;  %6332 = vmatmul.msk.f32.gmra.mxu1 %vm477_vm0, %v7479_v12  ;;  %v1785_v13 = vadd.f32 %v8225_v21, %v1784_v28  ;;  %v1782_v12 = vadd.f32 %v8225_v21, %v1781_v32  ;;  %v8505_v0 = vpop.f32.mrf.mxu0  ;;  %v2089_v28 = vmul.f32 0.17677669, %v904_v9 }
 0x28c   : > { %6462 = vmatmul.msk.f32.gmra.mxu2 %vm477_vm0, %v7481_v27 }
 0x28e   : > { %v1790_v46 = vpop.f32.mrf.mxu2 }
 0x28f   : > { %v1791_v49 = vadd.f32 %v8225_v21, %v1790_v46  ;;  %v1773_v46 = vadd.f32 %v8225_v21, %v8434_v39  ;;  %v1767_v39 = vadd.f32 %v8225_v21, %v8395_v22  ;;  %v1376_v22 = vadd.f32 %v8251_v25, %v1375_v38 }
 0x290   : > { %v1378_v8 = vpop.f32.mrf.mxu1  ;;  %v1755_v38 = vadd.f32 %v8225_v21, %v8323_v2  ;;  %v1370_v2 = vadd.f32 %v8251_v25, %v8469_v52  ;;  %v1367_v52 = vadd.f32 %v8251_v25, %v8458_v20 }
 0x291   : > { %4458 = vmatpush.msra.mxu1 %v1791_v49  ;;  %v1379_v9 = vadd.f32 %v8251_v25, %v1378_v8 }
 0x293   : > { %6566 = vmatmul.msk.f32.gmra.mxu3 %vm477_vm0, %v2088_v17  ;;  %6333 = vmatmul.msk.f32.gmra.mxu1 %vm477_vm0, %v7480_v10  ;;  %v1776_v10 = vadd.f32 %v8225_v21, %v8445_v16  ;;  %v8514_v17 = vpop.f32.mrf.mxu3  ;;  %v8525_v16 = vpop.f32.mrf.mxu0 }
 0x294   : > { %4459 = vmatpush.msra.mxu1 %v1788_v18  ;;  %6463 = vmatmul.msk.f32.gmra.mxu2 %vm477_vm0, %v7482_v42  ;;  %12089 = vst [vmem:[#allocation78_spill] sm:$0xff] %v8514_v17  ;;  %v1770_v18 = vadd.f32 %v8225_v21, %v8419_v58  ;;  %v1764_v58 = vadd.f32 %v8225_v21, %v8377_v59 }
 0x295   : > { %v1758_v59 = vadd.f32 %v8225_v21, %v8343_v62  ;;  %v1752_v62 = vadd.f32 %v8225_v21, %v8297_v30  ;;  %v1746_v30 = vadd.f32 %v8225_v21, %v8245_v11 }
 0x296   : > { %4460 = vmatpush.msra.mxu1 %v1785_v13  ;;  %v8510_v49 = vpop.f32.mrf.mxu2  ;;  %v7483_v13 = vld [vmem:[%s7663_s23 + $0x188] sm:$0xff] }
 0x298   : > { %4461 = vmatpush.msra.mxu1 %v1782_v12  ;;  %v1381_v50 = vpop.f32.mrf.mxu1 }
 0x299   : > { %v1382_v32 = vadd.f32 %v8251_v25, %v1381_v50  ;;  %v1373_v50 = vadd.f32 %v8251_v25, %v8480_v55  ;;  %v913_v55 = vadd.f32 %v8403_v33, %v8494_v51 }
 0x29a   : > { %4462 = vmatpush.msra.mxu1 %v1779_v3  ;;  %v1761_v3 = vadd.f32 %v8225_v21, %v8359_v56  ;;  %v7484_v56 = vld [vmem:[%s7663_s23 + $0x190] sm:$0xff] }
 0x29b   : > { %6567 = vmatmul.msk.f32.gmra.mxu3 %vm477_vm0, %v2089_v28  ;;  %6334 = vmatmul.msk.f32.gmra.mxu1 %vm477_vm0, %v7481_v27  ;;  %v8542_v8 = vpop.f32.mrf.mxu3  ;;  %v910_v28 = vadd.f32 %v8403_v33, %v909_v14  ;;  %v2092_v51 = vmul.f32 0.17677669, %v913_v55  ;;  %v1349_v55 = vadd.f32 %v8251_v25, %v8364_v6 }
 0x29c   : > { %6575 = vmatpush.xpose.msk.msra.mxu3 %vm477_vm0, %v1382_v32  ;;  %4463 = vmatpush.msra.mxu1 %v1776_v10  ;;  %12090 = vst [vmem:[#allocation79_spill] sm:$0xff] %v8542_v8  ;;  %v8550_v10 = vpop.f32.mrf.mxu0 }
 0x29d   : > { %6464 = vmatmul.msk.f32.gmra.mxu2 %vm477_vm0, %v7483_v13  ;;  %v2091_v14 = vmul.f32 0.17677669, %v910_v28 }
 0x29e   : > { %4464 = vmatpush.msra.mxu1 %v1773_v46  ;;  %v8532_v27 = vpop.f32.mrf.mxu2  ;;  %v1749_v46 = vadd.f32 %v8225_v21, %v8272_v45 }
 0x2a0   : > { %6576 = vmatpush.xpose.msk.msra.mxu3 %vm477_vm0, %v1379_v9  ;;  %4465 = vmatpush.msra.mxu1 %v1770_v18  ;;  %v8537_v12 = vpop.f32.mrf.mxu1  ;;  %v7485_v18 = vld [vmem:[%s7663_s23 + $0x198] sm:$0xff]  ;;  %v916_v9 = vadd.f32 %v8403_v33, %v8505_v0  ;;  %v1358_v0 = vadd.f32 %v8251_v25, %v8422_v35 }
 0x2a2   : > { %4466 = vmatpush.msra.mxu1 %v1767_v39  ;;  %v1364_v39 = vadd.f32 %v8251_v25, %v8449_v41 }
 0x2a3   : > { %6568 = vmatmul.msk.f32.gmra.mxu3 %vm477_vm0, %v2090_v43  ;;  %6335 = vmatmul.msk.f32.gmra.mxu1 %vm477_vm0, %v7482_v42  ;;  %v8576_v54 = vpop.f32.mrf.mxu3  ;;  %v7486_v43 = vld [vmem:[%s7663_s23 + $0x1a0] sm:$0xff] }
 0x2a4   : > { %6577 = vmatpush.xpose.msk.msra.mxu3 %vm477_vm0, %v1376_v22  ;;  %4467 = vmatpush.msra.mxu1 %v1764_v58  ;;  %12091 = vst [vmem:[#allocation80_spill] sm:$0xff] %v8576_v54  ;;  %v924_v45 = vpop.f32.mrf.mxu0  ;;  %v1361_v58 = vadd.f32 %v8251_v25, %v8436_v26  ;;  %v2093_v22 = vmul.f32 0.17677669, %v916_v9  ;;  %v1343_v9 = vadd.f32 %v8251_v25, %v8326_v29 }
 0x2a5   : > { %6465 = vmatmul.msk.f32.gmra.mxu2 %vm477_vm0, %v7484_v56 }
 0x2a6   : > { %4468 = vmatpush.msra.mxu1 %v1761_v3  ;;  %v8558_v42 = vpop.f32.mrf.mxu2 }
 0x2a8   : > { %6578 = vmatpush.xpose.msk.msra.mxu3 %vm477_vm0, %v1373_v50  ;;  %4469 = vmatpush.msra.mxu1 %v1758_v59  ;;  %v8563_v32 = vpop.f32.mrf.mxu1  ;;  %v919_v59 = vadd.f32 %v8403_v33, %v8525_v16  ;;  %v1352_v16 = vadd.f32 %v8251_v25, %v8380_v5 }
 0x2aa   : > { %4470 = vmatpush.msra.mxu1 %v1755_v38  ;;  %v1355_v38 = vadd.f32 %v8251_v25, %v8398_v31  ;;  %v2094_v35 = vmul.f32 0.17677669, %v919_v59  ;;  %v1337_v59 = vadd.f32 %v8251_v25, %v8277_v63 }
 0x2ab   : > { %6569 = vmatmul.msk.f32.gmra.mxu3 %vm477_vm0, %v2091_v14  ;;  %6336 = vmatmul.msk.f32.gmra.mxu1 %vm477_vm0, %v7483_v13  ;;  %v8600_v41 = vpop.f32.mrf.mxu3 }
 0x2ac   : > { %6579 = vmatpush.xpose.msk.msra.mxu3 %vm477_vm0, %v1370_v2  ;;  %4471 = vmatpush.msra.mxu1 %v1752_v62  ;;  %v927_v20 = vpop.f32.mrf.mxu0  ;;  %12092 = vst [vmem:[#allocation81_spill] sm:$0xff] %v8600_v41  ;;  %v7488_v2 = vld [vmem:[%s7663_s23 + $0x1b0] sm:$0xff] }
 0x2ad   : > { %6466 = vmatmul.msk.f32.gmra.mxu2 %vm477_vm0, %v7485_v18 }
 0x2ae   : > { %4472 = vmatpush.msra.mxu1 %v1749_v46  ;;  %v8582_v13 = vpop.f32.mrf.mxu2  ;;  %v922_v46 = vadd.f32 %v8403_v33, %v8550_v10  ;;  %v1346_v10 = vadd.f32 %v8251_v25, %v8346_v4 }
 0x2b0   : > { %6580 = vmatpush.xpose.msk.msra.mxu3 %vm477_vm0, %v1367_v52  ;;  %4473 = vmatpush.msra.mxu1 %v1746_v30  ;;  %v8585_v11 = vpop.f32.mrf.mxu1  ;;  %v2095_v5 = vmul.f32 0.17677669, %v922_v46 }
 0x2b3   : > { %6570 = vmatmul.msk.f32.gmra.mxu3 %vm477_vm0, %v2092_v51  ;;  %6337 = vmatmul.msk.f32.gmra.mxu1 %vm477_vm0, %v7484_v56  ;;  %v7487_v56 = vld [vmem:[%s7663_s23 + $0x1a8] sm:$0xff]  ;;  %v8621_v62 = vpop.f32.mrf.mxu3  ;;  %v925_v51 = vadd.f32 %v8403_v33, %v924_v45  ;;  %v1340_v45 = vadd.f32 %v8251_v25, %v8302_v23 }
 0x2b4   : > { %6581 = vmatpush.xpose.msk.msra.mxu3 %vm477_vm0, %v1364_v39  ;;  %v930_v26 = vpop.f32.mrf.mxu0  ;;  %12093 = vst [vmem:[#allocation82_spill] sm:$0xff] %v8621_v62  ;;  %v7489_v39 = vld [vmem:[%s7663_s23 + $0x1b8] sm:$0xff] }
 0x2b5   : > { %6467 = vmatmul.msk.f32.gmra.mxu2 %vm477_vm0, %v7486_v43  ;;  %v2096_v4 = vmul.f32 0.17677669, %v925_v51 }
 0x2b6   : > { %v8598_v3 = vpop.f32.mrf.mxu2 }
 0x2b8   : > { %6582 = vmatpush.xpose.msk.msra.mxu3 %vm477_vm0, %v1361_v58  ;;  %v8603_v28 = vpop.f32.mrf.mxu1 }
 0x2bb   : > { %6571 = vmatmul.msk.f32.gmra.mxu3 %vm477_vm0, %v2093_v22  ;;  %6338 = vmatmul.msk.f32.gmra.mxu1 %vm477_vm0, %v7485_v18  ;;  %v8641_v52 = vpop.f32.mrf.mxu3  ;;  %v928_v22 = vadd.f32 %v8403_v33, %v927_v20  ;;  %v931_v20 = vadd.f32 %v8403_v33, %v930_v26 }
 0x2bc   : > { %6583 = vmatpush.xpose.msk.msra.mxu3 %vm477_vm0, %v1358_v0  ;;  %v933_v31 = vpop.f32.mrf.mxu0  ;;  %12094 = vst [vmem:[#allocation83_spill] sm:$0xff] %v8641_v52  ;;  %v7490_v0 = vld [vmem:[%s7663_s23 + $0x1c0] sm:$0xff] }
 0x2bd   : > { %6468 = vmatmul.msk.f32.gmra.mxu2 %vm477_vm0, %v7487_v56  ;;  %v2098_v63 = vmul.f32 0.17677669, %v931_v20  ;;  %v934_v26 = vadd.f32 %v8403_v33, %v933_v31 }
 0x2be   : > { %v8616_v50 = vpop.f32.mrf.mxu2 }
 0x2c0   : > { %6584 = vmatpush.xpose.msk.msra.mxu3 %vm477_vm0, %v1355_v38  ;;  %v8619_v14 = vpop.f32.mrf.mxu1  ;;  %v2097_v38 = vmul.f32 0.17677669, %v928_v22  ;;  %v7493_v22 = vld [vmem:[%s7663_s23 + $0x1d8] sm:$0xff] }
 0x2c3   : > { %6572 = vmatmul.msk.f32.gmra.mxu3 %vm477_vm0, %v2094_v35  ;;  %6339 = vmatmul.msk.f32.gmra.mxu1 %vm477_vm0, %v7486_v43  ;;  %v8662_v29 = vpop.f32.mrf.mxu3 }
 0x2c4   : > { %6585 = vmatpush.xpose.msk.msra.mxu3 %vm477_vm0, %v1352_v16  ;;  %v936_v6 = vpop.f32.mrf.mxu0  ;;  %12095 = vst [vmem:[#allocation84_spill] sm:$0xff] %v8662_v29  ;;  %v7491_v16 = vld [vmem:[%s7663_s23 + $0x1c8] sm:$0xff] }
 0x2c5   : > { %6469 = vmatmul.msk.f32.gmra.mxu2 %vm477_vm0, %v7488_v2  ;;  %v937_v31 = vadd.f32 %v8403_v33, %v936_v6  ;;  %v7494_v6 = vld [vmem:[%s7663_s23 + $0x1e0] sm:$0xff] }
 0x2c6   : > { %v8634_v30 = vpop.f32.mrf.mxu2 }
 0x2c8   : > { %6586 = vmatpush.xpose.msk.msra.mxu3 %vm477_vm0, %v1349_v55  ;;  %v8637_v18 = vpop.f32.mrf.mxu1 }
 0x2cb   : > { %6573 = vmatmul.msk.f32.gmra.mxu3 %vm477_vm0, %v2095_v5  ;;  %6340 = vmatmul.msk.f32.gmra.mxu1 %vm477_vm0, %v7487_v56 }
 0x2cc   : > { %6587 = vmatpush.xpose.msk.msra.mxu3 %vm477_vm0, %v1346_v10  ;;  %v939_v23 = vpop.f32.mrf.mxu0  ;;  %v7492_v10 = vld [vmem:[%s7663_s23 + $0x1d0] sm:$0xff] }
 0x2cd   : > { %6470 = vmatmul.msk.f32.gmra.mxu2 %vm477_vm0, %v7489_v39 }
 0x2ce   : > { %v8651_v43 = vpop.f32.mrf.mxu2 }
 0x2d0   : > { %6588 = vmatpush.xpose.msk.msra.mxu3 %vm477_vm0, %v1343_v9  ;;  %v8654_v58 = vpop.f32.mrf.mxu1 }
 0x2d3   : > { %6574 = vmatmul.msk.f32.gmra.mxu3 %vm477_vm0, %v2096_v4  ;;  %6341 = vmatmul.msk.f32.gmra.mxu1 %vm477_vm0, %v7488_v2 }
 0x2d4   : > { %6589 = vmatpush.xpose.msk.msra.mxu3 %vm477_vm0, %v1340_v45  ;;  %v942_v5 = vpop.f32.mrf.mxu0 }
 0x2d5   : > { %6471 = vmatmul.msk.f32.gmra.mxu2 %vm477_vm0, %v7490_v0 }
 0x2d6   : > { %v8668_v56 = vpop.f32.mrf.mxu2 }
 0x2d8   : > { %6590 = vmatpush.xpose.msk.msra.mxu3 %vm477_vm0, %v1337_v59  ;;  %v8671_v35 = vpop.f32.mrf.mxu1  ;;  %v2100_v59 = vmul.f32 0.17677669, %v937_v31 }
 0x2db   : > { %6591 = vmatmul.msk.f32.vlgmr.msra.gmra.mxu3 %vm477_vm0, %v2097_v38  ;;  %6342 = vmatmul.msk.f32.gmra.mxu1 %vm477_vm0, %v7489_v39  ;;  %v2099_v39 = vmul.f32 0.17677669, %v934_v26 }
 0x2dc   : > { %v945_v45 = vpop.f32.mrf.mxu0 }
 0x2dd   : > { %6472 = vmatmul.msk.f32.gmra.mxu2 %vm477_vm0, %v7491_v16 }
 0x2de   : > { %v8678_v46 = vpop.f32.mrf.mxu3 }
 0x2df   : > { %v8680_v2 = vpop.f32.mrf.mxu2  ;;  %3497 = vmax.xlane.f32.xlu0 %v8678_v46 }
 0x2e0   : > { %v8683_v55 = vpop.f32.mrf.mxu1 }
 0x2e3   : > { %6592 = vmatmul.msk.f32.gmra.mxu3 %vm477_vm0, %v2098_v63  ;;  %6343 = vmatmul.msk.f32.gmra.mxu1 %vm477_vm0, %v7490_v0 }
 0x2e4   : > { %v948_v63 = vpop.f32.mrf.mxu0 }
 0x2e5   : > { %6473 = vmatmul.msk.f32.gmra.mxu2 %vm477_vm0, %v7492_v10 }
 0x2e6   : > { %v8690_v51 = vpop.f32.mrf.mxu3 }
 0x2e7   : > { %v8692_v9 = vpop.f32.mrf.mxu2  ;;  %3499 = vmax.xlane.f32.xlu0 %v8690_v51 }
 0x2e8   : > { %v8695_v4 = vpop.f32.mrf.mxu1 }
 0x2eb   : > { %6593 = vmatmul.msk.f32.gmra.mxu3 %vm477_vm0, %v2099_v39  ;;  %6344 = vmatmul.msk.f32.gmra.mxu1 %vm477_vm0, %v7491_v16  ;;  %v940_v16 = vadd.f32 %v8403_v33, %v939_v23  ;;  %v7495_v23 = vld [vmem:[%s7663_s23 + $0x1e8] sm:$0xff] }
 0x2ec   : > { %v951_v52 = vpop.f32.mrf.mxu0 }
 0x2ed   : > { %6474 = vmatmul.msk.f32.gmra.mxu2 %vm477_vm0, %v7493_v22  ;;  %v2101_v39 = vmul.f32 0.17677669, %v940_v16 }
 0x2ee   : > { %v8702_v0 = vpop.f32.mrf.mxu3 }
 0x2ef   : > { %v1826_v38 = vpop.f32.mrf.mxu2  ;;  %3501 = vmax.xlane.f32.xlu1 %v8702_v0 }
 0x2f0   : > { %v8705_v20 = vpop.f32.mrf.mxu1 }
 0x2f3   : > { %6594 = vmatmul.msk.f32.gmra.mxu3 %vm477_vm0, %v2100_v59  ;;  %6345 = vmatmul.msk.f32.gmra.mxu1 %vm477_vm0, %v7492_v10  ;;  %v943_v10 = vadd.f32 %v8403_v33, %v942_v5  ;;  %v7496_v5 = vld [vmem:[%s7663_s23 + $0x1f0] sm:$0xff] }
 0x2f4   : > { %v954_v17 = vpop.f32.mrf.mxu0 }
 0x2f5   : > { %6475 = vmatmul.msk.f32.gmra.mxu2 %vm477_vm0, %v7494_v6  ;;  %v2102_v62 = vmul.f32 0.17677669, %v943_v10 }
 0x2f6   : > { %v8712_v26 = vpop.f32.mrf.mxu3 }
 0x2f7   : > { %v1829_v31 = vpop.f32.mrf.mxu2  ;;  %3503 = vmax.xlane.f32.xlu1 %v8712_v26 }
 0x2f8   : > { %v8715_v29 = vpop.f32.mrf.mxu1 }
 0x2fb   : > { %6595 = vmatmul.msk.f32.gmra.mxu3 %vm477_vm0, %v2101_v39  ;;  %6346 = vmatmul.msk.f32.gmra.mxu1 %vm477_vm0, %v7493_v22  ;;  %v946_v22 = vadd.f32 %v8403_v33, %v945_v45 }
 0x2fd   : > { %6476 = vmatmul.msk.f32.gmra.mxu2 %vm477_vm0, %v7495_v23  ;;  %v2103_v54 = vmul.f32 0.17677669, %v946_v22 }
 0x2fe   : > { %v8722_v59 = vpop.f32.mrf.mxu3 }
 0x2ff   : > { %v1832_v16 = vpop.f32.mrf.mxu2  ;;  %3505 = vmax.xlane.f32.xlu2 %v8722_v59 }
 0x300   : > { %v8725_v41 = vpop.f32.mrf.mxu1 }
 0x303   : > { %6596 = vmatmul.msk.f32.gmra.mxu3 %vm477_vm0, %v2102_v62  ;;  %6347 = vmatmul.msk.f32.gmra.mxu1 %vm477_vm0, %v7494_v6  ;;  %v949_v62 = vadd.f32 %v8403_v33, %v948_v63  ;;  %v7497_v6 = vld [vmem:[%s7663_s23 + $0x1f8] sm:$0xff]  ;;  %v952_v63 = vadd.f32 %v8403_v33, %v951_v52 }
 0x305   : > { %6477 = vmatmul.msk.f32.gmra.mxu2 %vm477_vm0, %v7496_v5  ;;  %v2104_v24 = vmul.f32 0.17677669, %v949_v62  ;;  %v1830_v62 = vadd.f32 %v8225_v21, %v1829_v31 }
 0x306   : > { %v8732_v39 = vpop.f32.mrf.mxu3 }
 0x307   : > { %v1835_v8 = vpop.f32.mrf.mxu2  ;;  %3507 = vmax.xlane.f32.xlu2 %v8732_v39 }
 0x308   : > { %v1423_v10 = vpop.f32.mrf.mxu1  ;;  %v1836_v22 = vadd.f32 %v8225_v21, %v1835_v8  ;;  %v1827_v8 = vadd.f32 %v8225_v21, %v1826_v38  ;;  %v955_v38 = vadd.f32 %v8403_v33, %v954_v17 }
 0x30a   : > { %v2106_v17 = vmul.f32 0.17677669, %v955_v38  ;;  %v1412_v38 = vadd.f32 %v8251_v25, %v8695_v4 }
 0x30b   : > { %6597 = vmatmul.msk.f32.gmra.mxu3 %vm477_vm0, %v2103_v54  ;;  %6348 = vmatmul.msk.f32.gmra.mxu1 %vm477_vm0, %v7495_v23  ;;  %v1833_v54 = vadd.f32 %v8225_v21, %v1832_v16  ;;  %v957_v23 = vpop.f32.mrf.mxu0  ;;  %v1821_v16 = vadd.f32 %v8225_v21, %v8680_v2  ;;  %v1815_v2 = vadd.f32 %v8225_v21, %v8651_v43 }
 0x30c   : > { %v1809_v43 = vadd.f32 %v8225_v21, %v8616_v50  ;;  %v1803_v50 = vadd.f32 %v8225_v21, %v8582_v13  ;;  %v1797_v13 = vadd.f32 %v8225_v21, %v8532_v27  ;;  %v1415_v27 = vadd.f32 %v8251_v25, %v8705_v20 }
 0x30d   : > { %6478 = vmatmul.msk.f32.gmra.mxu2 %vm477_vm0, %v7497_v6 }
 0x30e   : > { %v8740_v45 = vpop.f32.mrf.mxu3 }
 0x30f   : > { %v1838_v47 = vpop.f32.mrf.mxu2  ;;  %3509 = vmax.xlane.f32.xlu0 %v8740_v45 }
 0x310   : > { %v1839_v34 = vadd.f32 %v8225_v21, %v1838_v47  ;;  %v1426_v60 = vpop.f32.mrf.mxu1 }
 0x312   : > { %4523 = vmatpush.msra.mxu2 %v1839_v34  ;;  %v2105_v34 = vmul.f32 0.17677669, %v952_v63 }
 0x313   : > { %6598 = vmatmul.msk.f32.gmra.mxu3 %vm477_vm0, %v2104_v24  ;;  %6349 = vmatmul.msk.f32.gmra.mxu1 %vm477_vm0, %v7496_v5  ;;  %v1824_v24 = vadd.f32 %v8225_v21, %v8692_v9  ;;  %v1818_v5 = vadd.f32 %v8225_v21, %v8668_v56  ;;  %v960_v9 = vpop.f32.mrf.mxu0  ;;  %v1812_v56 = vadd.f32 %v8225_v21, %v8634_v30 }
 0x314   : > { %4524 = vmatpush.msra.mxu2 %v1836_v22  ;;  %v7499_v22 = vld [vmem:[%s7663_s23 + $0x208] sm:$0xff]  ;;  %v1806_v30 = vadd.f32 %v8225_v21, %v8598_v3  ;;  %v1800_v3 = vadd.f32 %v8225_v21, %v8558_v42  ;;  %v1794_v42 = vadd.f32 %v8225_v21, %v8510_v49 }
 0x315   : > { %6479 = vmatmul.msk.f32.gmra.mxu2 %vm477_vm0, %v7498_v37 }
 0x316   : > { %v8753_v47 = vpop.f32.mrf.mxu3  ;;  %4525 = vmatpush.msra.mxu2 %v1833_v54  ;;  %v1427_v54 = vadd.f32 %v8251_v25, %v1426_v60  ;;  %v1424_v60 = vadd.f32 %v8251_v25, %v1423_v10  ;;  %v1421_v10 = vadd.f32 %v8251_v25, %v8725_v41  ;;  %v1418_v41 = vadd.f32 %v8251_v25, %v8715_v29 }
 0x317   : > { %3511 = vmax.xlane.f32.xlu1 %v8753_v47 }
 0x318   : > { %4526 = vmatpush.msra.mxu2 %v1830_v62  ;;  %v1429_v52 = vpop.f32.mrf.mxu1  ;;  %v958_v62 = vadd.f32 %v8403_v33, %v957_v23 }
 0x319   : > { %v1430_v31 = vadd.f32 %v8251_v25, %v1429_v52  ;;  %v961_v52 = vadd.f32 %v8403_v33, %v960_v9  ;;  %v1409_v9 = vadd.f32 %v8251_v25, %v8683_v55  ;;  %v7503_v55 = vld [vmem:[%s7663_s23 + $0x228] sm:$0xff] }
 0x31a   : > { %4527 = vmatpush.msra.mxu2 %v1827_v8  ;;  %v7500_v8 = vld [vmem:[%s7663_s23 + $0x210] sm:$0xff]  ;;  %v2107_v23 = vmul.f32 0.17677669, %v958_v62 }
 0x31b   : > { %6599 = vmatmul.msk.f32.gmra.mxu3 %vm477_vm0, %v2105_v34  ;;  %6350 = vmatmul.msk.f32.gmra.mxu1 %vm477_vm0, %v7497_v6 }
 0x31c   : > { %6607 = vmatpush.xpose.msk.msrb.mxu3 %vm477_vm0, %v1430_v31  ;;  %4528 = vmatpush.msra.mxu2 %v1824_v24  ;;  %v7501_v31 = vld [vmem:[%s7663_s23 + $0x218] sm:$0xff] }
 0x31d   : > { %6480 = vmatmul.msk.f32.gmra.mxu2 %vm477_vm0, %v7499_v22 }
 0x31e   : > { %v8772_v63 = vpop.f32.mrf.mxu3  ;;  %4529 = vmatpush.msra.mxu2 %v1821_v16  ;;  %v2108_v16 = vmul.f32 0.17677669, %v961_v52 }
 0x31f   : > { %3513 = vmax.xlane.f32.xlu2 %v8772_v63 }
 0x320   : > { %6608 = vmatpush.xpose.msk.msrb.mxu3 %vm477_vm0, %v1427_v54  ;;  %4530 = vmatpush.msra.mxu2 %v1818_v5  ;;  %v8778_v6 = vpop.f32.mrf.mxu1  ;;  %v7502_v5 = vld [vmem:[%s7663_s23 + $0x220] sm:$0xff]  ;;  %v1406_v54 = vadd.f32 %v8251_v25, %v8671_v35 }
 0x322   : > { %4531 = vmatpush.msra.mxu2 %v1815_v2 }
 0x323   : > { %6600 = vmatmul.msk.f32.gmra.mxu3 %vm477_vm0, %v2106_v17  ;;  %6351 = vmatmul.msk.f32.gmra.mxu1 %vm477_vm0, %v7498_v37  ;;  %v963_v37 = vpop.f32.mrf.mxu0 }
 0x324   : > { %6609 = vmatpush.xpose.msk.msrb.mxu3 %vm477_vm0, %v1424_v60  ;;  %4532 = vmatpush.msra.mxu2 %v1812_v56  ;;  %v964_v20 = vadd.f32 %v8403_v33, %v963_v37 }
 0x325   : > { %6481 = vmatmul.msk.f32.gmra.mxu2 %vm477_vm0, %v7500_v8 }
 0x326   : > { %v8795_v34 = vpop.f32.mrf.mxu3  ;;  %4533 = vmatpush.msra.mxu2 %v1809_v43  ;;  %v2109_v2 = vmul.f32 0.17677669, %v964_v20  ;;  %v1403_v43 = vadd.f32 %v8251_v25, %v8654_v58 }
 0x327   : > { %3515 = vmax.xlane.f32.xlu0 %v8795_v34 }
 0x328   : > { %6610 = vmatpush.xpose.msk.msrb.mxu3 %vm477_vm0, %v1421_v10  ;;  %4534 = vmatpush.msra.mxu2 %v1806_v30  ;;  %v8801_v24 = vpop.f32.mrf.mxu1  ;;  %v1400_v30 = vadd.f32 %v8251_v25, %v8637_v18  ;;  %v1397_v10 = vadd.f32 %v8251_v25, %v8619_v14  ;;  %v7506_v14 = vld [vmem:[%s7663_s23 + $0x238] sm:$0xff] }
 0x32a   : > { %4535 = vmatpush.msra.mxu2 %v1803_v50  ;;  %v7504_v50 = vld [vmem:[%s7663_s23 + $0x230] sm:$0xff] }
 0x32b   : > { %6601 = vmatmul.msk.f32.gmra.mxu3 %vm477_vm0, %v2107_v23  ;;  %6352 = vmatmul.msk.f32.gmra.mxu1 %vm477_vm0, %v7499_v22  ;;  %v966_v49 = vpop.f32.mrf.mxu0 }
 0x32c   : > { %6611 = vmatpush.xpose.msk.msrb.mxu3 %vm477_vm0, %v1418_v41  ;;  %4536 = vmatpush.msra.mxu2 %v1800_v3  ;;  %v967_v56 = vadd.f32 %v8403_v33, %v966_v49  ;;  %v8874_v3 = vld [vmem:[%s11903_s4] ss:$0 sm:$0xff] }
 0x32d   : > { %6482 = vmatmul.msk.f32.gmra.mxu2 %vm477_vm0, %v7501_v31  ;;  %v1391_v41 = vadd.f32 %v8874_v3, %v8585_v11  ;;  %v1385_v20 = vadd.f32 %v8874_v3, %v8537_v12 }
 0x32e   : > { %v8817_v29 = vpop.f32.mrf.mxu3  ;;  %4537 = vmatpush.msra.mxu2 %v1797_v13  ;;  %v2110_v62 = vmul.f32 0.17677669, %v967_v56  ;;  %v1394_v13 = vadd.f32 %v8874_v3, %v8603_v28 }
 0x32f   : > { %3517 = vmax.xlane.f32.xlu1 %v8817_v29 }
 0x330   : > { %6612 = vmatpush.xpose.msk.msrb.mxu3 %vm477_vm0, %v1415_v27  ;;  %4538 = vmatpush.msra.mxu2 %v1794_v42  ;;  %v8821_v21 = vpop.f32.mrf.mxu1  ;;  %v1388_v27 = vadd.f32 %v8874_v3, %v8563_v32 }
 0x333   : > { %6602 = vmatmul.msk.f32.gmra.mxu3 %vm477_vm0, %v2108_v16  ;;  %6353 = vmatmul.msk.f32.gmra.mxu1 %vm477_vm0, %v7500_v8  ;;  %v969_v17 = vpop.f32.mrf.mxu0 }
 0x334   : > { %6613 = vmatpush.xpose.msk.msrb.mxu3 %vm477_vm0, %v1412_v38  ;;  %v970_v8 = vadd.f32 %v8403_v33, %v969_v17 }
 0x335   : > { %6483 = vmatmul.msk.f32.gmra.mxu2 %vm477_vm0, %v7502_v5 }
 0x336   : > { %v8833_v22 = vpop.f32.mrf.mxu3  ;;  %v2111_v23 = vmul.f32 0.17677669, %v970_v8  ;;  %v8920_v8 = vld [vmem:[%s7663_s23 + $0x240] sm:$0xff] }
 0x337   : > { %3519 = vmax.xlane.f32.xlu2 %v8833_v22 }
 0x338   : > { %6614 = vmatpush.xpose.msk.msrb.mxu3 %vm477_vm0, %v1409_v9  ;;  %v8837_v4 = vpop.f32.mrf.mxu1 }
 0x33b   : > { %6603 = vmatmul.msk.f32.gmra.mxu3 %vm477_vm0, %v2109_v2  ;;  %6354 = vmatmul.msk.f32.gmra.mxu1 %vm477_vm0, %v7501_v31  ;;  %v972_v58 = vpop.f32.mrf.mxu0 }
 0x33c   : > { %6615 = vmatpush.xpose.msk.msrb.mxu3 %vm477_vm0, %v1406_v54  ;;  %v973_v25 = vadd.f32 %v8403_v33, %v972_v58 }
 0x33d   : > { %6484 = vmatmul.msk.f32.gmra.mxu2 %vm477_vm0, %v7503_v55 }
 0x33e   : > { %v8849_v60 = vpop.f32.mrf.mxu3  ;;  %v2112_v31 = vmul.f32 0.17677669, %v973_v25 }
 0x33f   : > { %3521 = vmax.xlane.f32.xlu0 %v8849_v60 }
 0x340   : > { %6616 = vmatpush.xpose.msk.msrb.mxu3 %vm477_vm0, %v1403_v43  ;;  %v8853_v35 = vpop.f32.mrf.mxu1 }
 0x343   : > { %6604 = vmatmul.msk.f32.gmra.mxu3 %vm477_vm0, %v2110_v62  ;;  %6355 = vmatmul.msk.f32.gmra.mxu1 %vm477_vm0, %v7502_v5  ;;  %v975_v42 = vpop.f32.mrf.mxu0 }
 0x344   : > { %6617 = vmatpush.xpose.msk.msrb.mxu3 %vm477_vm0, %v1400_v30  ;;  %v976_v11 = vadd.f32 %v8403_v33, %v975_v42  ;;  %v985_v42 = vadd.f32 %v8403_v33, %v7755_v40 }
 0x345   : > { %6485 = vmatmul.msk.f32.gmra.mxu2 %vm477_vm0, %v7504_v50 }
 0x346   : > { %v8865_v37 = vpop.f32.mrf.mxu3  ;;  %v2113_v9 = vmul.f32 0.17677669, %v976_v11  ;;  %v2116_v11 = vmul.f32 0.17677669, %v985_v42 }
 0x347   : > { %3523 = vmax.xlane.f32.xlu1 %v8865_v37 }
 0x348   : > { %6618 = vmatpush.xpose.msk.msrb.mxu3 %vm477_vm0, %v1397_v10  ;;  %v8869_v18 = vpop.f32.mrf.mxu1 }
 0x34b   : > { %6605 = vmatmul.msk.f32.gmra.mxu3 %vm477_vm0, %v2111_v23  ;;  %6356 = vmatmul.msk.f32.gmra.mxu1 %vm477_vm0, %v7503_v55  ;;  %v978_v2 = vpop.f32.mrf.mxu0 }
 0x34c   : > { %6619 = vmatpush.xpose.msk.msrb.mxu3 %vm477_vm0, %v1394_v13 }
 0x34d   : > { %6486 = vmatmul.msk.f32.gmra.mxu2 %vm477_vm0, %v7506_v14 }
 0x34e   : > { %v8886_v52 = vpop.f32.mrf.mxu3 }
 0x34f   : > { %3525 = vmax.xlane.f32.xlu2 %v8886_v52 }
 0x350   : > { %6620 = vmatpush.xpose.msk.msrb.mxu3 %vm477_vm0, %v1391_v41  ;;  %v8890_v28 = vpop.f32.mrf.mxu1  ;;  %v8936_v41 = vld [vmem:[%s7663_s23 + $0x248] sm:$0xff] }
 0x352   : > { %v3498_v16 = vpop.xlane.xlu0 %3497 }
 0x353   : > { %6606 = vmatmul.msk.f32.gmra.mxu3 %vm477_vm0, %v2112_v31  ;;  %6357 = vmatmul.msk.f32.gmra.mxu1 %vm477_vm0, %v7504_v50  ;;  %v3753_v49 = vsub.f32 %v8678_v46, %v3498_v16  ;;  %v979_v46 = vadd.f32 %v8403_v33, %v978_v2  ;;  %v982_v50 = vadd.f32 %v8403_v33, %v7747_v36 }
 0x354   : > { %6621 = vmatpush.xpose.msk.msrb.mxu3 %vm477_vm0, %v1388_v27 }
 0x355   : > { %v3881_v38 = vmul.f32 1.442695, %v3753_v49  ;;  %v2114_v43 = vmul.f32 0.17677669, %v979_v46  ;;  %v2115_v25 = vmul.f32 0.17677669, %v982_v50 }
 0x356   : > { %v8901_v5 = vpop.f32.mrf.mxu3 }
 0x357   : > { %6959 = vpow2.f32 %v3881_v38  ;;  %3527 = vmax.xlane.f32.xlu0 %v8901_v5  ;;  %v8952_v38 = vld [vmem:[%s7663_s23 + $0x250] sm:$0xff] }
 0x358   : > { %6622 = vmatpush.xpose.msk.msrb.mxu3 %vm477_vm0, %v1385_v20  ;;  %v8905_v32 = vpop.f32.mrf.mxu1  ;;  %v988_v20 = vadd.f32 %v8403_v33, %v7763_v44 }
 0x35a   : > { %v3500_v54 = vpop.xlane.xlu0 %3499  ;;  %v2117_v46 = vmul.f32 0.17677669, %v988_v20  ;;  %v8998_v20 = vld [vmem:[%s7663_s23 + $0x268] sm:$0xff] }
 0x35b   : > { %6623 = vmatmul.msk.f32.vlgmr.msrb.gmra.mxu3 %vm477_vm0, %v2113_v9  ;;  %6358 = vmatmul.msk.f32.gmra.mxu1 %vm477_vm0, %v7506_v14  ;;  %v3754_v12 = vsub.f32 %v8690_v51, %v3500_v54 }
 0x35d   : > { %v8911_v17 = vpop.eup %6959  ;;  %v3883_v56 = vmul.f32 1.442695, %v3754_v12 }
 0x35e   : > { %v8913_v55 = vpop.f32.mrf.mxu3  ;;  %4409 = vmatmul.f32.vlgmr.msrb.gmra.mxu0 %v8911_v17 }
 0x35f   : > { %6961 = vpow2.f32 %v3883_v56  ;;  %v8968_v56 = vld [vmem:[%s7663_s23 + $0x258] sm:$0xff] }
 0x360   : > { %v8916_v62 = vpop.f32.mrf.mxu1 }
 0x362   : > { %v3502_v30 = vpop.xlane.xlu1 %3501 }
 0x363   : > { %6624 = vmatmul.msk.f32.gmra.mxu3 %vm477_vm0, %v2114_v43  ;;  %6359 = vmatmul.msk.f32.gmra.mxu1 %vm477_vm0, %v8920_v8  ;;  %v3755_v51 = vsub.f32 %v8702_v0, %v3502_v30  ;;  %v991_v43 = vadd.f32 %v8403_v33, %v7771_v48 }
 0x365   : > { %v8925_v58 = vpop.eup %6961  ;;  %v3885_v10 = vmul.f32 1.442695, %v3755_v51 }
 0x366   : > { %v8929_v23 = vpop.f32.mrf.mxu3  ;;  %4412 = vmatmul.f32.gmra.mxu0 %v8925_v58 }
 0x367   : > { %6963 = vpow2.f32 %v3885_v10  ;;  %v2118_v10 = vmul.f32 0.17677669, %v991_v43 }
 0x368   : > { %v8932_v13 = vpop.f32.mrf.mxu1 }
 0x36a   : > { %v3504_v14 = vpop.xlane.xlu1 %3503 }
 0x36b   : > { %6625 = vmatmul.msk.f32.gmra.mxu3 %vm477_vm0, %v2115_v25  ;;  %6360 = vmatmul.msk.f32.gmra.mxu1 %vm477_vm0, %v8936_v41  ;;  %v3756_v36 = vsub.f32 %v8712_v26, %v3504_v14  ;;  %v8984_v14 = vld [vmem:[%s7663_s23 + $0x260] sm:$0xff] }
 0x36d   : > { %v8941_v0 = vpop.eup %6963  ;;  %v3887_v31 = vmul.f32 1.442695, %v3756_v36  ;;  %v994_v36 = vadd.f32 %v8403_v33, %v7782_v53  ;;  %v9008_v33 = vld [vmem:[%s11901_s2] ss:$0 sm:$0xff] }
 0x36e   : > { %v8945_v27 = vpop.f32.mrf.mxu3  ;;  %4415 = vmatmul.f32.gmra.mxu0 %v8941_v0 }
 0x36f   : > { %6965 = vpow2.f32 %v3887_v31 }
 0x370   : > { %v8948_v16 = vpop.f32.mrf.mxu1 }
 0x372   : > { %v3506_v49 = vpop.xlane.xlu2 %3505 }
 0x373   : > { %6626 = vmatmul.msk.f32.gmra.mxu3 %vm477_vm0, %v2116_v11  ;;  %6361 = vmatmul.msk.f32.gmra.mxu1 %vm477_vm0, %v8952_v38  ;;  %v3757_v40 = vsub.f32 %v8722_v59, %v3506_v49  ;;  %v2119_v49 = vmul.f32 0.17677669, %v994_v36 }
 0x375   : > { %v8957_v26 = vpop.eup %6965  ;;  %v3889_v9 = vmul.f32 1.442695, %v3757_v40 }
 0x376   : > { %v8961_v2 = vpop.f32.mrf.mxu3  ;;  %4418 = vmatmul.f32.gmra.mxu0 %v8957_v26 }
 0x377   : > { %6967 = vpow2.f32 %v3889_v9  ;;  %v997_v9 = vadd.f32 %v9008_v33, %v7790_v57 }
 0x378   : > { %v8964_v54 = vpop.f32.mrf.mxu1 }
 0x379   : > { %v2120_v43 = vmul.f32 0.17677669, %v997_v9  ;;  %v9040_v9 = vld [vmem:[%s7663_s23 + $0x278] sm:$0xff] }
 0x37a   : > { %v3508_v12 = vpop.xlane.xlu2 %3507 }
 0x37b   : > { %6627 = vmatmul.msk.f32.gmra.mxu3 %vm477_vm0, %v2117_v46  ;;  %6362 = vmatmul.msk.f32.gmra.mxu1 %vm477_vm0, %v8968_v56  ;;  %v3758_v44 = vsub.f32 %v8732_v39, %v3508_v12 }
 0x37d   : > { %v8973_v59 = vpop.eup %6967  ;;  %v3891_v30 = vmul.f32 1.442695, %v3758_v44  ;;  %v9015_v44 = vpop.f32.mrf.mxu2  ;;  %6487 = vmatmul.msk.f32.gmra.mxu2 %vm477_vm0, %v8920_v8 }
 0x37e   : > { %v8977_v51 = vpop.f32.mrf.mxu3  ;;  %4421 = vmatmul.f32.gmra.mxu0 %v8973_v59  ;;  %12101 = vst [vmem:[#allocation90_spill] sm:$0xff] %v9015_v44 }
 0x37f   : > { %12096 = vst [vmem:[#allocation85_spill] sm:$0xff] %v8977_v51  ;;  %6969 = vpow2.f32 %v3891_v30 }
 0x380   : > { %v8980_v50 = vpop.f32.mrf.mxu1 }
 0x382   : > { %v3510_v25 = vpop.xlane.xlu0 %3509 }
 0x383   : > { %6628 = vmatmul.msk.f32.gmra.mxu3 %vm477_vm0, %v2118_v10  ;;  %6363 = vmatmul.msk.f32.gmra.mxu1 %vm477_vm0, %v8984_v14  ;;  %v3759_v48 = vsub.f32 %v8740_v45, %v3510_v25  ;;  %v9021_v10 = vld [vmem:[%s7663_s23 + $0x270] sm:$0xff] }
 0x385   : > { %v8989_v39 = vpop.eup %6969  ;;  %v3893_v42 = vmul.f32 1.442695, %v3759_v48  ;;  %v1000_v48 = vadd.f32 %v9008_v33, %v7798_v61 }
 0x386   : > { %12097 = vst [vmem:[#allocation86_spill] sm:$0xff] %v8989_v39  ;;  %v8993_v31 = vpop.f32.mrf.mxu3  ;;  %4424 = vmatmul.f32.gmra.mxu0 %v8989_v39  ;;  %v12211_v39 = vld [vmem:[#allocation30_spill] sm:$0xff] }
 0x387   : > { %12098 = vst [vmem:[#allocation87_spill] sm:$0xff] %v8993_v31  ;;  %6971 = vpow2.f32 %v3893_v42  ;;  %v9033_v42 = vpop.f32.mrf.mxu2  ;;  %6488 = vmatmul.msk.f32.gmra.mxu2 %vm477_vm0, %v8936_v41  ;;  %v1003_v41 = vadd.f32 %v9008_v33, %v7806_v1  ;;  %v12215_v31 = vld [vmem:[#allocation34_spill] sm:$0xff] }
 0x388   : > { %v1471_v11 = vpop.f32.mrf.mxu1  ;;  %12104 = vst [vmem:[#allocation93_spill] sm:$0xff] %v9033_v42 }
 0x389   : > { %v1472_v1 = vadd.f32 %v8874_v3, %v1471_v11  ;;  %v1469_v11 = vadd.f32 %v8874_v3, %v8980_v50  ;;  %v9090_v50 = vld [vmem:[%s7663_s23 + $0x288] sm:$0xff] }
 0x38a   : > { %v3512_v40 = vpop.xlane.xlu1 %3511 }
 0x38b   : > { %6629 = vmatmul.msk.f32.gmra.mxu3 %vm477_vm0, %v2119_v49  ;;  %6364 = vmatmul.msk.f32.gmra.mxu1 %vm477_vm0, %v8998_v20  ;;  %v3760_v45 = vsub.f32 %v8753_v47, %v3512_v40  ;;  %v2121_v40 = vmul.f32 0.17677669, %v1000_v48 }
 0x38d   : > { %v9003_v53 = vpop.eup %6971  ;;  %v3895_v46 = vmul.f32 1.442695, %v3760_v45 }
 0x38e   : > { %12099 = vst [vmem:[#allocation88_spill] sm:$0xff] %v9003_v53  ;;  %v9012_v12 = vpop.f32.mrf.mxu3  ;;  %4427 = vmatmul.f32.gmra.mxu0 %v9003_v53 }
 0x38f   : > { %12100 = vst [vmem:[#allocation89_spill] sm:$0xff] %v9012_v12  ;;  %6973 = vpow2.f32 %v3895_v46  ;;  %v9054_v48 = vpop.f32.mrf.mxu2  ;;  %6489 = vmatmul.msk.f32.gmra.mxu2 %vm477_vm0, %v8952_v38 }
 0x390   : > { %v1474_v47 = vpop.f32.mrf.mxu1  ;;  %12107 = vst [vmem:[#allocation96_spill] sm:$0xff] %v9054_v48 }
 0x392   : > { %v3514_v30 = vpop.xlane.xlu2 %3513 }
 0x393   : > { %6630 = vmatmul.msk.f32.gmra.mxu3 %vm477_vm0, %v2120_v43  ;;  %6365 = vmatmul.msk.f32.gmra.mxu1 %vm477_vm0, %v9021_v10  ;;  %v3761_v57 = vsub.f32 %v8772_v63, %v3514_v30  ;;  %v1475_v30 = vadd.f32 %v8874_v3, %v1474_v47  ;;  %v9064_v47 = vld [vmem:[%s7663_s23 + $0x280] sm:$0xff] }
 0x395   : > { %v9026_v25 = vpop.eup %6973  ;;  %v3897_v8 = vmul.f32 1.442695, %v3761_v57 }
 0x396   : > { %12102 = vst [vmem:[#allocation91_spill] sm:$0xff] %v9026_v25  ;;  %v9030_v36 = vpop.f32.mrf.mxu3  ;;  %4430 = vmatmul.f32.gmra.mxu0 %v9026_v25 }
 0x397   : > { %12103 = vst [vmem:[#allocation92_spill] sm:$0xff] %v9030_v36  ;;  %6975 = vpow2.f32 %v3897_v8  ;;  %v2122_v8 = vmul.f32 0.17677669, %v1003_v41  ;;  %v9079_v41 = vpop.f32.mrf.mxu2  ;;  %6490 = vmatmul.msk.f32.gmra.mxu2 %vm477_vm0, %v8968_v56 }
 0x398   : > { %v1477_v49 = vpop.f32.mrf.mxu1  ;;  %12110 = vst [vmem:[#allocation99_spill] sm:$0xff] %v9079_v41 }
 0x399   : > { %v1478_v63 = vadd.f32 %v8874_v3, %v1477_v49 }
 0x39a   : > { %v3516_v45 = vpop.xlane.xlu0 %3515 }
 0x39b   : > { %6631 = vmatmul.msk.f32.gmra.mxu3 %vm477_vm0, %v2121_v40  ;;  %6366 = vmatmul.msk.f32.gmra.mxu1 %vm477_vm0, %v9040_v9  ;;  %v3762_v61 = vsub.f32 %v8795_v34, %v3516_v45 }
 0x39c   : > { %6639 = vmatpush.xpose.msk.msra.mxu3 %vm477_vm0, %v1478_v63  ;;  %v1006_v63 = vadd.f32 %v9008_v33, %v7814_v7  ;;  %v1466_v7 = vadd.f32 %v8874_v3, %v8964_v54  ;;  %v1463_v54 = vadd.f32 %v8874_v3, %v8948_v16  ;;  %v9116_v16 = vld [vmem:[%s7663_s23 + $0x290] sm:$0xff] }
 0x39d   : > { %v9046_v46 = vpop.eup %6975  ;;  %v3899_v43 = vmul.f32 1.442695, %v3762_v61 }
 0x39e   : > { %12105 = vst [vmem:[#allocation94_spill] sm:$0xff] %v9046_v46  ;;  %v9051_v57 = vpop.f32.mrf.mxu3  ;;  %4433 = vmatmul.f32.gmra.mxu0 %v9046_v46 }
 0x39f   : > { %12106 = vst [vmem:[#allocation95_spill] sm:$0xff] %v9051_v57  ;;  %6977 = vpow2.f32 %v3899_v43  ;;  %v2123_v43 = vmul.f32 0.17677669, %v1006_v63  ;;  %v9105_v63 = vpop.f32.mrf.mxu2  ;;  %6491 = vmatmul.msk.f32.gmra.mxu2 %vm477_vm0, %v8984_v14 }
 0x3a0   : > { %6640 = vmatpush.xpose.msk.msra.mxu3 %vm477_vm0, %v1475_v30  ;;  %v9059_v34 = vpop.f32.mrf.mxu1  ;;  %12113 = vst [vmem:[#allocation102_spill] sm:$0xff] %v9105_v63 }
 0x3a2   : > { %v3518_v49 = vpop.xlane.xlu1 %3517 }
 0x3a3   : > { %6632 = vmatmul.msk.f32.gmra.mxu3 %vm477_vm0, %v2122_v8  ;;  %6367 = vmatmul.msk.f32.gmra.mxu1 %vm477_vm0, %v9064_v47  ;;  %v3763_v40 = vsub.f32 %v8817_v29, %v3518_v49 }
 0x3a4   : > { %6641 = vmatpush.xpose.msk.msra.mxu3 %vm477_vm0, %v1472_v1  ;;  %v1009_v1 = vadd.f32 %v9008_v33, %v7822_v15  ;;  %v1460_v15 = vadd.f32 %v8874_v3, %v8932_v13  ;;  %v1457_v13 = vadd.f32 %v8874_v3, %v8916_v62  ;;  %v9142_v62 = vld [vmem:[%s7663_s23 + $0x298] sm:$0xff] }
 0x3a5   : > { %v9070_v38 = vpop.eup %6977  ;;  %v3901_v45 = vmul.f32 1.442695, %v3763_v40 }
 0x3a6   : > { %12108 = vst [vmem:[#allocation97_spill] sm:$0xff] %v9070_v38  ;;  %v9076_v61 = vpop.f32.mrf.mxu3  ;;  %4436 = vmatmul.f32.gmra.mxu0 %v9070_v38 }
 0x3a7   : > { %12109 = vst [vmem:[#allocation98_spill] sm:$0xff] %v9076_v61  ;;  %6979 = vpow2.f32 %v3901_v45  ;;  %v2124_v45 = vmul.f32 0.17677669, %v1009_v1  ;;  %v9131_v1 = vpop.f32.mrf.mxu2  ;;  %6492 = vmatmul.msk.f32.gmra.mxu2 %vm477_vm0, %v8998_v20 }
 0x3a8   : > { %6642 = vmatpush.xpose.msk.msra.mxu3 %vm477_vm0, %v1469_v11  ;;  %v9084_v29 = vpop.f32.mrf.mxu1  ;;  %12116 = vst [vmem:[#allocation105_spill] sm:$0xff] %v9131_v1 }
 0x3aa   : > { %v3520_v30 = vpop.xlane.xlu2 %3519 }
 0x3ab   : > { %6633 = vmatmul.msk.f32.gmra.mxu3 %vm477_vm0, %v2123_v43  ;;  %6368 = vmatmul.msk.f32.gmra.mxu1 %vm477_vm0, %v9090_v50  ;;  %v3764_v8 = vsub.f32 %v8833_v22, %v3520_v30 }
 0x3ac   : > { %6643 = vmatpush.xpose.msk.msra.mxu3 %vm477_vm0, %v1466_v7  ;;  %v1012_v7 = vadd.f32 %v9008_v33, %v7830_v19  ;;  %v1454_v19 = vadd.f32 %v8874_v3, %v8905_v32  ;;  %v1451_v32 = vadd.f32 %v8874_v3, %v8890_v28  ;;  %v9168_v28 = vld [vmem:[%s7663_s23 + $0x2a0] sm:$0xff] }
 0x3ad   : > { %v9096_v56 = vpop.eup %6979  ;;  %v3903_v49 = vmul.f32 1.442695, %v3764_v8 }
 0x3ae   : > { %12111 = vst [vmem:[#allocation100_spill] sm:$0xff] %v9096_v56  ;;  %v9102_v40 = vpop.f32.mrf.mxu3  ;;  %4439 = vmatmul.f32.gmra.mxu0 %v9096_v56 }
 0x3af   : > { %12112 = vst [vmem:[#allocation101_spill] sm:$0xff] %v9102_v40  ;;  %6981 = vpow2.f32 %v3903_v49  ;;  %v2125_v49 = vmul.f32 0.17677669, %v1012_v7 }
 0x3b0   : > { %6644 = vmatpush.xpose.msk.msra.mxu3 %vm477_vm0, %v1463_v54  ;;  %v9110_v22 = vpop.f32.mrf.mxu1 }
 0x3b2   : > { %v3522_v11 = vpop.xlane.xlu0 %3521 }
 0x3b3   : > { %6634 = vmatmul.msk.f32.gmra.mxu3 %vm477_vm0, %v2124_v45  ;;  %6369 = vmatmul.msk.f32.gmra.mxu1 %vm477_vm0, %v9116_v16  ;;  %v3765_v43 = vsub.f32 %v8849_v60, %v3522_v11 }
 0x3b4   : > { %6645 = vmatpush.xpose.msk.msra.mxu3 %vm477_vm0, %v1460_v15  ;;  %v12118_v15 = vld [vmem:[#allocation13_spill] sm:$0xff] }
 0x3b5   : > { %v9122_v14 = vpop.eup %6981  ;;  %v3905_v30 = vmul.f32 1.442695, %v3765_v43  ;;  %v1015_v11 = vadd.f32 %v9008_v33, %v12118_v15 }
 0x3b6   : > { %12114 = vst [vmem:[#allocation103_spill] sm:$0xff] %v9122_v14  ;;  %v9128_v8 = vpop.f32.mrf.mxu3  ;;  %4442 = vmatmul.f32.gmra.mxu0 %v9122_v14 }
 0x3b7   : > { %12115 = vst [vmem:[#allocation104_spill] sm:$0xff] %v9128_v8  ;;  %6983 = vpow2.f32 %v3905_v30  ;;  %v9157_v30 = vpop.f32.mrf.mxu2  ;;  %6493 = vmatmul.msk.f32.gmra.mxu2 %vm477_vm0, %v9021_v10 }
 0x3b8   : > { %6646 = vmatpush.xpose.msk.msra.mxu3 %vm477_vm0, %v1457_v13  ;;  %v9136_v60 = vpop.f32.mrf.mxu1  ;;  %12120 = vst [vmem:[#allocation107_spill] sm:$0xff] %v9157_v30  ;;  %v2126_v13 = vmul.f32 0.17677669, %v1015_v11 }
 0x3ba   : > { %v3524_v54 = vpop.xlane.xlu1 %3523 }
 0x3bb   : > { %6635 = vmatmul.msk.f32.gmra.mxu3 %vm477_vm0, %v2125_v49  ;;  %6370 = vmatmul.msk.f32.gmra.mxu1 %vm477_vm0, %v9142_v62  ;;  %v3766_v45 = vsub.f32 %v8865_v37, %v3524_v54  ;;  %v1448_v49 = vadd.f32 %v8874_v3, %v8869_v18  ;;  %v1445_v18 = vadd.f32 %v8874_v3, %v8853_v35  ;;  %v9194_v35 = vld [vmem:[%s7663_s23 + $0x2a8] sm:$0xff] }
 0x3bc   : > { %6647 = vmatpush.xpose.msk.msra.mxu3 %vm477_vm0, %v1454_v19 }
 0x3bd   : > { %v9148_v20 = vpop.eup %6983  ;;  %v3907_v43 = vmul.f32 1.442695, %v3766_v45  ;;  %v12122_v45 = vld [vmem:[#allocation15_spill] sm:$0xff] }
 0x3be   : > { %12117 = vst [vmem:[#allocation106_spill] sm:$0xff] %v9148_v20  ;;  %v9154_v7 = vpop.f32.mrf.mxu3  ;;  %4445 = vmatmul.f32.gmra.mxu0 %v9148_v20  ;;  %v1018_v15 = vadd.f32 %v9008_v33, %v12122_v45  ;;  %v12126_v45 = vld [vmem:[#allocation17_spill] sm:$0xff] }
 0x3bf   : > { %12119 = vst [vmem:[#allocation13_spill] sm:$0xff] %v9154_v7  ;;  %6985 = vpow2.f32 %v3907_v43 }
 0x3c0   : > { %6648 = vmatpush.xpose.msk.msra.mxu3 %vm477_vm0, %v1451_v32  ;;  %v9162_v37 = vpop.f32.mrf.mxu1  ;;  %v9183_v32 = vpop.f32.mrf.mxu2  ;;  %6494 = vmatmul.msk.f32.gmra.mxu2 %vm477_vm0, %v9040_v9 }
 0x3c1   : > { %12124 = vst [vmem:[#allocation109_spill] sm:$0xff] %v9183_v32 }
 0x3c2   : > { %v3526_v19 = vpop.xlane.xlu2 %3525 }
 0x3c3   : > { %6636 = vmatmul.msk.f32.gmra.mxu3 %vm477_vm0, %v2126_v13  ;;  %6371 = vmatmul.msk.f32.gmra.mxu1 %vm477_vm0, %v9168_v28  ;;  %v3767_v54 = vsub.f32 %v8886_v52, %v3526_v19  ;;  %v2127_v13 = vmul.f32 0.17677669, %v1018_v15  ;;  %v1021_v15 = vadd.f32 %v9008_v33, %v12126_v45 }
 0x3c4   : > { %6649 = vmatpush.xpose.msk.msra.mxu3 %vm477_vm0, %v1448_v49  ;;  %v1442_v49 = vadd.f32 %v8874_v3, %v8837_v4  ;;  %v1439_v4 = vadd.f32 %v8874_v3, %v8821_v21  ;;  %v7522_v21 = vld [vmem:[%s7663_s23 + $0x2b0] sm:$0xff] }
 0x3c5   : > { %v9174_v10 = vpop.eup %6985  ;;  %v3909_v11 = vmul.f32 1.442695, %v3767_v54 }
 0x3c6   : > { %12121 = vst [vmem:[#allocation108_spill] sm:$0xff] %v9174_v10  ;;  %v9180_v43 = vpop.f32.mrf.mxu3  ;;  %4448 = vmatmul.f32.gmra.mxu0 %v9174_v10 }
 0x3c7   : > { %12123 = vst [vmem:[#allocation15_spill] sm:$0xff] %v9180_v43  ;;  %6987 = vpow2.f32 %v3909_v11 }
 0x3c8   : > { %6650 = vmatpush.xpose.msk.msra.mxu3 %vm477_vm0, %v1445_v18  ;;  %v9188_v52 = vpop.f32.mrf.mxu1 }
 0x3ca   : > { %v3528_v19 = vpop.xlane.xlu0 %3527 }
 0x3cb   : > { %6637 = vmatmul.msk.f32.gmra.mxu3 %vm477_vm0, %v2127_v13  ;;  %6372 = vmatmul.msk.f32.gmra.mxu1 %vm477_vm0, %v9194_v35  ;;  %v3768_v54 = vsub.f32 %v8901_v5, %v3528_v19  ;;  %v9209_v13 = vpop.f32.mrf.mxu2  ;;  %v1436_v19 = vadd.f32 %v8874_v3, %v8801_v24 }
 0x3cc   : > { %6651 = vmatpush.xpose.msk.msra.mxu3 %vm477_vm0, %v1442_v49  ;;  %12128 = vst [vmem:[#allocation111_spill] sm:$0xff] %v9209_v13  ;;  %6495 = vmatmul.msk.f32.gmra.mxu2 %vm477_vm0, %v9064_v47  ;;  %v2128_v49 = vmul.f32 0.17677669, %v1021_v15  ;;  %v12130_v47 = vld [vmem:[#allocation19_spill] sm:$0xff] }
 0x3cd   : > { %v9200_v9 = vpop.eup %6987  ;;  %v3911_v11 = vmul.f32 1.442695, %v3768_v54  ;;  %v1024_v45 = vadd.f32 %v9008_v33, %v12130_v47 }
 0x3ce   : > { %12125 = vst [vmem:[#allocation110_spill] sm:$0xff] %v9200_v9  ;;  %v9206_v18 = vpop.f32.mrf.mxu3  ;;  %4451 = vmatmul.f32.gmra.mxu0 %v9200_v9 }
 0x3cf   : > { %12127 = vst [vmem:[#allocation17_spill] sm:$0xff] %v9206_v18  ;;  %6989 = vpow2.f32 %v3911_v11  ;;  %v1433_v11 = vadd.f32 %v8874_v3, %v8778_v6  ;;  %v12133_v6 = vld [vmem:[#allocation21_spill] sm:$0xff]  ;;  %v12175_v18 = vld [vmem:[#allocation56_spill] sm:$0xff] }
 0x3d0   : > { %6652 = vmatpush.xpose.msk.msra.mxu3 %vm477_vm0, %v1439_v4  ;;  %v9214_v5 = vpop.f32.mrf.mxu1  ;;  %v1027_v47 = vadd.f32 %v9008_v33, %v12133_v6 }
 0x3d3   : > { %6638 = vmatmul.msk.f32.gmra.mxu3 %vm477_vm0, %v2128_v49  ;;  %6373 = vmatmul.msk.f32.gmra.mxu1 %vm477_vm0, %v7522_v21  ;;  %v9231_v24 = vpop.f32.mrf.mxu2  ;;  %v2129_v49 = vmul.f32 0.17677669, %v1024_v45  ;;  %v7524_v45 = vld [vmem:[%s7663_s23 + $0x2c0] sm:$0xff] }
 0x3d4   : > { %6653 = vmatpush.xpose.msk.msra.mxu3 %vm477_vm0, %v1436_v19  ;;  %12132 = vst [vmem:[#allocation113_spill] sm:$0xff] %v9231_v24  ;;  %6496 = vmatmul.msk.f32.gmra.mxu2 %vm477_vm0, %v9090_v50  ;;  %v7523_v19 = vld [vmem:[%s7663_s23 + $0x2b8] sm:$0xff] }
 0x3d5   : > { %v9222_v54 = vpop.eup %6989 }
 0x3d6   : > { %12129 = vst [vmem:[#allocation112_spill] sm:$0xff] %v9222_v54  ;;  %v9228_v15 = vpop.f32.mrf.mxu3  ;;  %4454 = vmatmul.f32.gmra.mxu0 %v9222_v54 }
 0x3d7   : > { %12131 = vst [vmem:[#allocation19_spill] sm:$0xff] %v9228_v15 }
 0x3d8   : > { %6654 = vmatpush.xpose.msk.msra.mxu3 %vm477_vm0, %v1433_v11  ;;  %v9236_v4 = vpop.f32.mrf.mxu1  ;;  %v2130_v11 = vmul.f32 0.17677669, %v1027_v47  ;;  %v7525_v47 = vld [vmem:[%s7663_s23 + $0x2c8] sm:$0xff] }
 0x3db   : > { %6655 = vmatmul.msk.f32.vlgmr.msra.gmra.mxu3 %vm477_vm0, %v2129_v49  ;;  %6374 = vmatmul.msk.f32.gmra.mxu1 %vm477_vm0, %v7523_v19  ;;  %v9245_v42 = vpop.f32.mrf.mxu2  ;;  %v12136_v49 = vld [vmem:[#allocation23_spill] sm:$0xff] }
 0x3dc   : > { %12135 = vst [vmem:[#allocation114_spill] sm:$0xff] %v9245_v42  ;;  %6497 = vmatmul.msk.f32.gmra.mxu2 %vm477_vm0, %v9116_v16  ;;  %v1030_v48 = vadd.f32 %v9008_v33, %v12136_v49 }
 0x3de   : > { %v9243_v44 = vpop.f32.mrf.mxu3  ;;  %v2131_v63 = vmul.f32 0.17677669, %v1030_v48  ;;  %v7526_v48 = vld [vmem:[%s7663_s23 + $0x2d0] sm:$0xff] }
 0x3df   : > { %12134 = vst [vmem:[#allocation21_spill] sm:$0xff] %v9243_v44 }
 0x3e0   : > { %v9249_v50 = vpop.f32.mrf.mxu1 }
 0x3e3   : > { %6656 = vmatmul.msk.f32.gmra.mxu3 %vm477_vm0, %v2130_v11  ;;  %6375 = vmatmul.msk.f32.gmra.mxu1 %vm477_vm0, %v7524_v45  ;;  %v9258_v41 = vpop.f32.mrf.mxu2  ;;  %v12139_v11 = vld [vmem:[#allocation25_spill] sm:$0xff] }
 0x3e4   : > { %12138 = vst [vmem:[#allocation115_spill] sm:$0xff] %v9258_v41  ;;  %6498 = vmatmul.msk.f32.gmra.mxu2 %vm477_vm0, %v9142_v62  ;;  %v1033_v1 = vadd.f32 %v9008_v33, %v12139_v11 }
 0x3e6   : > { %v9256_v6 = vpop.f32.mrf.mxu3  ;;  %v2132_v32 = vmul.f32 0.17677669, %v1033_v1  ;;  %v7527_v1 = vld [vmem:[%s7663_s23 + $0x2d8] sm:$0xff] }
 0x3e7   : > { %12137 = vst [vmem:[#allocation23_spill] sm:$0xff] %v9256_v6 }
 0x3e8   : > { %v9262_v16 = vpop.f32.mrf.mxu1 }
 0x3eb   : > { %6657 = vmatmul.msk.f32.gmra.mxu3 %vm477_vm0, %v2131_v63  ;;  %6376 = vmatmul.msk.f32.gmra.mxu1 %vm477_vm0, %v7525_v47  ;;  %v9271_v30 = vpop.f32.mrf.mxu2  ;;  %v12142_v63 = vld [vmem:[#allocation27_spill] sm:$0xff] }
 0x3ec   : > { %12141 = vst [vmem:[#allocation116_spill] sm:$0xff] %v9271_v30  ;;  %6499 = vmatmul.msk.f32.gmra.mxu2 %vm477_vm0, %v9168_v28  ;;  %v1036_v13 = vadd.f32 %v9008_v33, %v12142_v63 }
 0x3ee   : > { %v9269_v49 = vpop.f32.mrf.mxu3  ;;  %v2133_v42 = vmul.f32 0.17677669, %v1036_v13  ;;  %v7528_v13 = vld [vmem:[%s7663_s23 + $0x2e0] sm:$0xff] }
 0x3ef   : > { %12140 = vst [vmem:[#allocation25_spill] sm:$0xff] %v9269_v49 }
 0x3f0   : > { %v9275_v62 = vpop.f32.mrf.mxu1 }
 0x3f3   : > { %6658 = vmatmul.msk.f32.gmra.mxu3 %vm477_vm0, %v2132_v32  ;;  %6377 = vmatmul.msk.f32.gmra.mxu1 %vm477_vm0, %v7526_v48  ;;  %v9284_v24 = vpop.f32.mrf.mxu2  ;;  %v12145_v32 = vld [vmem:[#allocation29_spill] sm:$0xff] }
 0x3f4   : > { %12144 = vst [vmem:[#allocation117_spill] sm:$0xff] %v9284_v24  ;;  %6500 = vmatmul.msk.f32.gmra.mxu2 %vm477_vm0, %v9194_v35  ;;  %v1039_v41 = vadd.f32 %v9008_v33, %v12145_v32 }
 0x3f6   : > { %v9282_v11 = vpop.f32.mrf.mxu3  ;;  %v2134_v35 = vmul.f32 0.17677669, %v1039_v41  ;;  %v9312_v41 = vld [vmem:[%s7663_s23 + $0x2e8] sm:$0xff] }
 0x3f7   : > { %12143 = vst [vmem:[#allocation27_spill] sm:$0xff] %v9282_v11 }
 0x3f8   : > { %v9288_v28 = vpop.f32.mrf.mxu1 }
 0x3fb   : > { %6659 = vmatmul.msk.f32.gmra.mxu3 %vm477_vm0, %v2133_v42  ;;  %6378 = vmatmul.msk.f32.gmra.mxu1 %vm477_vm0, %v7527_v1  ;;  %v9297_v30 = vpop.f32.mrf.mxu2  ;;  %v12148_v42 = vld [vmem:[#allocation31_spill] sm:$0xff] }
 0x3fc   : > { %12147 = vst [vmem:[#allocation118_spill] sm:$0xff] %v9297_v30  ;;  %6501 = vmatmul.msk.f32.gmra.mxu2 %vm477_vm0, %v7522_v21  ;;  %v1042_v11 = vadd.f32 %v9008_v33, %v12148_v42  ;;  %v12151_v21 = vld [vmem:[#allocation33_spill] sm:$0xff] }
 0x3fe   : > { %v9295_v63 = vpop.f32.mrf.mxu3  ;;  %v2135_v30 = vmul.f32 0.17677669, %v1042_v11  ;;  %v12153_v11 = vld [vmem:[#allocation35_spill] sm:$0xff] }
 0x3ff   : > { %12146 = vst [vmem:[#allocation29_spill] sm:$0xff] %v9295_v63  ;;  %v1048_v54 = vadd.f32 %v9008_v33, %v12153_v11  ;;  %v12155_v11 = vld [vmem:[#allocation37_spill] sm:$0xff] }
 0x400   : > { %v1516_v24 = vpop.f32.mrf.mxu1 }
 0x403   : > { %6660 = vmatmul.msk.f32.gmra.mxu3 %vm477_vm0, %v2134_v35  ;;  %6379 = vmatmul.msk.f32.gmra.mxu1 %vm477_vm0, %v7528_v13  ;;  %v9307_v32 = vpop.f32.mrf.mxu2  ;;  %v1045_v35 = vadd.f32 %v9008_v33, %v12151_v21 }
 0x404   : > { %12150 = vst [vmem:[#allocation119_spill] sm:$0xff] %v9307_v32  ;;  %6502 = vmatmul.msk.f32.gmra.mxu2 %vm477_vm0, %v7523_v19 }
 0x405   : > { %v2136_v32 = vmul.f32 0.17677669, %v1045_v35 }
 0x406   : > { %v9305_v49 = vpop.f32.mrf.mxu3 }
 0x407   : > { %12149 = vst [vmem:[#allocation31_spill] sm:$0xff] %v9305_v49 }
 0x408   : > { %v1519_v63 = vpop.f32.mrf.mxu1 }
 0x409   : > { %v1520_v6 = vadd.f32 %v8874_v3, %v1519_v63 }
 0x40b   : > { %6661 = vmatmul.msk.f32.gmra.mxu3 %vm477_vm0, %v2135_v30  ;;  %6380 = vmatmul.msk.f32.gmra.mxu1 %vm477_vm0, %v9312_v41  ;;  %v9320_v49 = vpop.f32.mrf.mxu2  ;;  %v9325_v30 = vld [vmem:[%s7663_s23 + $0x2f0] sm:$0xff] }
 0x40c   : > { %6503 = vmatmul.msk.f32.gmra.mxu2 %vm477_vm0, %v7524_v45  ;;  %v2137_v45 = vmul.f32 0.17677669, %v1048_v54 }
 0x40e   : > { %v9318_v42 = vpop.f32.mrf.mxu3 }
 0x40f   : > { %12152 = vst [vmem:[#allocation33_spill] sm:$0xff] %v9318_v42 }
 0x410   : > { %v1522_v19 = vpop.f32.mrf.mxu1 }
 0x411   : > { %v1523_v44 = vadd.f32 %v8874_v3, %v1522_v19  ;;  %v12157_v19 = vld [vmem:[#allocation39_spill] sm:$0xff] }
 0x413   : > { %6662 = vmatmul.msk.f32.gmra.mxu3 %vm477_vm0, %v2136_v32  ;;  %6381 = vmatmul.msk.f32.gmra.mxu1 %vm477_vm0, %v9325_v30  ;;  %v9333_v42 = vpop.f32.mrf.mxu2  ;;  %v9339_v32 = vld [vmem:[%s7663_s23 + $0x2f8] sm:$0xff] }
 0x414   : > { %6504 = vmatmul.msk.f32.gmra.mxu2 %vm477_vm0, %v7525_v47 }
 0x416   : > { %v9331_v21 = vpop.f32.mrf.mxu3 }
 0x417   : > { %12154 = vst [vmem:[#allocation35_spill] sm:$0xff] %v9331_v21  ;;  %v1051_v21 = vadd.f32 %v9008_v33, %v12155_v11 }
 0x418   : > { %v1525_v9 = vpop.f32.mrf.mxu1 }
 0x419   : > { %v1526_v35 = vadd.f32 %v8874_v3, %v1525_v9 }
 0x41b   : > { %6663 = vmatmul.msk.f32.gmra.mxu3 %vm477_vm0, %v2137_v45  ;;  %6382 = vmatmul.msk.f32.gmra.mxu1 %vm477_vm0, %v9339_v32  ;;  %v9349_v54 = vpop.f32.mrf.mxu2  ;;  %v2138_v45 = vmul.f32 0.17677669, %v1051_v21 }
 0x41c   : > { %6671 = vmatpush.xpose.msk.msrb.mxu3 %vm477_vm0, %v1526_v35  ;;  %6505 = vmatmul.msk.f32.gmra.mxu2 %vm477_vm0, %v7526_v48  ;;  %v9358_v35 = vld [vmem:[%s7663_s23 + $0x300] sm:$0xff]  ;;  %v1054_v48 = vadd.f32 %v9008_v33, %v12157_v19  ;;  %v9378_v19 = vld [vmem:[%s7663_s23 + $0x308] sm:$0xff] }
 0x41e   : > { %v9347_v47 = vpop.f32.mrf.mxu3 }
 0x41f   : > { %12156 = vst [vmem:[#allocation37_spill] sm:$0xff] %v9347_v47 }
 0x420   : > { %6672 = vmatpush.xpose.msk.msrb.mxu3 %vm477_vm0, %v1523_v44  ;;  %v9353_v9 = vpop.f32.mrf.mxu1  ;;  %v1517_v44 = vadd.f32 %v8874_v3, %v1516_v24  ;;  %v12159_v24 = vld [vmem:[#allocation41_spill] sm:$0xff] }
 0x423   : > { %6664 = vmatmul.msk.f32.gmra.mxu3 %vm477_vm0, %v2138_v45  ;;  %6383 = vmatmul.msk.f32.gmra.mxu1 %vm477_vm0, %v9358_v35  ;;  %v9368_v21 = vpop.f32.mrf.mxu2  ;;  %v2139_v45 = vmul.f32 0.17677669, %v1054_v48 }
 0x424   : > { %6673 = vmatpush.xpose.msk.msrb.mxu3 %vm477_vm0, %v1520_v6  ;;  %6506 = vmatmul.msk.f32.gmra.mxu2 %vm477_vm0, %v7527_v1  ;;  %v1514_v6 = vadd.f32 %v8874_v3, %v9288_v28  ;;  %v1057_v1 = vadd.f32 %v9008_v33, %v12159_v24  ;;  %v9399_v24 = vld [vmem:[%s7663_s23 + $0x310] sm:$0xff] }
 0x426   : > { %v9366_v11 = vpop.f32.mrf.mxu3 }
 0x427   : > { %12158 = vst [vmem:[#allocation39_spill] sm:$0xff] %v9366_v11 }
 0x428   : > { %6674 = vmatpush.xpose.msk.msrb.mxu3 %vm477_vm0, %v1517_v44  ;;  %v9372_v63 = vpop.f32.mrf.mxu1  ;;  %v1511_v44 = vadd.f32 %v8874_v3, %v9275_v62  ;;  %v12161_v62 = vld [vmem:[#allocation43_spill] sm:$0xff] }
 0x42b   : > { %6665 = vmatmul.msk.f32.gmra.mxu3 %vm477_vm0, %v2139_v45  ;;  %6384 = vmatmul.msk.f32.gmra.mxu1 %vm477_vm0, %v9378_v19  ;;  %v9389_v47 = vpop.f32.mrf.mxu2  ;;  %v2140_v45 = vmul.f32 0.17677669, %v1057_v1 }
 0x42c   : > { %6675 = vmatpush.xpose.msk.msrb.mxu3 %vm477_vm0, %v1514_v6  ;;  %6507 = vmatmul.msk.f32.gmra.mxu2 %vm477_vm0, %v7528_v13  ;;  %v1508_v6 = vadd.f32 %v8874_v3, %v9262_v16  ;;  %v1060_v13 = vadd.f32 %v9008_v33, %v12161_v62  ;;  %v9421_v62 = vld [vmem:[%s7663_s23 + $0x318] sm:$0xff] }
 0x42e   : > { %v9387_v48 = vpop.f32.mrf.mxu3 }
 0x42f   : > { %12160 = vst [vmem:[#allocation41_spill] sm:$0xff] %v9387_v48 }
 0x430   : > { %6676 = vmatpush.xpose.msk.msrb.mxu3 %vm477_vm0, %v1511_v44  ;;  %v9393_v28 = vpop.f32.mrf.mxu1  ;;  %v1505_v44 = vadd.f32 %v8874_v3, %v9249_v50  ;;  %v12163_v50 = vld [vmem:[#allocation45_spill] sm:$0xff] }
 0x433   : > { %6666 = vmatmul.msk.f32.gmra.mxu3 %vm477_vm0, %v2140_v45  ;;  %6385 = vmatmul.msk.f32.gmra.mxu1 %vm477_vm0, %v9399_v24  ;;  %v9410_v48 = vpop.f32.mrf.mxu2  ;;  %v2141_v45 = vmul.f32 0.17677669, %v1060_v13 }
 0x434   : > { %6677 = vmatpush.xpose.msk.msrb.mxu3 %vm477_vm0, %v1508_v6  ;;  %6508 = vmatmul.msk.f32.gmra.mxu2 %vm477_vm0, %v9312_v41  ;;  %v1502_v6 = vadd.f32 %v8874_v3, %v9236_v4  ;;  %v1063_v41 = vadd.f32 %v9008_v33, %v12163_v50  ;;  %v7536_v50 = vld [vmem:[%s7663_s23 + $0x320] sm:$0xff] }
 0x436   : > { %v9408_v1 = vpop.f32.mrf.mxu3 }
 0x437   : > { %12162 = vst [vmem:[#allocation43_spill] sm:$0xff] %v9408_v1 }
 0x438   : > { %6678 = vmatpush.xpose.msk.msrb.mxu3 %vm477_vm0, %v1505_v44  ;;  %v9415_v16 = vpop.f32.mrf.mxu1  ;;  %v1499_v44 = vadd.f32 %v8874_v3, %v9214_v5  ;;  %v12165_v5 = vld [vmem:[#allocation47_spill] sm:$0xff] }
 0x43b   : > { %6667 = vmatmul.msk.f32.gmra.mxu3 %vm477_vm0, %v2141_v45  ;;  %6386 = vmatmul.msk.f32.gmra.mxu1 %vm477_vm0, %v9421_v62  ;;  %v9432_v1 = vpop.f32.mrf.mxu2  ;;  %v2142_v45 = vmul.f32 0.17677669, %v1063_v41 }
 0x43c   : > { %6679 = vmatpush.xpose.msk.msrb.mxu3 %vm477_vm0, %v1502_v6  ;;  %6509 = vmatmul.msk.f32.gmra.mxu2 %vm477_vm0, %v9325_v30  ;;  %v1496_v6 = vadd.f32 %v8874_v3, %v9188_v52  ;;  %v1493_v30 = vadd.f32 %v8874_v3, %v9162_v37  ;;  %v12167_v37 = vld [vmem:[#allocation49_spill] sm:$0xff] }
 0x43e   : > { %v9430_v13 = vpop.f32.mrf.mxu3 }
 0x43f   : > { %12164 = vst [vmem:[#allocation45_spill] sm:$0xff] %v9430_v13  ;;  %v1066_v13 = vadd.f32 %v9008_v33, %v12165_v5  ;;  %v7537_v5 = vld [vmem:[%s7663_s23 + $0x328] sm:$0xff] }
 0x440   : > { %6680 = vmatpush.xpose.msk.msrb.mxu3 %vm477_vm0, %v1499_v44  ;;  %v9437_v4 = vpop.f32.mrf.mxu1 }
 0x443   : > { %6668 = vmatmul.msk.f32.gmra.mxu3 %vm477_vm0, %v2142_v45  ;;  %6387 = vmatmul.msk.f32.gmra.mxu1 %vm477_vm0, %v7536_v50  ;;  %v9451_v41 = vpop.f32.mrf.mxu2  ;;  %v2143_v45 = vmul.f32 0.17677669, %v1066_v13 }
 0x444   : > { %6681 = vmatpush.xpose.msk.msrb.mxu3 %vm477_vm0, %v1496_v6  ;;  %6510 = vmatmul.msk.f32.gmra.mxu2 %vm477_vm0, %v9339_v32  ;;  %v1490_v6 = vadd.f32 %v8874_v3, %v9136_v60  ;;  %v1487_v32 = vadd.f32 %v8874_v3, %v9110_v22  ;;  %v12169_v22 = vld [vmem:[#allocation51_spill] sm:$0xff] }
 0x446   : > { %v9449_v44 = vpop.f32.mrf.mxu3 }
 0x447   : > { %12166 = vst [vmem:[#allocation47_spill] sm:$0xff] %v9449_v44  ;;  %v1069_v44 = vadd.f32 %v9008_v33, %v12167_v37  ;;  %v7538_v37 = vld [vmem:[%s7663_s23 + $0x330] sm:$0xff] }
 0x448   : > { %6682 = vmatpush.xpose.msk.msrb.mxu3 %vm477_vm0, %v1493_v30  ;;  %v9456_v52 = vpop.f32.mrf.mxu1 }
 0x44b   : > { %6669 = vmatmul.msk.f32.gmra.mxu3 %vm477_vm0, %v2143_v45  ;;  %6388 = vmatmul.msk.f32.gmra.mxu1 %vm477_vm0, %v7537_v5  ;;  %v9470_v13 = vpop.f32.mrf.mxu2  ;;  %v2144_v45 = vmul.f32 0.17677669, %v1069_v44 }
 0x44c   : > { %6683 = vmatpush.xpose.msk.msrb.mxu3 %vm477_vm0, %v1490_v6  ;;  %6511 = vmatmul.msk.f32.gmra.mxu2 %vm477_vm0, %v9358_v35  ;;  %v1484_v6 = vadd.f32 %v8874_v3, %v9084_v29  ;;  %v1481_v35 = vadd.f32 %v8874_v3, %v9059_v34 }
 0x44e   : > { %v9468_v30 = vpop.f32.mrf.mxu3 }
 0x44f   : > { %12168 = vst [vmem:[#allocation49_spill] sm:$0xff] %v9468_v30  ;;  %v1072_v30 = vadd.f32 %v9008_v33, %v12169_v22  ;;  %v12171_v22 = vld [vmem:[#allocation53_spill] sm:$0xff] }
 0x450   : > { %6684 = vmatpush.xpose.msk.msrb.mxu3 %vm477_vm0, %v1487_v32  ;;  %v9475_v60 = vpop.f32.mrf.mxu1  ;;  %v1075_v34 = vadd.f32 %v9008_v33, %v12171_v22 }
 0x453   : > { %6670 = vmatmul.msk.f32.gmra.mxu3 %vm477_vm0, %v2144_v45  ;;  %6389 = vmatmul.msk.f32.gmra.mxu1 %vm477_vm0, %v7538_v37  ;;  %v9489_v44 = vpop.f32.mrf.mxu2  ;;  %v2145_v45 = vmul.f32 0.17677669, %v1072_v30  ;;  %v9511_v30 = vld [vmem:[%s7663_s23 + $0x340] sm:$0xff] }
 0x454   : > { %6685 = vmatpush.xpose.msk.msrb.mxu3 %vm477_vm0, %v1484_v6  ;;  %6512 = vmatmul.msk.f32.gmra.mxu2 %vm477_vm0, %v9378_v19  ;;  %v7539_v6 = vld [vmem:[%s7663_s23 + $0x338] sm:$0xff] }
 0x456   : > { %v9487_v32 = vpop.f32.mrf.mxu3 }
 0x457   : > { %12170 = vst [vmem:[#allocation51_spill] sm:$0xff] %v9487_v32 }
 0x458   : > { %6686 = vmatpush.xpose.msk.msrb.mxu3 %vm477_vm0, %v1481_v35  ;;  %v9494_v29 = vpop.f32.mrf.mxu1  ;;  %v2146_v35 = vmul.f32 0.17677669, %v1075_v34 }
 0x45b   : > { %6687 = vmatmul.msk.f32.vlgmr.msrb.gmra.mxu3 %vm477_vm0, %v2145_v45  ;;  %6390 = vmatmul.msk.f32.gmra.mxu1 %vm477_vm0, %v7539_v6  ;;  %v9503_v11 = vpop.f32.mrf.mxu2  ;;  %v12173_v45 = vld [vmem:[#allocation55_spill] sm:$0xff] }
 0x45c   : > { %6513 = vmatmul.msk.f32.gmra.mxu2 %vm477_vm0, %v9399_v24  ;;  %v1078_v22 = vadd.f32 %v9008_v33, %v12173_v45  ;;  %v1081_v45 = vadd.f32 %v9008_v33, %v12175_v18 }
 0x45e   : > { %v9501_v32 = vpop.f32.mrf.mxu3  ;;  %v2147_v34 = vmul.f32 0.17677669, %v1078_v22  ;;  %v2148_v14 = vmul.f32 0.17677669, %v1081_v45  ;;  %v9538_v22 = vld [vmem:[%s7663_s23 + $0x350] sm:$0xff]  ;;  %v12179_v45 = vld [vmem:[#allocation3_spill] sm:$0xff] }
 0x45f   : > { %12172 = vst [vmem:[#allocation53_spill] sm:$0xff] %v9501_v32  ;;  %v1087_v40 = vadd.f32 %v9008_v33, %v12179_v45 }
 0x460   : > { %v9507_v19 = vpop.f32.mrf.mxu1 }
 0x463   : > { %6688 = vmatmul.msk.f32.gmra.mxu3 %vm477_vm0, %v2146_v35  ;;  %6391 = vmatmul.msk.f32.gmra.mxu1 %vm477_vm0, %v9511_v30  ;;  %v1922_v43 = vpop.f32.mrf.mxu2  ;;  %v9525_v35 = vld [vmem:[%s7663_s23 + $0x348] sm:$0xff] }
 0x464   : > { %6514 = vmatmul.msk.f32.gmra.mxu2 %vm477_vm0, %v9421_v62 }
 0x466   : > { %v9517_v32 = vpop.f32.mrf.mxu3 }
 0x467   : > { %12174 = vst [vmem:[#allocation55_spill] sm:$0xff] %v9517_v32 }
 0x468   : > { %v9521_v24 = vpop.f32.mrf.mxu1 }
 0x46b   : > { %6689 = vmatmul.msk.f32.gmra.mxu3 %vm477_vm0, %v2147_v34  ;;  %6392 = vmatmul.msk.f32.gmra.mxu1 %vm477_vm0, %v9525_v35  ;;  %v1925_v32 = vpop.f32.mrf.mxu2  ;;  %v12177_v34 = vld [vmem:[#allocation2_spill] sm:$0xff] }
 0x46c   : > { %6515 = vmatmul.msk.f32.gmra.mxu2 %vm477_vm0, %v7536_v50  ;;  %v1084_v20 = vadd.f32 %v9008_v33, %v12177_v34 }
 0x46e   : > { %v9531_v15 = vpop.f32.mrf.mxu3  ;;  %v2149_v10 = vmul.f32 0.17677669, %v1084_v20  ;;  %v9564_v20 = vld [vmem:[%s7663_s23 + $0x360] sm:$0xff] }
 0x46f   : > { %12176 = vst [vmem:[#allocation56_spill] sm:$0xff] %v9531_v15 }
 0x470   : > { %v9534_v62 = vpop.f32.mrf.mxu1 }
 0x473   : > { %6690 = vmatmul.msk.f32.gmra.mxu3 %vm477_vm0, %v2148_v14  ;;  %6393 = vmatmul.msk.f32.gmra.mxu1 %vm477_vm0, %v9538_v22  ;;  %v1928_v15 = vpop.f32.mrf.mxu2  ;;  %v9551_v14 = vld [vmem:[%s7663_s23 + $0x358] sm:$0xff] }
 0x474   : > { %6516 = vmatmul.msk.f32.gmra.mxu2 %vm477_vm0, %v7537_v5  ;;  %v2150_v5 = vmul.f32 0.17677669, %v1087_v40 }
 0x476   : > { %v9544_v18 = vpop.f32.mrf.mxu3 }
 0x477   : > { %12178 = vst [vmem:[#allocation2_spill] sm:$0xff] %v9544_v18 }
 0x478   : > { %v9547_v50 = vpop.f32.mrf.mxu1 }
 0x47b   : > { %6691 = vmatmul.msk.f32.gmra.mxu3 %vm477_vm0, %v2149_v10  ;;  %6394 = vmatmul.msk.f32.gmra.mxu1 %vm477_vm0, %v9551_v14  ;;  %v1931_v8 = vpop.f32.mrf.mxu2  ;;  %v12181_v10 = vld [vmem:[#allocation4_spill] sm:$0xff] }
 0x47c   : > { %6517 = vmatmul.msk.f32.gmra.mxu2 %vm477_vm0, %v7538_v37  ;;  %v1090_v7 = vadd.f32 %v9008_v33, %v12181_v10  ;;  %v9576_v37 = vld [vmem:[%s11905_s6] ss:$0 sm:$0xff]  ;;  %v9582_v10 = vld [vmem:[%s7663_s23 + $0x368] sm:$0xff] }
 0x47d   : > { %v1932_v38 = vadd.f32 %v9576_v37, %v1931_v8  ;;  %v1923_v8 = vadd.f32 %v9576_v37, %v1922_v43  ;;  %v1920_v36 = vadd.f32 %v9576_v37, %v9503_v11  ;;  %v12185_v43 = vld [vmem:[#allocation6_spill] sm:$0xff] }
 0x47e   : > { %v9557_v34 = vpop.f32.mrf.mxu3  ;;  %v2151_v46 = vmul.f32 0.17677669, %v1090_v7 }
 0x47f   : > { %12180 = vst [vmem:[#allocation3_spill] sm:$0xff] %v9557_v34 }
 0x480   : > { %v9560_v18 = vpop.f32.mrf.mxu1 }
 0x483   : > { %6692 = vmatmul.msk.f32.gmra.mxu3 %vm477_vm0, %v2150_v5  ;;  %6395 = vmatmul.msk.f32.gmra.mxu1 %vm477_vm0, %v9564_v20  ;;  %v1934_v34 = vpop.f32.mrf.mxu2 }
 0x484   : > { %6518 = vmatmul.msk.f32.gmra.mxu2 %vm477_vm0, %v7539_v6  ;;  %v1935_v40 = vadd.f32 %v9576_v37, %v1934_v34  ;;  %v1929_v6 = vadd.f32 %v9576_v37, %v1928_v15  ;;  %v1926_v34 = vadd.f32 %v9576_v37, %v1925_v32  ;;  %v1917_v15 = vadd.f32 %v9576_v37, %v9489_v44 }
 0x485   : > { %v1096_v32 = vadd.f32 %v9008_v33, %v12185_v43  ;;  %v1905_v44 = vadd.f32 %v9576_v37, %v9410_v48  ;;  %v12187_v48 = vld [vmem:[#allocation7_spill] sm:$0xff]  ;;  %v1899_v43 = vadd.f32 %v9576_v37, %v9368_v21  ;;  %v1890_v21 = vadd.f32 %v9576_v37, %v9320_v49 }
 0x486   : > { %v9570_v45 = vpop.f32.mrf.mxu3  ;;  %4653 = vmatpush.msra.mxu0 %v1935_v40 }
 0x487   : > { %12182 = vst [vmem:[#allocation4_spill] sm:$0xff] %v9570_v45  ;;  %v12183_v45 = vld [vmem:[#allocation5_spill] sm:$0xff] }
 0x488   : > { %v1567_v5 = vpop.f32.mrf.mxu1  ;;  %4654 = vmatpush.msra.mxu0 %v1932_v38  ;;  %v1093_v56 = vadd.f32 %v9008_v33, %v12183_v45  ;;  %v9597_v38 = vld [vmem:[%s7663_s23 + $0x370] sm:$0xff]  ;;  %v1911_v45 = vadd.f32 %v9576_v37, %v9451_v41  ;;  %v9625_v41 = vld [vmem:[%s11903_s4] ss:$0 sm:$0xff] }
 0x48a   : > { %4655 = vmatpush.msra.mxu0 %v1929_v6  ;;  %v2152_v40 = vmul.f32 0.17677669, %v1093_v56  ;;  %v1914_v56 = vadd.f32 %v9576_v37, %v9470_v13  ;;  %v9618_v13 = vld [vmem:[%s7663_s23 + $0x378] sm:$0xff] }
 0x48b   : > { %6693 = vmatmul.msk.f32.gmra.mxu3 %vm477_vm0, %v2151_v46  ;;  %6396 = vmatmul.msk.f32.gmra.mxu1 %vm477_vm0, %v9582_v10 }
 0x48c   : > { %4656 = vmatpush.msra.mxu0 %v1926_v34  ;;  %v1908_v34 = vadd.f32 %v9576_v37, %v9432_v1 }
 0x48e   : > { %v9590_v7 = vpop.f32.mrf.mxu3  ;;  %4657 = vmatpush.msra.mxu0 %v1923_v8  ;;  %v2153_v8 = vmul.f32 0.17677669, %v1096_v32  ;;  %v1568_v32 = vadd.f32 %v9625_v41, %v1567_v5  ;;  %v12189_v5 = vld [vmem:[#allocation8_spill] sm:$0xff] }
 0x48f   : > { %12184 = vst [vmem:[#allocation5_spill] sm:$0xff] %v9590_v7 }
 0x490   : > { %v1570_v46 = vpop.f32.mrf.mxu1  ;;  %4658 = vmatpush.msra.mxu0 %v1920_v36 }
 0x491   : > { %v1571_v1 = vadd.f32 %v9625_v41, %v1570_v46  ;;  %v1896_v46 = vadd.f32 %v9576_v37, %v9349_v54  ;;  %v1565_v54 = vadd.f32 %v9625_v41, %v9560_v18  ;;  %v1562_v18 = vadd.f32 %v9625_v41, %v9547_v50  ;;  %v12191_v50 = vld [vmem:[#allocation9_spill] sm:$0xff] }
 0x492   : > { %4659 = vmatpush.msra.mxu0 %v1917_v15 }
 0x493   : > { %6694 = vmatmul.msk.f32.gmra.mxu3 %vm477_vm0, %v2152_v40  ;;  %6397 = vmatmul.msk.f32.gmra.mxu1 %vm477_vm0, %v9597_v38  ;;  %v1099_v40 = vadd.f32 %v9008_v33, %v12187_v48 }
 0x494   : > { %4660 = vmatpush.msra.mxu0 %v1914_v56 }
 0x496   : > { %v9607_v11 = vpop.f32.mrf.mxu3  ;;  %4661 = vmatpush.msra.mxu0 %v1911_v45  ;;  %v1893_v45 = vadd.f32 %v9576_v37, %v9333_v42  ;;  %v1102_v42 = vadd.f32 %v9008_v33, %v12189_v5  ;;  %v9715_v5 = vld [vmem:[%s7663_s23 + $0x398] sm:$0xff] }
 0x497   : > { %12186 = vst [vmem:[#allocation6_spill] sm:$0xff] %v9607_v11 }
 0x498   : > { %v1573_v6 = vpop.f32.mrf.mxu1  ;;  %4662 = vmatpush.msra.mxu0 %v1908_v34  ;;  %v9658_v34 = vpop.f32.mrf.mxu2  ;;  %6519 = vmatmul.msk.f32.gmra.mxu2 %vm477_vm0, %v9511_v30  ;;  %v1559_v30 = vadd.f32 %v9625_v41, %v9534_v62 }
 0x499   : > { %v1574_v36 = vadd.f32 %v8874_v3, %v1573_v6  ;;  %v1902_v3 = vadd.f32 %v9576_v37, %v9389_v47  ;;  %v2154_v47 = vmul.f32 0.17677669, %v1099_v40  ;;  %v9647_v6 = vld [vmem:[%s7663_s23 + $0x380] sm:$0xff]  ;;  %v1556_v40 = vadd.f32 %v9625_v41, %v9521_v24 }
 0x49a   : > { %4663 = vmatpush.msra.mxu0 %v1905_v44  ;;  %v9671_v44 = vld [vmem:[%s7663_s23 + $0x388] sm:$0xff] }
 0x49b   : > { %6695 = vmatmul.msk.f32.gmra.mxu3 %vm477_vm0, %v2153_v8  ;;  %6398 = vmatmul.msk.f32.gmra.mxu1 %vm477_vm0, %v9618_v13 }
 0x49c   : > { %6703 = vmatpush.xpose.msk.msra.mxu3 %vm477_vm0, %v1574_v36  ;;  %4664 = vmatpush.msra.mxu0 %v1902_v3  ;;  %v2155_v36 = vmul.f32 0.17677669, %v1102_v42  ;;  %v12195_v42 = vld [vmem:[#allocation11_spill] sm:$0xff] }
 0x49e   : > { %v9633_v15 = vpop.f32.mrf.mxu3  ;;  %4665 = vmatpush.msra.mxu0 %v1899_v43 }
 0x49f   : > { %12188 = vst [vmem:[#allocation7_spill] sm:$0xff] %v9633_v15 }
 0x4a0   : > { %6704 = vmatpush.xpose.msk.msra.mxu3 %vm477_vm0, %v1571_v1  ;;  %v9641_v56 = vpop.f32.mrf.mxu1  ;;  %4666 = vmatpush.msra.mxu0 %v1896_v46  ;;  %v1105_v1 = vadd.f32 %v9008_v33, %v12191_v50  ;;  %v9680_v3 = vpop.f32.mrf.mxu2  ;;  %v12193_v46 = vld [vmem:[#allocation10_spill] sm:$0xff] }
 0x4a1   : > { %6520 = vmatmul.msk.f32.gmra.mxu2 %vm477_vm0, %v9525_v35  ;;  %v1553_v35 = vadd.f32 %v9625_v41, %v9507_v19  ;;  %v1108_v24 = vadd.f32 %v9008_v33, %v12193_v46 }
 0x4a2   : > { %4667 = vmatpush.msra.mxu0 %v1893_v45  ;;  %v2156_v62 = vmul.f32 0.17677669, %v1105_v1  ;;  %v9737_v1 = vld [vmem:[%s7663_s23 + $0x3a0] sm:$0xff] }
 0x4a3   : > { %6696 = vmatmul.msk.f32.gmra.mxu3 %vm477_vm0, %v2154_v47  ;;  %6399 = vmatmul.msk.f32.gmra.mxu1 %vm477_vm0, %v9647_v6  ;;  %v2157_v19 = vmul.f32 0.17677669, %v1108_v24 }
 0x4a4   : > { %6705 = vmatpush.xpose.msk.msra.mxu3 %vm477_vm0, %v1568_v32  ;;  %4668 = vmatpush.msra.mxu0 %v1890_v21  ;;  %v9693_v32 = vld [vmem:[%s7663_s23 + $0x390] sm:$0xff] }
 0x4a6   : > { %v9662_v8 = vpop.f32.mrf.mxu3 }
 0x4a7   : > { %12190 = vst [vmem:[#allocation8_spill] sm:$0xff] %v9662_v8 }
 0x4a8   : > { %6706 = vmatpush.xpose.msk.msra.mxu3 %vm477_vm0, %v1565_v54  ;;  %v9667_v49 = vpop.f32.mrf.mxu1  ;;  %v9702_v47 = vpop.f32.mrf.mxu2  ;;  %v1550_v54 = vadd.f32 %v9625_v41, %v9494_v29  ;;  %v1111_v29 = vadd.f32 %v9008_v33, %v12195_v42 }
 0x4a9   : > { %6521 = vmatmul.msk.f32.gmra.mxu2 %vm477_vm0, %v9538_v22  ;;  %v1547_v22 = vadd.f32 %v9625_v41, %v9475_v60 }
 0x4aa   : > { %v2158_v60 = vmul.f32 0.17677669, %v1111_v29 }
 0x4ab   : > { %6697 = vmatmul.msk.f32.gmra.mxu3 %vm477_vm0, %v2155_v36  ;;  %6400 = vmatmul.msk.f32.gmra.mxu1 %vm477_vm0, %v9671_v44 }
 0x4ac   : > { %6707 = vmatpush.xpose.msk.msra.mxu3 %vm477_vm0, %v1562_v18 }
 0x4ae   : > { %v9684_v48 = vpop.f32.mrf.mxu3 }
 0x4af   : > { %12192 = vst [vmem:[#allocation9_spill] sm:$0xff] %v9684_v48 }
 0x4b0   : > { %6708 = vmatpush.xpose.msk.msra.mxu3 %vm477_vm0, %v1559_v30  ;;  %v9689_v43 = vpop.f32.mrf.mxu1  ;;  %v9724_v18 = vpop.f32.mrf.mxu2  ;;  %v1544_v30 = vadd.f32 %v9625_v41, %v9456_v52  ;;  %v1541_v52 = vadd.f32 %v9625_v41, %v9437_v4  ;;  %v12199_v4 = vld [vmem:[#allocation14_spill] sm:$0xff] }
 0x4b1   : > { %6522 = vmatmul.msk.f32.gmra.mxu2 %vm477_vm0, %v9551_v14  ;;  %v12197_v14 = vld [vmem:[#allocation12_spill] sm:$0xff] }
 0x4b3   : > { %6698 = vmatmul.msk.f32.gmra.mxu3 %vm477_vm0, %v2156_v62  ;;  %6401 = vmatmul.msk.f32.gmra.mxu1 %vm477_vm0, %v9693_v32 }
 0x4b4   : > { %6709 = vmatpush.xpose.msk.msra.mxu3 %vm477_vm0, %v1556_v40  ;;  %v1114_v40 = vadd.f32 %v9008_v33, %v12197_v14  ;;  %v9781_v14 = vld [vmem:[%s7663_s23 + $0x3b0] sm:$0xff] }
 0x4b6   : > { %v9706_v45 = vpop.f32.mrf.mxu3  ;;  %v2159_v24 = vmul.f32 0.17677669, %v1114_v40  ;;  %v1529_v40 = vadd.f32 %v9625_v41, %v9353_v9  ;;  %v12203_v9 = vld [vmem:[#allocation18_spill] sm:$0xff] }
 0x4b7   : > { %12194 = vst [vmem:[#allocation10_spill] sm:$0xff] %v9706_v45 }
 0x4b8   : > { %6710 = vmatpush.xpose.msk.msra.mxu3 %vm477_vm0, %v1553_v35  ;;  %v9711_v21 = vpop.f32.mrf.mxu1  ;;  %v9744_v62 = vpop.f32.mrf.mxu2 }
 0x4b9   : > { %6523 = vmatmul.msk.f32.gmra.mxu2 %vm477_vm0, %v9564_v20  ;;  %v1117_v20 = vadd.f32 %v9008_v33, %v12199_v4  ;;  %v9801_v4 = vld [vmem:[%s7663_s23 + $0x3b8] sm:$0xff] }
 0x4bb   : > { %6699 = vmatmul.msk.f32.gmra.mxu3 %vm477_vm0, %v2157_v19  ;;  %6402 = vmatmul.msk.f32.gmra.mxu1 %vm477_vm0, %v9715_v5  ;;  %v9759_v19 = vld [vmem:[%s7663_s23 + $0x3a8] sm:$0xff] }
 0x4bc   : > { %6711 = vmatpush.xpose.msk.msra.mxu3 %vm477_vm0, %v1550_v54  ;;  %v1538_v54 = vadd.f32 %v9625_v41, %v9415_v16  ;;  %v1535_v16 = vadd.f32 %v9625_v41, %v9393_v28  ;;  %v12201_v28 = vld [vmem:[#allocation16_spill] sm:$0xff] }
 0x4be   : > { %v9728_v36 = vpop.f32.mrf.mxu3 }
 0x4bf   : > { %12196 = vst [vmem:[#allocation11_spill] sm:$0xff] %v9728_v36 }
 0x4c0   : > { %6712 = vmatpush.xpose.msk.msra.mxu3 %vm477_vm0, %v1547_v22  ;;  %v9733_v50 = vpop.f32.mrf.mxu1  ;;  %v9766_v22 = vpop.f32.mrf.mxu2 }
 0x4c1   : > { %6524 = vmatmul.msk.f32.gmra.mxu2 %vm477_vm0, %v9582_v10  ;;  %v1120_v10 = vadd.f32 %v9008_v33, %v12201_v28  ;;  %v9818_v28 = vld [vmem:[%s7663_s23 + $0x3c0] sm:$0xff] }
 0x4c3   : > { %6700 = vmatmul.msk.f32.gmra.mxu3 %vm477_vm0, %v2158_v60  ;;  %6403 = vmatmul.msk.f32.gmra.mxu1 %vm477_vm0, %v9737_v1  ;;  %v1532_v60 = vadd.f32 %v9625_v41, %v9372_v63 }
 0x4c4   : > { %6713 = vmatpush.xpose.msk.msra.mxu3 %vm477_vm0, %v1544_v30  ;;  %v2160_v30 = vmul.f32 0.17677669, %v1117_v20  ;;  %v1123_v20 = vadd.f32 %v9008_v33, %v12203_v9  ;;  %v9825_v33 = vld [vmem:[%s11901_s2] ss:$0 sm:$0xff] }
 0x4c6   : > { %v9750_v35 = vpop.f32.mrf.mxu3 }
 0x4c7   : > { %12198 = vst [vmem:[#allocation12_spill] sm:$0xff] %v9750_v35 }
 0x4c8   : > { %6714 = vmatpush.xpose.msk.msra.mxu3 %vm477_vm0, %v1541_v52  ;;  %v9753_v46 = vpop.f32.mrf.mxu1 }
 0x4cb   : > { %6701 = vmatmul.msk.f32.gmra.mxu3 %vm477_vm0, %v2159_v24  ;;  %6404 = vmatmul.msk.f32.gmra.mxu1 %vm477_vm0, %v9759_v19  ;;  %v9792_v24 = vpop.f32.mrf.mxu2 }
 0x4cc   : > { %6715 = vmatpush.xpose.msk.msra.mxu3 %vm477_vm0, %v1538_v54  ;;  %6525 = vmatmul.msk.f32.gmra.mxu2 %vm477_vm0, %v9597_v38  ;;  %v2161_v54 = vmul.f32 0.17677669, %v1120_v10  ;;  %v12204_v10 = vld [vmem:[#allocation20_spill] sm:$0xff] }
 0x4ce   : > { %v9772_v42 = vpop.f32.mrf.mxu3 }
 0x4cf   : > { %12200 = vst [vmem:[#allocation14_spill] sm:$0xff] %v9772_v42 }
 0x4d0   : > { %6716 = vmatpush.xpose.msk.msra.mxu3 %vm477_vm0, %v1535_v16  ;;  %v9775_v29 = vpop.f32.mrf.mxu1 }
 0x4d3   : > { %6702 = vmatmul.msk.f32.gmra.mxu3 %vm477_vm0, %v2160_v30  ;;  %6405 = vmatmul.msk.f32.gmra.mxu1 %vm477_vm0, %v9781_v14  ;;  %v9809_v30 = vpop.f32.mrf.mxu2 }
 0x4d4   : > { %6717 = vmatpush.xpose.msk.msra.mxu3 %vm477_vm0, %v1532_v60  ;;  %6526 = vmatmul.msk.f32.gmra.mxu2 %vm477_vm0, %v9618_v13  ;;  %v2162_v60 = vmul.f32 0.17677669, %v1123_v20  ;;  %v1126_v13 = vadd.f32 %v9825_v33, %v12204_v10  ;;  %v12205_v10 = vld [vmem:[#allocation22_spill] sm:$0xff] }
 0x4d5   : > { %v1129_v35 = vadd.f32 %v9825_v33, %v12205_v10  ;;  %v12206_v10 = vld [vmem:[#allocation24_spill] sm:$0xff] }
 0x4d6   : > { %v9790_v52 = vpop.f32.mrf.mxu3  ;;  %v2163_v20 = vmul.f32 0.17677669, %v1126_v13  ;;  %v1132_v48 = vadd.f32 %v9825_v33, %v12206_v10  ;;  %v12207_v10 = vld [vmem:[#allocation26_spill] sm:$0xff] }
 0x4d7   : > { %12202 = vst [vmem:[#allocation16_spill] sm:$0xff] %v9790_v52  ;;  %v2164_v13 = vmul.f32 0.17677669, %v1129_v35  ;;  %v1135_v11 = vadd.f32 %v9825_v33, %v12207_v10  ;;  %v12209_v10 = vld [vmem:[#allocation28_spill] sm:$0xff] }
 0x4d8   : > { %6718 = vmatpush.xpose.msk.msra.mxu3 %vm477_vm0, %v1529_v40  ;;  %v9797_v63 = vpop.f32.mrf.mxu1  ;;  %v2165_v35 = vmul.f32 0.17677669, %v1132_v48  ;;  %v1138_v7 = vadd.f32 %v9825_v33, %v12209_v10  ;;  %v1141_v10 = vadd.f32 %v9825_v33, %v12211_v39 }
 0x4db   : > { %6719 = vmatmul.msk.f32.vlgmr.msra.gmra.mxu3 %vm477_vm0, %v2161_v54  ;;  %6406 = vmatmul.msk.f32.gmra.mxu1 %vm477_vm0, %v9801_v4  ;;  %v9831_v54 = vpop.f32.mrf.mxu2 }
 0x4dc   : > { %6527 = vmatmul.msk.f32.gmra.mxu2 %vm477_vm0, %v9647_v6 }
 0x4de   : > { %v9807_v16 = vpop.f32.mrf.mxu3 }
 0x4df   : > { %3625 = vmax.xlane.f32.xlu1 %v9807_v16 }
 0x4e0   : > { %v9814_v38 = vpop.f32.mrf.mxu1 }
 0x4e3   : > { %6720 = vmatmul.msk.f32.gmra.mxu3 %vm477_vm0, %v2162_v60  ;;  %6407 = vmatmul.msk.f32.gmra.mxu1 %vm477_vm0, %v9818_v28  ;;  %v9840_v60 = vld [vmem:[%s7663_s23 + $0x3c8] sm:$0xff]  ;;  %v9848_v52 = vpop.f32.mrf.mxu2 }
 0x4e4   : > { %6528 = vmatmul.msk.f32.gmra.mxu2 %vm477_vm0, %v9671_v44 }
 0x4e6   : > { %v9829_v40 = vpop.f32.mrf.mxu3 }
 0x4e7   : > { %3627 = vmax.xlane.f32.xlu2 %v9829_v40 }
 0x4e8   : > { %v9836_v9 = vpop.f32.mrf.mxu1 }
 0x4eb   : > { %6721 = vmatmul.msk.f32.gmra.mxu3 %vm477_vm0, %v2163_v20  ;;  %6408 = vmatmul.msk.f32.gmra.mxu1 %vm477_vm0, %v9840_v60  ;;  %v9857_v20 = vld [vmem:[%s7663_s23 + $0x3d0] sm:$0xff]  ;;  %v9865_v36 = vpop.f32.mrf.mxu2 }
 0x4ec   : > { %6529 = vmatmul.msk.f32.gmra.mxu2 %vm477_vm0, %v9693_v32  ;;  %v2166_v32 = vmul.f32 0.17677669, %v1135_v11 }
 0x4ee   : > { %v9846_v42 = vpop.f32.mrf.mxu3 }
 0x4ef   : > { %3629 = vmax.xlane.f32.xlu0 %v9846_v42 }
 0x4f0   : > { %v9853_v6 = vpop.f32.mrf.mxu1 }
 0x4f3   : > { %6722 = vmatmul.msk.f32.gmra.mxu3 %vm477_vm0, %v2164_v13  ;;  %6409 = vmatmul.msk.f32.gmra.mxu1 %vm477_vm0, %v9857_v20  ;;  %v9874_v13 = vld [vmem:[%s7663_s23 + $0x3d8] sm:$0xff]  ;;  %v9882_v8 = vpop.f32.mrf.mxu2 }
 0x4f4   : > { %6530 = vmatmul.msk.f32.gmra.mxu2 %vm477_vm0, %v9715_v5  ;;  %v2167_v5 = vmul.f32 0.17677669, %v1138_v7 }
 0x4f6   : > { %v9863_v45 = vpop.f32.mrf.mxu3 }
 0x4f7   : > { %3631 = vmax.xlane.f32.xlu1 %v9863_v45 }
 0x4f8   : > { %v9870_v44 = vpop.f32.mrf.mxu1 }
 0x4fb   : > { %6723 = vmatmul.msk.f32.gmra.mxu3 %vm477_vm0, %v2165_v35  ;;  %6410 = vmatmul.msk.f32.gmra.mxu1 %vm477_vm0, %v9874_v13  ;;  %v9889_v35 = vld [vmem:[%s7663_s23 + $0x3e0] sm:$0xff]  ;;  %v1973_v61 = vpop.f32.mrf.mxu2 }
 0x4fc   : > { %6531 = vmatmul.msk.f32.gmra.mxu2 %vm477_vm0, %v9737_v1  ;;  %v2168_v1 = vmul.f32 0.17677669, %v1141_v10 }
 0x4fe   : > { %v9880_v15 = vpop.f32.mrf.mxu3 }
 0x4ff   : > { %12208 = vst [vmem:[#allocation18_spill] sm:$0xff] %v9880_v15  ;;  %3633 = vmax.xlane.f32.xlu2 %v9880_v15 }
 0x500   : > { %v1612_v48 = vpop.f32.mrf.mxu1 }
 0x503   : > { %6724 = vmatmul.msk.f32.gmra.mxu3 %vm477_vm0, %v2166_v32  ;;  %6411 = vmatmul.msk.f32.gmra.mxu1 %vm477_vm0, %v9889_v35  ;;  %v9902_v32 = vld [vmem:[%s7663_s23 + $0x3e8] sm:$0xff]  ;;  %v1976_v25 = vpop.f32.mrf.mxu2 }
 0x504   : > { %6532 = vmatmul.msk.f32.gmra.mxu2 %vm477_vm0, %v9759_v19 }
 0x506   : > { %v9895_v57 = vpop.f32.mrf.mxu3 }
 0x507   : > { %12210 = vst [vmem:[#allocation20_spill] sm:$0xff] %v9895_v57  ;;  %3635 = vmax.xlane.f32.xlu0 %v9895_v57  ;;  %v12213_v57 = vld [vmem:[#allocation32_spill] sm:$0xff] }
 0x508   : > { %v1615_v11 = vpop.f32.mrf.mxu1  ;;  %v1144_v39 = vadd.f32 %v9825_v33, %v12213_v57 }
 0x50a   : > { %v2169_v10 = vmul.f32 0.17677669, %v1144_v39 }
 0x50b   : > { %6725 = vmatmul.msk.f32.gmra.mxu3 %vm477_vm0, %v2167_v5  ;;  %6412 = vmatmul.msk.f32.gmra.mxu1 %vm477_vm0, %v9902_v32  ;;  %v9915_v5 = vld [vmem:[%s7663_s23 + $0x3f0] sm:$0xff]  ;;  %v1979_v51 = vpop.f32.mrf.mxu2 }
 0x50c   : > { %6533 = vmatmul.msk.f32.gmra.mxu2 %vm477_vm0, %v9781_v14  ;;  %v1147_v14 = vadd.f32 %v9825_v33, %v12215_v31  ;;  %v1977_v31 = vadd.f32 %v9576_v37, %v1976_v25  ;;  %v1610_v25 = vadd.f32 %v9625_v41, %v9870_v44  ;;  %v12218_v44 = vld [vmem:[#allocation38_spill] sm:$0xff] }
 0x50e   : > { %v9908_v53 = vpop.f32.mrf.mxu3 }
 0x50f   : > { %12212 = vst [vmem:[#allocation22_spill] sm:$0xff] %v9908_v53  ;;  %3637 = vmax.xlane.f32.xlu1 %v9908_v53  ;;  %v9929_v53 = vld [vmem:[%s7663_s23 + $0x3f8] sm:$0xff]  ;;  %s10781_s23 = scalar_lea.vmem %s11908_s9, %s6929_s20 }
 0x510   : > { %v1618_v7 = vpop.f32.mrf.mxu1 }
 0x511   : > { %v1619_v57 = vadd.f32 %v9625_v41, %v1618_v7 }
 0x513   : > { %6726 = vmatmul.msk.f32.gmra.mxu3 %vm477_vm0, %v2168_v1  ;;  %6413 = vmatmul.msk.f32.gmra.mxu1 %vm477_vm0, %v9915_v5 }
 0x516   : > { %v9921_v15 = vpop.f32.mrf.mxu3 }
 0x517   : > { %12214 = vst [vmem:[#allocation24_spill] sm:$0xff] %v9921_v15  ;;  %3639 = vmax.xlane.f32.xlu2 %v9921_v15  ;;  %v1982_v15 = vpop.f32.mrf.mxu2  ;;  %6534 = vmatmul.msk.f32.gmra.mxu2 %vm477_vm0, %v9801_v4  ;;  %v1613_v4 = vadd.f32 %v9625_v41, %v1612_v48 }
 0x518   : > { %v1621_v19 = vpop.f32.mrf.mxu1  ;;  %v1983_v39 = vadd.f32 %v9576_v37, %v1982_v15  ;;  %v12217_v15 = vld [vmem:[#allocation36_spill] sm:$0xff] }
 0x519   : > { %v1622_v1 = vadd.f32 %v9625_v41, %v1621_v19  ;;  %v1616_v19 = vadd.f32 %v9625_v41, %v1615_v11  ;;  %v1150_v11 = vadd.f32 %v9825_v33, %v12217_v15  ;;  %v12219_v15 = vld [vmem:[#allocation40_spill] sm:$0xff] }
 0x51a   : > { %4718 = vmatpush.msrb.mxu1 %v1983_v39  ;;  %v1968_v39 = vadd.f32 %v9576_v37, %v9865_v36 }
 0x51b   : > { %6727 = vmatmul.msk.f32.gmra.mxu3 %vm477_vm0, %v2169_v10  ;;  %6414 = vmatmul.msk.f32.gmra.mxu1 %vm477_vm0, %v9929_v53  ;;  %v2170_v10 = vmul.f32 0.17677669, %v1147_v14  ;;  %v2171_v48 = vmul.f32 0.17677669, %v1150_v11  ;;  %v1156_v11 = vadd.f32 %v9825_v33, %v12219_v15 }
 0x51c   : > { %6735 = vmatpush.xpose.msk.msrb.mxu3 %vm477_vm0, %v1622_v1  ;;  %v1980_v1 = vadd.f32 %v9576_v37, %v1979_v51  ;;  %v1971_v51 = vadd.f32 %v9576_v37, %v9882_v8  ;;  %v1607_v8 = vadd.f32 %v9625_v41, %v9853_v6  ;;  %v1604_v6 = vadd.f32 %v9625_v41, %v9836_v9 }
 0x51d   : > { %v1601_v9 = vadd.f32 %v9625_v41, %v9814_v38  ;;  %v1598_v38 = vadd.f32 %v9625_v41, %v9797_v63  ;;  %v12220_v63 = vld [vmem:[#allocation42_spill] sm:$0xff] }
 0x51e   : > { %v9937_v12 = vpop.f32.mrf.mxu3  ;;  %4719 = vmatpush.msrb.mxu1 %v1980_v1 }
 0x51f   : > { %3641 = vmax.xlane.f32.xlu0 %v9937_v12  ;;  %v9957_v14 = vpop.f32.mrf.mxu2  ;;  %6535 = vmatmul.msk.f32.gmra.mxu2 %vm477_vm0, %v9818_v28  ;;  %v1965_v28 = vadd.f32 %v9576_v37, %v9848_v52  ;;  %v1959_v52 = vadd.f32 %v9576_v37, %v9809_v30  ;;  %v1950_v30 = vadd.f32 %v9576_v37, %v9744_v62 }
 0x520   : > { %6736 = vmatpush.xpose.msk.msrb.mxu3 %vm477_vm0, %v1619_v57  ;;  %v9945_v7 = vpop.f32.mrf.mxu1  ;;  %v1974_v57 = vadd.f32 %v9576_v37, %v1973_v61  ;;  %4720 = vmatpush.msrb.mxu1 %v1977_v31  ;;  %v1944_v62 = vadd.f32 %v9576_v37, %v9702_v47  ;;  %v1595_v47 = vadd.f32 %v9625_v41, %v9775_v29 }
 0x521   : > { %12216 = vst [vmem:[#allocation26_spill] sm:$0xff] %v9945_v7 }
 0x522   : > { %4721 = vmatpush.msrb.mxu1 %v1974_v57 }
 0x523   : > { %6728 = vmatmul.msk.f32.gmra.mxu3 %vm477_vm0, %v2170_v10  ;;  %v1962_v10 = vadd.f32 %v9576_v37, %v9831_v54 }
 0x524   : > { %6737 = vmatpush.xpose.msk.msrb.mxu3 %vm477_vm0, %v1616_v19  ;;  %4722 = vmatpush.msrb.mxu1 %v1971_v51  ;;  %v1153_v19 = vadd.f32 %v9825_v33, %v12218_v44  ;;  %v2173_v51 = vmul.f32 0.17677669, %v1156_v11  ;;  %v12221_v44 = vld [vmem:[#allocation44_spill] sm:$0xff] }
 0x526   : > { %v9955_v7 = vpop.f32.mrf.mxu3  ;;  %4723 = vmatpush.msrb.mxu1 %v1968_v39  ;;  %v2172_v31 = vmul.f32 0.17677669, %v1153_v19  ;;  %v10033_v39 = vpop.f32.mrf.mxu0  ;;  %v1162_v19 = vadd.f32 %v9825_v33, %v12221_v44 }
 0x527   : > { %3643 = vmax.xlane.f32.xlu1 %v9955_v7  ;;  %v9983_v1 = vpop.f32.mrf.mxu2  ;;  %6536 = vmatmul.msk.f32.gmra.mxu2 %vm477_vm0, %v9840_v60  ;;  %v1956_v60 = vadd.f32 %v9576_v37, %v9792_v24 }
 0x528   : > { %6738 = vmatpush.xpose.msk.msrb.mxu3 %vm477_vm0, %v1613_v4  ;;  %v9967_v61 = vpop.f32.mrf.mxu1  ;;  %4724 = vmatpush.msrb.mxu1 %v1965_v28  ;;  %v1953_v4 = vadd.f32 %v9576_v37, %v9766_v22  ;;  %v1947_v22 = vadd.f32 %v9576_v37, %v9724_v18 }
 0x52a   : > { %4725 = vmatpush.msrb.mxu1 %v1962_v10 }
 0x52b   : > { %6729 = vmatmul.msk.f32.gmra.mxu3 %vm477_vm0, %v2171_v48  ;;  %v1159_v48 = vadd.f32 %v9825_v33, %v12220_v63 }
 0x52c   : > { %6739 = vmatpush.xpose.msk.msrb.mxu3 %vm477_vm0, %v1610_v25  ;;  %4726 = vmatpush.msrb.mxu1 %v1959_v52  ;;  %v1941_v25 = vadd.f32 %v9576_v37, %v9680_v3 }
 0x52e   : > { %v9981_v36 = vpop.f32.mrf.mxu3  ;;  %4727 = vmatpush.msrb.mxu1 %v1956_v60 }
 0x52f   : > { %3645 = vmax.xlane.f32.xlu2 %v9981_v36  ;;  %v10011_v57 = vpop.f32.mrf.mxu2  ;;  %6537 = vmatmul.msk.f32.gmra.mxu2 %vm477_vm0, %v9857_v20  ;;  %v1938_v20 = vadd.f32 %v9576_v37, %v9658_v34  ;;  %v1592_v34 = vadd.f32 %v9625_v41, %v9753_v46  ;;  %v10059_v46 = vpop.f32.mrf.mxu0 }
 0x530   : > { %6740 = vmatpush.xpose.msk.msrb.mxu3 %vm477_vm0, %v1607_v8  ;;  %v9993_v54 = vpop.f32.mrf.mxu1  ;;  %4728 = vmatpush.msrb.mxu1 %v1953_v4  ;;  %v2174_v8 = vmul.f32 0.17677669, %v1159_v48  ;;  %v1586_v4 = vadd.f32 %v9625_v41, %v9711_v21 }
 0x532   : > { %4729 = vmatpush.msrb.mxu1 %v1950_v30 }
 0x533   : > { %6730 = vmatmul.msk.f32.gmra.mxu3 %vm477_vm0, %v2172_v31  ;;  %v2175_v31 = vmul.f32 0.17677669, %v1162_v19 }
 0x534   : > { %6741 = vmatpush.xpose.msk.msrb.mxu3 %vm477_vm0, %v1604_v6  ;;  %4730 = vmatpush.msrb.mxu1 %v1947_v22 }
 0x536   : > { %v10009_v24 = vpop.f32.mrf.mxu3  ;;  %4731 = vmatpush.msrb.mxu1 %v1944_v62 }
 0x537   : > { %3647 = vmax.xlane.f32.xlu0 %v10009_v24  ;;  %v10037_v3 = vpop.f32.mrf.mxu2  ;;  %6538 = vmatmul.msk.f32.gmra.mxu2 %vm477_vm0, %v9874_v13  ;;  %v1589_v13 = vadd.f32 %v9625_v41, %v9733_v50  ;;  %v12222_v50 = vld [vmem:[#allocation46_spill] sm:$0xff]  ;;  %v10084_v11 = vpop.f32.mrf.mxu0 }
 0x538   : > { %6742 = vmatpush.xpose.msk.msrb.mxu3 %vm477_vm0, %v1601_v9  ;;  %v10021_v18 = vpop.f32.mrf.mxu1  ;;  %4732 = vmatpush.msrb.mxu1 %v1941_v25  ;;  %v1165_v60 = vadd.f32 %v9825_v33, %v12222_v50  ;;  %v1577_v25 = vadd.f32 %v9625_v41, %v9641_v56  ;;  %v12229_v50 = vld [vmem:[#allocation52_spill] sm:$0xff] }
 0x53a   : > { %4733 = vmatpush.msrb.mxu1 %v1938_v20  ;;  %v2176_v15 = vmul.f32 0.17677669, %v1165_v60  ;;  %v1174_v60 = vadd.f32 %v9825_v33, %v12229_v50  ;;  %v12241_v50 = vld [vmem:[#allocation57_spill] sm:$0xff] }
 0x53b   : > { %6731 = vmatmul.msk.f32.gmra.mxu3 %vm477_vm0, %v2173_v51 }
 0x53c   : > { %6743 = vmatpush.xpose.msk.msrb.mxu3 %vm477_vm0, %v1598_v38 }
 0x53e   : > { %v10035_v28 = vpop.f32.mrf.mxu3 }
 0x53f   : > { %3649 = vmax.xlane.f32.xlu1 %v10035_v28  ;;  %v10055_v52 = vpop.f32.mrf.mxu2  ;;  %6539 = vmatmul.msk.f32.gmra.mxu2 %vm477_vm0, %v9889_v35  ;;  %v1583_v35 = vadd.f32 %v9625_v41, %v9689_v43  ;;  %v1580_v43 = vadd.f32 %v9625_v41, %v9667_v49  ;;  %v10107_v63 = vpop.f32.mrf.mxu0 }
 0x540   : > { %6744 = vmatpush.xpose.msk.msrb.mxu3 %vm477_vm0, %v1595_v47  ;;  %v10045_v29 = vpop.f32.mrf.mxu1  ;;  %12224 = vst [vmem:[#allocation28_spill] sm:$0xff] %v10107_v63 }
 0x543   : > { %6732 = vmatmul.msk.f32.gmra.mxu3 %vm477_vm0, %v2174_v8 }
 0x544   : > { %6745 = vmatpush.xpose.msk.msrb.mxu3 %vm477_vm0, %v1592_v34 }
 0x546   : > { %v10053_v10 = vpop.f32.mrf.mxu3 }
 0x547   : > { %3651 = vmax.xlane.f32.xlu2 %v10053_v10  ;;  %v10075_v9 = vpop.f32.mrf.mxu2  ;;  %6540 = vmatmul.msk.f32.gmra.mxu2 %vm477_vm0, %v9902_v32  ;;  %v12223_v32 = vld [vmem:[#allocation48_spill] sm:$0xff] }
 0x548   : > { %6746 = vmatpush.xpose.msk.msrb.mxu3 %vm477_vm0, %v1589_v13  ;;  %v10063_v6 = vpop.f32.mrf.mxu1  ;;  %v1168_v38 = vadd.f32 %v9825_v33, %v12223_v32 }
 0x54a   : > { %v2177_v47 = vmul.f32 0.17677669, %v1168_v38 }
 0x54b   : > { %6733 = vmatmul.msk.f32.gmra.mxu3 %vm477_vm0, %v2175_v31 }
 0x54c   : > { %6747 = vmatpush.xpose.msk.msrb.mxu3 %vm477_vm0, %v1586_v4 }
 0x54e   : > { %v10073_v30 = vpop.f32.mrf.mxu3 }
 0x54f   : > { %3529 = vmax.xlane.f32.xlu2 %v8913_v55  ;;  %3653 = vmax.xlane.f32.xlu0 %v10073_v30  ;;  %v10099_v49 = vpop.f32.mrf.mxu2 }
 0x550   : > { %6748 = vmatpush.xpose.msk.msrb.mxu3 %vm477_vm0, %v1583_v35  ;;  %v10082_v21 = vpop.f32.mrf.mxu1  ;;  %6541 = vmatmul.msk.f32.gmra.mxu2 %vm477_vm0, %v9915_v5  ;;  %v10133_v35 = vpop.f32.mrf.mxu0 }
 0x551   : > { %12230 = vst [vmem:[#allocation36_spill] sm:$0xff] %v10133_v35 }
 0x552   : > { %v3626_v22 = vpop.xlane.xlu1 %3625 }
 0x553   : > { %v3817_v62 = vsub.f32 %v9807_v16, %v3626_v22  ;;  %6734 = vmatmul.msk.f32.gmra.mxu3 %vm477_vm0, %v2176_v15 }
 0x554   : > { %6749 = vmatpush.xpose.msk.msrb.mxu3 %vm477_vm0, %v1580_v43  ;;  %v2179_v43 = vmul.f32 0.17677669, %v1174_v60  ;;  %v1180_v60 = vadd.f32 %v9825_v33, %v12241_v50 }
 0x555   : > { %v4009_v51 = vmul.f32 1.442695, %v3817_v62 }
 0x556   : > { %v10095_v20 = vpop.f32.mrf.mxu3 }
 0x557   : > { %6991 = vpow2.f32 %v4009_v51  ;;  %4139 = vadd.xlane.f32.xlu2 %v8925_v58  ;;  %4137 = vadd.xlane.f32.xlu0 %v8911_v17  ;;  %v12226_v58 = vld [vmem:[#allocation50_spill] sm:$0xff]  ;;  %v10120_v5 = vpop.f32.mrf.mxu2 }
 0x558   : > { %3655 = vmax.xlane.f32.xlu1 %v10095_v20  ;;  %6750 = vmatpush.xpose.msk.msrb.mxu3 %vm477_vm0, %v1577_v25  ;;  %v10103_v16 = vpop.f32.mrf.mxu1  ;;  %v1171_v34 = vadd.f32 %v9825_v33, %v12226_v58  ;;  %v12233_v51 = vld [vmem:[#allocation54_spill] sm:$0xff]  ;;  %v12235_v25 = vld [vmem:[#allocation89_spill] sm:$0xff] }
 0x559   : > { %6542 = vmatmul.msk.f32.gmra.mxu2 %vm477_vm0, %v9929_v53 }
 0x55a   : > { %v3628_v56 = vpop.xlane.xlu2 %3627  ;;  %v2178_v19 = vmul.f32 0.17677669, %v1171_v34 }
 0x55b   : > { %v3818_v48 = vsub.f32 %v9829_v40, %v3628_v56  ;;  %6751 = vmatmul.msk.f32.vlgmr.msrb.gmra.mxu3 %vm477_vm0, %v2177_v47  ;;  %v12236_v47 = vld [vmem:[#allocation87_spill] sm:$0xff]  ;;  %v12237_v56 = vld [vmem:[#allocation85_spill] sm:$0xff] }
 0x55d   : > { %v10111_v17 = vpop.eup %6991  ;;  %v4011_v8 = vmul.f32 1.442695, %v3818_v48 }
 0x55e   : > { %12225 = vst [vmem:[#allocation30_spill] sm:$0xff] %v10111_v17  ;;  %4669 = vmatmul.f32.vlgmr.msra.gmra.mxu0 %v10111_v17  ;;  %v10116_v44 = vpop.f32.mrf.mxu3 }
 0x55f   : > { %6993 = vpow2.f32 %v4011_v8  ;;  %12227 = vst [vmem:[#allocation32_spill] sm:$0xff] %v10116_v44  ;;  %3535 = vmax.xlane.f32.xlu2 %v8961_v2  ;;  %3533 = vmax.xlane.f32.xlu0 %v8945_v27 }
 0x560   : > { %3531 = vmax.xlane.f32.xlu1 %v8929_v23  ;;  %v10123_v40 = vpop.f32.mrf.mxu1 }
 0x562   : > { %v3630_v13 = vpop.xlane.xlu0 %3629 }
 0x563   : > { %v3819_v31 = vsub.f32 %v9846_v42, %v3630_v13  ;;  %6752 = vmatmul.msk.f32.gmra.mxu3 %vm477_vm0, %v2178_v19  ;;  %v10141_v42 = vpop.f32.mrf.mxu2  ;;  %v12239_v19 = vld [vmem:[#allocation18_spill] sm:$0xff] }
 0x565   : > { %v10129_v4 = vpop.eup %6993  ;;  %v4013_v15 = vmul.f32 1.442695, %v3819_v31 }
 0x566   : > { %12228 = vst [vmem:[#allocation34_spill] sm:$0xff] %v10129_v4  ;;  %4672 = vmatmul.f32.gmra.mxu0 %v10129_v4  ;;  %v10143_v22 = vpop.f32.mrf.mxu3  ;;  %v12252_v4 = vld [vmem:[#allocation92_spill] sm:$0xff] }
 0x567   : > { %6995 = vpow2.f32 %v4013_v15  ;;  %4145 = vadd.xlane.f32.xlu2 %v8973_v59  ;;  %4143 = vadd.xlane.f32.xlu0 %v8957_v26  ;;  %12231 = vst [vmem:[#allocation38_spill] sm:$0xff] %v10143_v22  ;;  %v1177_v59 = vadd.f32 %v9825_v33, %v12233_v51  ;;  %v12258_v22 = vld [vmem:[#allocation100_spill] sm:$0xff] }
 0x568   : > { %4141 = vadd.xlane.f32.xlu1 %v8941_v0  ;;  %v10139_v53 = vpop.f32.mrf.mxu1  ;;  %v10152_v0 = vpop.f32.mrf.mxu0 }
 0x569   : > { %12234 = vst [vmem:[#allocation42_spill] sm:$0xff] %v10152_v0  ;;  %v2180_v58 = vmul.f32 0.17677669, %v1177_v59  ;;  %v12261_v0 = vld [vmem:[#allocation24_spill] sm:$0xff] }
 0x56a   : > { %v3632_v62 = vpop.xlane.xlu1 %3631 }
 0x56b   : > { %v3820_v32 = vsub.f32 %v9863_v45, %v3632_v62  ;;  %6753 = vmatmul.msk.f32.gmra.mxu3 %vm477_vm0, %v2179_v43  ;;  %v10159_v48 = vpop.f32.mrf.mxu2  ;;  %v12242_v43 = vld [vmem:[#allocation91_spill] sm:$0xff]  ;;  %v12243_v62 = vld [vmem:[#allocation88_spill] sm:$0xff] }
 0x56d   : > { %v10147_v38 = vpop.eup %6995  ;;  %v4015_v26 = vmul.f32 1.442695, %v3820_v32  ;;  %v12244_v32 = vld [vmem:[#allocation86_spill] sm:$0xff] }
 0x56e   : > { %12232 = vst [vmem:[#allocation40_spill] sm:$0xff] %v10147_v38  ;;  %4675 = vmatmul.f32.gmra.mxu0 %v10147_v38  ;;  %v10161_v8 = vpop.f32.mrf.mxu3 }
 0x56f   : > { %6997 = vpow2.f32 %v4015_v26  ;;  %3541 = vmax.xlane.f32.xlu2 %v12235_v25  ;;  %3539 = vmax.xlane.f32.xlu0 %v12236_v47  ;;  %12238 = vst [vmem:[#allocation44_spill] sm:$0xff] %v10161_v8  ;;  %v2181_v26 = vmul.f32 0.17677669, %v1180_v60  ;;  %v12251_v60 = vld [vmem:[#allocation95_spill] sm:$0xff] }
 0x570   : > { %3537 = vmax.xlane.f32.xlu1 %v12237_v56  ;;  %v10157_v45 = vpop.f32.mrf.mxu1 }
 0x572   : > { %v3634_v34 = vpop.xlane.xlu2 %3633 }
 0x573   : > { %v3821_v13 = vsub.f32 %v12239_v19, %v3634_v34  ;;  %6754 = vmatmul.msk.f32.gmra.mxu3 %vm477_vm0, %v2180_v58  ;;  %v10175_v59 = vpop.f32.mrf.mxu2  ;;  %v10177_v58 = vpop.f32.mrf.mxu0  ;;  %v12246_v19 = vld [vmem:[#allocation20_spill] sm:$0xff] }
 0x574   : > { %12245 = vst [vmem:[#allocation48_spill] sm:$0xff] %v10177_v58 }
 0x575   : > { %v10165_v31 = vpop.eup %6997  ;;  %v4017_v15 = vmul.f32 1.442695, %v3821_v13 }
 0x576   : > { %12240 = vst [vmem:[#allocation46_spill] sm:$0xff] %v10165_v31  ;;  %4678 = vmatmul.f32.gmra.mxu0 %v10165_v31  ;;  %v12250_v31 = vld [vmem:[#allocation98_spill] sm:$0xff] }
 0x577   : > { %6999 = vpow2.f32 %v4017_v15  ;;  %4151 = vadd.xlane.f32.xlu2 %v12242_v43  ;;  %4149 = vadd.xlane.f32.xlu0 %v12243_v62  ;;  %v12248_v15 = vld [vmem:[#allocation58_spill] sm:$0xff]  ;;  %v10185_v62 = vpop.f32.mrf.mxu3 }
 0x578   : > { %4147 = vadd.xlane.f32.xlu1 %v12244_v32  ;;  %v10173_v51 = vpop.f32.mrf.mxu1  ;;  %v1183_v43 = vadd.f32 %v9825_v33, %v12248_v15  ;;  %12249 = vst [vmem:[#allocation52_spill] sm:$0xff] %v10185_v62  ;;  %v12254_v15 = vld [vmem:[#allocation22_spill] sm:$0xff] }
 0x57a   : > { %v3636_v34 = vpop.xlane.xlu0 %3635 }
 0x57b   : > { %v3822_v50 = vsub.f32 %v12246_v19, %v3636_v34  ;;  %6755 = vmatmul.msk.f32.gmra.mxu3 %vm477_vm0, %v2181_v26  ;;  %v10193_v26 = vpop.f32.mrf.mxu2  ;;  %v2182_v19 = vmul.f32 0.17677669, %v1183_v43  ;;  %v10195_v38 = vpop.f32.mrf.mxu0  ;;  %v12259_v43 = vld [vmem:[#allocation97_spill] sm:$0xff] }
 0x57c   : > { %12253 = vst [vmem:[#allocation54_spill] sm:$0xff] %v10195_v38  ;;  %v12260_v38 = vld [vmem:[#allocation94_spill] sm:$0xff] }
 0x57d   : > { %v10181_v13 = vpop.eup %6999  ;;  %v4019_v32 = vmul.f32 1.442695, %v3822_v50 }
 0x57e   : > { %12247 = vst [vmem:[#allocation50_spill] sm:$0xff] %v10181_v13  ;;  %4681 = vmatmul.f32.gmra.mxu0 %v10181_v13 }
 0x57f   : > { %7001 = vpow2.f32 %v4019_v32  ;;  %3547 = vmax.xlane.f32.xlu2 %v12250_v31  ;;  %3545 = vmax.xlane.f32.xlu0 %v12251_v60  ;;  %v12256_v32 = vld [vmem:[#allocation59_spill] sm:$0xff]  ;;  %v10204_v17 = vpop.f32.mrf.mxu3 }
 0x580   : > { %3543 = vmax.xlane.f32.xlu1 %v12252_v4  ;;  %v10191_v34 = vpop.f32.mrf.mxu1  ;;  %v1186_v13 = vadd.f32 %v9825_v33, %v12256_v32  ;;  %12257 = vst [vmem:[#allocation87_spill] sm:$0xff] %v10204_v17  ;;  %v12263_v32 = vld [vmem:[#allocation60_spill] sm:$0xff] }
 0x582   : > { %v3638_v8 = vpop.xlane.xlu1 %3637 }
 0x583   : > { %v3823_v62 = vsub.f32 %v12254_v15, %v3638_v8  ;;  %6756 = vmatmul.msk.f32.gmra.mxu3 %vm477_vm0, %v2182_v19  ;;  %v10209_v15 = vpop.f32.mrf.mxu2  ;;  %v2183_v19 = vmul.f32 0.17677669, %v1186_v13  ;;  %v12267_v13 = vld [vmem:[#allocation101_spill] sm:$0xff] }
 0x585   : > { %v10199_v50 = vpop.eup %7001  ;;  %v4021_v44 = vmul.f32 1.442695, %v3823_v62 }
 0x586   : > { %12255 = vst [vmem:[#allocation89_spill] sm:$0xff] %v10199_v50  ;;  %4684 = vmatmul.f32.gmra.mxu0 %v10199_v50  ;;  %v10217_v50 = vpop.f32.mrf.mxu0 }
 0x587   : > { %7003 = vpow2.f32 %v4021_v44  ;;  %4157 = vadd.xlane.f32.xlu2 %v12258_v22  ;;  %4155 = vadd.xlane.f32.xlu0 %v12259_v43  ;;  %v1189_v44 = vadd.f32 %v9825_v33, %v12263_v32  ;;  %12264 = vst [vmem:[#allocation18_spill] sm:$0xff] %v10217_v50  ;;  %v12266_v43 = vld [vmem:[#allocation104_spill] sm:$0xff]  ;;  %v10223_v17 = vpop.f32.mrf.mxu3 }
 0x588   : > { %4153 = vadd.xlane.f32.xlu1 %v12260_v38  ;;  %v1663_v8 = vpop.f32.mrf.mxu1  ;;  %v12265_v38 = vld [vmem:[#allocation13_spill] sm:$0xff]  ;;  %12268 = vst [vmem:[#allocation57_spill] sm:$0xff] %v10223_v17  ;;  %v12273_v17 = vld [vmem:[#allocation103_spill] sm:$0xff] }
 0x58a   : > { %v3640_v58 = vpop.xlane.xlu2 %3639 }
 0x58b   : > { %v3824_v35 = vsub.f32 %v12261_v0, %v3640_v58  ;;  %6757 = vmatmul.msk.f32.gmra.mxu3 %vm477_vm0, %v2183_v19  ;;  %v2024_v58 = vpop.f32.mrf.mxu2  ;;  %v2184_v19 = vmul.f32 0.17677669, %v1189_v44  ;;  %v12272_v44 = vld [vmem:[#allocation106_spill] sm:$0xff] }
 0x58d   : > { %v10213_v62 = vpop.eup %7003  ;;  %v4023_v22 = vmul.f32 1.442695, %v3824_v35 }
 0x58e   : > { %12262 = vst [vmem:[#allocation85_spill] sm:$0xff] %v10213_v62  ;;  %4687 = vmatmul.f32.gmra.mxu0 %v10213_v62  ;;  %v12270_v62 = vld [vmem:[#allocation61_spill] sm:$0xff] }
 0x58f   : > { %7005 = vpow2.f32 %v4023_v22  ;;  %3553 = vmax.xlane.f32.xlu2 %v12265_v38  ;;  %3551 = vmax.xlane.f32.xlu0 %v12266_v43  ;;  %v1192_v22 = vadd.f32 %v9825_v33, %v12270_v62  ;;  %v10232_v43 = vpop.f32.mrf.mxu0  ;;  %v10238_v60 = vpop.f32.mrf.mxu3 }
 0x590   : > { %3549 = vmax.xlane.f32.xlu1 %v12267_v13  ;;  %v1666_v0 = vpop.f32.mrf.mxu1  ;;  %v12271_v13 = vld [vmem:[#allocation108_spill] sm:$0xff]  ;;  %12274 = vst [vmem:[#allocation88_spill] sm:$0xff] %v10238_v60 }
 0x592   : > { %v3642_v63 = vpop.xlane.xlu0 %3641 }
 0x593   : > { %v3825_v32 = vsub.f32 %v9937_v12, %v3642_v63  ;;  %6758 = vmatmul.msk.f32.gmra.mxu3 %vm477_vm0, %v2184_v19  ;;  %v2027_v63 = vpop.f32.mrf.mxu2  ;;  %v2185_v19 = vmul.f32 0.17677669, %v1192_v22  ;;  %v12277_v22 = vld [vmem:[#allocation19_spill] sm:$0xff] }
 0x595   : > { %v10227_v35 = vpop.eup %7005  ;;  %v4025_v50 = vmul.f32 1.442695, %v3825_v32  ;;  %v12276_v32 = vld [vmem:[#allocation62_spill] sm:$0xff] }
 0x596   : > { %12269 = vst [vmem:[#allocation91_spill] sm:$0xff] %v10227_v35  ;;  %4690 = vmatmul.f32.gmra.mxu0 %v10227_v35 }
 0x597   : > { %7007 = vpow2.f32 %v4025_v50  ;;  %4163 = vadd.xlane.f32.xlu2 %v12271_v13  ;;  %4161 = vadd.xlane.f32.xlu0 %v12272_v44  ;;  %v1667_v50 = vadd.f32 %v9625_v41, %v1666_v0  ;;  %v10267_v60 = vpop.f32.mrf.mxu3 }
 0x598   : > { %4159 = vadd.xlane.f32.xlu1 %v12273_v17  ;;  %v1669_v12 = vpop.f32.mrf.mxu1  ;;  %v1195_v17 = vadd.f32 %v9825_v33, %v12276_v32  ;;  %12282 = vst [vmem:[#allocation58_spill] sm:$0xff] %v10267_v60 }
 0x599   : > { %v1670_v38 = vadd.f32 %v9625_v41, %v1669_v12  ;;  %v12278_v12 = vld [vmem:[#allocation17_spill] sm:$0xff] }
 0x59a   : > { %v3644_v4 = vpop.xlane.xlu1 %3643  ;;  %v2186_v0 = vmul.f32 0.17677669, %v1195_v17  ;;  %v12281_v17 = vld [vmem:[#allocation63_spill] sm:$0xff] }
 0x59b   : > { %v3826_v62 = vsub.f32 %v9955_v7, %v3644_v4  ;;  %6759 = vmatmul.msk.f32.gmra.mxu3 %vm477_vm0, %v2185_v19  ;;  %v1664_v7 = vadd.f32 %v9625_v41, %v1663_v8  ;;  %v12279_v4 = vld [vmem:[#allocation15_spill] sm:$0xff]  ;;  %v10254_v19 = vpop.f32.mrf.mxu0  ;;  %v1661_v8 = vadd.f32 %v9625_v41, %v10191_v34  ;;  %v10276_v34 = vld [vmem:[%s11905_s6] ss:$0 sm:$0xff] }
 0x59c   : > { %6767 = vmatpush.xpose.msk.msra.mxu3 %vm477_vm0, %v1670_v38  ;;  %v2030_v38 = vpop.f32.mrf.mxu2 }
 0x59d   : > { %v10244_v13 = vpop.eup %7007  ;;  %v4027_v44 = vmul.f32 1.442695, %v3826_v62  ;;  %v2031_v32 = vadd.f32 %v9576_v37, %v2030_v38 }
 0x59e   : > { %12275 = vst [vmem:[#allocation86_spill] sm:$0xff] %v10244_v13  ;;  %4693 = vmatmul.f32.gmra.mxu0 %v10244_v13  ;;  %v1198_v13 = vadd.f32 %v9825_v33, %v12281_v17 }
 0x59f   : > { %7009 = vpow2.f32 %v4027_v44  ;;  %3559 = vmax.xlane.f32.xlu2 %v12277_v22  ;;  %3557 = vmax.xlane.f32.xlu0 %v12278_v12  ;;  %v2028_v44 = vadd.f32 %v9576_v37, %v2027_v63  ;;  %v12283_v63 = vld [vmem:[#allocation23_spill] sm:$0xff] }
 0x5a0   : > { %3555 = vmax.xlane.f32.xlu1 %v12279_v4  ;;  %6768 = vmatpush.xpose.msk.msra.mxu3 %vm477_vm0, %v1667_v50 }
 0x5a1   : > { %4783 = vmatpush.msrb.mxu2 %v2031_v32  ;;  %v2187_v32 = vmul.f32 0.17677669, %v1198_v13 }
 0x5a2   : > { %v3646_v62 = vpop.xlane.xlu2 %3645 }
 0x5a3   : > { %v3827_v35 = vsub.f32 %v9981_v36, %v3646_v62  ;;  %6760 = vmatmul.msk.f32.gmra.mxu3 %vm477_vm0, %v2186_v0  ;;  %v2025_v36 = vadd.f32 %v9576_v37, %v2024_v58  ;;  %4784 = vmatpush.msrb.mxu2 %v2028_v44  ;;  %v12284_v0 = vld [vmem:[#allocation21_spill] sm:$0xff]  ;;  %v12285_v37 = vld [vmem:[#allocation110_spill] sm:$0xff]  ;;  %v2019_v62 = vadd.f32 %v10276_v34, %v10193_v26  ;;  %v10288_v17 = vpop.f32.mrf.mxu0  ;;  %v12287_v26 = vld [vmem:[#allocation64_spill] sm:$0xff] }
 0x5a4   : > { %6769 = vmatpush.xpose.msk.msra.mxu3 %vm477_vm0, %v1664_v7  ;;  %v2022_v7 = vadd.f32 %v10276_v34, %v10209_v15  ;;  %v10284_v58 = vpop.f32.mrf.mxu2  ;;  %v1655_v15 = vadd.f32 %v9625_v41, %v10157_v45  ;;  %v2010_v45 = vadd.f32 %v10276_v34, %v10141_v42  ;;  %v2004_v42 = vadd.f32 %v10276_v34, %v10099_v49 }
 0x5a5   : > { %v10263_v50 = vpop.eup %7009  ;;  %v4029_v38 = vmul.f32 1.442695, %v3827_v35  ;;  %v1658_v35 = vadd.f32 %v9625_v41, %v10173_v51  ;;  %4785 = vmatpush.msrb.mxu2 %v2025_v36  ;;  %v2016_v51 = vadd.f32 %v10276_v34, %v10175_v59  ;;  %v1652_v59 = vadd.f32 %v9625_v41, %v10139_v53  ;;  %v10323_v41 = vld [vmem:[%s11903_s4] ss:$0 sm:$0xff] }
 0x5a6   : > { %12280 = vst [vmem:[#allocation20_spill] sm:$0xff] %v10263_v50  ;;  %4696 = vmatmul.f32.gmra.mxu0 %v10263_v50  ;;  %v1649_v53 = vadd.f32 %v10323_v41, %v10123_v40  ;;  %v2001_v49 = vadd.f32 %v10276_v34, %v10075_v9  ;;  %v1646_v40 = vadd.f32 %v10323_v41, %v10103_v16  ;;  %v5171_v16 = vld [vmem:[%s11906_s7 + $0x10] sm:$0xff]  ;;  %v12352_v50 = vld [vmem:[#allocation45_spill] sm:$0xff] }
 0x5a7   : > { %7011 = vpow2.f32 %v4029_v38  ;;  %3563 = vmax.xlane.f32.xlu2 %v12283_v63  ;;  %3561 = vmax.xlane.f32.xlu0 %v12284_v0 }
 0x5a8   : > { %4165 = vadd.xlane.f32.xlu1 %v12285_v37  ;;  %6770 = vmatpush.xpose.msk.msra.mxu3 %vm477_vm0, %v1661_v8  ;;  %v1201_v8 = vadd.f32 %v9825_v33, %v12287_v26  ;;  %v10304_v37 = vpop.f32.mrf.mxu3  ;;  %v12292_v26 = vld [vmem:[#allocation25_spill] sm:$0xff] }
 0x5a9   : > { %4786 = vmatpush.msrb.mxu2 %v2022_v7  ;;  %12288 = vst [vmem:[#allocation22_spill] sm:$0xff] %v10304_v37  ;;  %v12289_v7 = vld [vmem:[#allocation112_spill] sm:$0xff] }
 0x5aa   : > { %v3648_v44 = vpop.xlane.xlu0 %3647 }
 0x5ab   : > { %v3828_v38 = vsub.f32 %v10009_v24, %v3648_v44  ;;  %6761 = vmatmul.msk.f32.gmra.mxu3 %vm477_vm0, %v2187_v32  ;;  %v2013_v24 = vadd.f32 %v10276_v34, %v10159_v48  ;;  %4787 = vmatpush.msrb.mxu2 %v2019_v62  ;;  %v2188_v48 = vmul.f32 0.17677669, %v1201_v8  ;;  %v2007_v32 = vadd.f32 %v10276_v34, %v10120_v5 }
 0x5ac   : > { %6771 = vmatpush.xpose.msk.msra.mxu3 %vm477_vm0, %v1658_v35  ;;  %v10312_v35 = vpop.f32.mrf.mxu2  ;;  %v1998_v8 = vadd.f32 %v10276_v34, %v10055_v52 }
 0x5ad   : > { %v10297_v13 = vpop.eup %7011  ;;  %v4031_v36 = vmul.f32 1.442695, %v3828_v38  ;;  %4788 = vmatpush.msrb.mxu2 %v2016_v51  ;;  %v12291_v38 = vld [vmem:[#allocation65_spill] sm:$0xff]  ;;  %v10332_v51 = vpop.f32.mrf.mxu0 }
 0x5ae   : > { %12286 = vst [vmem:[#allocation98_spill] sm:$0xff] %v10297_v13  ;;  %4699 = vmatmul.f32.gmra.mxu0 %v10297_v13 }
 0x5af   : > { %7013 = vpow2.f32 %v4031_v36  ;;  %4789 = vmatpush.msrb.mxu2 %v2013_v24  ;;  %v5172_v36 = vld [vmem:[%s11906_s7 + $0x18] sm:$0xff] }
 0x5b0   : > { %4167 = vadd.xlane.f32.xlu1 %v12289_v7  ;;  %6772 = vmatpush.xpose.msk.msra.mxu3 %vm477_vm0, %v1655_v15  ;;  %v1995_v7 = vadd.f32 %v10276_v34, %v10037_v3  ;;  %v12295_v3 = vld [vmem:[#allocation66_spill] sm:$0xff] }
 0x5b1   : > { %4790 = vmatpush.msrb.mxu2 %v2010_v45  ;;  %v10348_v45 = vpop.f32.mrf.mxu3  ;;  %5573 = vmatpush.msrb.mxu0 %v5172_v36 }
 0x5b2   : > { %v3650_v62 = vpop.xlane.xlu1 %3649  ;;  %12293 = vst [vmem:[#allocation100_spill] sm:$0xff] %v10348_v45 }
 0x5b3   : > { %v3829_v44 = vsub.f32 %v10035_v28, %v3650_v62  ;;  %6762 = vmatmul.msk.f32.gmra.mxu3 %vm477_vm0, %v2188_v48  ;;  %v1204_v28 = vadd.f32 %v9825_v33, %v12291_v38  ;;  %4791 = vmatpush.msrb.mxu2 %v2007_v32  ;;  %v1643_v48 = vadd.f32 %v10323_v41, %v10082_v21  ;;  %v5170_v62 = vld [vmem:[%s11906_s7 + $0x8] sm:$0xff] }
 0x5b4   : > { %6773 = vmatpush.xpose.msk.msra.mxu3 %vm477_vm0, %v1652_v59  ;;  %v10346_v9 = vpop.f32.mrf.mxu2  ;;  %5574 = vmatpush.msrb.mxu0 %v5171_v16  ;;  %v1992_v32 = vadd.f32 %v10276_v34, %v10011_v57  ;;  %v1989_v21 = vadd.f32 %v10276_v34, %v9983_v1  ;;  %v5169_v57 = vld [vmem:[%s11906_s7] sm:$0xff]  ;;  %v1640_v38 = vadd.f32 %v10323_v41, %v10063_v6  ;;  %v12298_v6 = vld [vmem:[#allocation67_spill] sm:$0xff] }
 0x5b5   : > { %v10328_v5 = vpop.eup %7013  ;;  %v4033_v15 = vmul.f32 1.442695, %v3829_v44  ;;  %4792 = vmatpush.msrb.mxu2 %v2004_v42  ;;  %v2189_v24 = vmul.f32 0.17677669, %v1204_v28  ;;  %v1986_v28 = vadd.f32 %v10276_v34, %v9957_v14  ;;  %v1210_v16 = vadd.f32 %v9825_v33, %v12298_v6 }
 0x5b6   : > { %12290 = vst [vmem:[#allocation59_spill] sm:$0xff] %v10328_v5  ;;  %4702 = vmatmul.f32.gmra.mxu0 %v10328_v5 }
 0x5b7   : > { %7015 = vpow2.f32 %v4033_v15  ;;  %4793 = vmatpush.msrb.mxu2 %v2001_v49  ;;  %5575 = vmatpush.msrb.mxu0 %v5170_v62 }
 0x5b8   : > { %3565 = vmax.xlane.f32.xlu1 %v12292_v26  ;;  %6774 = vmatpush.xpose.msk.msra.mxu3 %vm477_vm0, %v1649_v53  ;;  %v10375_v53 = vpop.f32.mrf.mxu0 }
 0x5b9   : > { %4794 = vmatpush.msrb.mxu2 %v1998_v8  ;;  %5576 = vmatpush.msrb.mxu0 %v5169_v57  ;;  %v10384_v8 = vpop.f32.mrf.mxu3 }
 0x5ba   : > { %v3652_v59 = vpop.xlane.xlu2 %3651  ;;  %12296 = vst [vmem:[#allocation94_spill] sm:$0xff] %v10384_v8 }
 0x5bb   : > { %v3830_v52 = vsub.f32 %v10053_v10, %v3652_v59  ;;  %6763 = vmatmul.msk.f32.gmra.mxu3 %vm477_vm0, %v2189_v24  ;;  %v1207_v10 = vadd.f32 %v9825_v33, %v12295_v3  ;;  %4795 = vmatpush.msrb.mxu2 %v1995_v7 }
 0x5bc   : > { %6775 = vmatpush.xpose.msk.msra.mxu3 %vm477_vm0, %v1646_v40  ;;  %v10382_v1 = vpop.f32.mrf.mxu2 }
 0x5bd   : > { %v10365_v44 = vpop.eup %7015  ;;  %v4035_v42 = vmul.f32 1.442695, %v3830_v52  ;;  %4796 = vmatpush.msrb.mxu2 %v1992_v32  ;;  %v2190_v15 = vmul.f32 0.17677669, %v1207_v10  ;;  %v1637_v52 = vadd.f32 %v10323_v41, %v10045_v29  ;;  %v1634_v32 = vadd.f32 %v10323_v41, %v10021_v18 }
 0x5be   : > { %12294 = vst [vmem:[#allocation97_spill] sm:$0xff] %v10365_v44  ;;  %4705 = vmatmul.f32.gmra.mxu0 %v10365_v44  ;;  %v1631_v18 = vadd.f32 %v10323_v41, %v9993_v54 }
 0x5bf   : > { %7017 = vpow2.f32 %v4035_v42  ;;  %4797 = vmatpush.msrb.mxu2 %v1989_v21  ;;  %v12299_v21 = vld [vmem:[#allocation68_spill] sm:$0xff] }
 0x5c0   : > { %6776 = vmatpush.xpose.msk.msra.mxu3 %vm477_vm0, %v1643_v48  ;;  %v10400_v48 = vpop.f32.mrf.mxu0  ;;  %v1213_v57 = vadd.f32 %v9825_v33, %v12299_v21  ;;  %v12306_v21 = vld [vmem:[#allocation119_spill] sm:$0xff] }
 0x5c1   : > { %4798 = vmatpush.msrb.mxu2 %v1986_v28 }
 0x5c2   : > { %v3530_v49 = vpop.xlane.xlu2 %3529  ;;  %v3654_v40 = vpop.xlane.xlu0 %3653 }
 0x5c3   : > { %v3769_v36 = vsub.f32 %v8913_v55, %v3530_v49  ;;  %v3831_v24 = vsub.f32 %v10073_v30, %v3654_v40  ;;  %6764 = vmatmul.msk.f32.gmra.mxu3 %vm477_vm0, %v2190_v15  ;;  %v2191_v30 = vmul.f32 0.17677669, %v1210_v16  ;;  %v2192_v49 = vmul.f32 0.17677669, %v1213_v57 }
 0x5c4   : > { %6777 = vmatpush.xpose.msk.msra.mxu3 %vm477_vm0, %v1640_v38  ;;  %v10398_v55 = vpop.f32.mrf.mxu2  ;;  %v10409_v38 = vpop.f32.mrf.mxu3  ;;  %v1628_v40 = vadd.f32 %v10323_v41, %v9967_v61 }
 0x5c5   : > { %v10390_v14 = vpop.eup %7017  ;;  %v3913_v59 = vmul.f32 1.442695, %v3769_v36  ;;  %v4037_v7 = vmul.f32 1.442695, %v3831_v24  ;;  %12300 = vst [vmem:[#allocation60_spill] sm:$0xff] %v10409_v38  ;;  %v12350_v38 = vld [vmem:[#allocation101_spill] sm:$0xff] }
 0x5c6   : > { %12297 = vst [vmem:[#allocation24_spill] sm:$0xff] %v10390_v14  ;;  %4708 = vmatmul.f32.gmra.mxu0 %v10390_v14 }
 0x5c7   : > { %7019 = vpow2.f32 %v3913_v59 }
 0x5c8   : > { %7021 = vpow2.f32 %v4037_v7  ;;  %6778 = vmatpush.xpose.msk.msra.mxu3 %vm477_vm0, %v1637_v52  ;;  %v10421_v6 = vpop.f32.mrf.mxu0  ;;  %v12302_v52 = vld [vmem:[#allocation69_spill] sm:$0xff] }
 0x5ca   : > { %v4140_v62 = vpop.xlane.xlu2 %4139  ;;  %v4138_v3 = vpop.xlane.xlu0 %4137 }
 0x5cb   : > { %v3656_v10 = vpop.xlane.xlu1 %3655  ;;  %6765 = vmatmul.msk.f32.gmra.mxu3 %vm477_vm0, %v2191_v30  ;;  %v1216_v30 = vadd.f32 %v9825_v33, %v12302_v52 }
 0x5cc   : > { %v3832_v29 = vsub.f32 %v10095_v20, %v3656_v10  ;;  %6779 = vmatpush.xpose.msk.msra.mxu3 %vm477_vm0, %v1634_v32  ;;  %v10417_v20 = vpop.f32.mrf.mxu2  ;;  %v10437_v57 = vpop.f32.mrf.mxu3 }
 0x5cd   : > { %v7020_v42 = vpop.eup %7019  ;;  %12307 = vst [vmem:[#allocation106_spill] sm:$0xff] %v10437_v57  ;;  %v2193_v33 = vmul.f32 0.17677669, %v1216_v30  ;;  %v10460_v30 = vld [vmem:[%s11901_s2] ss:$0 sm:$0xff]  ;;  %v12334_v57 = vld [vmem:[#allocation92_spill] sm:$0xff] }
 0x5ce   : > { %v10411_v28 = vpop.eup %7021  ;;  %v4039_v15 = vmul.f32 1.442695, %v3832_v29  ;;  %4474 = vmatmul.f32.vlgmr.msra.gmra.mxu1 %v7020_v42  ;;  %4169 = vadd.xlane.f32.xlu0 %v7020_v42  ;;  %v12304_v29 = vld [vmem:[#allocation26_spill] sm:$0xff] }
 0x5cf   : > { %12301 = vst [vmem:[#allocation61_spill] sm:$0xff] %v10411_v28  ;;  %4711 = vmatmul.f32.gmra.mxu0 %v10411_v28 }
 0x5d0   : > { %7023 = vpow2.f32 %v4039_v15  ;;  %6780 = vmatpush.xpose.msk.msra.mxu3 %vm477_vm0, %v1631_v18  ;;  %v12308_v18 = vld [vmem:[#allocation118_spill] sm:$0xff] }
 0x5d1   : > { %7025 = vrcp.f32 %v4138_v3  ;;  %v1887_v3 = vadd.f32 %v10276_v34, %v12306_v21  ;;  %v1884_v15 = vadd.f32 %v10276_v34, %v12308_v18 }
 0x5d2   : > { %v3536_v36 = vpop.xlane.xlu2 %3535  ;;  %v3534_v24 = vpop.xlane.xlu0 %3533 }
 0x5d3   : > { %v3772_v54 = vsub.f32 %v8961_v2, %v3536_v36  ;;  %v3771_v16 = vsub.f32 %v8945_v27, %v3534_v24  ;;  %v3532_v59 = vpop.xlane.xlu1 %3531  ;;  %6766 = vmatmul.msk.f32.gmra.mxu3 %vm477_vm0, %v2192_v49  ;;  %v1625_v2 = vadd.f32 %v10323_v41, %v12304_v29  ;;  %v12305_v27 = vld [vmem:[#allocation27_spill] sm:$0xff] }
 0x5d4   : > { %v3770_v7 = vsub.f32 %v8929_v23, %v3532_v59  ;;  %6781 = vmatpush.xpose.msk.msra.mxu3 %vm477_vm0, %v1628_v40  ;;  %v10441_v23 = vpop.f32.mrf.mxu2 }
 0x5d5   : > { %v3919_v61 = vmul.f32 1.442695, %v3772_v54  ;;  %v3917_v32 = vmul.f32 1.442695, %v3771_v16  ;;  %v12310_v54 = vld [vmem:[#allocation117_spill] sm:$0xff] }
 0x5d6   : > { %v10430_v10 = vpop.eup %7023  ;;  %v3915_v42 = vmul.f32 1.442695, %v3770_v7  ;;  %3567 = vmax.xlane.f32.xlu0 %v12305_v27  ;;  %v1881_v16 = vadd.f32 %v10276_v34, %v12310_v54  ;;  %v12315_v54 = vld [vmem:[#allocation114_spill] sm:$0xff] }
 0x5d7   : > { %12303 = vst [vmem:[#allocation108_spill] sm:$0xff] %v10430_v10  ;;  %7027 = vpow2.f32 %v3919_v61  ;;  %4714 = vmatmul.f32.gmra.mxu0 %v10430_v10  ;;  %v7026_v41 = vpop.eup %7025  ;;  %v12311_v61 = vld [vmem:[#allocation70_spill] sm:$0xff] }
 0x5d8   : > { %7029 = vpow2.f32 %v3917_v32  ;;  %6782 = vmatpush.xpose.msk.msra.mxu3 %vm477_vm0, %v1625_v2  ;;  %v5041_v7 = vmul.f32 %v7026_v41, %v10033_v39  ;;  %v1219_v32 = vadd.f32 %v10460_v30, %v12311_v61  ;;  %v12312_v2 = vld [vmem:[#allocation116_spill] sm:$0xff] }
 0x5d9   : > { %7031 = vpow2.f32 %v3915_v42  ;;  %v1878_v42 = vadd.f32 %v10276_v34, %v12312_v2 }
 0x5da   : > { %v10445_v49 = vpop.xlane.xlu2 %4145  ;;  %v10447_v40 = vpop.xlane.xlu0 %4143  ;;  %7033 = vrcp.f32 %v4140_v62  ;;  %v12313_v62 = vld [vmem:[#allocation115_spill] sm:$0xff] }
 0x5db   : > { %v4142_v36 = vpop.xlane.xlu1 %4141  ;;  %6783 = vmatmul.msk.f32.vlgmr.msra.gmra.mxu3 %vm477_vm0, %v2193_v33  ;;  %v10450_v24 = vpop.f32.mrf.mxu0  ;;  %v1875_v21 = vadd.f32 %v10276_v34, %v12313_v62  ;;  %v2194_v33 = vmul.f32 0.17677669, %v1219_v32 }
 0x5dc   : > { %4588 = vmatpush.msrb.mxu3 %v1887_v3  ;;  %12309 = vst [vmem:[#allocation103_spill] sm:$0xff] %v10450_v24  ;;  %v10468_v39 = vpop.f32.mrf.mxu2  ;;  %v10472_v3 = vpop.f32.mrf.mxu3  ;;  %7035 = vrcp.f32 %v4142_v36  ;;  %v12322_v36 = vld [vmem:[#allocation29_spill] sm:$0xff] }
 0x5dd   : > { %v10454_v59 = vpop.eup %7027  ;;  %12314 = vst [vmem:[#allocation62_spill] sm:$0xff] %v10472_v3  ;;  %v12348_v3 = vld [vmem:[#allocation104_spill] sm:$0xff] }
 0x5de   : > { %4589 = vmatpush.msrb.mxu3 %v1884_v15  ;;  %v7030_v52 = vpop.eup %7029  ;;  %4175 = vadd.xlane.f32.xlu0 %v10454_v59 }
 0x5df   : > { %v7032_v29 = vpop.eup %7031  ;;  %4173 = vadd.xlane.f32.xlu1 %v7030_v52  ;;  %6799 = vmatmul.msk.f32.vlgmr.msrb.gmra.mxu0 %vm477_vm0, %v5041_v7 }
 0x5e0   : > { %4590 = vmatpush.msrb.mxu3 %v1881_v16  ;;  %4171 = vadd.xlane.f32.xlu2 %v7032_v29  ;;  %v7034_v15 = vpop.eup %7033  ;;  %v1872_v16 = vadd.f32 %v10276_v34, %v12315_v54  ;;  %v12318_v54 = vld [vmem:[#allocation71_spill] sm:$0xff] }
 0x5e1   : > { %4477 = vmatmul.f32.gmra.mxu1 %v7032_v29 }
 0x5e2   : > { %4591 = vmatpush.msrb.mxu3 %v1878_v42  ;;  %v3542_v41 = vpop.xlane.xlu2 %3541  ;;  %v3540_v18 = vpop.xlane.xlu0 %3539  ;;  %v12317_v42 = vld [vmem:[#allocation113_spill] sm:$0xff] }
 0x5e3   : > { %v3775_v7 = vsub.f32 %v12235_v25, %v3542_v41  ;;  %v3774_v61 = vsub.f32 %v12236_v47, %v3540_v18  ;;  %v3538_v29 = vpop.xlane.xlu1 %3537  ;;  %v10478_v2 = vpop.f32.mrf.mxu0  ;;  %6784 = vmatmul.msk.f32.gmra.mxu3 %vm477_vm0, %v2194_v33  ;;  %v1869_v32 = vadd.f32 %v10276_v34, %v12317_v42  ;;  %v12319_v41 = vld [vmem:[#allocation33_spill] sm:$0xff]  ;;  %v5042_v47 = vmul.f32 %v7034_v15, %v10059_v46  ;;  %v12320_v18 = vld [vmem:[#allocation111_spill] sm:$0xff] }
 0x5e4   : > { %4592 = vmatpush.msrb.mxu3 %v1875_v21  ;;  %12316 = vst [vmem:[#allocation19_spill] sm:$0xff] %v10478_v2  ;;  %v3773_v62 = vsub.f32 %v12237_v56, %v3538_v29  ;;  %v1222_v21 = vadd.f32 %v10460_v30, %v12318_v54  ;;  %v1866_v56 = vadd.f32 %v10276_v34, %v12320_v18  ;;  %v12321_v33 = vld [vmem:[#allocation31_spill] sm:$0xff]  ;;  %v7036_v29 = vpop.eup %7035  ;;  %v12328_v18 = vld [vmem:[#allocation72_spill] sm:$0xff] }
 0x5e5   : > { %v3925_v24 = vmul.f32 1.442695, %v3775_v7  ;;  %v3923_v10 = vmul.f32 1.442695, %v3774_v61  ;;  %v12323_v7 = vld [vmem:[#allocation109_spill] sm:$0xff]  ;;  %v12331_v2 = vld [vmem:[#allocation96_spill] sm:$0xff] }
 0x5e6   : > { %4593 = vmatpush.msrb.mxu3 %v1872_v16  ;;  %v3921_v25 = vmul.f32 1.442695, %v3773_v62  ;;  %3573 = vmax.xlane.f32.xlu0 %v12319_v41  ;;  %v10493_v16 = vpop.f32.mrf.mxu2  ;;  %v1863_v61 = vadd.f32 %v10276_v34, %v12323_v7  ;;  %v2195_v46 = vmul.f32 0.17677669, %v1222_v21  ;;  %v12324_v62 = vld [vmem:[#allocation107_spill] sm:$0xff]  ;;  %v10510_v21 = vpop.f32.mrf.mxu3  ;;  %v5043_v7 = vmul.f32 %v7036_v29, %v10084_v11 }
 0x5e7   : > { %7037 = vpow2.f32 %v3925_v24  ;;  %3571 = vmax.xlane.f32.xlu1 %v12321_v33  ;;  %6800 = vmatmul.msk.f32.gmra.mxu0 %vm477_vm0, %v5042_v47  ;;  %12327 = vst [vmem:[#allocation15_spill] sm:$0xff] %v10510_v21 }
 0x5e8   : > { %4594 = vmatpush.msrb.mxu3 %v1869_v32  ;;  %7039 = vpow2.f32 %v3923_v10  ;;  %3569 = vmax.xlane.f32.xlu2 %v12322_v36  ;;  %v1860_v10 = vadd.f32 %v10276_v34, %v12324_v62 }
 0x5e9   : > { %7041 = vpow2.f32 %v3921_v25  ;;  %4480 = vmatmul.f32.gmra.mxu1 %v7030_v52  ;;  %v12326_v25 = vld [vmem:[#allocation105_spill] sm:$0xff] }
 0x5ea   : > { %4595 = vmatpush.msrb.mxu3 %v1866_v56  ;;  %v10497_v15 = vpop.xlane.xlu2 %4151  ;;  %v10499_v24 = vpop.xlane.xlu0 %4149  ;;  %v1857_v52 = vadd.f32 %v10276_v34, %v12326_v25  ;;  %7043 = vrcp.f32 %v10447_v40  ;;  %v1225_v56 = vadd.f32 %v10460_v30, %v12328_v18 }
 0x5eb   : > { %v4148_v42 = vpop.xlane.xlu1 %4147  ;;  %v10503_v32 = vpop.f32.mrf.mxu0  ;;  %6785 = vmatmul.msk.f32.gmra.mxu3 %vm477_vm0, %v2195_v46  ;;  %v12329_v46 = vld [vmem:[#allocation102_spill] sm:$0xff]  ;;  %7045 = vrcp.f32 %v10445_v49 }
 0x5ec   : > { %4596 = vmatpush.msrb.mxu3 %v1863_v61  ;;  %12325 = vst [vmem:[#allocation17_spill] sm:$0xff] %v10503_v32  ;;  %v1854_v62 = vadd.f32 %v10276_v34, %v12329_v46  ;;  %v2196_v18 = vmul.f32 0.17677669, %v1225_v56 }
 0x5ed   : > { %v10506_v54 = vpop.eup %7037 }
 0x5ee   : > { %4597 = vmatpush.msrb.mxu3 %v1860_v10  ;;  %v10513_v47 = vpop.eup %7039  ;;  %4181 = vadd.xlane.f32.xlu0 %v10506_v54  ;;  %v10523_v40 = vpop.f32.mrf.mxu2  ;;  %v12330_v10 = vld [vmem:[#allocation99_spill] sm:$0xff] }
 0x5ef   : > { %v7042_v61 = vpop.eup %7041  ;;  %4179 = vadd.xlane.f32.xlu1 %v10513_v47  ;;  %6801 = vmatmul.msk.f32.gmra.mxu0 %vm477_vm0, %v5043_v7  ;;  %v1851_v25 = vadd.f32 %v10276_v34, %v12330_v10  ;;  %v12332_v7 = vld [vmem:[#allocation95_spill] sm:$0xff] }
 0x5f0   : > { %4598 = vmatpush.msrb.mxu3 %v1857_v52  ;;  %4177 = vadd.xlane.f32.xlu2 %v7042_v61  ;;  %v7044_v32 = vpop.eup %7043  ;;  %v1848_v52 = vadd.f32 %v10276_v34, %v12331_v2  ;;  %v12336_v2 = vld [vmem:[#allocation73_spill] sm:$0xff] }
 0x5f1   : > { %4483 = vmatmul.f32.gmra.mxu1 %v10454_v59  ;;  %v12335_v59 = vld [vmem:[#allocation93_spill] sm:$0xff] }
 0x5f2   : > { %4599 = vmatpush.msrb.mxu3 %v1854_v62  ;;  %v3548_v11 = vpop.xlane.xlu2 %3547  ;;  %v3546_v29 = vpop.xlane.xlu0 %3545  ;;  %v1845_v56 = vadd.f32 %v10276_v34, %v12335_v59 }
 0x5f3   : > { %v3778_v46 = vsub.f32 %v12250_v31, %v3548_v11  ;;  %v3777_v14 = vsub.f32 %v12332_v7, %v3546_v29  ;;  %v3544_v21 = vpop.xlane.xlu1 %3543  ;;  %v10532_v28 = vpop.f32.mrf.mxu0  ;;  %6786 = vmatmul.msk.f32.gmra.mxu3 %vm477_vm0, %v2196_v18  ;;  %v1228_v31 = vadd.f32 %v10460_v30, %v12336_v2  ;;  %v12337_v11 = vld [vmem:[#allocation39_spill] sm:$0xff]  ;;  %v12338_v29 = vld [vmem:[#allocation28_spill] sm:$0xff]  ;;  %v12341_v18 = vld [vmem:[#allocation37_spill] sm:$0xff] }
 0x5f4   : > { %4600 = vmatpush.msrb.mxu3 %v1851_v25  ;;  %12333 = vst [vmem:[#allocation63_spill] sm:$0xff] %v10532_v28  ;;  %v3776_v10 = vsub.f32 %v12334_v57, %v3544_v21  ;;  %v5044_v7 = vmul.f32 %v7044_v32, %v12338_v29  ;;  %v12339_v28 = vld [vmem:[#allocation90_spill] sm:$0xff]  ;;  %v10545_v21 = vpop.f32.mrf.mxu3  ;;  %v12345_v2 = vld [vmem:[#allocation36_spill] sm:$0xff] }
 0x5f5   : > { %v3931_v62 = vmul.f32 1.442695, %v3778_v46  ;;  %v3929_v44 = vmul.f32 1.442695, %v3777_v14  ;;  %v1842_v57 = vadd.f32 %v10276_v34, %v12339_v28  ;;  %12340 = vst [vmem:[#allocation23_spill] sm:$0xff] %v10545_v21  ;;  %v12342_v14 = vld [vmem:[#allocation35_spill] sm:$0xff]  ;;  %v7046_v46 = vpop.eup %7045 }
 0x5f6   : > { %4601 = vmatpush.msrb.mxu3 %v1848_v52  ;;  %v3927_v25 = vmul.f32 1.442695, %v3776_v10  ;;  %3579 = vmax.xlane.f32.xlu0 %v12337_v11  ;;  %v10550_v49 = vpop.f32.mrf.mxu2  ;;  %v2197_v32 = vmul.f32 0.17677669, %v1228_v31  ;;  %v5045_v31 = vmul.f32 %v7046_v46, %v12345_v2 }
 0x5f7   : > { %7047 = vpow2.f32 %v3931_v62  ;;  %3577 = vmax.xlane.f32.xlu1 %v12341_v18  ;;  %6802 = vmatmul.msk.f32.gmra.mxu0 %vm477_vm0, %v5044_v7  ;;  %v12344_v62 = vld [vmem:[#allocation74_spill] sm:$0xff] }
 0x5f8   : > { %4602 = vmatpush.msrb.mxu3 %v1845_v56  ;;  %7049 = vpow2.f32 %v3929_v44  ;;  %3575 = vmax.xlane.f32.xlu2 %v12342_v14 }
 0x5f9   : > { %7051 = vpow2.f32 %v3927_v25  ;;  %4486 = vmatmul.f32.gmra.mxu1 %v7042_v61  ;;  %v1231_v61 = vadd.f32 %v10460_v30, %v12344_v62 }
 0x5fa   : > { %4603 = vmatpush.msrb.mxu3 %v1842_v57  ;;  %v10552_v52 = vpop.xlane.xlu2 %4157  ;;  %v10554_v28 = vpop.xlane.xlu0 %4155  ;;  %7053 = vrcp.f32 %v4148_v42 }
 0x5fb   : > { %v10556_v10 = vpop.xlane.xlu1 %4153  ;;  %v10558_v59 = vpop.f32.mrf.mxu0  ;;  %6787 = vmatmul.msk.f32.gmra.mxu3 %vm477_vm0, %v2197_v32  ;;  %v2198_v42 = vmul.f32 0.17677669, %v1231_v61  ;;  %7055 = vrcp.f32 %v10499_v24 }
 0x5fc   : > { %12343 = vst [vmem:[#allocation21_spill] sm:$0xff] %v10558_v59  ;;  %v10573_v7 = vpop.f32.mrf.mxu3  ;;  %v12347_v59 = vld [vmem:[#allocation13_spill] sm:$0xff] }
 0x5fd   : > { %v10561_v44 = vpop.eup %7047  ;;  %12346 = vst [vmem:[#allocation110_spill] sm:$0xff] %v10573_v7 }
 0x5fe   : > { %v10563_v56 = vpop.eup %7049  ;;  %4187 = vadd.xlane.f32.xlu0 %v10561_v44  ;;  %v10571_v29 = vpop.f32.mrf.mxu2 }
 0x5ff   : > { %v7052_v25 = vpop.eup %7051  ;;  %4185 = vadd.xlane.f32.xlu1 %v10563_v56  ;;  %6803 = vmatmul.msk.f32.gmra.mxu0 %vm477_vm0, %v5045_v31 }
 0x600   : > { %4183 = vadd.xlane.f32.xlu2 %v7052_v25  ;;  %v7054_v62 = vpop.eup %7053 }
 0x601   : > { %4489 = vmatmul.f32.gmra.mxu1 %v10513_v47  ;;  %v12351_v47 = vld [vmem:[#allocation75_spill] sm:$0xff] }
 0x602   : > { %v3554_v57 = vpop.xlane.xlu2 %3553  ;;  %v3552_v32 = vpop.xlane.xlu0 %3551  ;;  %v1234_v61 = vadd.f32 %v10460_v30, %v12351_v47  ;;  %v12359_v47 = vld [vmem:[#allocation48_spill] sm:$0xff] }
 0x603   : > { %v3781_v21 = vsub.f32 %v12347_v59, %v3554_v57  ;;  %v3780_v46 = vsub.f32 %v12348_v3, %v3552_v32  ;;  %v3550_v2 = vpop.xlane.xlu1 %3549  ;;  %v10578_v13 = vpop.f32.mrf.mxu0  ;;  %6788 = vmatmul.msk.f32.gmra.mxu3 %vm477_vm0, %v2198_v42  ;;  %v12353_v59 = vld [vmem:[#allocation42_spill] sm:$0xff]  ;;  %v12354_v3 = vld [vmem:[#allocation43_spill] sm:$0xff] }
 0x604   : > { %12349 = vst [vmem:[#allocation64_spill] sm:$0xff] %v10578_v13  ;;  %v3779_v31 = vsub.f32 %v12350_v38, %v3550_v2  ;;  %v5046_v57 = vmul.f32 %v7054_v62, %v12353_v59  ;;  %v12355_v38 = vld [vmem:[#allocation41_spill] sm:$0xff]  ;;  %v2199_v24 = vmul.f32 0.17677669, %v1234_v61 }
 0x605   : > { %v3937_v7 = vmul.f32 1.442695, %v3781_v21  ;;  %v3935_v5 = vmul.f32 1.442695, %v3780_v46  ;;  %v7056_v46 = vpop.eup %7055 }
 0x606   : > { %v3933_v45 = vmul.f32 1.442695, %v3779_v31  ;;  %3585 = vmax.xlane.f32.xlu0 %v12352_v50  ;;  %v10590_v42 = vpop.f32.mrf.mxu2  ;;  %v5047_v61 = vmul.f32 %v7056_v46, %v12359_v47 }
 0x607   : > { %7057 = vpow2.f32 %v3937_v7  ;;  %3583 = vmax.xlane.f32.xlu1 %v12354_v3  ;;  %6804 = vmatmul.msk.f32.gmra.mxu0 %vm477_vm0, %v5046_v57 }
 0x608   : > { %7059 = vpow2.f32 %v3935_v5  ;;  %3581 = vmax.xlane.f32.xlu2 %v12355_v38  ;;  %v10601_v5 = vpop.f32.mrf.mxu3 }
 0x609   : > { %7061 = vpow2.f32 %v3933_v45  ;;  %4492 = vmatmul.f32.gmra.mxu1 %v10506_v54  ;;  %12357 = vst [vmem:[#allocation65_spill] sm:$0xff] %v10601_v5  ;;  %v12358_v54 = vld [vmem:[#allocation76_spill] sm:$0xff] }
 0x60a   : > { %v10593_v21 = vpop.xlane.xlu2 %4163  ;;  %v10595_v32 = vpop.xlane.xlu0 %4161  ;;  %7063 = vrcp.f32 %v10497_v15  ;;  %v1237_v31 = vadd.f32 %v10460_v30, %v12358_v54 }
 0x60b   : > { %v10597_v62 = vpop.xlane.xlu1 %4159  ;;  %v10599_v7 = vpop.f32.mrf.mxu0  ;;  %6789 = vmatmul.msk.f32.gmra.mxu3 %vm477_vm0, %v2199_v24  ;;  %7065 = vrcp.f32 %v10556_v10 }
 0x60c   : > { %12356 = vst [vmem:[#allocation112_spill] sm:$0xff] %v10599_v7  ;;  %v2200_v15 = vmul.f32 0.17677669, %v1237_v31 }
 0x60d   : > { %v10604_v2 = vpop.eup %7057 }
 0x60e   : > { %v10607_v45 = vpop.eup %7059  ;;  %4193 = vadd.xlane.f32.xlu0 %v10604_v2  ;;  %v2072_v57 = vpop.f32.mrf.mxu2 }
 0x60f   : > { %v10613_v59 = vpop.eup %7061  ;;  %4191 = vadd.xlane.f32.xlu1 %v10607_v45  ;;  %6805 = vmatmul.msk.f32.gmra.mxu0 %vm477_vm0, %v5047_v61 }
 0x610   : > { %4189 = vadd.xlane.f32.xlu2 %v10613_v59  ;;  %v7064_v13 = vpop.eup %7063  ;;  %v10627_v60 = vpop.f32.mrf.mxu3 }
 0x611   : > { %4495 = vmatmul.f32.gmra.mxu1 %v7052_v25  ;;  %v12361_v25 = vld [vmem:[#allocation77_spill] sm:$0xff] }
 0x612   : > { %v3560_v24 = vpop.xlane.xlu2 %3559  ;;  %v3558_v7 = vpop.xlane.xlu0 %3557  ;;  %v1240_v31 = vadd.f32 %v10460_v30, %v12361_v25 }
 0x613   : > { %v3784_v54 = vsub.f32 %v12277_v22, %v3560_v24  ;;  %v3783_v5 = vsub.f32 %v12278_v12, %v3558_v7  ;;  %v3556_v8 = vpop.xlane.xlu1 %3555  ;;  %v10620_v46 = vpop.f32.mrf.mxu0  ;;  %6790 = vmatmul.msk.f32.gmra.mxu3 %vm477_vm0, %v2200_v15  ;;  %v12362_v22 = vld [vmem:[#allocation51_spill] sm:$0xff]  ;;  %v12363_v12 = vld [vmem:[#allocation54_spill] sm:$0xff]  ;;  %v12364_v24 = vld [vmem:[#allocation49_spill] sm:$0xff] }
 0x614   : > { %12360 = vst [vmem:[#allocation25_spill] sm:$0xff] %v10620_v46  ;;  %v3782_v47 = vsub.f32 %v12279_v4, %v3556_v8  ;;  %v5048_v7 = vmul.f32 %v7064_v13, %v12363_v12  ;;  %v12365_v4 = vld [vmem:[#allocation47_spill] sm:$0xff]  ;;  %v2201_v10 = vmul.f32 0.17677669, %v1240_v31  ;;  %v7066_v15 = vpop.eup %7065 }
 0x615   : > { %v3943_v61 = vmul.f32 1.442695, %v3784_v54  ;;  %v3941_v37 = vmul.f32 1.442695, %v3783_v5 }
 0x616   : > { %v3939_v38 = vmul.f32 1.442695, %v3782_v47  ;;  %3591 = vmax.xlane.f32.xlu0 %v12362_v22  ;;  %v2075_v8 = vpop.f32.mrf.mxu2 }
 0x617   : > { %7067 = vpow2.f32 %v3943_v61  ;;  %3589 = vmax.xlane.f32.xlu1 %v12364_v24  ;;  %6806 = vmatmul.msk.f32.gmra.mxu0 %vm477_vm0, %v5048_v7  ;;  %v2076_v46 = vadd.f32 %v10276_v34, %v2075_v8  ;;  %v2070_v8 = vadd.f32 %v10276_v34, %v10590_v42 }
 0x618   : > { %7069 = vpow2.f32 %v3941_v37  ;;  %3587 = vmax.xlane.f32.xlu2 %v12365_v4 }
 0x619   : > { %7071 = vpow2.f32 %v3939_v38  ;;  %4498 = vmatmul.f32.gmra.mxu1 %v10563_v56  ;;  %v12367_v56 = vld [vmem:[#allocation78_spill] sm:$0xff] }
 0x61a   : > { %v3562_v5 = vpop.xlane.xlu0 %3561  ;;  %7073 = vrcp.f32 %v10554_v28  ;;  %v3564_v61 = vpop.xlane.xlu2 %3563  ;;  %v1243_v31 = vadd.f32 %v10460_v30, %v12367_v56 }
 0x61b   : > { %v3785_v54 = vsub.f32 %v12284_v0, %v3562_v5  ;;  %v10636_v47 = vpop.xlane.xlu1 %4165  ;;  %v10638_v13 = vpop.f32.mrf.mxu0  ;;  %6791 = vmatmul.msk.f32.gmra.mxu3 %vm477_vm0, %v2201_v10  ;;  %v12368_v0 = vld [vmem:[#allocation18_spill] sm:$0xff]  ;;  %v3786_v5 = vsub.f32 %v12283_v63, %v3564_v61  ;;  %v2073_v61 = vadd.f32 %v10276_v34, %v2072_v57  ;;  %v2067_v57 = vadd.f32 %v10276_v34, %v10571_v29 }
 0x61c   : > { %12366 = vst [vmem:[#allocation66_spill] sm:$0xff] %v10638_v13  ;;  %v5049_v12 = vmul.f32 %v7066_v15, %v12368_v0  ;;  %v10653_v10 = vpop.f32.mrf.mxu3  ;;  %v2202_v56 = vmul.f32 0.17677669, %v1243_v31 }
 0x61d   : > { %v10641_v37 = vpop.eup %7067  ;;  %v3945_v25 = vmul.f32 1.442695, %v3785_v54  ;;  %v3947_v63 = vmul.f32 1.442695, %v3786_v5 }
 0x61e   : > { %v10644_v38 = vpop.eup %7069  ;;  %4199 = vadd.xlane.f32.xlu0 %v10641_v37  ;;  %v2078_v28 = vpop.f32.mrf.mxu2 }
 0x61f   : > { %v10650_v7 = vpop.eup %7071  ;;  %4197 = vadd.xlane.f32.xlu1 %v10644_v38  ;;  %7075 = vpow2.f32 %v3945_v25  ;;  %6807 = vmatmul.msk.f32.gmra.mxu0 %vm477_vm0, %v5049_v12  ;;  %v2079_v54 = vadd.f32 %v10276_v34, %v2078_v28  ;;  %v12370_v25 = vld [vmem:[#allocation79_spill] sm:$0xff]  ;;  %v12371_v12 = vld [vmem:[#allocation56_spill] sm:$0xff] }
 0x620   : > { %4195 = vadd.xlane.f32.xlu2 %v10650_v7  ;;  %v7074_v15 = vpop.eup %7073  ;;  %7077 = vrcp.f32 %v10552_v52  ;;  %v1246_v31 = vadd.f32 %v10460_v30, %v12370_v25  ;;  %v12373_v52 = vld [vmem:[#allocation53_spill] sm:$0xff] }
 0x621   : > { %4501 = vmatmul.f32.gmra.mxu1 %v10561_v44  ;;  %4848 = vmatpush.msra.mxu3 %v2079_v54  ;;  %v5050_v28 = vmul.f32 %v7074_v15, %v10232_v43  ;;  %7079 = vpow2.f32 %v3947_v63  ;;  %v12375_v15 = vld [vmem:[#allocation80_spill] sm:$0xff] }
 0x622   : > { %7081 = vrcp.f32 %v10597_v62  ;;  %v1249_v63 = vadd.f32 %v10460_v30, %v12375_v15  ;;  %v12382_v15 = vld [vmem:[#allocation4_spill] sm:$0xff] }
 0x623   : > { %v10660_v0 = vpop.xlane.xlu1 %4167  ;;  %v10662_v13 = vpop.f32.mrf.mxu0  ;;  %6792 = vmatmul.msk.f32.gmra.mxu3 %vm477_vm0, %v2202_v56 }
 0x624   : > { %12369 = vst [vmem:[#allocation67_spill] sm:$0xff] %v10662_v13  ;;  %4849 = vmatpush.msra.mxu3 %v2076_v46  ;;  %v12372_v13 = vld [vmem:[#allocation55_spill] sm:$0xff]  ;;  %v2203_v46 = vmul.f32 0.17677669, %v1246_v31  ;;  %v10680_v5 = vpop.f32.mrf.mxu3  ;;  %v2204_v62 = vmul.f32 0.17677669, %v1249_v63 }
 0x625   : > { %v7076_v44 = vpop.eup %7075 }
 0x626   : > { %3597 = vmax.xlane.f32.xlu0 %v12371_v12  ;;  %4539 = vmatmul.f32.vlgmr.msra.gmra.mxu2 %v7076_v44  ;;  %v7078_v43 = vpop.eup %7077 }
 0x627   : > { %3595 = vmax.xlane.f32.xlu1 %v12372_v13  ;;  %6808 = vmatmul.msk.f32.gmra.mxu0 %vm477_vm0, %v5050_v28  ;;  %v7080_v29 = vpop.eup %7079  ;;  %v5051_v25 = vmul.f32 %v7078_v43, %v10254_v19 }
 0x628   : > { %3593 = vmax.xlane.f32.xlu2 %v12373_v52  ;;  %4850 = vmatpush.msra.mxu3 %v2073_v61  ;;  %v7082_v31 = vpop.eup %7081 }
 0x629   : > { %4504 = vmatmul.f32.gmra.mxu1 %v10613_v59  ;;  %v2064_v59 = vadd.f32 %v10276_v34, %v10550_v49  ;;  %v2058_v49 = vadd.f32 %v10276_v34, %v10493_v16  ;;  %v2055_v16 = vadd.f32 %v10276_v34, %v10468_v39  ;;  %v2049_v39 = vadd.f32 %v10276_v34, %v10417_v20 }
 0x62a   : > { %4851 = vmatpush.msra.mxu3 %v2070_v8  ;;  %v5052_v8 = vmul.f32 %v7082_v31, %v10288_v17  ;;  %v2043_v20 = vadd.f32 %v10276_v34, %v10382_v1  ;;  %v2034_v1 = vadd.f32 %v10276_v34, %v10284_v58 }
 0x62b   : > { %v3566_v54 = vpop.xlane.xlu1 %3565  ;;  %v10682_v56 = vpop.f32.mrf.mxu0  ;;  %6793 = vmatmul.msk.f32.gmra.mxu3 %vm477_vm0, %v2203_v46  ;;  %v12379_v46 = vld [vmem:[#allocation2_spill] sm:$0xff] }
 0x62c   : > { %12374 = vst [vmem:[#allocation68_spill] sm:$0xff] %v10682_v56  ;;  %v3787_v42 = vsub.f32 %v12292_v26, %v3566_v54  ;;  %4852 = vmatpush.msra.mxu3 %v2067_v57  ;;  %v2061_v26 = vadd.f32 %v10276_v34, %v10523_v40  ;;  %v10701_v19 = vpop.f32.mrf.mxu3  ;;  %v12378_v57 = vld [vmem:[#allocation3_spill] sm:$0xff] }
 0x62e   : > { %v3949_v61 = vmul.f32 1.442695, %v3787_v42  ;;  %4542 = vmatmul.f32.gmra.mxu2 %v7080_v29  ;;  %4853 = vmatpush.msra.mxu3 %v2064_v59  ;;  %v2046_v42 = vadd.f32 %v10276_v34, %v10398_v55 }
 0x62f   : > { %4203 = vadd.xlane.f32.xlu1 %v7080_v29  ;;  %6809 = vmatmul.msk.f32.gmra.mxu0 %vm477_vm0, %v5051_v25 }
 0x630   : > { %7083 = vpow2.f32 %v3949_v61  ;;  %4201 = vadd.xlane.f32.xlu2 %v7076_v44  ;;  %4854 = vmatpush.msra.mxu3 %v2061_v26  ;;  %v12377_v44 = vld [vmem:[#allocation81_spill] sm:$0xff] }
 0x631   : > { %4507 = vmatmul.f32.gmra.mxu1 %v10607_v45  ;;  %7085 = vrcp.f32 %v10595_v32  ;;  %v1252_v45 = vadd.f32 %v10460_v30, %v12377_v44  ;;  %v2052_v32 = vadd.f32 %v10276_v34, %v10441_v23 }
 0x632   : > { %4855 = vmatpush.msra.mxu3 %v2058_v49  ;;  %7087 = vrcp.f32 %v10593_v21  ;;  %v2040_v21 = vadd.f32 %v10276_v34, %v10346_v9  ;;  %v12384_v9 = vld [vmem:[#allocation83_spill] sm:$0xff] }
 0x633   : > { %v10698_v28 = vpop.f32.mrf.mxu0  ;;  %6794 = vmatmul.msk.f32.gmra.mxu3 %vm477_vm0, %v2204_v62  ;;  %v2205_v43 = vmul.f32 0.17677669, %v1252_v45  ;;  %7089 = vrcp.f32 %v10636_v47 }
 0x634   : > { %12376 = vst [vmem:[#allocation69_spill] sm:$0xff] %v10698_v28  ;;  %4856 = vmatpush.msra.mxu3 %v2055_v16  ;;  %v10726_v29 = vpop.f32.mrf.mxu3  ;;  %7091 = vrcp.f32 %v10660_v0 }
 0x636   : > { %v7084_v40 = vpop.eup %7083  ;;  %4857 = vmatpush.msra.mxu3 %v2052_v32 }
 0x637   : > { %3601 = vmax.xlane.f32.xlu1 %v12378_v57  ;;  %4205 = vadd.xlane.f32.xlu0 %v7084_v40  ;;  %v7086_v54 = vpop.eup %7085 }
 0x638   : > { %6810 = vmatmul.msk.f32.gmra.mxu0 %vm477_vm0, %v5052_v8  ;;  %3599 = vmax.xlane.f32.xlu2 %v12379_v46  ;;  %v5053_v23 = vmul.f32 %v7086_v54, %v10332_v51  ;;  %v7088_v61 = vpop.eup %7087  ;;  %v2037_v51 = vadd.f32 %v10276_v34, %v10312_v35  ;;  %v10772_v54 = vld [vmem:[%s11907_s8] ss:$0 sm:$0xff] }
 0x639   : > { %4510 = vmatmul.f32.gmra.mxu1 %v10604_v2  ;;  %4545 = vmatmul.f32.gmra.mxu2 %v7084_v40  ;;  %v12381_v2 = vld [vmem:[#allocation82_spill] sm:$0xff]  ;;  %v5054_v26 = vmul.f32 %v7088_v61, %v10375_v53  ;;  %v7090_v31 = vpop.eup %7089  ;;  %v12386_v53 = vld [vmem:[#allocation84_spill] sm:$0xff] }
 0x63a   : > { %v1255_v59 = vadd.f32 %v10460_v30, %v12381_v2  ;;  %4858 = vmatpush.msra.mxu3 %v2049_v39  ;;  %v1261_v40 = vadd.f32 %v10460_v30, %v12386_v53  ;;  %v5055_v44 = vmul.f32 %v7090_v31, %v10400_v48  ;;  %v7092_v8 = vpop.eup %7091 }
 0x63b   : > { %v10715_v17 = vpop.f32.mrf.mxu0  ;;  %6795 = vmatmul.msk.f32.gmra.mxu3 %vm477_vm0, %v2205_v43  ;;  %v5056_v48 = vmul.f32 %v7092_v8, %v10421_v6 }
 0x63c   : > { %12380 = vst [vmem:[#allocation26_spill] sm:$0xff] %v10715_v17  ;;  %4859 = vmatpush.msra.mxu3 %v2046_v42  ;;  %v2206_v63 = vmul.f32 0.17677669, %v1255_v59  ;;  %v10747_v35 = vpop.f32.mrf.mxu3  ;;  %v12443_v17 = vld [vmem:[#allocation65_spill] sm:$0xff] }
 0x63e   : > { %4860 = vmatpush.msra.mxu3 %v2043_v20 }
 0x63f   : > { %3603 = vmax.xlane.f32.xlu0 %v12382_v15 }
 0x640   : > { %6811 = vmatmul.msk.f32.gmra.mxu0 %vm477_vm0, %v5053_v23  ;;  %4861 = vmatpush.msra.mxu3 %v2040_v21 }
 0x641   : > { %4513 = vmatmul.f32.gmra.mxu1 %v10650_v7  ;;  %v4170_v55 = vpop.xlane.xlu0 %4169  ;;  %v1258_v7 = vadd.f32 %v10460_v30, %v12384_v9 }
 0x642   : > { %4862 = vmatpush.msra.mxu3 %v2037_v51 }
 0x643   : > { %v10737_v25 = vpop.f32.mrf.mxu0  ;;  %6796 = vmatmul.msk.f32.gmra.mxu3 %vm477_vm0, %v2206_v63  ;;  %v2207_v62 = vmul.f32 0.17677669, %v1258_v7 }
 0x644   : > { %12383 = vst [vmem:[#allocation27_spill] sm:$0xff] %v10737_v25  ;;  %4863 = vmatpush.msra.mxu3 %v2034_v1  ;;  %v10762_v16 = vpop.f32.mrf.mxu3 }
 0x648   : > { %6812 = vmatmul.msk.f32.gmra.mxu0 %vm477_vm0, %v5054_v26 }
 0x649   : > { %4516 = vmatmul.f32.gmra.mxu1 %v10644_v38  ;;  %v3568_v49 = vpop.xlane.xlu0 %3567 }
 0x64a   : > { %v3788_v47 = vsub.f32 %v12305_v27, %v3568_v49  ;;  %v2208_v27 = vmul.f32 0.17677669, %v1261_v40 }
 0x64b   : > { %6797 = vmatmul.msk.f32.gmra.mxu3 %vm477_vm0, %v2207_v62  ;;  %v4475_v43 = vpop.f32.mrf.mxu1 }
 0x64c   : > { %v3951_v34 = vmul.f32 1.442695, %v3788_v47  ;;  %v10752_v58 = vpop.f32.mrf.mxu0 }
 0x64d   : > { %12385 = vst [vmem:[#allocation119_spill] sm:$0xff] %v10752_v58  ;;  %v12436_v58 = vld [vmem:[#allocation106_spill] sm:$0xff] }
 0x64e   : > { %7093 = vpow2.f32 %v3951_v34 }
 0x64f   : > { %7095 = vrcp.f32 %v4170_v55  ;;  %v10784_v55 = vpop.f32.mrf.mxu3 }
 0x650   : > { %6813 = vmatmul.msk.f32.gmra.mxu0 %vm477_vm0, %v5055_v44 }
 0x651   : > { %4519 = vmatmul.f32.gmra.mxu1 %v10641_v37  ;;  %v10760_v38 = vpop.xlane.xlu0 %4175 }
 0x652   : > { %v4174_v45 = vpop.xlane.xlu1 %4173 }
 0x653   : > { %v4172_v32 = vpop.xlane.xlu2 %4171  ;;  %6798 = vmatmul.msk.f32.gmra.mxu3 %vm477_vm0, %v2208_v27 }
 0x654   : > { %v7094_v0 = vpop.eup %7093  ;;  %v10765_v30 = vpop.f32.mrf.mxu0  ;;  %7097 = vrcp.f32 %v4172_v32 }
 0x655   : > { %12387 = vst [vmem:[#allocation118_spill] sm:$0xff] %v10765_v30  ;;  %4207 = vadd.xlane.f32.xlu2 %v7094_v0  ;;  %4548 = vmatmul.f32.gmra.mxu2 %v7094_v0  ;;  %v7096_v21 = vpop.eup %7095 }
 0x656   : > { %v5057_v51 = vmul.f32 %v7096_v21, %v4475_v43 }
 0x657   : > { %v10796_v44 = vpop.f32.mrf.mxu3 }
 0x658   : > { %6814 = vmatmul.msk.f32.gmra.mxu0 %vm477_vm0, %v5056_v48 }
 0x659   : > { %v3574_v37 = vpop.xlane.xlu0 %3573 }
 0x65a   : > { %v3791_v39 = vsub.f32 %v12319_v41, %v3574_v37  ;;  %v3572_v42 = vpop.xlane.xlu1 %3571  ;;  %v7098_v7 = vpop.eup %7097 }
 0x65b   : > { %v3570_v2 = vpop.xlane.xlu2 %3569  ;;  %v3790_v59 = vsub.f32 %v12321_v33, %v3572_v42  ;;  %v12388_v33 = vld [vmem:[#allocation5_spill] sm:$0xff] }
 0x65c   : > { %v3957_v6 = vmul.f32 1.442695, %v3791_v39  ;;  %v3789_v23 = vsub.f32 %v12322_v36, %v3570_v2  ;;  %v5578_v20 = vpop.f32.mrf.mxu0  ;;  %v12389_v2 = vld [vmem:[#allocation8_spill] sm:$0xff] }
 0x65d   : > { %v3955_v41 = vmul.f32 1.442695, %v3790_v59  ;;  %v5579_v61 = vadd.f32 %v10772_v54, %v5578_v20  ;;  %3605 = vmax.xlane.f32.xlu2 %v12388_v33  ;;  %v12390_v20 = vld [vmem:[#allocation7_spill] sm:$0xff] }
 0x65e   : > { %v4478_v63 = vpop.f32.mrf.mxu1  ;;  %7099 = vpow2.f32 %v3957_v6  ;;  %v3953_v1 = vmul.f32 1.442695, %v3789_v23 }
 0x65f   : > { %7101 = vpow2.f32 %v3955_v41  ;;  %5962 = vst.msk [vmem:[%s10781_s23] sm:$0xff] %vm477_vm0, %v5579_v61  ;;  %v5058_v34 = vmul.f32 %v7098_v7, %v4478_v63 }
 0x660   : > { %7103 = vpow2.f32 %v3953_v1  ;;  %6815 = vmatmul.msk.f32.gmra.mxu0 %vm477_vm0, %v5057_v51 }
 0x661   : > { %v10791_v36 = vpop.xlane.xlu0 %4181  ;;  %7105 = vrcp.f32 %v4174_v45 }
 0x662   : > { %v10793_v9 = vpop.xlane.xlu1 %4179  ;;  %7107 = vrcp.f32 %v10760_v38 }
 0x663   : > { %v4178_v26 = vpop.xlane.xlu2 %4177 }
 0x664   : > { %v7100_v49 = vpop.eup %7099  ;;  %v5581_v47 = vpop.f32.mrf.mxu0 }
 0x665   : > { %v7102_v62 = vpop.eup %7101  ;;  %4213 = vadd.xlane.f32.xlu2 %v7100_v49  ;;  %v5582_v40 = vadd.f32 %v10772_v54, %v5581_v47 }
 0x666   : > { %v7104_v31 = vpop.eup %7103  ;;  %v4481_v53 = vpop.f32.mrf.mxu1  ;;  %4211 = vadd.xlane.f32.xlu0 %v7102_v62 }
 0x667   : > { %4209 = vadd.xlane.f32.xlu1 %v7104_v31  ;;  %4551 = vmatmul.f32.gmra.mxu2 %v7104_v31  ;;  %5963 = vst.msk [vmem:[%s10781_s23 + $0x8] sm:$0xff] %vm477_vm0, %v5582_v40  ;;  %v7106_v39 = vpop.eup %7105 }
 0x668   : > { %6816 = vmatmul.msk.f32.gmra.mxu0 %vm477_vm0, %v5058_v34  ;;  %v5059_v59 = vmul.f32 %v7106_v39, %v4481_v53  ;;  %v7108_v41 = vpop.eup %7107  ;;  %v12393_v39 = vld [vmem:[#allocation11_spill] sm:$0xff] }
 0x669   : > { %v3580_v27 = vpop.xlane.xlu0 %3579 }
 0x66a   : > { %v3794_v8 = vsub.f32 %v12337_v11, %v3580_v27  ;;  %v3578_v32 = vpop.xlane.xlu1 %3577 }
 0x66b   : > { %v3576_v0 = vpop.xlane.xlu2 %3575  ;;  %v3793_v43 = vsub.f32 %v12341_v18, %v3578_v32  ;;  %v12391_v18 = vld [vmem:[#allocation6_spill] sm:$0xff] }
 0x66c   : > { %v3963_v48 = vmul.f32 1.442695, %v3794_v8  ;;  %v3792_v37 = vsub.f32 %v12342_v14, %v3576_v0  ;;  %v5584_v42 = vpop.f32.mrf.mxu0  ;;  %v10812_v14 = vpop.f32.mrf.mxu3 }
 0x66d   : > { %v3961_v45 = vmul.f32 1.442695, %v3793_v43  ;;  %3611 = vmax.xlane.f32.xlu2 %v12389_v2  ;;  %v5585_v11 = vadd.f32 %v10772_v54, %v5584_v42  ;;  %v12392_v43 = vld [vmem:[#allocation41_spill] sm:$0xff] }
 0x66e   : > { %7109 = vpow2.f32 %v3963_v48  ;;  %v3959_v6 = vmul.f32 1.442695, %v3792_v37  ;;  %v4484_v23 = vpop.f32.mrf.mxu1  ;;  %3609 = vmax.xlane.f32.xlu0 %v12390_v20 }
 0x66f   : > { %7111 = vpow2.f32 %v3961_v45  ;;  %3607 = vmax.xlane.f32.xlu1 %v12391_v18  ;;  %4554 = vmatmul.f32.gmra.mxu2 %v7102_v62  ;;  %5964 = vst.msk [vmem:[%s10781_s23 + $0x10] sm:$0xff] %vm477_vm0, %v5585_v11  ;;  %v5060_v62 = vmul.f32 %v7108_v41, %v4484_v23 }
 0x670   : > { %7113 = vpow2.f32 %v3959_v6  ;;  %6817 = vmatmul.msk.f32.gmra.mxu0 %vm477_vm0, %v5059_v59  ;;  %v12394_v6 = vld [vmem:[#allocation10_spill] sm:$0xff] }
 0x671   : > { %v10814_v38 = vpop.xlane.xlu0 %4187  ;;  %7115 = vrcp.f32 %v4178_v26 }
 0x672   : > { %v10816_v21 = vpop.xlane.xlu1 %4185  ;;  %7117 = vrcp.f32 %v10793_v9 }
 0x673   : > { %v10818_v63 = vpop.xlane.xlu2 %4183 }
 0x674   : > { %v10820_v61 = vpop.eup %7109  ;;  %v5587_v1 = vpop.f32.mrf.mxu0 }
 0x675   : > { %v7112_v51 = vpop.eup %7111  ;;  %4219 = vadd.xlane.f32.xlu2 %v10820_v61  ;;  %v5588_v31 = vadd.f32 %v10772_v54, %v5587_v1  ;;  %v10828_v27 = vpop.f32.mrf.mxu3 }
 0x676   : > { %v7114_v7 = vpop.eup %7113  ;;  %v4487_v47 = vpop.f32.mrf.mxu1  ;;  %4217 = vadd.xlane.f32.xlu0 %v7112_v51 }
 0x677   : > { %4215 = vadd.xlane.f32.xlu1 %v7114_v7  ;;  %4557 = vmatmul.f32.gmra.mxu2 %v7100_v49  ;;  %5965 = vst.msk [vmem:[%s10781_s23 + $0x18] sm:$0xff] %vm477_vm0, %v5588_v31  ;;  %v7116_v26 = vpop.eup %7115 }
 0x678   : > { %6818 = vmatmul.msk.f32.gmra.mxu0 %vm477_vm0, %v5060_v62  ;;  %v5061_v45 = vmul.f32 %v7116_v26, %v4487_v47  ;;  %v7118_v11 = vpop.eup %7117 }
 0x679   : > { %v3586_v34 = vpop.xlane.xlu0 %3585 }
 0x67a   : > { %v3797_v53 = vsub.f32 %v12352_v50, %v3586_v34  ;;  %v3584_v40 = vpop.xlane.xlu1 %3583 }
 0x67b   : > { %v3582_v8 = vpop.xlane.xlu2 %3581  ;;  %v3796_v32 = vsub.f32 %v12354_v3, %v3584_v40  ;;  %v12395_v3 = vld [vmem:[#allocation9_spill] sm:$0xff] }
 0x67c   : > { %v3969_v0 = vmul.f32 1.442695, %v3797_v53  ;;  %v3795_v48 = vsub.f32 %v12392_v43, %v3582_v8  ;;  %v5590_v37 = vpop.f32.mrf.mxu0 }
 0x67d   : > { %v3967_v49 = vmul.f32 1.442695, %v3796_v32  ;;  %3617 = vmax.xlane.f32.xlu2 %v12393_v39  ;;  %v5591_v59 = vadd.f32 %v10772_v54, %v5590_v37  ;;  %v10850_v47 = vpop.f32.mrf.mxu3 }
 0x67e   : > { %7119 = vpow2.f32 %v3969_v0  ;;  %v3965_v50 = vmul.f32 1.442695, %v3795_v48  ;;  %v4490_v42 = vpop.f32.mrf.mxu1  ;;  %3615 = vmax.xlane.f32.xlu0 %v12394_v6 }
 0x67f   : > { %7121 = vpow2.f32 %v3967_v49  ;;  %3613 = vmax.xlane.f32.xlu1 %v12395_v3  ;;  %4560 = vmatmul.f32.gmra.mxu2 %v7114_v7  ;;  %5966 = vst.msk [vmem:[%s10781_s23 + $0x20] sm:$0xff] %vm477_vm0, %v5591_v59  ;;  %v5062_v34 = vmul.f32 %v7118_v11, %v4490_v42  ;;  %v12397_v59 = vld [vmem:[#allocation14_spill] sm:$0xff] }
 0x680   : > { %7123 = vpow2.f32 %v3965_v50  ;;  %6819 = vmatmul.msk.f32.gmra.mxu0 %vm477_vm0, %v5061_v45  ;;  %v12396_v45 = vld [vmem:[#allocation16_spill] sm:$0xff] }
 0x681   : > { %v10840_v9 = vpop.xlane.xlu0 %4193  ;;  %7125 = vrcp.f32 %v10791_v36 }
 0x682   : > { %v10842_v23 = vpop.xlane.xlu1 %4191  ;;  %7127 = vrcp.f32 %v10818_v63 }
 0x683   : > { %v10844_v41 = vpop.xlane.xlu2 %4189 }
 0x684   : > { %v10846_v1 = vpop.eup %7119  ;;  %v5593_v7 = vpop.f32.mrf.mxu0 }
 0x685   : > { %v10848_v62 = vpop.eup %7121  ;;  %4225 = vadd.xlane.f32.xlu2 %v10846_v1  ;;  %v5594_v40 = vadd.f32 %v10772_v54, %v5593_v7  ;;  %v10865_v11 = vpop.f32.mrf.mxu3 }
 0x686   : > { %v7124_v31 = vpop.eup %7123  ;;  %v4493_v53 = vpop.f32.mrf.mxu1  ;;  %4223 = vadd.xlane.f32.xlu0 %v10848_v62 }
 0x687   : > { %4221 = vadd.xlane.f32.xlu1 %v7124_v31  ;;  %4563 = vmatmul.f32.gmra.mxu2 %v7112_v51  ;;  %5967 = vst.msk [vmem:[%s10781_s23 + $0x28] sm:$0xff] %vm477_vm0, %v5594_v40  ;;  %v7126_v26 = vpop.eup %7125 }
 0x688   : > { %6820 = vmatmul.msk.f32.gmra.mxu0 %vm477_vm0, %v5062_v34  ;;  %v5063_v36 = vmul.f32 %v7126_v26, %v4493_v53  ;;  %v7128_v53 = vpop.eup %7127 }
 0x689   : > { %v3592_v8 = vpop.xlane.xlu0 %3591 }
 0x68a   : > { %v3590_v32 = vpop.xlane.xlu1 %3589 }
 0x68b   : > { %v3588_v0 = vpop.xlane.xlu2 %3587  ;;  %v3799_v43 = vsub.f32 %v12364_v24, %v3590_v32  ;;  %v12398_v24 = vld [vmem:[#allocation12_spill] sm:$0xff] }
 0x68c   : > { %v3798_v48 = vsub.f32 %v12365_v4, %v3588_v0  ;;  %v5596_v37 = vpop.f32.mrf.mxu0  ;;  %v3800_v4 = vsub.f32 %v12362_v22, %v3592_v8 }
 0x68d   : > { %v3973_v49 = vmul.f32 1.442695, %v3799_v43  ;;  %3623 = vmax.xlane.f32.xlu2 %v12396_v45  ;;  %v5597_v42 = vadd.f32 %v10772_v54, %v5596_v37 }
 0x68e   : > { %v3971_v51 = vmul.f32 1.442695, %v3798_v48  ;;  %v4496_v50 = vpop.f32.mrf.mxu1  ;;  %3621 = vmax.xlane.f32.xlu0 %v12397_v59  ;;  %v3975_v40 = vmul.f32 1.442695, %v3800_v4  ;;  %v10890_v48 = vpop.f32.mrf.mxu3 }
 0x68f   : > { %7129 = vpow2.f32 %v3973_v49  ;;  %3619 = vmax.xlane.f32.xlu1 %v12398_v24  ;;  %4566 = vmatmul.f32.gmra.mxu2 %v10820_v61  ;;  %5968 = vst.msk [vmem:[%s10781_s23 + $0x30] sm:$0xff] %vm477_vm0, %v5597_v42  ;;  %v5064_v22 = vmul.f32 %v7128_v53, %v4496_v50 }
 0x690   : > { %7131 = vpow2.f32 %v3971_v51  ;;  %6821 = vmatmul.msk.f32.gmra.mxu0 %vm477_vm0, %v5063_v36 }
 0x691   : > { %v10873_v63 = vpop.xlane.xlu0 %4199  ;;  %7133 = vrcp.f32 %v10816_v21 }
 0x692   : > { %v10875_v7 = vpop.xlane.xlu1 %4197  ;;  %7135 = vpow2.f32 %v3975_v40 }
 0x693   : > { %v10877_v34 = vpop.xlane.xlu2 %4195  ;;  %7137 = vrcp.f32 %v10814_v38 }
 0x694   : > { %v5599_v0 = vpop.f32.mrf.mxu0 }
 0x695   : > { %v10879_v32 = vpop.eup %7129  ;;  %v5600_v43 = vadd.f32 %v10772_v54, %v5599_v0 }
 0x696   : > { %v10881_v61 = vpop.eup %7131  ;;  %v4499_v8 = vpop.f32.mrf.mxu1  ;;  %4229 = vadd.xlane.f32.xlu0 %v10879_v32 }
 0x697   : > { %4227 = vadd.xlane.f32.xlu1 %v10881_v61  ;;  %4569 = vmatmul.f32.gmra.mxu2 %v7124_v31  ;;  %5969 = vst.msk [vmem:[%s10781_s23 + $0x38] sm:$0xff] %vm477_vm0, %v5600_v43  ;;  %v7134_v42 = vpop.eup %7133  ;;  %v10906_v38 = vpop.f32.mrf.mxu3 }
 0x698   : > { %6822 = vmatmul.msk.f32.gmra.mxu0 %vm477_vm0, %v5064_v22  ;;  %v10896_v53 = vpop.eup %7135  ;;  %v5065_v40 = vmul.f32 %v7134_v42, %v4499_v8 }
 0x699   : > { %v3598_v26 = vpop.xlane.xlu0 %3597 }
 0x69a   : > { %v3803_v49 = vsub.f32 %v12371_v12, %v3598_v26  ;;  %v3596_v37 = vpop.xlane.xlu1 %3595 }
 0x69b   : > { %v3594_v36 = vpop.xlane.xlu2 %3593  ;;  %v3802_v51 = vsub.f32 %v12372_v13, %v3596_v37 }
 0x69c   : > { %v3981_v50 = vmul.f32 1.442695, %v3803_v49  ;;  %v3801_v21 = vsub.f32 %v12373_v52, %v3594_v36  ;;  %v5602_v4 = vpop.f32.mrf.mxu0  ;;  %v7138_v52 = vpop.eup %7137 }
 0x69d   : > { %v3979_v31 = vmul.f32 1.442695, %v3802_v51  ;;  %v5603_v12 = vadd.f32 %v10772_v54, %v5602_v4 }
 0x69e   : > { %7139 = vpow2.f32 %v3981_v50  ;;  %v3977_v0 = vmul.f32 1.442695, %v3801_v21  ;;  %v4502_v22 = vpop.f32.mrf.mxu1  ;;  %v7570_v50 = vld [vmem:[%s11906_s7 + $0x18] sm:$0xff] }
 0x69f   : > { %7141 = vpow2.f32 %v3979_v31  ;;  %4231 = vadd.xlane.f32.xlu1 %v10896_v53  ;;  %4572 = vmatmul.f32.gmra.mxu2 %v10848_v62  ;;  %5970 = vst.msk [vmem:[%s10781_s23 + $0x40] sm:$0xff] %vm477_vm0, %v5603_v12  ;;  %v5066_v51 = vmul.f32 %v7138_v52, %v4502_v22  ;;  %v7572_v22 = vld [vmem:[%s11906_s7 + $0x8] sm:$0xff] }
 0x6a0   : > { %7143 = vpow2.f32 %v3977_v0  ;;  %6823 = vmatmul.msk.f32.gmra.mxu0 %vm477_vm0, %v5065_v40  ;;  %v10926_v40 = vpop.f32.mrf.mxu3 }
 0x6a1   : > { %7145 = vrcp.f32 %v10844_v41  ;;  %v7571_v41 = vld [vmem:[%s11906_s7 + $0x10] sm:$0xff] }
 0x6a2   : > { %v10904_v13 = vpop.xlane.xlu1 %4203  ;;  %7147 = vrcp.f32 %v10842_v23 }
 0x6a3   : > { %v10908_v8 = vpop.xlane.xlu2 %4201 }
 0x6a4   : > { %v7140_v43 = vpop.eup %7139  ;;  %v5605_v49 = vpop.f32.mrf.mxu0 }
 0x6a5   : > { %v7142_v26 = vpop.eup %7141  ;;  %v5606_v62 = vadd.f32 %v10772_v54, %v5605_v49 }
 0x6a6   : > { %v7144_v37 = vpop.eup %7143  ;;  %v4505_v36 = vpop.f32.mrf.mxu1  ;;  %4235 = vadd.xlane.f32.xlu0 %v7142_v26 }
 0x6a7   : > { %4237 = vadd.xlane.f32.xlu1 %v7140_v43  ;;  %4233 = vadd.xlane.f32.xlu2 %v7144_v37  ;;  %5971 = vst.msk [vmem:[%s10781_s23 + $0x48] sm:$0xff] %vm477_vm0, %v5606_v62  ;;  %v7146_v12 = vpop.eup %7145 }
 0x6a8   : > { %4575 = vmatmul.f32.gmra.mxu2 %v10846_v1  ;;  %4604 = vmatmul.f32.vlgmr.msrb.gmra.mxu3 %v7144_v37  ;;  %v7148_v23 = vpop.eup %7147 }
 0x6a9   : > { %6824 = vmatmul.msk.f32.gmra.mxu0 %vm477_vm0, %v5066_v51  ;;  %6943 = vmatpush.msrb.mxu3 %v7570_v50 }
 0x6aa   : > { %v10919_v21 = vpop.xlane.xlu0 %4205  ;;  %v3602_v31 = vpop.xlane.xlu1 %3601 }
 0x6ab   : > { %v3600_v42 = vpop.xlane.xlu2 %3599  ;;  %6944 = vmatpush.msrb.mxu3 %v7571_v41  ;;  %v3805_v1 = vsub.f32 %v12378_v57, %v3602_v31  ;;  %v7573_v57 = vld [vmem:[%s11906_s7] sm:$0xff] }
 0x6ac   : > { %v3804_v4 = vsub.f32 %v12379_v46, %v3600_v42  ;;  %v5608_v0 = vpop.f32.mrf.mxu0  ;;  %v5067_v46 = vmul.f32 %v7146_v12, %v4505_v36 }
 0x6ad   : > { %6945 = vmatpush.msrb.mxu3 %v7572_v22  ;;  %v3985_v49 = vmul.f32 1.442695, %v3805_v1  ;;  %v5609_v62 = vadd.f32 %v10772_v54, %v5608_v0  ;;  %v10942_v0 = vpop.f32.mrf.mxu3 }
 0x6ae   : > { %v3983_v52 = vmul.f32 1.442695, %v3804_v4  ;;  %v4508_v37 = vpop.f32.mrf.mxu1 }
 0x6af   : > { %6946 = vmatpush.msrb.mxu3 %v7573_v57  ;;  %5972 = vst.msk [vmem:[%s10781_s23 + $0x50] sm:$0xff] %vm477_vm0, %v5609_v62  ;;  %v5068_v22 = vmul.f32 %v7148_v23, %v4508_v37  ;;  %v4540_v37 = vpop.f32.mrf.mxu2 }
 0x6b0   : > { %7149 = vpow2.f32 %v3983_v52  ;;  %4578 = vmatmul.f32.gmra.mxu2 %v10881_v61  ;;  %4607 = vmatmul.f32.gmra.mxu3 %v7142_v26 }
 0x6b1   : > { %7151 = vpow2.f32 %v3985_v49  ;;  %6825 = vmatmul.msk.f32.gmra.mxu0 %vm477_vm0, %v5067_v46 }
 0x6b2   : > { %v3604_v51 = vpop.xlane.xlu0 %3603 }
 0x6b3   : > { %v3806_v50 = vsub.f32 %v12382_v15, %v3604_v51 }
 0x6b5   : > { %v3987_v36 = vmul.f32 1.442695, %v3806_v50  ;;  %v5611_v42 = vpop.f32.mrf.mxu0 }
 0x6b6   : > { %v7150_v31 = vpop.eup %7149  ;;  %v4511_v41 = vpop.f32.mrf.mxu1  ;;  %v5612_v4 = vadd.f32 %v10772_v54, %v5611_v42 }
 0x6b7   : > { %v7152_v1 = vpop.eup %7151  ;;  %7153 = vpow2.f32 %v3987_v36  ;;  %4239 = vadd.xlane.f32.xlu2 %v7150_v31  ;;  %v4543_v42 = vpop.f32.mrf.mxu2 }
 0x6b8   : > { %7155 = vrcp.f32 %v10840_v9  ;;  %5973 = vst.msk [vmem:[%s10781_s23 + $0x58] sm:$0xff] %vm477_vm0, %v5612_v4  ;;  %4581 = vmatmul.f32.gmra.mxu2 %v10879_v32  ;;  %4241 = vadd.xlane.f32.xlu0 %v7152_v1  ;;  %v10954_v9 = vpop.f32.mrf.mxu3 }
 0x6b9   : > { %4610 = vmatmul.f32.gmra.mxu3 %v7140_v43  ;;  %6826 = vmatmul.msk.f32.gmra.mxu0 %vm477_vm0, %v5068_v22  ;;  %7157 = vrcp.f32 %v10877_v34 }
 0x6ba   : > { %7159 = vrcp.f32 %v10875_v7 }
 0x6bb   : > { %7161 = vrcp.f32 %v10873_v63 }
 0x6bd   : > { %v7154_v15 = vpop.eup %7153  ;;  %v5614_v61 = vpop.f32.mrf.mxu0 }
 0x6be   : > { %v7156_v26 = vpop.eup %7155  ;;  %v5615_v12 = vadd.f32 %v10772_v54, %v5614_v61  ;;  %4243 = vadd.xlane.f32.xlu1 %v7154_v15  ;;  %v4514_v49 = vpop.f32.mrf.mxu1 }
 0x6bf   : > { %v5069_v52 = vmul.f32 %v7156_v26, %v4511_v41  ;;  %v7158_v43 = vpop.eup %7157 }
 0x6c0   : > { %5974 = vst.msk [vmem:[%s10781_s23 + $0x60] sm:$0xff] %vm477_vm0, %v5615_v12  ;;  %4584 = vmatmul.f32.gmra.mxu2 %v10896_v53  ;;  %v5070_v46 = vmul.f32 %v7158_v43, %v4514_v49  ;;  %v10964_v57 = vpop.f32.mrf.mxu3  ;;  %v7160_v50 = vpop.eup %7159 }
 0x6c1   : > { %4613 = vmatmul.f32.gmra.mxu3 %v7150_v31  ;;  %6827 = vmatmul.msk.f32.gmra.mxu0 %vm477_vm0, %v5069_v52  ;;  %v7162_v61 = vpop.eup %7161  ;;  %v4546_v12 = vpop.f32.mrf.mxu2 }
 0x6c5   : > { %v5617_v32 = vpop.f32.mrf.mxu0 }
 0x6c6   : > { %v5618_v62 = vadd.f32 %v10772_v54, %v5617_v32  ;;  %v4517_v53 = vpop.f32.mrf.mxu1 }
 0x6c7   : > { %v5071_v36 = vmul.f32 %v7160_v50, %v4517_v53 }
 0x6c8   : > { %5975 = vst.msk [vmem:[%s10781_s23 + $0x68] sm:$0xff] %vm477_vm0, %v5618_v62  ;;  %v10961_v34 = vpop.xlane.xlu2 %4207 }
 0x6c9   : > { %4616 = vmatmul.f32.gmra.mxu3 %v7152_v1  ;;  %6828 = vmatmul.msk.f32.gmra.mxu0 %vm477_vm0, %v5070_v46  ;;  %v10972_v1 = vpop.f32.mrf.mxu3 }
 0x6ca   : > { %12399 = vst [vmem:[#allocation117_spill] sm:$0xff] %v10972_v1 }
 0x6cd   : > { %v5620_v51 = vpop.f32.mrf.mxu0 }
 0x6ce   : > { %v5621_v23 = vadd.f32 %v10772_v54, %v5620_v51  ;;  %v4520_v4 = vpop.f32.mrf.mxu1 }
 0x6cf   : > { %v5072_v26 = vmul.f32 %v7162_v61, %v4520_v4 }
 0x6d0   : > { %5976 = vst.msk [vmem:[%s10781_s23 + $0x70] sm:$0xff] %vm477_vm0, %v5621_v23  ;;  %v3606_v7 = vpop.xlane.xlu2 %3605 }
 0x6d1   : > { %4619 = vmatmul.f32.gmra.mxu3 %v7154_v15  ;;  %6829 = vmatmul.msk.f32.gmra.mxu0 %vm477_vm0, %v5071_v36  ;;  %v3807_v31 = vsub.f32 %v12388_v33, %v3606_v7  ;;  %v10986_v62 = vpop.f32.mrf.mxu3 }
 0x6d2   : > { %12400 = vst [vmem:[#allocation70_spill] sm:$0xff] %v10986_v62 }
 0x6d3   : > { %v3989_v41 = vmul.f32 1.442695, %v3807_v31 }
 0x6d5   : > { %7163 = vpow2.f32 %v3989_v41  ;;  %v5623_v22 = vpop.f32.mrf.mxu0 }
 0x6d6   : > { %7165 = vrcp.f32 %v10908_v8  ;;  %v5624_v63 = vadd.f32 %v10772_v54, %v5623_v22 }
 0x6d7   : > { %7167 = vrcp.f32 %v10904_v13 }
 0x6d8   : > { %5977 = vst.msk [vmem:[%s10781_s23 + $0x78] sm:$0xff] %vm477_vm0, %v5624_v63  ;;  %v10978_v15 = vpop.xlane.xlu2 %4213  ;;  %v4549_v23 = vpop.f32.mrf.mxu2 }
 0x6d9   : > { %6830 = vmatmul.msk.f32.gmra.mxu0 %vm477_vm0, %v5072_v26  ;;  %v10981_v33 = vpop.xlane.xlu0 %4211 }
 0x6da   : > { %v10983_v52 = vpop.xlane.xlu1 %4209 }
 0x6db   : > { %v7164_v49 = vpop.eup %7163 }
 0x6dc   : > { %v7166_v32 = vpop.eup %7165  ;;  %4245 = vadd.xlane.f32.xlu2 %v7164_v49  ;;  %4622 = vmatmul.f32.gmra.mxu3 %v7164_v49 }
 0x6dd   : > { %v5626_v8 = vpop.f32.mrf.mxu0  ;;  %v5073_v46 = vmul.f32 %v7166_v32, %v4540_v37  ;;  %v7168_v22 = vpop.eup %7167 }
 0x6de   : > { %v5627_v43 = vadd.f32 %v10772_v54, %v5626_v8  ;;  %v5074_v63 = vmul.f32 %v7168_v22, %v4543_v42 }
 0x6e0   : > { %5978 = vst.msk [vmem:[%s10781_s23 + $0x80] sm:$0xff] %vm477_vm0, %v5627_v43  ;;  %v3612_v53 = vpop.xlane.xlu2 %3611 }
 0x6e1   : > { %6831 = vmatmul.msk.f32.gmra.mxu0 %vm477_vm0, %v5073_v46  ;;  %v3810_v51 = vsub.f32 %v12389_v2, %v3612_v53  ;;  %v3610_v50 = vpop.xlane.xlu0 %3609 }
 0x6e2   : > { %v3809_v36 = vsub.f32 %v12390_v20, %v3610_v50  ;;  %v3608_v7 = vpop.xlane.xlu1 %3607  ;;  %v11001_v20 = vpop.f32.mrf.mxu3 }
 0x6e3   : > { %v3995_v31 = vmul.f32 1.442695, %v3810_v51  ;;  %v3808_v41 = vsub.f32 %v12391_v18, %v3608_v7  ;;  %12401 = vst [vmem:[#allocation116_spill] sm:$0xff] %v11001_v20 }
 0x6e4   : > { %v3993_v4 = vmul.f32 1.442695, %v3809_v36 }
 0x6e5   : > { %7169 = vpow2.f32 %v3995_v31  ;;  %v3991_v37 = vmul.f32 1.442695, %v3808_v41  ;;  %v5629_v13 = vpop.f32.mrf.mxu0 }
 0x6e6   : > { %7171 = vpow2.f32 %v3993_v4  ;;  %v5630_v61 = vadd.f32 %v10772_v54, %v5629_v13 }
 0x6e7   : > { %7173 = vpow2.f32 %v3991_v37 }
 0x6e8   : > { %7175 = vrcp.f32 %v10919_v21  ;;  %5979 = vst.msk [vmem:[%s10781_s23 + $0x88] sm:$0xff] %vm477_vm0, %v5630_v61  ;;  %v10999_v2 = vpop.xlane.xlu2 %4219 }
 0x6e9   : > { %6832 = vmatmul.msk.f32.gmra.mxu0 %vm477_vm0, %v5074_v63  ;;  %v11004_v18 = vpop.xlane.xlu0 %4217  ;;  %7177 = vrcp.f32 %v10961_v34 }
 0x6ea   : > { %v4552_v26 = vpop.f32.mrf.mxu2  ;;  %v11006_v49 = vpop.xlane.xlu1 %4215 }
 0x6eb   : > { %v7170_v32 = vpop.eup %7169  ;;  %v11016_v13 = vpop.f32.mrf.mxu3 }
 0x6ec   : > { %v7172_v8 = vpop.eup %7171  ;;  %4251 = vadd.xlane.f32.xlu2 %v7170_v32  ;;  %12402 = vst [vmem:[#allocation115_spill] sm:$0xff] %v11016_v13 }
 0x6ed   : > { %v7174_v42 = vpop.eup %7173  ;;  %v5632_v43 = vpop.f32.mrf.mxu0  ;;  %4249 = vadd.xlane.f32.xlu1 %v7172_v8 }
 0x6ee   : > { %v7176_v21 = vpop.eup %7175  ;;  %v5633_v46 = vadd.f32 %v10772_v54, %v5632_v43  ;;  %4247 = vadd.xlane.f32.xlu0 %v7174_v42  ;;  %4625 = vmatmul.f32.gmra.mxu3 %v7174_v42 }
 0x6ef   : > { %v5075_v53 = vmul.f32 %v7176_v21, %v4546_v12  ;;  %v7178_v61 = vpop.eup %7177 }
 0x6f0   : > { %5980 = vst.msk [vmem:[%s10781_s23 + $0x90] sm:$0xff] %vm477_vm0, %v5633_v46  ;;  %v3618_v51 = vpop.xlane.xlu2 %3617 }
 0x6f1   : > { %6833 = vmatmul.msk.f32.gmra.mxu0 %vm477_vm0, %v5075_v53  ;;  %v3813_v50 = vsub.f32 %v12393_v39, %v3618_v51  ;;  %v3616_v36 = vpop.xlane.xlu0 %3615  ;;  %v5076_v39 = vmul.f32 %v7178_v61, %v4549_v23 }
 0x6f2   : > { %v4555_v7 = vpop.f32.mrf.mxu2  ;;  %v3812_v31 = vsub.f32 %v12394_v6, %v3616_v36  ;;  %v3614_v41 = vpop.xlane.xlu1 %3613 }
 0x6f3   : > { %v4001_v4 = vmul.f32 1.442695, %v3813_v50  ;;  %v3811_v37 = vsub.f32 %v12395_v3, %v3614_v41 }
 0x6f4   : > { %v3999_v12 = vmul.f32 1.442695, %v3812_v31 }
 0x6f5   : > { %7179 = vpow2.f32 %v4001_v4  ;;  %v3997_v34 = vmul.f32 1.442695, %v3811_v37  ;;  %v5635_v22 = vpop.f32.mrf.mxu0 }
 0x6f6   : > { %7181 = vpow2.f32 %v3999_v12  ;;  %v5636_v63 = vadd.f32 %v10772_v54, %v5635_v22  ;;  %4628 = vmatmul.f32.gmra.mxu3 %v7172_v8 }
 0x6f7   : > { %7183 = vpow2.f32 %v3997_v34 }
 0x6f8   : > { %7185 = vrcp.f32 %v10983_v52  ;;  %5981 = vst.msk [vmem:[%s10781_s23 + $0x98] sm:$0xff] %vm477_vm0, %v5636_v63  ;;  %v11022_v6 = vpop.xlane.xlu2 %4225  ;;  %v11029_v52 = vpop.f32.mrf.mxu3 }
 0x6f9   : > { %6834 = vmatmul.msk.f32.gmra.mxu0 %vm477_vm0, %v5076_v39  ;;  %v11025_v3 = vpop.xlane.xlu0 %4223  ;;  %12403 = vst [vmem:[#allocation114_spill] sm:$0xff] %v11029_v52  ;;  %7187 = vrcp.f32 %v10981_v33 }
 0x6fa   : > { %v4558_v42 = vpop.f32.mrf.mxu2  ;;  %v11027_v43 = vpop.xlane.xlu1 %4221 }
 0x6fb   : > { %v7180_v21 = vpop.eup %7179 }
 0x6fc   : > { %v7182_v46 = vpop.eup %7181  ;;  %4257 = vadd.xlane.f32.xlu2 %v7180_v21 }
 0x6fd   : > { %v7184_v8 = vpop.eup %7183  ;;  %v5638_v23 = vpop.f32.mrf.mxu0  ;;  %4255 = vadd.xlane.f32.xlu1 %v7182_v46 }
 0x6fe   : > { %v7186_v53 = vpop.eup %7185  ;;  %v5639_v51 = vadd.f32 %v10772_v54, %v5638_v23  ;;  %4253 = vadd.xlane.f32.xlu0 %v7184_v8  ;;  %4631 = vmatmul.f32.gmra.mxu3 %v7170_v32 }
 0x6ff   : > { %v5077_v50 = vmul.f32 %v7186_v53, %v4552_v26  ;;  %v7188_v61 = vpop.eup %7187 }
 0x700   : > { %5982 = vst.msk [vmem:[%s10781_s23 + $0xa0] sm:$0xff] %vm477_vm0, %v5639_v51  ;;  %v3624_v36 = vpop.xlane.xlu2 %3623  ;;  %v5078_v39 = vmul.f32 %v7188_v61, %v4555_v7 }
 0x701   : > { %6835 = vmatmul.msk.f32.gmra.mxu0 %vm477_vm0, %v5077_v50  ;;  %v3816_v31 = vsub.f32 %v12396_v45, %v3624_v36  ;;  %v3622_v41 = vpop.xlane.xlu0 %3621  ;;  %v11040_v45 = vpop.f32.mrf.mxu3  ;;  %v12406_v36 = vld [vmem:[#allocation38_spill] sm:$0xff] }
 0x702   : > { %v3815_v4 = vsub.f32 %v12397_v59, %v3622_v41  ;;  %v3620_v37 = vpop.xlane.xlu1 %3619  ;;  %v4561_v22 = vpop.f32.mrf.mxu2  ;;  %12404 = vst [vmem:[#allocation113_spill] sm:$0xff] %v11040_v45  ;;  %v12407_v41 = vld [vmem:[#allocation30_spill] sm:$0xff] }
 0x703   : > { %v4007_v12 = vmul.f32 1.442695, %v3816_v31  ;;  %v3814_v34 = vsub.f32 %v12398_v24, %v3620_v37 }
 0x704   : > { %v4005_v32 = vmul.f32 1.442695, %v3815_v4 }
 0x705   : > { %7189 = vpow2.f32 %v4007_v12  ;;  %v4003_v26 = vmul.f32 1.442695, %v3814_v34  ;;  %v5641_v33 = vpop.f32.mrf.mxu0  ;;  %v12408_v12 = vld [vmem:[#allocation32_spill] sm:$0xff] }
 0x706   : > { %7191 = vpow2.f32 %v4005_v32  ;;  %v5642_v63 = vadd.f32 %v10772_v54, %v5641_v33  ;;  %4634 = vmatmul.f32.gmra.mxu3 %v7184_v8  ;;  %v12410_v34 = vld [vmem:[#allocation40_spill] sm:$0xff] }
 0x707   : > { %7193 = vpow2.f32 %v4003_v26  ;;  %v12411_v26 = vld [vmem:[#allocation44_spill] sm:$0xff] }
 0x708   : > { %7195 = vrcp.f32 %v10978_v15  ;;  %5983 = vst.msk [vmem:[%s10781_s23 + $0xa8] sm:$0xff] %vm477_vm0, %v5642_v63  ;;  %v12413_v63 = vld [vmem:[#allocation87_spill] sm:$0xff] }
 0x709   : > { %6836 = vmatmul.msk.f32.gmra.mxu0 %vm477_vm0, %v5078_v39  ;;  %7197 = vrcp.f32 %v11006_v49  ;;  %v11051_v15 = vpop.f32.mrf.mxu3  ;;  %v12414_v39 = vld [vmem:[#allocation46_spill] sm:$0xff] }
 0x70a   : > { %v4564_v50 = vpop.f32.mrf.mxu2  ;;  %12405 = vst [vmem:[#allocation71_spill] sm:$0xff] %v11051_v15  ;;  %7199 = vrcp.f32 %v11004_v18 }
 0x70b   : > { %v7190_v59 = vpop.eup %7189  ;;  %7201 = vrcp.f32 %v10999_v2 }
 0x70c   : > { %v7192_v24 = vpop.eup %7191  ;;  %4263 = vadd.xlane.f32.xlu2 %v7190_v59  ;;  %7203 = vrcp.f32 %v11027_v43  ;;  %v12421_v43 = vld [vmem:[#allocation58_spill] sm:$0xff] }
 0x70d   : > { %v7194_v23 = vpop.eup %7193  ;;  %v5644_v53 = vpop.f32.mrf.mxu0  ;;  %4261 = vadd.xlane.f32.xlu1 %v7192_v24  ;;  %7205 = vrcp.f32 %v11025_v3 }
 0x70e   : > { %v7196_v51 = vpop.eup %7195  ;;  %v5645_v7 = vadd.f32 %v10772_v54, %v5644_v53  ;;  %4259 = vadd.xlane.f32.xlu0 %v7194_v23  ;;  %4637 = vmatmul.f32.gmra.mxu3 %v7182_v46  ;;  %7207 = vrcp.f32 %v11022_v6 }
 0x70f   : > { %v5079_v8 = vmul.f32 %v7196_v51, %v4558_v42  ;;  %v7198_v4 = vpop.eup %7197 }
 0x710   : > { %5984 = vst.msk [vmem:[%s10781_s23 + $0xb0] sm:$0xff] %vm477_vm0, %v5645_v7  ;;  %v5080_v42 = vmul.f32 %v7198_v4, %v4561_v22  ;;  %v7200_v33 = vpop.eup %7199 }
 0x711   : > { %6837 = vmatmul.msk.f32.gmra.mxu0 %vm477_vm0, %v5079_v8  ;;  %v11061_v46 = vpop.f32.mrf.mxu3  ;;  %v5081_v18 = vmul.f32 %v7200_v33, %v4564_v50  ;;  %v7202_v53 = vpop.eup %7201  ;;  %v12416_v8 = vld [vmem:[#allocation52_spill] sm:$0xff] }
 0x712   : > { %v4567_v49 = vpop.f32.mrf.mxu2  ;;  %12409 = vst [vmem:[#allocation33_spill] sm:$0xff] %v11061_v46  ;;  %v7204_v4 = vpop.eup %7203 }
 0x713   : > { %v7206_v33 = vpop.eup %7205 }
 0x714   : > { %3659 = vmax.xlane.f32.xlu2 %v12406_v36 }
 0x715   : > { %v5647_v31 = vpop.f32.mrf.mxu0  ;;  %4265 = vadd.xlane.f32.xlu1 %v12407_v41  ;;  %v12418_v41 = vld [vmem:[#allocation57_spill] sm:$0xff] }
 0x716   : > { %v5648_v37 = vadd.f32 %v10772_v54, %v5647_v31  ;;  %3657 = vmax.xlane.f32.xlu0 %v12408_v12  ;;  %4640 = vmatmul.f32.gmra.mxu3 %v7180_v21  ;;  %v12412_v21 = vld [vmem:[#allocation34_spill] sm:$0xff]  ;;  %v12417_v31 = vld [vmem:[#allocation89_spill] sm:$0xff] }
 0x718   : > { %5985 = vst.msk [vmem:[%s10781_s23 + $0xb8] sm:$0xff] %vm477_vm0, %v5648_v37 }
 0x719   : > { %6838 = vmatmul.msk.f32.gmra.mxu0 %vm477_vm0, %v5080_v42  ;;  %v11073_v51 = vpop.f32.mrf.mxu3  ;;  %v12419_v42 = vld [vmem:[#allocation50_spill] sm:$0xff] }
 0x71a   : > { %v4570_v22 = vpop.f32.mrf.mxu2  ;;  %12415 = vst [vmem:[#allocation111_spill] sm:$0xff] %v11073_v51 }
 0x71c   : > { %4269 = vadd.xlane.f32.xlu2 %v12410_v34 }
 0x71d   : > { %v5650_v32 = vpop.f32.mrf.mxu0  ;;  %3661 = vmax.xlane.f32.xlu1 %v12411_v26 }
 0x71e   : > { %v5651_v61 = vadd.f32 %v10772_v54, %v5650_v32  ;;  %4267 = vadd.xlane.f32.xlu0 %v12412_v21  ;;  %4643 = vmatmul.f32.gmra.mxu3 %v7194_v23  ;;  %v5082_v23 = vmul.f32 %v7202_v53, %v4567_v49  ;;  %v12422_v32 = vld [vmem:[#allocation85_spill] sm:$0xff]  ;;  %v4228_v53 = vpop.xlane.xlu1 %4227 }
 0x71f   : > { %7209 = vrcp.f32 %v4228_v53  ;;  %v12431_v53 = vld [vmem:[#allocation59_spill] sm:$0xff] }
 0x720   : > { %5986 = vst.msk [vmem:[%s10781_s23 + $0xc0] sm:$0xff] %vm477_vm0, %v5651_v61 }
 0x721   : > { %6839 = vmatmul.msk.f32.gmra.mxu0 %vm477_vm0, %v5081_v18  ;;  %v11085_v34 = vpop.f32.mrf.mxu3 }
 0x722   : > { %v4573_v50 = vpop.f32.mrf.mxu2  ;;  %12420 = vst [vmem:[#allocation31_spill] sm:$0xff] %v11085_v34 }
 0x723   : > { %v5084_v18 = vmul.f32 %v7206_v33, %v4573_v50 }
 0x724   : > { %3665 = vmax.xlane.f32.xlu2 %v12413_v63 }
 0x725   : > { %4271 = vadd.xlane.f32.xlu1 %v12414_v39  ;;  %v12425_v39 = vld [vmem:[#allocation86_spill] sm:$0xff] }
 0x726   : > { %v5653_v7 = vpop.f32.mrf.mxu0  ;;  %3663 = vmax.xlane.f32.xlu0 %v12416_v8  ;;  %4646 = vmatmul.f32.gmra.mxu3 %v7192_v24  ;;  %v5083_v24 = vmul.f32 %v7204_v4, %v4570_v22 }
 0x727   : > { %v5654_v2 = vadd.f32 %v10772_v54, %v5653_v7  ;;  %v12426_v7 = vld [vmem:[#allocation22_spill] sm:$0xff] }
 0x729   : > { %5987 = vst.msk [vmem:[%s10781_s23 + $0xc8] sm:$0xff] %vm477_vm0, %v5654_v2  ;;  %6840 = vmatmul.msk.f32.gmra.mxu0 %vm477_vm0, %v5082_v23  ;;  %v11099_v3 = vpop.f32.mrf.mxu3  ;;  %v7208_v23 = vpop.eup %7207 }
 0x72a   : > { %12424 = vst [vmem:[#allocation29_spill] sm:$0xff] %v11099_v3  ;;  %v12442_v3 = vld [vmem:[#allocation23_spill] sm:$0xff] }
 0x72b   : > { %v4576_v61 = vpop.f32.mrf.mxu2 }
 0x72c   : > { %4275 = vadd.xlane.f32.xlu2 %v12417_v31  ;;  %v12427_v31 = vld [vmem:[#allocation91_spill] sm:$0xff]  ;;  %v5085_v50 = vmul.f32 %v7208_v23, %v4576_v61  ;;  %v4232_v23 = vpop.xlane.xlu1 %4231 }
 0x72d   : > { %3667 = vmax.xlane.f32.xlu1 %v12418_v41 }
 0x72e   : > { %v5656_v37 = vpop.f32.mrf.mxu0  ;;  %4273 = vadd.xlane.f32.xlu0 %v12419_v42  ;;  %4649 = vmatmul.f32.gmra.mxu3 %v7190_v59  ;;  %v12423_v59 = vld [vmem:[#allocation88_spill] sm:$0xff]  ;;  %v12428_v42 = vld [vmem:[#allocation94_spill] sm:$0xff] }
 0x72f   : > { %v5657_v49 = vadd.f32 %v10772_v54, %v5656_v37 }
 0x731   : > { %5988 = vst.msk [vmem:[%s10781_s23 + $0xd0] sm:$0xff] %vm477_vm0, %v5657_v49  ;;  %6841 = vmatmul.msk.f32.gmra.mxu0 %vm477_vm0, %v5083_v24  ;;  %v4605_v37 = vpop.f32.mrf.mxu3  ;;  %v4230_v24 = vpop.xlane.xlu0 %4229  ;;  %v12429_v49 = vld [vmem:[#allocation20_spill] sm:$0xff] }
 0x732   : > { %7211 = vrcp.f32 %v4230_v24 }
 0x733   : > { %v4579_v6 = vpop.f32.mrf.mxu2  ;;  %7213 = vrcp.f32 %v4232_v23  ;;  %v12437_v23 = vld [vmem:[#allocation61_spill] sm:$0xff] }
 0x734   : > { %3671 = vmax.xlane.f32.xlu2 %v12421_v43 }
 0x735   : > { %4277 = vadd.xlane.f32.xlu1 %v12422_v32  ;;  %v7210_v32 = vpop.eup %7209 }
 0x736   : > { %v5659_v21 = vpop.f32.mrf.mxu0  ;;  %3669 = vmax.xlane.f32.xlu0 %v12423_v59  ;;  %v5086_v61 = vmul.f32 %v7210_v32, %v4579_v6  ;;  %v12434_v32 = vld [vmem:[#allocation62_spill] sm:$0xff] }
 0x737   : > { %v5660_v22 = vadd.f32 %v10772_v54, %v5659_v21  ;;  %v12430_v21 = vld [vmem:[#allocation100_spill] sm:$0xff] }
 0x739   : > { %5989 = vst.msk [vmem:[%s10781_s23 + $0xd8] sm:$0xff] %vm477_vm0, %v5660_v22  ;;  %6842 = vmatmul.msk.f32.gmra.mxu0 %vm477_vm0, %v5084_v18 }
 0x73b   : > { %v4582_v22 = vpop.f32.mrf.mxu2 }
 0x73c   : > { %4281 = vadd.xlane.f32.xlu2 %v12425_v39  ;;  %v4608_v39 = vpop.f32.mrf.mxu3 }
 0x73d   : > { %3673 = vmax.xlane.f32.xlu1 %v12426_v7 }
 0x73e   : > { %v5662_v2 = vpop.f32.mrf.mxu0  ;;  %4279 = vadd.xlane.f32.xlu0 %v12427_v31  ;;  %v7212_v31 = vpop.eup %7211 }
 0x73f   : > { %v5663_v4 = vadd.f32 %v10772_v54, %v5662_v2  ;;  %v11114_v54 = vld [vmem:[%s11907_s8] ss:$0 sm:$0xff]  ;;  %v12432_v2 = vld [vmem:[#allocation60_spill] sm:$0xff]  ;;  %v5087_v6 = vmul.f32 %v7212_v31, %v4582_v22 }
 0x741   : > { %5990 = vst.msk [vmem:[%s10781_s23 + $0xe0] sm:$0xff] %vm477_vm0, %v5663_v4  ;;  %6843 = vmatmul.msk.f32.gmra.mxu0 %vm477_vm0, %v5085_v50  ;;  %v12433_v4 = vld [vmem:[#allocation98_spill] sm:$0xff] }
 0x743   : > { %v4585_v24 = vpop.f32.mrf.mxu2 }
 0x744   : > { %3677 = vmax.xlane.f32.xlu2 %v12428_v42 }
 0x745   : > { %4283 = vadd.xlane.f32.xlu1 %v12429_v49 }
 0x746   : > { %v5665_v33 = vpop.f32.mrf.mxu0  ;;  %3675 = vmax.xlane.f32.xlu0 %v12430_v21 }
 0x747   : > { %v5666_v18 = vadd.f32 %v11114_v54, %v5665_v33  ;;  %v4234_v33 = vpop.xlane.xlu2 %4233 }
 0x748   : > { %7215 = vrcp.f32 %v4234_v33 }
 0x749   : > { %5991 = vst.msk [vmem:[%s10781_s23 + $0xe8] sm:$0xff] %vm477_vm0, %v5666_v18  ;;  %6844 = vmatmul.msk.f32.gmra.mxu0 %vm477_vm0, %v5086_v61  ;;  %v12435_v61 = vld [vmem:[#allocation97_spill] sm:$0xff]  ;;  %v7214_v18 = vpop.eup %7213 }
 0x74a   : > { %v5088_v22 = vmul.f32 %v7214_v18, %v4585_v24  ;;  %v12440_v18 = vld [vmem:[#allocation108_spill] sm:$0xff] }
 0x74c   : > { %4287 = vadd.xlane.f32.xlu2 %v12431_v53  ;;  %v4611_v53 = vpop.f32.mrf.mxu3 }
 0x74d   : > { %3679 = vmax.xlane.f32.xlu1 %v12432_v2 }
 0x74e   : > { %v5668_v50 = vpop.f32.mrf.mxu0  ;;  %4285 = vadd.xlane.f32.xlu0 %v12433_v4  ;;  %v12438_v4 = vld [vmem:[#allocation15_spill] sm:$0xff] }
 0x74f   : > { %v5669_v49 = vadd.f32 %v11114_v54, %v5668_v50  ;;  %v4236_v50 = vpop.xlane.xlu0 %4235  ;;  %v4240_v25 = vpop.xlane.xlu2 %4239 }
 0x750   : > { %7217 = vrcp.f32 %v4236_v50 }
 0x751   : > { %5992 = vst.msk [vmem:[%s10781_s23 + $0xf0] sm:$0xff] %vm477_vm0, %v5669_v49  ;;  %6845 = vmatmul.msk.f32.gmra.mxu0 %vm477_vm0, %v5087_v6  ;;  %v7216_v6 = vpop.eup %7215 }
 0x752   : > { %v5089_v34 = vmul.f32 %v7216_v6, %v4605_v37 }
 0x754   : > { %3683 = vmax.xlane.f32.xlu2 %v12434_v32  ;;  %v4614_v33 = vpop.f32.mrf.mxu3 }
 0x755   : > { %4289 = vadd.xlane.f32.xlu1 %v12435_v61  ;;  %v12439_v61 = vld [vmem:[#allocation24_spill] sm:$0xff] }
 0x756   : > { %v5671_v30 = vpop.f32.mrf.mxu0  ;;  %3681 = vmax.xlane.f32.xlu0 %v12436_v58 }
 0x757   : > { %v5672_v31 = vadd.f32 %v11114_v54, %v5671_v30  ;;  %v4238_v30 = vpop.xlane.xlu1 %4237  ;;  %v4246_v37 = vpop.xlane.xlu2 %4245 }
 0x758   : > { %7219 = vrcp.f32 %v4238_v30 }
 0x759   : > { %5993 = vst.msk [vmem:[%s10781_s23 + $0xf8] sm:$0xff] %vm477_vm0, %v5672_v31  ;;  %6846 = vmatmul.msk.f32.gmra.mxu0 %vm477_vm0, %v5088_v22  ;;  %v12441_v22 = vld [vmem:[#allocation110_spill] sm:$0xff]  ;;  %v7218_v31 = vpop.eup %7217  ;;  %7221 = vrcp.f32 %v4240_v25 }
 0x75c   : > { %4293 = vadd.xlane.f32.xlu2 %v12437_v23 }
 0x75d   : > { %3685 = vmax.xlane.f32.xlu1 %v12438_v4 }
 0x75e   : > { %v5674_v49 = vpop.f32.mrf.mxu0  ;;  %4291 = vadd.xlane.f32.xlu0 %v12439_v61  ;;  %v5090_v61 = vmul.f32 %v7218_v31, %v4608_v39 }
 0x75f   : > { %v5675_v24 = vadd.f32 %v11114_v54, %v5674_v49  ;;  %v4244_v50 = vpop.xlane.xlu1 %4243  ;;  %v4242_v49 = vpop.xlane.xlu0 %4241 }
 0x760   : > { %v11150_v39 = vpop.xlane.xlu2 %4251  ;;  %7223 = vrcp.f32 %v4242_v49 }
 0x761   : > { %5994 = vst.msk [vmem:[%s10781_s23 + $0x100] sm:$0xff] %vm477_vm0, %v5675_v24  ;;  %6847 = vmatmul.msk.f32.gmra.mxu0 %vm477_vm0, %v5089_v34  ;;  %v4617_v34 = vpop.f32.mrf.mxu3  ;;  %v7220_v24 = vpop.eup %7219  ;;  %7225 = vrcp.f32 %v4244_v50 }
 0x762   : > { %v5091_v51 = vmul.f32 %v7220_v24, %v4611_v53  ;;  %7227 = vrcp.f32 %v4246_v37 }
 0x764   : > { %4295 = vadd.xlane.f32.xlu2 %v12440_v18 }
 0x765   : > { %3689 = vmax.xlane.f32.xlu1 %v12441_v22 }
 0x766   : > { %v5677_v23 = vpop.f32.mrf.mxu0  ;;  %3687 = vmax.xlane.f32.xlu0 %v12442_v3 }
 0x767   : > { %v5678_v6 = vadd.f32 %v11114_v54, %v5677_v23  ;;  %v11153_v31 = vpop.xlane.xlu1 %4249  ;;  %v4248_v23 = vpop.xlane.xlu0 %4247 }
 0x769   : > { %5995 = vst.msk [vmem:[%s10781_s23 + $0x108] sm:$0xff] %vm477_vm0, %v5678_v6  ;;  %6848 = vmatmul.msk.f32.gmra.mxu0 %vm477_vm0, %v5090_v61  ;;  %v4620_v61 = vpop.f32.mrf.mxu3  ;;  %v7222_v6 = vpop.eup %7221 }
 0x76a   : > { %v5092_v15 = vmul.f32 %v7222_v6, %v4614_v33 }
 0x76c   : > { %3693 = vmax.xlane.f32.xlu2 %v10627_v60 }
 0x76e   : > { %v5680_v18 = vpop.f32.mrf.mxu0  ;;  %3691 = vmax.xlane.f32.xlu0 %v12443_v17 }
 0x76f   : > { %v5681_v30 = vadd.f32 %v11114_v54, %v5680_v18  ;;  %v11158_v46 = vpop.xlane.xlu2 %4257 }
 0x770   : > { %v11161_v24 = vpop.xlane.xlu1 %4255 }
 0x771   : > { %5996 = vst.msk [vmem:[%s10781_s23 + $0x110] sm:$0xff] %vm477_vm0, %v5681_v30  ;;  %6849 = vmatmul.msk.f32.gmra.mxu0 %vm477_vm0, %v5091_v51  ;;  %v11163_v25 = vpop.xlane.xlu0 %4253  ;;  %v4623_v18 = vpop.f32.mrf.mxu3 }
 0x772   : > { %v7224_v51 = vpop.eup %7223 }
 0x773   : > { %v5093_v56 = vmul.f32 %v7224_v51, %v4617_v34 }
 0x776   : > { %v5683_v28 = vpop.f32.mrf.mxu0 }
 0x777   : > { %v5684_v53 = vadd.f32 %v11114_v54, %v5683_v28 }
 0x779   : > { %5997 = vst.msk [vmem:[%s10781_s23 + $0x118] sm:$0xff] %vm477_vm0, %v5684_v53  ;;  %6850 = vmatmul.msk.f32.gmra.mxu0 %vm477_vm0, %v5092_v15  ;;  %v4626_v53 = vpop.f32.mrf.mxu3  ;;  %v7226_v15 = vpop.eup %7225 }
 0x77a   : > { %v5094_v13 = vmul.f32 %v7226_v15, %v4620_v61  ;;  %v7228_v61 = vpop.eup %7227 }
 0x77b   : > { %v5095_v37 = vmul.f32 %v7228_v61, %v4623_v18 }
 0x77e   : > { %v5686_v30 = vpop.f32.mrf.mxu0 }
 0x77f   : > { %v5687_v33 = vadd.f32 %v11114_v54, %v5686_v30  ;;  %v11169_v6 = vpop.xlane.xlu2 %4263 }
 0x780   : > { %v11171_v28 = vpop.xlane.xlu1 %4261 }
 0x781   : > { %5998 = vst.msk [vmem:[%s10781_s23 + $0x120] sm:$0xff] %vm477_vm0, %v5687_v33  ;;  %6851 = vmatmul.msk.f32.gmra.mxu0 %vm477_vm0, %v5093_v56  ;;  %v11176_v49 = vpop.xlane.xlu0 %4259  ;;  %v4629_v15 = vpop.f32.mrf.mxu3 }
 0x786   : > { %v5689_v45 = vpop.f32.mrf.mxu0 }
 0x787   : > { %v5690_v34 = vadd.f32 %v11114_v54, %v5689_v45  ;;  %v3660_v51 = vpop.xlane.xlu2 %3659 }
 0x788   : > { %v11179_v30 = vpop.xlane.xlu1 %4265  ;;  %v3834_v50 = vsub.f32 %v12406_v36, %v3660_v51 }
 0x789   : > { %5999 = vst.msk [vmem:[%s10781_s23 + $0x128] sm:$0xff] %vm477_vm0, %v5690_v34  ;;  %6852 = vmatmul.msk.f32.gmra.mxu0 %vm477_vm0, %v5094_v13  ;;  %v3658_v56 = vpop.xlane.xlu0 %3657 }
 0x78a   : > { %v3833_v33 = vsub.f32 %v12408_v12, %v3658_v56  ;;  %v4043_v52 = vmul.f32 1.442695, %v3834_v50  ;;  %v4632_v56 = vpop.f32.mrf.mxu3 }
 0x78c   : > { %v4041_v20 = vmul.f32 1.442695, %v3833_v33  ;;  %7229 = vpow2.f32 %v4043_v52 }
 0x78e   : > { %7231 = vpow2.f32 %v4041_v20  ;;  %v5692_v45 = vpop.f32.mrf.mxu0 }
 0x78f   : > { %v5693_v62 = vadd.f32 %v11114_v54, %v5692_v45  ;;  %v11187_v1 = vpop.xlane.xlu2 %4269  ;;  %7233 = vrcp.f32 %v4248_v23 }
 0x790   : > { %v3662_v36 = vpop.xlane.xlu1 %3661 }
 0x791   : > { %6000 = vst.msk [vmem:[%s10781_s23 + $0x130] sm:$0xff] %vm477_vm0, %v5693_v62  ;;  %6853 = vmatmul.msk.f32.gmra.mxu0 %vm477_vm0, %v5095_v37  ;;  %v11192_v13 = vpop.xlane.xlu0 %4267  ;;  %v3835_v12 = vsub.f32 %v12411_v26, %v3662_v36 }
 0x792   : > { %v7230_v52 = vpop.eup %7229 }
 0x793   : > { %v4045_v34 = vmul.f32 1.442695, %v3835_v12  ;;  %4299 = vadd.xlane.f32.xlu0 %v7230_v52 }
 0x794   : > { %v7232_v20 = vpop.eup %7231 }
 0x795   : > { %7235 = vpow2.f32 %v4045_v34  ;;  %4734 = vmatmul.f32.vlgmr.msrb.gmra.mxu1 %v7232_v20  ;;  %4297 = vadd.xlane.f32.xlu1 %v7232_v20  ;;  %v7234_v18 = vpop.eup %7233 }
 0x796   : > { %v5695_v51 = vpop.f32.mrf.mxu0  ;;  %v5096_v23 = vmul.f32 %v7234_v18, %v4626_v53  ;;  %7237 = vrcp.f32 %v11153_v31 }
 0x797   : > { %v5696_v50 = vadd.f32 %v11114_v54, %v5695_v51  ;;  %v3666_v62 = vpop.xlane.xlu2 %3665 }
 0x798   : > { %v11197_v33 = vpop.xlane.xlu1 %4271  ;;  %v3837_v26 = vsub.f32 %v12413_v63, %v3666_v62 }
 0x799   : > { %6001 = vst.msk [vmem:[%s10781_s23 + $0x138] sm:$0xff] %vm477_vm0, %v5696_v50  ;;  %6854 = vmatmul.msk.f32.gmra.mxu0 %vm477_vm0, %v5096_v23  ;;  %v3664_v61 = vpop.xlane.xlu0 %3663  ;;  %v4635_v23 = vpop.f32.mrf.mxu3 }
 0x79a   : > { %v3836_v45 = vsub.f32 %v12416_v8, %v3664_v61  ;;  %v4049_v37 = vmul.f32 1.442695, %v3837_v26 }
 0x79b   : > { %v7236_v53 = vpop.eup %7235  ;;  %3697 = vmax.xlane.f32.xlu0 %v10680_v5 }
 0x79c   : > { %v4047_v36 = vmul.f32 1.442695, %v3836_v45  ;;  %7239 = vpow2.f32 %v4049_v37  ;;  %4301 = vadd.xlane.f32.xlu2 %v7236_v53  ;;  %v7238_v31 = vpop.eup %7237 }
 0x79d   : > { %4737 = vmatmul.f32.gmra.mxu1 %v7230_v52  ;;  %3695 = vmax.xlane.f32.xlu1 %v10653_v10  ;;  %v5097_v12 = vmul.f32 %v7238_v31, %v4629_v15 }
 0x79e   : > { %7241 = vpow2.f32 %v4047_v36  ;;  %v5698_v63 = vpop.f32.mrf.mxu0 }
 0x79f   : > { %v5699_v34 = vadd.f32 %v11114_v54, %v5698_v63  ;;  %v11207_v20 = vpop.xlane.xlu2 %4275  ;;  %7243 = vrcp.f32 %v11150_v39 }
 0x7a0   : > { %v3668_v8 = vpop.xlane.xlu1 %3667 }
 0x7a1   : > { %6002 = vst.msk [vmem:[%s10781_s23 + $0x140] sm:$0xff] %vm477_vm0, %v5699_v34  ;;  %6855 = vmatmul.msk.f32.gmra.mxu0 %vm477_vm0, %v5097_v12  ;;  %v11213_v18 = vpop.xlane.xlu0 %4273  ;;  %v3838_v52 = vsub.f32 %v12418_v41, %v3668_v8 }
 0x7a2   : > { %v7240_v51 = vpop.eup %7239 }
 0x7a3   : > { %v4051_v50 = vmul.f32 1.442695, %v3838_v52  ;;  %4305 = vadd.xlane.f32.xlu0 %v7240_v51 }
 0x7a4   : > { %v7242_v15 = vpop.eup %7241  ;;  %3699 = vmax.xlane.f32.xlu2 %v10701_v19 }
 0x7a5   : > { %7245 = vpow2.f32 %v4051_v50  ;;  %4740 = vmatmul.f32.gmra.mxu1 %v7236_v53  ;;  %4303 = vadd.xlane.f32.xlu1 %v7242_v15  ;;  %v7244_v39 = vpop.eup %7243 }
 0x7a6   : > { %v5701_v62 = vpop.f32.mrf.mxu0  ;;  %v5098_v26 = vmul.f32 %v7244_v39, %v4632_v56  ;;  %7247 = vrcp.f32 %v11163_v25  ;;  %v4638_v56 = vpop.f32.mrf.mxu3 }
 0x7a7   : > { %v5702_v61 = vadd.f32 %v11114_v54, %v5701_v62  ;;  %v3672_v45 = vpop.xlane.xlu2 %3671 }
 0x7a8   : > { %v11219_v41 = vpop.xlane.xlu1 %4277  ;;  %v3840_v37 = vsub.f32 %v12421_v43, %v3672_v45 }
 0x7a9   : > { %6003 = vst.msk [vmem:[%s10781_s23 + $0x148] sm:$0xff] %vm477_vm0, %v5702_v61  ;;  %6856 = vmatmul.msk.f32.gmra.mxu0 %vm477_vm0, %v5098_v26  ;;  %v3670_v36 = vpop.xlane.xlu0 %3669 }
 0x7aa   : > { %v3839_v53 = vsub.f32 %v12423_v59, %v3670_v36  ;;  %v4055_v31 = vmul.f32 1.442695, %v3840_v37 }
 0x7ab   : > { %v7246_v63 = vpop.eup %7245  ;;  %3703 = vmax.xlane.f32.xlu0 %v10747_v35 }
 0x7ac   : > { %v4053_v12 = vmul.f32 1.442695, %v3839_v53  ;;  %7249 = vpow2.f32 %v4055_v31  ;;  %4307 = vadd.xlane.f32.xlu2 %v7246_v63  ;;  %v7248_v43 = vpop.eup %7247 }
 0x7ad   : > { %4743 = vmatmul.f32.gmra.mxu1 %v7242_v15  ;;  %3701 = vmax.xlane.f32.xlu1 %v10726_v29  ;;  %v5099_v34 = vmul.f32 %v7248_v43, %v4635_v23 }
 0x7ae   : > { %7251 = vpow2.f32 %v4053_v12  ;;  %v5704_v25 = vpop.f32.mrf.mxu0  ;;  %v4641_v26 = vpop.f32.mrf.mxu3 }
 0x7af   : > { %v5705_v8 = vadd.f32 %v11114_v54, %v5704_v25  ;;  %v11229_v52 = vpop.xlane.xlu2 %4281  ;;  %7253 = vrcp.f32 %v11161_v24 }
 0x7b0   : > { %v3674_v59 = vpop.xlane.xlu1 %3673 }
 0x7b1   : > { %6004 = vst.msk [vmem:[%s10781_s23 + $0x150] sm:$0xff] %vm477_vm0, %v5705_v8  ;;  %6857 = vmatmul.msk.f32.gmra.mxu0 %vm477_vm0, %v5099_v34  ;;  %v11235_v50 = vpop.xlane.xlu0 %4279  ;;  %v3841_v15 = vsub.f32 %v12426_v7, %v3674_v59 }
 0x7b2   : > { %v11238_v39 = vpop.eup %7249 }
 0x7b3   : > { %v4057_v62 = vmul.f32 1.442695, %v3841_v15  ;;  %4311 = vadd.xlane.f32.xlu0 %v11238_v39 }
 0x7b4   : > { %v7252_v23 = vpop.eup %7251  ;;  %3705 = vmax.xlane.f32.xlu2 %v10762_v16 }
 0x7b5   : > { %7255 = vpow2.f32 %v4057_v62  ;;  %4746 = vmatmul.f32.gmra.mxu1 %v7240_v51  ;;  %4309 = vadd.xlane.f32.xlu1 %v7252_v23  ;;  %v7254_v24 = vpop.eup %7253 }
 0x7b6   : > { %v5707_v61 = vpop.f32.mrf.mxu0  ;;  %v5100_v45 = vmul.f32 %v7254_v24, %v4638_v56  ;;  %7257 = vrcp.f32 %v11158_v46  ;;  %v4644_v8 = vpop.f32.mrf.mxu3 }
 0x7b7   : > { %v5708_v37 = vadd.f32 %v11114_v54, %v5707_v61  ;;  %v3678_v36 = vpop.xlane.xlu2 %3677 }
 0x7b8   : > { %v11244_v7 = vpop.xlane.xlu1 %4283  ;;  %v3843_v53 = vsub.f32 %v12428_v42, %v3678_v36 }
 0x7b9   : > { %6005 = vst.msk [vmem:[%s10781_s23 + $0x158] sm:$0xff] %vm477_vm0, %v5708_v37  ;;  %6858 = vmatmul.msk.f32.gmra.mxu0 %vm477_vm0, %v5100_v45  ;;  %v3676_v31 = vpop.xlane.xlu0 %3675 }
 0x7ba   : > { %v3842_v51 = vsub.f32 %v12430_v21, %v3676_v31  ;;  %v4061_v12 = vmul.f32 1.442695, %v3843_v53 }
 0x7bb   : > { %v11251_v43 = vpop.eup %7255  ;;  %3709 = vmax.xlane.f32.xlu0 %v10796_v44 }
 0x7bc   : > { %v4059_v56 = vmul.f32 1.442695, %v3842_v51  ;;  %7259 = vpow2.f32 %v4061_v12  ;;  %4313 = vadd.xlane.f32.xlu2 %v11251_v43  ;;  %v7258_v46 = vpop.eup %7257 }
 0x7bd   : > { %4749 = vmatmul.f32.gmra.mxu1 %v7246_v63  ;;  %3707 = vmax.xlane.f32.xlu1 %v10784_v55  ;;  %v5101_v25 = vmul.f32 %v7258_v46, %v4641_v26 }
 0x7be   : > { %7261 = vpow2.f32 %v4059_v56  ;;  %v5710_v42 = vpop.f32.mrf.mxu0  ;;  %v4647_v31 = vpop.f32.mrf.mxu3 }
 0x7bf   : > { %v5711_v34 = vadd.f32 %v11114_v54, %v5710_v42  ;;  %v11257_v21 = vpop.xlane.xlu2 %4287  ;;  %7263 = vrcp.f32 %v11176_v49 }
 0x7c0   : > { %v3680_v59 = vpop.xlane.xlu1 %3679 }
 0x7c1   : > { %6006 = vst.msk [vmem:[%s10781_s23 + $0x160] sm:$0xff] %vm477_vm0, %v5711_v34  ;;  %6859 = vmatmul.msk.f32.gmra.mxu0 %vm477_vm0, %v5101_v25  ;;  %v11263_v15 = vpop.xlane.xlu0 %4285  ;;  %v3844_v63 = vsub.f32 %v12432_v2, %v3680_v59 }
 0x7c2   : > { %v11266_v62 = vpop.eup %7259 }
 0x7c3   : > { %v4063_v24 = vmul.f32 1.442695, %v3844_v63  ;;  %4317 = vadd.xlane.f32.xlu0 %v11266_v62 }
 0x7c4   : > { %v11269_v26 = vpop.eup %7261  ;;  %3711 = vmax.xlane.f32.xlu2 %v10812_v14 }
 0x7c5   : > { %7265 = vpow2.f32 %v4063_v24  ;;  %4752 = vmatmul.f32.gmra.mxu1 %v7252_v23  ;;  %4315 = vadd.xlane.f32.xlu1 %v11269_v26  ;;  %v7264_v49 = vpop.eup %7263 }
 0x7c6   : > { %v5713_v61 = vpop.f32.mrf.mxu0  ;;  %v5102_v45 = vmul.f32 %v7264_v49, %v4644_v8  ;;  %7267 = vrcp.f32 %v11171_v28  ;;  %v4650_v59 = vpop.f32.mrf.mxu3 }
 0x7c7   : > { %v5714_v37 = vadd.f32 %v11114_v54, %v5713_v61  ;;  %v3684_v2 = vpop.xlane.xlu2 %3683 }
 0x7c8   : > { %v11275_v36 = vpop.xlane.xlu1 %4289  ;;  %v3846_v56 = vsub.f32 %v12434_v32, %v3684_v2 }
 0x7c9   : > { %6007 = vst.msk [vmem:[%s10781_s23 + $0x168] sm:$0xff] %vm477_vm0, %v5714_v37  ;;  %6860 = vmatmul.msk.f32.gmra.mxu0 %vm477_vm0, %v5102_v45  ;;  %v3682_v53 = vpop.xlane.xlu0 %3681 }
 0x7ca   : > { %v3845_v23 = vsub.f32 %v12436_v58, %v3682_v53  ;;  %v4067_v8 = vmul.f32 1.442695, %v3846_v56 }
 0x7cb   : > { %v11281_v51 = vpop.eup %7265  ;;  %3715 = vmax.xlane.f32.xlu0 %v10850_v47 }
 0x7cc   : > { %v4065_v12 = vmul.f32 1.442695, %v3845_v23  ;;  %4319 = vadd.xlane.f32.xlu2 %v11281_v51  ;;  %v7268_v28 = vpop.eup %7267 }
 0x7cd   : > { %4755 = vmatmul.f32.gmra.mxu1 %v11238_v39  ;;  %3713 = vmax.xlane.f32.xlu1 %v10828_v27  ;;  %v5103_v42 = vmul.f32 %v7268_v28, %v4647_v31  ;;  %v12444_v28 = vld [vmem:[#allocation103_spill] sm:$0xff] }
 0x7ce   : > { %7269 = vpow2.f32 %v4065_v12  ;;  %v5716_v46 = vpop.f32.mrf.mxu0 }
 0x7cf   : > { %v5717_v58 = vadd.f32 %v11114_v54, %v5716_v46  ;;  %v11289_v25 = vpop.xlane.xlu2 %4293  ;;  %7271 = vrcp.f32 %v11169_v6 }
 0x7d0   : > { %v3686_v34 = vpop.xlane.xlu1 %3685  ;;  %7273 = vrcp.f32 %v11179_v30 }
 0x7d1   : > { %6008 = vst.msk [vmem:[%s10781_s23 + $0x170] sm:$0xff] %vm477_vm0, %v5717_v58  ;;  %6861 = vmatmul.msk.f32.gmra.mxu0 %vm477_vm0, %v5103_v42  ;;  %v11295_v39 = vpop.xlane.xlu0 %4291  ;;  %v3847_v63 = vsub.f32 %v12438_v4, %v3686_v34  ;;  %7275 = vpow2.f32 %v4067_v8 }
 0x7d2   : > { %7277 = vrcp.f32 %v11192_v13 }
 0x7d3   : > { %3717 = vmax.xlane.f32.xlu0 %v10865_v11  ;;  %v4069_v45 = vmul.f32 1.442695, %v3847_v63 }
 0x7d4   : > { %v11298_v32 = vpop.eup %7269  ;;  %3721 = vmax.xlane.f32.xlu2 %v10906_v38 }
 0x7d5   : > { %4758 = vmatmul.f32.gmra.mxu1 %v11251_v43  ;;  %4321 = vadd.xlane.f32.xlu1 %v11298_v32  ;;  %v7272_v6 = vpop.eup %7271  ;;  %7279 = vpow2.f32 %v4069_v45 }
 0x7d6   : > { %v5719_v24 = vpop.f32.mrf.mxu0  ;;  %v5104_v49 = vmul.f32 %v7272_v6, %v4650_v59  ;;  %v7274_v53 = vpop.eup %7273 }
 0x7d7   : > { %v5720_v61 = vadd.f32 %v11114_v54, %v5719_v24  ;;  %v11309_v4 = vpop.xlane.xlu2 %4295  ;;  %v7276_v23 = vpop.eup %7275  ;;  %v5105_v56 = vmul.f32 %v7274_v53, %v12444_v28  ;;  %v12445_v24 = vld [vmem:[#allocation19_spill] sm:$0xff] }
 0x7d8   : > { %v3690_v37 = vpop.xlane.xlu1 %3689  ;;  %v7278_v46 = vpop.eup %7277 }
 0x7d9   : > { %6009 = vst.msk [vmem:[%s10781_s23 + $0x178] sm:$0xff] %vm477_vm0, %v5720_v61  ;;  %6862 = vmatmul.msk.f32.gmra.mxu0 %vm477_vm0, %v5104_v49  ;;  %v3688_v2 = vpop.xlane.xlu0 %3687  ;;  %v3849_v30 = vsub.f32 %v12441_v22, %v3690_v37  ;;  %v5106_v49 = vmul.f32 %v7278_v46, %v12445_v24  ;;  %v12446_v37 = vld [vmem:[#allocation17_spill] sm:$0xff] }
 0x7da   : > { %v3848_v43 = vsub.f32 %v12442_v3, %v3688_v2 }
 0x7db   : > { %v4073_v31 = vmul.f32 1.442695, %v3849_v30  ;;  %3719 = vmax.xlane.f32.xlu0 %v10890_v48  ;;  %v7280_v42 = vpop.eup %7279 }
 0x7dc   : > { %v4071_v12 = vmul.f32 1.442695, %v3848_v43  ;;  %3723 = vmax.xlane.f32.xlu2 %v10926_v40  ;;  %v12447_v43 = vld [vmem:[#allocation117_spill] sm:$0xff] }
 0x7dd   : > { %7281 = vpow2.f32 %v4073_v31  ;;  %4761 = vmatmul.f32.gmra.mxu1 %v11269_v26  ;;  %4323 = vadd.xlane.f32.xlu1 %v7276_v23  ;;  %v12448_v31 = vld [vmem:[#allocation63_spill] sm:$0xff] }
 0x7de   : > { %7283 = vpow2.f32 %v4071_v12  ;;  %v5722_v22 = vpop.f32.mrf.mxu0 }
 0x7df   : > { %v5723_v3 = vadd.f32 %v11114_v54, %v5722_v22  ;;  %v3694_v8 = vpop.xlane.xlu2 %3693  ;;  %7285 = vrcp.f32 %v11187_v1 }
 0x7e0   : > { %v3851_v63 = vsub.f32 %v10627_v60, %v3694_v8 }
 0x7e1   : > { %6010 = vst.msk [vmem:[%s10781_s23 + $0x180] sm:$0xff] %vm477_vm0, %v5723_v3  ;;  %6863 = vmatmul.msk.f32.gmra.mxu0 %vm477_vm0, %v5105_v56  ;;  %v3692_v13 = vpop.xlane.xlu0 %3691  ;;  %v12451_v56 = vld [vmem:[#allocation21_spill] sm:$0xff] }
 0x7e2   : > { %v3850_v58 = vsub.f32 %v12443_v17, %v3692_v13  ;;  %v4077_v61 = vmul.f32 1.442695, %v3851_v63 }
 0x7e3   : > { %v7282_v34 = vpop.eup %7281 }
 0x7e4   : > { %v11323_v26 = vpop.eup %7283  ;;  %v4075_v59 = vmul.f32 1.442695, %v3850_v58  ;;  %4799 = vmatmul.f32.vlgmr.msrb.gmra.mxu2 %v7282_v34  ;;  %3725 = vmax.xlane.f32.xlu2 %v10942_v0 }
 0x7e5   : > { %4764 = vmatmul.f32.gmra.mxu1 %v11266_v62  ;;  %4325 = vadd.xlane.f32.xlu1 %v7280_v42  ;;  %v7286_v1 = vpop.eup %7285 }
 0x7e6   : > { %7287 = vpow2.f32 %v4075_v59  ;;  %4327 = vadd.xlane.f32.xlu0 %v11323_v26  ;;  %v5725_v17 = vpop.f32.mrf.mxu0  ;;  %v5107_v2 = vmul.f32 %v7286_v1, %v12446_v37 }
 0x7e7   : > { %v5726_v6 = vadd.f32 %v11114_v54, %v5725_v17  ;;  %7289 = vrcp.f32 %v11197_v33 }
 0x7e8   : > { %7291 = vpow2.f32 %v4077_v61 }
 0x7e9   : > { %6011 = vst.msk [vmem:[%s10781_s23 + $0x188] sm:$0xff] %vm477_vm0, %v5726_v6  ;;  %6864 = vmatmul.msk.f32.gmra.mxu0 %vm477_vm0, %v5106_v49  ;;  %7293 = vrcp.f32 %v11213_v18  ;;  %v12450_v18 = vld [vmem:[#allocation116_spill] sm:$0xff] }
 0x7ea   : > { %7295 = vrcp.f32 %v11207_v20  ;;  %v12453_v49 = vld [vmem:[#allocation112_spill] sm:$0xff] }
 0x7eb   : > { %7297 = vrcp.f32 %v11219_v41 }
 0x7ec   : > { %v7288_v45 = vpop.eup %7287  ;;  %4329 = vadd.xlane.f32.xlu2 %v7282_v34  ;;  %v12452_v34 = vld [vmem:[#allocation64_spill] sm:$0xff]  ;;  %7299 = vrcp.f32 %v11235_v50 }
 0x7ed   : > { %4767 = vmatmul.f32.gmra.mxu1 %v11281_v51  ;;  %4802 = vmatmul.f32.gmra.mxu2 %v7288_v45  ;;  %v7290_v30 = vpop.eup %7289 }
 0x7ee   : > { %3727 = vmax.xlane.f32.xlu1 %v10954_v9  ;;  %3729 = vmax.xlane.f32.xlu0 %v10964_v57  ;;  %v5728_v60 = vpop.f32.mrf.mxu0  ;;  %v7292_v33 = vpop.eup %7291  ;;  %v5108_v12 = vmul.f32 %v7290_v30, %v12448_v31  ;;  %v12454_v30 = vld [vmem:[#allocation25_spill] sm:$0xff] }
 0x7ef   : > { %v5729_v62 = vadd.f32 %v11114_v54, %v5728_v60  ;;  %v7294_v22 = vpop.eup %7293 }
 0x7f0   : > { %v5109_v46 = vmul.f32 %v7294_v22, %v12451_v56  ;;  %v7296_v13 = vpop.eup %7295 }
 0x7f1   : > { %6012 = vst.msk [vmem:[%s10781_s23 + $0x190] sm:$0xff] %vm477_vm0, %v5729_v62  ;;  %6865 = vmatmul.msk.f32.gmra.mxu0 %vm477_vm0, %v5107_v2  ;;  %v5110_v8 = vmul.f32 %v7296_v13, %v12452_v34  ;;  %v7298_v63 = vpop.eup %7297 }
 0x7f2   : > { %v5111_v61 = vmul.f32 %v7298_v63, %v12453_v49  ;;  %v12458_v49 = vld [vmem:[#allocation67_spill] sm:$0xff] }
 0x7f4   : > { %3731 = vmax.xlane.f32.xlu2 %v12447_v43 }
 0x7f5   : > { %4770 = vmatmul.f32.gmra.mxu1 %v11298_v32  ;;  %4805 = vmatmul.f32.gmra.mxu2 %v7292_v33  ;;  %v12449_v32 = vld [vmem:[#allocation70_spill] sm:$0xff] }
 0x7f6   : > { %4331 = vadd.xlane.f32.xlu1 %v7288_v45  ;;  %4333 = vadd.xlane.f32.xlu0 %v7292_v33  ;;  %v5731_v51 = vpop.f32.mrf.mxu0 }
 0x7f7   : > { %v5732_v53 = vadd.f32 %v11114_v54, %v5731_v51 }
 0x7f9   : > { %6013 = vst.msk [vmem:[%s10781_s23 + $0x198] sm:$0xff] %vm477_vm0, %v5732_v53  ;;  %6866 = vmatmul.msk.f32.gmra.mxu0 %vm477_vm0, %v5108_v12 }
 0x7fd   : > { %4773 = vmatmul.f32.gmra.mxu1 %v7276_v23 }
 0x7fe   : > { %3733 = vmax.xlane.f32.xlu1 %v12449_v32  ;;  %3735 = vmax.xlane.f32.xlu0 %v12450_v18  ;;  %v5734_v3 = vpop.f32.mrf.mxu0 }
 0x7ff   : > { %v5735_v28 = vadd.f32 %v11114_v54, %v5734_v3 }
 0x801   : > { %6014 = vst.msk [vmem:[%s10781_s23 + $0x1a0] sm:$0xff] %vm477_vm0, %v5735_v28  ;;  %6867 = vmatmul.msk.f32.gmra.mxu0 %vm477_vm0, %v5109_v46  ;;  %v12455_v46 = vld [vmem:[#allocation66_spill] sm:$0xff] }
 0x805   : > { %4776 = vmatmul.f32.gmra.mxu1 %v7280_v42 }
 0x806   : > { %v5737_v23 = vpop.f32.mrf.mxu0  ;;  %v11361_v20 = vpop.xlane.xlu0 %4299 }
 0x807   : > { %v5738_v58 = vadd.f32 %v11114_v54, %v5737_v23 }
 0x808   : > { %v11365_v59 = vpop.xlane.xlu1 %4297 }
 0x809   : > { %6015 = vst.msk [vmem:[%s10781_s23 + $0x1a8] sm:$0xff] %vm477_vm0, %v5738_v58  ;;  %6868 = vmatmul.msk.f32.gmra.mxu0 %vm477_vm0, %v5110_v8 }
 0x80d   : > { %4779 = vmatmul.f32.gmra.mxu1 %v11323_v26  ;;  %v7300_v26 = vpop.eup %7299 }
 0x80e   : > { %v5740_v41 = vpop.f32.mrf.mxu0  ;;  %v3698_v42 = vpop.xlane.xlu0 %3697  ;;  %v5112_v33 = vmul.f32 %v7300_v26, %v12454_v30  ;;  %v12459_v26 = vld [vmem:[#allocation113_spill] sm:$0xff] }
 0x80f   : > { %v5741_v17 = vadd.f32 %v11114_v54, %v5740_v41  ;;  %v11373_v6 = vpop.xlane.xlu2 %4301  ;;  %v3853_v24 = vsub.f32 %v10680_v5, %v3698_v42 }
 0x810   : > { %v3696_v1 = vpop.xlane.xlu1 %3695 }
 0x811   : > { %6016 = vst.msk [vmem:[%s10781_s23 + $0x1b0] sm:$0xff] %vm477_vm0, %v5741_v17  ;;  %v3852_v45 = vsub.f32 %v10653_v10, %v3696_v1  ;;  %v4081_v60 = vmul.f32 1.442695, %v3853_v24  ;;  %6869 = vmatmul.msk.f32.gmra.mxu0 %vm477_vm0, %v5111_v61 }
 0x813   : > { %v4079_v50 = vmul.f32 1.442695, %v3852_v45  ;;  %7301 = vpow2.f32 %v4081_v60 }
 0x815   : > { %7303 = vpow2.f32 %v4079_v50 }
 0x816   : > { %7305 = vrcp.f32 %v11229_v52  ;;  %v5743_v62 = vpop.f32.mrf.mxu0  ;;  %v11382_v37 = vpop.xlane.xlu0 %4305 }
 0x817   : > { %v5744_v5 = vadd.f32 %v11114_v54, %v5743_v62  ;;  %v3700_v2 = vpop.xlane.xlu2 %3699 }
 0x818   : > { %v11386_v51 = vpop.xlane.xlu1 %4303  ;;  %v3854_v10 = vsub.f32 %v10701_v19, %v3700_v2 }
 0x819   : > { %v7302_v53 = vpop.eup %7301  ;;  %6017 = vst.msk [vmem:[%s10781_s23 + $0x1b8] sm:$0xff] %vm477_vm0, %v5744_v5  ;;  %6870 = vmatmul.msk.f32.gmra.mxu0 %vm477_vm0, %v5112_v33 }
 0x81a   : > { %v4083_v31 = vmul.f32 1.442695, %v3854_v10  ;;  %4337 = vadd.xlane.f32.xlu1 %v7302_v53  ;;  %v12460_v10 = vld [vmem:[#allocation68_spill] sm:$0xff] }
 0x81b   : > { %v7304_v52 = vpop.eup %7303 }
 0x81c   : > { %v7306_v12 = vpop.eup %7305  ;;  %7307 = vpow2.f32 %v4083_v31  ;;  %4808 = vmatmul.f32.gmra.mxu2 %v7304_v52  ;;  %4335 = vadd.xlane.f32.xlu2 %v7304_v52 }
 0x81d   : > { %7309 = vrcp.f32 %v11244_v7  ;;  %v5113_v13 = vmul.f32 %v7306_v12, %v12455_v46  ;;  %v12456_v7 = vld [vmem:[#allocation114_spill] sm:$0xff] }
 0x81e   : > { %v5746_v22 = vpop.f32.mrf.mxu0  ;;  %v3704_v3 = vpop.xlane.xlu0 %3703 }
 0x81f   : > { %v5747_v28 = vadd.f32 %v11114_v54, %v5746_v22  ;;  %v11394_v19 = vpop.xlane.xlu2 %4307  ;;  %v3856_v56 = vsub.f32 %v10747_v35, %v3704_v3  ;;  %v12457_v35 = vld [vmem:[#allocation115_spill] sm:$0xff] }
 0x820   : > { %v3702_v23 = vpop.xlane.xlu1 %3701 }
 0x821   : > { %6018 = vst.msk [vmem:[%s10781_s23 + $0x1c0] sm:$0xff] %vm477_vm0, %v5747_v28  ;;  %v3855_v58 = vsub.f32 %v10726_v29, %v3702_v23  ;;  %v4087_v34 = vmul.f32 1.442695, %v3856_v56  ;;  %6871 = vmatmul.msk.f32.gmra.mxu0 %vm477_vm0, %v5113_v13  ;;  %v12463_v23 = vld [vmem:[#allocation69_spill] sm:$0xff] }
 0x822   : > { %v7308_v8 = vpop.eup %7307  ;;  %3739 = vmax.xlane.f32.xlu1 %v12456_v7 }
 0x823   : > { %v4085_v63 = vmul.f32 1.442695, %v3855_v58  ;;  %7311 = vpow2.f32 %v4087_v34  ;;  %4339 = vadd.xlane.f32.xlu0 %v7308_v8  ;;  %v7310_v41 = vpop.eup %7309 }
 0x824   : > { %4811 = vmatmul.f32.gmra.mxu2 %v7302_v53  ;;  %3737 = vmax.xlane.f32.xlu2 %v12457_v35  ;;  %v5114_v61 = vmul.f32 %v7310_v41, %v12458_v49 }
 0x825   : > { %7313 = vpow2.f32 %v4085_v63 }
 0x826   : > { %7315 = vrcp.f32 %v11263_v15  ;;  %v5749_v42 = vpop.f32.mrf.mxu0  ;;  %v11405_v17 = vpop.xlane.xlu0 %4311 }
 0x827   : > { %v5750_v29 = vadd.f32 %v11114_v54, %v5749_v42  ;;  %v3706_v24 = vpop.xlane.xlu2 %3705  ;;  %v12464_v42 = vld [vmem:[#allocation111_spill] sm:$0xff] }
 0x828   : > { %v11409_v1 = vpop.xlane.xlu1 %4309  ;;  %v3857_v45 = vsub.f32 %v10762_v16, %v3706_v24  ;;  %v11443_v24 = vpop.f32.mrf.mxu1 }
 0x829   : > { %v7312_v60 = vpop.eup %7311  ;;  %6019 = vst.msk [vmem:[%s10781_s23 + $0x1c8] sm:$0xff] %vm477_vm0, %v5750_v29  ;;  %6872 = vmatmul.msk.f32.gmra.mxu0 %vm477_vm0, %v5114_v61 }
 0x82a   : > { %v4089_v50 = vmul.f32 1.442695, %v3857_v45  ;;  %4343 = vadd.xlane.f32.xlu1 %v7312_v60 }
 0x82b   : > { %v7314_v15 = vpop.eup %7313  ;;  %3741 = vmax.xlane.f32.xlu0 %v12459_v26 }
 0x82c   : > { %v7316_v62 = vpop.eup %7315  ;;  %7317 = vpow2.f32 %v4089_v50  ;;  %4814 = vmatmul.f32.gmra.mxu2 %v7308_v8  ;;  %4341 = vadd.xlane.f32.xlu2 %v7314_v15 }
 0x82d   : > { %7319 = vrcp.f32 %v11257_v21  ;;  %v5115_v53 = vmul.f32 %v7316_v62, %v12460_v10  ;;  %v12461_v21 = vld [vmem:[#allocation33_spill] sm:$0xff] }
 0x82e   : > { %v5752_v5 = vpop.f32.mrf.mxu0  ;;  %v3710_v2 = vpop.xlane.xlu0 %3709 }
 0x82f   : > { %v5753_v16 = vadd.f32 %v11114_v54, %v5752_v5  ;;  %v11418_v30 = vpop.xlane.xlu2 %4313  ;;  %v3859_v33 = vsub.f32 %v10796_v44, %v3710_v2  ;;  %v12462_v44 = vld [vmem:[#allocation71_spill] sm:$0xff] }
 0x830   : > { %v3708_v31 = vpop.xlane.xlu1 %3707 }
 0x831   : > { %6020 = vst.msk [vmem:[%s10781_s23 + $0x1d0] sm:$0xff] %vm477_vm0, %v5753_v16  ;;  %v3858_v52 = vsub.f32 %v10784_v55, %v3708_v31  ;;  %v4093_v12 = vmul.f32 1.442695, %v3859_v33  ;;  %6873 = vmatmul.msk.f32.gmra.mxu0 %vm477_vm0, %v5115_v53  ;;  %v11464_v53 = vld [vmem:[%s11907_s8] ss:$0 sm:$0xff] }
 0x832   : > { %v7318_v22 = vpop.eup %7317  ;;  %3745 = vmax.xlane.f32.xlu1 %v12461_v21 }
 0x833   : > { %v4091_v3 = vmul.f32 1.442695, %v3858_v52  ;;  %7321 = vpow2.f32 %v4093_v12  ;;  %4345 = vadd.xlane.f32.xlu0 %v7318_v22  ;;  %v7320_v28 = vpop.eup %7319 }
 0x834   : > { %4817 = vmatmul.f32.gmra.mxu2 %v7314_v15  ;;  %3743 = vmax.xlane.f32.xlu2 %v12462_v44  ;;  %v5116_v58 = vmul.f32 %v7320_v28, %v12463_v23  ;;  %v12465_v15 = vld [vmem:[#allocation26_spill] sm:$0xff] }
 0x835   : > { %7323 = vpow2.f32 %v4091_v3  ;;  %v12468_v3 = vld [vmem:[#allocation27_spill] sm:$0xff] }
 0x836   : > { %7325 = vrcp.f32 %v11275_v36  ;;  %v5755_v56 = vpop.f32.mrf.mxu0  ;;  %v11429_v46 = vpop.xlane.xlu0 %4317 }
 0x837   : > { %v5756_v55 = vadd.f32 %v11114_v54, %v5755_v56  ;;  %v3712_v13 = vpop.xlane.xlu2 %3711 }
 0x838   : > { %v11433_v34 = vpop.xlane.xlu1 %4315  ;;  %v3860_v8 = vsub.f32 %v10812_v14, %v3712_v13 }
 0x839   : > { %v11436_v63 = vpop.eup %7321  ;;  %6021 = vst.msk [vmem:[%s10781_s23 + $0x1d8] sm:$0xff] %vm477_vm0, %v5756_v55  ;;  %6874 = vmatmul.msk.f32.gmra.mxu0 %vm477_vm0, %v5116_v58 }
 0x83a   : > { %v4095_v41 = vmul.f32 1.442695, %v3860_v8  ;;  %4349 = vadd.xlane.f32.xlu1 %v11436_v63 }
 0x83b   : > { %v7324_v36 = vpop.eup %7323  ;;  %3747 = vmax.xlane.f32.xlu0 %v12464_v42 }
 0x83c   : > { %v7326_v29 = vpop.eup %7325  ;;  %7327 = vpow2.f32 %v4095_v41  ;;  %4820 = vmatmul.f32.gmra.mxu2 %v7312_v60  ;;  %4347 = vadd.xlane.f32.xlu2 %v7324_v36 }
 0x83d   : > { %7329 = vrcp.f32 %v11295_v39  ;;  %v5117_v62 = vmul.f32 %v7326_v29, %v12465_v15  ;;  %v12466_v39 = vld [vmem:[#allocation29_spill] sm:$0xff] }
 0x83e   : > { %v5758_v14 = vpop.f32.mrf.mxu0  ;;  %v3716_v49 = vpop.xlane.xlu0 %3715 }
 0x83f   : > { %v5759_v61 = vadd.f32 %v11114_v54, %v5758_v14  ;;  %v11447_v45 = vpop.xlane.xlu2 %4319  ;;  %v3862_v50 = vsub.f32 %v10850_v47, %v3716_v49  ;;  %v12467_v47 = vld [vmem:[#allocation31_spill] sm:$0xff] }
 0x840   : > { %v3714_v5 = vpop.xlane.xlu1 %3713  ;;  %v12469_v49 = vld [vmem:[#allocation119_spill] sm:$0xff] }
 0x841   : > { %6022 = vst.msk [vmem:[%s10781_s23 + $0x1e0] sm:$0xff] %vm477_vm0, %v5759_v61  ;;  %v3861_v60 = vsub.f32 %v10828_v27, %v3714_v5  ;;  %v4099_v2 = vmul.f32 1.442695, %v3862_v50  ;;  %6875 = vmatmul.msk.f32.gmra.mxu0 %vm477_vm0, %v5117_v62 }
 0x842   : > { %v11455_v16 = vpop.eup %7327  ;;  %3751 = vmax.xlane.f32.xlu1 %v12466_v39 }
 0x843   : > { %v4097_v33 = vmul.f32 1.442695, %v3861_v60  ;;  %7331 = vpow2.f32 %v4099_v2  ;;  %4351 = vadd.xlane.f32.xlu0 %v11455_v16  ;;  %v7330_v54 = vpop.eup %7329 }
 0x844   : > { %4823 = vmatmul.f32.gmra.mxu2 %v7318_v22  ;;  %3749 = vmax.xlane.f32.xlu2 %v12467_v47  ;;  %v5118_v28 = vmul.f32 %v7330_v54, %v12468_v3  ;;  %v11469_v22 = vpop.f32.mrf.mxu1  ;;  %v12470_v54 = vld [vmem:[#allocation118_spill] sm:$0xff] }
 0x845   : > { %7333 = vpow2.f32 %v4097_v33 }
 0x846   : > { %7335 = vrcp.f32 %v11289_v25  ;;  %v5761_v27 = vpop.f32.mrf.mxu0  ;;  %v3718_v10 = vpop.xlane.xlu0 %3717 }
 0x847   : > { %v5762_v31 = vadd.f32 %v11464_v53, %v5761_v27  ;;  %v3863_v52 = vsub.f32 %v10865_v11, %v3718_v10  ;;  %v3722_v12 = vpop.xlane.xlu2 %3721 }
 0x848   : > { %v11471_v56 = vpop.xlane.xlu1 %4321  ;;  %v3865_v25 = vsub.f32 %v10906_v38, %v3722_v12 }
 0x849   : > { %v11474_v55 = vpop.eup %7331  ;;  %6023 = vst.msk [vmem:[%s10781_s23 + $0x1e8] sm:$0xff] %vm477_vm0, %v5762_v31  ;;  %v4101_v13 = vmul.f32 1.442695, %v3863_v52  ;;  %6876 = vmatmul.msk.f32.gmra.mxu0 %vm477_vm0, %v5118_v28 }
 0x84a   : > { %v4105_v23 = vmul.f32 1.442695, %v3865_v25 }
 0x84b   : > { %v11479_v58 = vpop.eup %7333  ;;  %7337 = vpow2.f32 %v4101_v13  ;;  %4355 = vadd.xlane.f32.xlu0 %v11474_v55 }
 0x84c   : > { %v7336_v11 = vpop.eup %7335  ;;  %7339 = vpow2.f32 %v4105_v23  ;;  %4826 = vmatmul.f32.gmra.mxu2 %v7324_v36  ;;  %4353 = vadd.xlane.f32.xlu2 %v11479_v58  ;;  %v11495_v5 = vpop.f32.mrf.mxu1 }
 0x84d   : > { %7341 = vrcp.f32 %v11309_v4  ;;  %v5119_v61 = vmul.f32 %v7336_v11, %v12469_v49 }
 0x84e   : > { %v5764_v38 = vpop.f32.mrf.mxu0  ;;  %v3720_v8 = vpop.xlane.xlu0 %3719 }
 0x84f   : > { %v5765_v41 = vadd.f32 %v11464_v53, %v5764_v38  ;;  %v3864_v29 = vsub.f32 %v10890_v48, %v3720_v8  ;;  %v3724_v14 = vpop.xlane.xlu2 %3723 }
 0x850   : > { %v11487_v50 = vpop.xlane.xlu1 %4323  ;;  %v3866_v15 = vsub.f32 %v10926_v40, %v3724_v14 }
 0x851   : > { %v11490_v62 = vpop.eup %7337  ;;  %6024 = vst.msk [vmem:[%s10781_s23 + $0x1f0] sm:$0xff] %vm477_vm0, %v5765_v41  ;;  %v4103_v36 = vmul.f32 1.442695, %v3864_v29  ;;  %6877 = vmatmul.msk.f32.gmra.mxu0 %vm477_vm0, %v5119_v61 }
 0x852   : > { %v7340_v4 = vpop.eup %7339  ;;  %v4107_v60 = vmul.f32 1.442695, %v3866_v15  ;;  %4357 = vadd.xlane.f32.xlu1 %v11490_v62 }
 0x853   : > { %7343 = vpow2.f32 %v4103_v36  ;;  %4864 = vmatmul.f32.vlgmr.msra.gmra.mxu3 %v7340_v4  ;;  %4361 = vadd.xlane.f32.xlu0 %v7340_v4  ;;  %v7342_v48 = vpop.eup %7341 }
 0x854   : > { %7345 = vpow2.f32 %v4107_v60  ;;  %4829 = vmatmul.f32.gmra.mxu2 %v11436_v63  ;;  %v5120_v27 = vmul.f32 %v7342_v48, %v12470_v54 }
 0x855   : > { %7347 = vrcp.f32 %v11365_v59  ;;  %v11513_v59 = vpop.f32.mrf.mxu1 }
 0x856   : > { %v5767_v40 = vpop.f32.mrf.mxu0 }
 0x857   : > { %v5768_v2 = vadd.f32 %v11464_v53, %v5767_v40  ;;  %v3726_v33 = vpop.xlane.xlu2 %3725 }
 0x858   : > { %v11502_v10 = vpop.xlane.xlu1 %4325  ;;  %v3867_v31 = vsub.f32 %v10942_v0, %v3726_v33 }
 0x859   : > { %v11505_v52 = vpop.eup %7343  ;;  %6025 = vst.msk [vmem:[%s10781_s23 + $0x1f8] sm:$0xff] %vm477_vm0, %v5768_v2  ;;  %v11509_v12 = vpop.xlane.xlu0 %4327  ;;  %6878 = vmatmul.msk.f32.gmra.mxu0 %vm477_vm0, %v5120_v27 }
 0x85a   : > { %v7346_v63 = vpop.eup %7345  ;;  %v4109_v3 = vmul.f32 1.442695, %v3867_v31  ;;  %4359 = vadd.xlane.f32.xlu2 %v11505_v52 }
 0x85b   : > { %4867 = vmatmul.f32.gmra.mxu3 %v7346_v63  ;;  %4363 = vadd.xlane.f32.xlu1 %v7346_v63  ;;  %v7348_v0 = vpop.eup %7347 }
 0x85c   : > { %7349 = vpow2.f32 %v4109_v3  ;;  %4832 = vmatmul.f32.gmra.mxu2 %v11455_v16  ;;  %v5121_v25 = vmul.f32 %v7348_v0, %v11443_v24 }
 0x85d   : > { %7351 = vrcp.f32 %v11361_v20  ;;  %v4747_v20 = vpop.f32.mrf.mxu1 }
 0x85e   : > { %v5770_v28 = vpop.f32.mrf.mxu0 }
 0x85f   : > { %v5771_v13 = vadd.f32 %v11464_v53, %v5770_v28  ;;  %v11518_v23 = vpop.xlane.xlu2 %4329 }
 0x861   : > { %6026 = vst.msk [vmem:[%s10781_s23 + $0x200] sm:$0xff] %vm477_vm0, %v5771_v13  ;;  %v3728_v11 = vpop.xlane.xlu1 %3727  ;;  %v3730_v38 = vpop.xlane.xlu0 %3729  ;;  %6879 = vmatmul.msk.f32.gmra.mxu0 %vm477_vm0, %v5121_v25 }
 0x862   : > { %v7350_v8 = vpop.eup %7349  ;;  %v3868_v41 = vsub.f32 %v10954_v9, %v3728_v11  ;;  %v3869_v16 = vsub.f32 %v10964_v57, %v3730_v38 }
 0x863   : > { %4870 = vmatmul.f32.gmra.mxu3 %v7350_v8  ;;  %4365 = vadd.xlane.f32.xlu2 %v7350_v8  ;;  %v7352_v14 = vpop.eup %7351 }
 0x864   : > { %v4111_v24 = vmul.f32 1.442695, %v3868_v41  ;;  %v4113_v29 = vmul.f32 1.442695, %v3869_v16  ;;  %4835 = vmatmul.f32.gmra.mxu2 %v11479_v58  ;;  %v5122_v61 = vmul.f32 %v7352_v14, %v11469_v22 }
 0x865   : > { %v4750_v2 = vpop.f32.mrf.mxu1 }
 0x866   : > { %7353 = vpow2.f32 %v4111_v24  ;;  %v5773_v49 = vpop.f32.mrf.mxu0 }
 0x867   : > { %7355 = vpow2.f32 %v4113_v29  ;;  %v5774_v15 = vadd.f32 %v11464_v53, %v5773_v49  ;;  %v3732_v36 = vpop.xlane.xlu2 %3731 }
 0x868   : > { %7357 = vrcp.f32 %v11373_v6  ;;  %v3870_v9 = vsub.f32 %v12447_v43, %v3732_v36 }
 0x869   : > { %6027 = vst.msk [vmem:[%s10781_s23 + $0x208] sm:$0xff] %vm477_vm0, %v5774_v15  ;;  %v11533_v57 = vpop.xlane.xlu1 %4331  ;;  %v11535_v4 = vpop.xlane.xlu0 %4333  ;;  %6880 = vmatmul.msk.f32.gmra.mxu0 %vm477_vm0, %v5122_v61 }
 0x86a   : > { %v4115_v58 = vmul.f32 1.442695, %v3870_v9 }
 0x86c   : > { %v7354_v60 = vpop.eup %7353  ;;  %7359 = vpow2.f32 %v4115_v58  ;;  %4838 = vmatmul.f32.gmra.mxu2 %v11474_v55 }
 0x86d   : > { %v7356_v22 = vpop.eup %7355  ;;  %4873 = vmatmul.f32.gmra.mxu3 %v7354_v60  ;;  %4367 = vadd.xlane.f32.xlu0 %v7354_v60  ;;  %7361 = vrcp.f32 %v11386_v51 }
 0x86e   : > { %v7358_v6 = vpop.eup %7357  ;;  %4369 = vadd.xlane.f32.xlu1 %v7356_v22  ;;  %v5776_v43 = vpop.f32.mrf.mxu0 }
 0x86f   : > { %v5123_v48 = vmul.f32 %v7358_v6, %v11495_v5  ;;  %v5777_v40 = vadd.f32 %v11464_v53, %v5776_v43 }
 0x871   : > { %6028 = vst.msk [vmem:[%s10781_s23 + $0x210] sm:$0xff] %vm477_vm0, %v5777_v40  ;;  %v3734_v33 = vpop.xlane.xlu1 %3733  ;;  %v3736_v54 = vpop.xlane.xlu0 %3735  ;;  %6881 = vmatmul.msk.f32.gmra.mxu0 %vm477_vm0, %v5123_v48 }
 0x872   : > { %v7360_v55 = vpop.eup %7359  ;;  %v3871_v27 = vsub.f32 %v12449_v32, %v3734_v33  ;;  %v3872_v31 = vsub.f32 %v12450_v18, %v3736_v54  ;;  %v4753_v32 = vpop.f32.mrf.mxu1 }
 0x873   : > { %4371 = vadd.xlane.f32.xlu2 %v7360_v55  ;;  %v7362_v51 = vpop.eup %7361 }
 0x874   : > { %v4117_v63 = vmul.f32 1.442695, %v3871_v27  ;;  %v4119_v5 = vmul.f32 1.442695, %v3872_v31  ;;  %4841 = vmatmul.f32.gmra.mxu2 %v11490_v62  ;;  %v5124_v0 = vmul.f32 %v7362_v51, %v11513_v59 }
 0x875   : > { %4876 = vmatmul.f32.gmra.mxu3 %v7356_v22 }
 0x876   : > { %7363 = vpow2.f32 %v4117_v63  ;;  %v5779_v3 = vpop.f32.mrf.mxu0 }
 0x877   : > { %7365 = vpow2.f32 %v4119_v5  ;;  %v5780_v28 = vadd.f32 %v11464_v53, %v5779_v3 }
 0x878   : > { %7367 = vrcp.f32 %v11382_v37 }
 0x879   : > { %6029 = vst.msk [vmem:[%s10781_s23 + $0x218] sm:$0xff] %vm477_vm0, %v5780_v28  ;;  %6882 = vmatmul.msk.f32.gmra.mxu0 %vm477_vm0, %v5124_v0  ;;  %7369 = vrcp.f32 %v11394_v19 }
 0x87a   : > { %v4756_v37 = vpop.f32.mrf.mxu1  ;;  %7371 = vrcp.f32 %v11409_v1 }
 0x87b   : > { %7373 = vrcp.f32 %v11405_v17 }
 0x87c   : > { %v7364_v18 = vpop.eup %7363  ;;  %4844 = vmatmul.f32.gmra.mxu2 %v11505_v52  ;;  %7375 = vrcp.f32 %v11418_v30 }
 0x87d   : > { %v7366_v62 = vpop.eup %7365  ;;  %4373 = vadd.xlane.f32.xlu0 %v7364_v18  ;;  %4879 = vmatmul.f32.gmra.mxu3 %v7360_v55 }
 0x87e   : > { %v7368_v25 = vpop.eup %7367  ;;  %4375 = vadd.xlane.f32.xlu1 %v7366_v62  ;;  %v5782_v59 = vpop.f32.mrf.mxu0 }
 0x87f   : > { %v5125_v13 = vmul.f32 %v7368_v25, %v4747_v20  ;;  %v5783_v11 = vadd.f32 %v11464_v53, %v5782_v59  ;;  %v7370_v38 = vpop.eup %7369 }
 0x880   : > { %v5126_v8 = vmul.f32 %v7370_v38, %v4750_v2  ;;  %v7372_v16 = vpop.eup %7371 }
 0x881   : > { %6030 = vst.msk [vmem:[%s10781_s23 + $0x220] sm:$0xff] %vm477_vm0, %v5783_v11  ;;  %6883 = vmatmul.msk.f32.gmra.mxu0 %vm477_vm0, %v5125_v13  ;;  %v5127_v14 = vmul.f32 %v7372_v16, %v4753_v32  ;;  %v7374_v61 = vpop.eup %7373 }
 0x882   : > { %v4759_v24 = vpop.f32.mrf.mxu1  ;;  %v5128_v58 = vmul.f32 %v7374_v61, %v4756_v37 }
 0x885   : > { %4882 = vmatmul.f32.gmra.mxu3 %v7364_v18 }
 0x886   : > { %v5785_v52 = vpop.f32.mrf.mxu0 }
 0x887   : > { %v5786_v41 = vadd.f32 %v11464_v53, %v5785_v52 }
 0x889   : > { %6031 = vst.msk [vmem:[%s10781_s23 + $0x228] sm:$0xff] %vm477_vm0, %v5786_v41  ;;  %6884 = vmatmul.msk.f32.gmra.mxu0 %vm477_vm0, %v5126_v8 }
 0x88a   : > { %v4762_v6 = vpop.f32.mrf.mxu1 }
 0x88d   : > { %4885 = vmatmul.f32.gmra.mxu3 %v7366_v62  ;;  %v11565_v19 = vpop.xlane.xlu1 %4337 }
 0x88e   : > { %v5788_v29 = vpop.f32.mrf.mxu0 }
 0x88f   : > { %v5789_v20 = vadd.f32 %v11464_v53, %v5788_v29  ;;  %v11568_v49 = vpop.xlane.xlu2 %4335 }
 0x891   : > { %6032 = vst.msk [vmem:[%s10781_s23 + $0x230] sm:$0xff] %vm477_vm0, %v5789_v20  ;;  %6885 = vmatmul.msk.f32.gmra.mxu0 %vm477_vm0, %v5127_v14 }
 0x892   : > { %v4765_v5 = vpop.f32.mrf.mxu1 }
 0x895   : > { %v3740_v1 = vpop.xlane.xlu1 %3739 }
 0x896   : > { %v5791_v15 = vpop.f32.mrf.mxu0  ;;  %v11574_v36 = vpop.xlane.xlu0 %4339  ;;  %v3874_v9 = vsub.f32 %v12456_v7, %v3740_v1 }
 0x897   : > { %v5792_v60 = vadd.f32 %v11464_v53, %v5791_v15  ;;  %v3738_v22 = vpop.xlane.xlu2 %3737  ;;  %v7376_v7 = vpop.eup %7375 }
 0x898   : > { %v3873_v17 = vsub.f32 %v12457_v35, %v3738_v22  ;;  %v4123_v43 = vmul.f32 1.442695, %v3874_v9  ;;  %v5129_v54 = vmul.f32 %v7376_v7, %v4759_v24 }
 0x899   : > { %6033 = vst.msk [vmem:[%s10781_s23 + $0x238] sm:$0xff] %vm477_vm0, %v5792_v60  ;;  %6886 = vmatmul.msk.f32.gmra.mxu0 %vm477_vm0, %v5128_v58 }
 0x89a   : > { %v4121_v48 = vmul.f32 1.442695, %v3873_v17  ;;  %7377 = vpow2.f32 %v4123_v43  ;;  %v4800_v17 = vpop.f32.mrf.mxu2 }
 0x89c   : > { %7379 = vpow2.f32 %v4121_v48 }
 0x89d   : > { %v11583_v40 = vpop.xlane.xlu1 %4343  ;;  %7381 = vrcp.f32 %v11433_v34 }
 0x89e   : > { %v5794_v2 = vpop.f32.mrf.mxu0  ;;  %v3742_v33 = vpop.xlane.xlu0 %3741 }
 0x89f   : > { %v5795_v30 = vadd.f32 %v11464_v53, %v5794_v2  ;;  %v11586_v55 = vpop.xlane.xlu2 %4341  ;;  %v3875_v35 = vsub.f32 %v12459_v26, %v3742_v33 }
 0x8a0   : > { %v7378_v27 = vpop.eup %7377 }
 0x8a1   : > { %6034 = vst.msk [vmem:[%s10781_s23 + $0x240] sm:$0xff] %vm477_vm0, %v5795_v30  ;;  %v4125_v31 = vmul.f32 1.442695, %v3875_v35  ;;  %6887 = vmatmul.msk.f32.gmra.mxu0 %vm477_vm0, %v5129_v54  ;;  %4379 = vadd.xlane.f32.xlu0 %v7378_v27 }
 0x8a2   : > { %v7380_v63 = vpop.eup %7379 }
 0x8a3   : > { %7383 = vpow2.f32 %v4125_v31  ;;  %4377 = vadd.xlane.f32.xlu2 %v7380_v63  ;;  %4888 = vmatmul.f32.gmra.mxu3 %v7380_v63  ;;  %v7382_v3 = vpop.eup %7381 }
 0x8a4   : > { %v5130_v28 = vmul.f32 %v7382_v3, %v4762_v6  ;;  %7385 = vrcp.f32 %v11429_v46 }
 0x8a5   : > { %v3746_v51 = vpop.xlane.xlu1 %3745 }
 0x8a6   : > { %v5797_v0 = vpop.f32.mrf.mxu0  ;;  %v3877_v26 = vsub.f32 %v12461_v21, %v3746_v51  ;;  %v4768_v21 = vpop.f32.mrf.mxu1 }
 0x8a7   : > { %v5798_v34 = vadd.f32 %v11464_v53, %v5797_v0  ;;  %v3744_v32 = vpop.xlane.xlu2 %3743  ;;  %v11602_v38 = vpop.xlane.xlu0 %4345 }
 0x8a8   : > { %v3876_v18 = vsub.f32 %v12462_v44, %v3744_v32  ;;  %v4129_v62 = vmul.f32 1.442695, %v3877_v26 }
 0x8a9   : > { %v7384_v25 = vpop.eup %7383  ;;  %6035 = vst.msk [vmem:[%s10781_s23 + $0x248] sm:$0xff] %vm477_vm0, %v5798_v34  ;;  %6888 = vmatmul.msk.f32.gmra.mxu0 %vm477_vm0, %v5130_v28 }
 0x8aa   : > { %v4127_v59 = vmul.f32 1.442695, %v3876_v18  ;;  %7387 = vpow2.f32 %v4129_v62  ;;  %4381 = vadd.xlane.f32.xlu1 %v7384_v25  ;;  %v7386_v11 = vpop.eup %7385 }
 0x8ab   : > { %4891 = vmatmul.f32.gmra.mxu3 %v7378_v27  ;;  %v5131_v46 = vmul.f32 %v7386_v11, %v4765_v5 }
 0x8ac   : > { %7389 = vpow2.f32 %v4127_v59 }
 0x8ad   : > { %v11600_v13 = vpop.xlane.xlu1 %4349  ;;  %7391 = vrcp.f32 %v11447_v45 }
 0x8ae   : > { %v5800_v37 = vpop.f32.mrf.mxu0  ;;  %v4771_v29 = vpop.f32.mrf.mxu1  ;;  %7393 = vrcp.f32 %v11471_v56 }
 0x8af   : > { %v5801_v44 = vadd.f32 %v11464_v53, %v5800_v37  ;;  %v11605_v52 = vpop.xlane.xlu2 %4347  ;;  %v3748_v58 = vpop.xlane.xlu0 %3747 }
 0x8b0   : > { %v7388_v8 = vpop.eup %7387 }
 0x8b1   : > { %6036 = vst.msk [vmem:[%s10781_s23 + $0x250] sm:$0xff] %vm477_vm0, %v5801_v44  ;;  %6889 = vmatmul.msk.f32.gmra.mxu0 %vm477_vm0, %v5131_v46 }
 0x8b2   : > { %v7390_v41 = vpop.eup %7389  ;;  %4385 = vadd.xlane.f32.xlu1 %v7388_v8 }
 0x8b3   : > { %4383 = vadd.xlane.f32.xlu2 %v7390_v41  ;;  %4894 = vmatmul.f32.gmra.mxu3 %v7384_v25  ;;  %v7392_v24 = vpop.eup %7391 }
 0x8b4   : > { %v5132_v1 = vmul.f32 %v7392_v24, %v4768_v21  ;;  %v7394_v22 = vpop.eup %7393 }
 0x8b5   : > { %v3752_v16 = vpop.xlane.xlu1 %3751  ;;  %v5133_v43 = vmul.f32 %v7394_v22, %v4771_v29 }
 0x8b6   : > { %v5803_v14 = vpop.f32.mrf.mxu0  ;;  %v3880_v20 = vsub.f32 %v12466_v39, %v3752_v16  ;;  %v3878_v39 = vsub.f32 %v12464_v42, %v3748_v58  ;;  %v4774_v48 = vpop.f32.mrf.mxu1 }
 0x8b7   : > { %v5804_v61 = vadd.f32 %v11464_v53, %v5803_v14  ;;  %v3750_v15 = vpop.xlane.xlu2 %3749  ;;  %v11641_v18 = vpop.xlane.xlu0 %4351 }
 0x8b8   : > { %v3879_v45 = vsub.f32 %v12467_v47, %v3750_v15  ;;  %v4135_v9 = vmul.f32 1.442695, %v3880_v20  ;;  %v4131_v7 = vmul.f32 1.442695, %v3878_v39 }
 0x8b9   : > { %6037 = vst.msk [vmem:[%s10781_s23 + $0x258] sm:$0xff] %vm477_vm0, %v5804_v61  ;;  %6890 = vmatmul.msk.f32.gmra.mxu0 %vm477_vm0, %v5132_v1 }
 0x8ba   : > { %v4133_v60 = vmul.f32 1.442695, %v3879_v45  ;;  %7395 = vpow2.f32 %v4135_v9 }
 0x8bb   : > { %4897 = vmatmul.f32.gmra.mxu3 %v7390_v41 }
 0x8bc   : > { %7397 = vpow2.f32 %v4133_v60 }
 0x8bd   : > { %7399 = vrcp.f32 %v11487_v50  ;;  %v4803_v50 = vpop.f32.mrf.mxu2 }
 0x8be   : > { %v5806_v6 = vpop.f32.mrf.mxu0  ;;  %7401 = vpow2.f32 %v4131_v7  ;;  %v4777_v27 = vpop.f32.mrf.mxu1 }
 0x8bf   : > { %v5807_v56 = vadd.f32 %v11464_v53, %v5806_v6  ;;  %7403 = vrcp.f32 %v11502_v10  ;;  %v11650_v46 = vpop.xlane.xlu0 %4355 }
 0x8c0   : > { %v7396_v47 = vpop.eup %7395  ;;  %7405 = vrcp.f32 %v11509_v12 }
 0x8c1   : > { %6038 = vst.msk [vmem:[%s10781_s23 + $0x260] sm:$0xff] %vm477_vm0, %v5807_v56  ;;  %6891 = vmatmul.msk.f32.gmra.mxu0 %vm477_vm0, %v5133_v43  ;;  %4391 = vadd.xlane.f32.xlu2 %v7396_v47  ;;  %7407 = vrcp.f32 %v11518_v23 }
 0x8c2   : > { %v7398_v2 = vpop.eup %7397  ;;  %7409 = vrcp.f32 %v11533_v57 }
 0x8c3   : > { %4389 = vadd.xlane.f32.xlu0 %v7398_v2  ;;  %4900 = vmatmul.f32.gmra.mxu3 %v7388_v8  ;;  %v7400_v42 = vpop.eup %7399  ;;  %7411 = vrcp.f32 %v11535_v4 }
 0x8c4   : > { %v5134_v54 = vmul.f32 %v7400_v42, %v4774_v48  ;;  %v7402_v35 = vpop.eup %7401  ;;  %7413 = vrcp.f32 %v11568_v49  ;;  %v11677_v49 = vpop.xlane.xlu2 %4353 }
 0x8c5   : > { %v7404_v31 = vpop.eup %7403  ;;  %v4806_v10 = vpop.f32.mrf.mxu2  ;;  %7415 = vrcp.f32 %v11565_v19 }
 0x8c6   : > { %v5809_v33 = vpop.f32.mrf.mxu0  ;;  %v5135_v5 = vmul.f32 %v7404_v31, %v4777_v27  ;;  %v4780_v3 = vpop.f32.mrf.mxu1  ;;  %7417 = vrcp.f32 %v11574_v36 }
 0x8c7   : > { %v5810_v30 = vadd.f32 %v11464_v53, %v5809_v33  ;;  %v7406_v0 = vpop.eup %7405  ;;  %v11659_v20 = vpop.xlane.xlu0 %4361 }
 0x8c8   : > { %v5136_v28 = vmul.f32 %v7406_v0, %v4780_v3  ;;  %v7408_v62 = vpop.eup %7407 }
 0x8c9   : > { %6039 = vst.msk [vmem:[%s10781_s23 + $0x268] sm:$0xff] %vm477_vm0, %v5810_v30  ;;  %6892 = vmatmul.msk.f32.gmra.mxu0 %vm477_vm0, %v5134_v54  ;;  %v5137_v25 = vmul.f32 %v7408_v62, %v4800_v17  ;;  %v7410_v11 = vpop.eup %7409 }
 0x8ca   : > { %v5138_v8 = vmul.f32 %v7410_v11, %v4803_v50  ;;  %v7412_v16 = vpop.eup %7411 }
 0x8cb   : > { %4387 = vadd.xlane.f32.xlu0 %v7402_v35  ;;  %4903 = vmatmul.f32.gmra.mxu3 %v7402_v35  ;;  %v5139_v29 = vmul.f32 %v7412_v16, %v4806_v10  ;;  %v7414_v4 = vpop.eup %7413 }
 0x8cc   : > { %v7416_v22 = vpop.eup %7415 }
 0x8cd   : > { %v4809_v12 = vpop.f32.mrf.mxu2  ;;  %v11686_v48 = vpop.xlane.xlu2 %4359 }
 0x8ce   : > { %v5812_v63 = vpop.f32.mrf.mxu0  ;;  %v5140_v45 = vmul.f32 %v7414_v4, %v4809_v12  ;;  %v7418_v7 = vpop.eup %7417 }
 0x8cf   : > { %v5813_v51 = vadd.f32 %v11464_v53, %v5812_v63 }
 0x8d1   : > { %6040 = vst.msk [vmem:[%s10781_s23 + $0x270] sm:$0xff] %vm477_vm0, %v5813_v51  ;;  %6893 = vmatmul.msk.f32.gmra.mxu0 %vm477_vm0, %v5135_v5 }
 0x8d3   : > { %4906 = vmatmul.f32.gmra.mxu3 %v7398_v2 }
 0x8d5   : > { %v4812_v37 = vpop.f32.mrf.mxu2 }
 0x8d6   : > { %v5815_v26 = vpop.f32.mrf.mxu0  ;;  %v11636_v32 = vpop.f32.mrf.mxu3  ;;  %v5141_v17 = vmul.f32 %v7416_v22, %v4812_v37 }
 0x8d7   : > { %v5816_v34 = vadd.f32 %v11464_v53, %v5815_v26  ;;  %v11695_v27 = vpop.xlane.xlu2 %4365 }
 0x8d9   : > { %6041 = vst.msk [vmem:[%s10781_s23 + $0x278] sm:$0xff] %vm477_vm0, %v5816_v34  ;;  %6894 = vmatmul.msk.f32.gmra.mxu0 %vm477_vm0, %v5136_v28 }
 0x8db   : > { %4909 = vmatmul.f32.gmra.mxu3 %v7396_v47 }
 0x8dd   : > { %v4815_v14 = vpop.f32.mrf.mxu2 }
 0x8de   : > { %v5818_v23 = vpop.f32.mrf.mxu0  ;;  %v11645_v21 = vpop.f32.mrf.mxu3  ;;  %v5142_v42 = vmul.f32 %v7418_v7, %v4815_v14 }
 0x8df   : > { %v5819_v59 = vadd.f32 %v11464_v53, %v5818_v23 }
 0x8e0   : > { %v11668_v9 = vpop.xlane.xlu0 %4367 }
 0x8e1   : > { %6042 = vst.msk [vmem:[%s10781_s23 + $0x280] sm:$0xff] %vm477_vm0, %v5819_v59  ;;  %6895 = vmatmul.msk.f32.gmra.mxu0 %vm477_vm0, %v5137_v25 }
 0x8e5   : > { %v4818_v39 = vpop.f32.mrf.mxu2 }
 0x8e6   : > { %v5821_v44 = vpop.f32.mrf.mxu0  ;;  %v11653_v57 = vpop.f32.mrf.mxu3 }
 0x8e7   : > { %v5822_v41 = vadd.f32 %v11464_v53, %v5821_v44  ;;  %v11702_v51 = vpop.xlane.xlu2 %4371 }
 0x8e9   : > { %6043 = vst.msk [vmem:[%s10781_s23 + $0x288] sm:$0xff] %vm477_vm0, %v5822_v41  ;;  %6896 = vmatmul.msk.f32.gmra.mxu0 %vm477_vm0, %v5138_v8 }
 0x8ed   : > { %v4821_v19 = vpop.f32.mrf.mxu2 }
 0x8ee   : > { %v5824_v24 = vpop.f32.mrf.mxu0 }
 0x8ef   : > { %v5825_v1 = vadd.f32 %v11464_v53, %v5824_v24 }
 0x8f0   : > { %v11663_v61 = vpop.f32.mrf.mxu3  ;;  %v4374_v43 = vpop.xlane.xlu0 %4373 }
 0x8f1   : > { %6044 = vst.msk [vmem:[%s10781_s23 + $0x290] sm:$0xff] %vm477_vm0, %v5825_v1  ;;  %6897 = vmatmul.msk.f32.gmra.mxu0 %vm477_vm0, %v5139_v29  ;;  %7419 = vrcp.f32 %v4374_v43 }
 0x8f2   : > { %7421 = vrcp.f32 %v11586_v55 }
 0x8f3   : > { %7423 = vrcp.f32 %v11583_v40 }
 0x8f4   : > { %7425 = vrcp.f32 %v11602_v38 }
 0x8f5   : > { %v4824_v50 = vpop.f32.mrf.mxu2  ;;  %7427 = vrcp.f32 %v11605_v52 }
 0x8f6   : > { %v5827_v15 = vpop.f32.mrf.mxu0 }
 0x8f7   : > { %v5828_v58 = vadd.f32 %v11464_v53, %v5827_v15  ;;  %v7420_v54 = vpop.eup %7419 }
 0x8f8   : > { %v11672_v60 = vpop.f32.mrf.mxu3  ;;  %v7422_v35 = vpop.eup %7421 }
 0x8f9   : > { %6045 = vst.msk [vmem:[%s10781_s23 + $0x298] sm:$0xff] %vm477_vm0, %v5828_v58  ;;  %6898 = vmatmul.msk.f32.gmra.mxu0 %vm477_vm0, %v5140_v45  ;;  %v5143_v63 = vmul.f32 %v7422_v35, %v4818_v39  ;;  %v7424_v55 = vpop.eup %7423 }
 0x8fa   : > { %v5144_v3 = vmul.f32 %v7424_v55, %v4821_v19  ;;  %v7426_v40 = vpop.eup %7425 }
 0x8fb   : > { %v5145_v12 = vmul.f32 %v7426_v40, %v4824_v50  ;;  %v7428_v38 = vpop.eup %7427 }
 0x8fd   : > { %v4827_v0 = vpop.f32.mrf.mxu2 }
 0x8fe   : > { %v5830_v6 = vpop.f32.mrf.mxu0  ;;  %v5146_v44 = vmul.f32 %v7428_v38, %v4827_v0 }
 0x8ff   : > { %v5831_v56 = vadd.f32 %v11464_v53, %v5830_v6 }
 0x900   : > { %v11681_v47 = vpop.f32.mrf.mxu3 }
 0x901   : > { %6046 = vst.msk [vmem:[%s10781_s23 + $0x2a0] sm:$0xff] %vm477_vm0, %v5831_v56  ;;  %6899 = vmatmul.msk.f32.gmra.mxu0 %vm477_vm0, %v5141_v17 }
 0x905   : > { %v4830_v25 = vpop.f32.mrf.mxu2 }
 0x906   : > { %v5833_v2 = vpop.f32.mrf.mxu0 }
 0x907   : > { %v5834_v33 = vadd.f32 %v11464_v53, %v5833_v2 }
 0x908   : > { %v4883_v36 = vpop.f32.mrf.mxu3 }
 0x909   : > { %6047 = vst.msk [vmem:[%s10781_s23 + $0x2a8] sm:$0xff] %vm477_vm0, %v5834_v33  ;;  %v11692_v30 = vmul.f32 %v7420_v54, %v4883_v36  ;;  %6900 = vmatmul.msk.f32.gmra.mxu0 %vm477_vm0, %v5142_v42 }
 0x90d   : > { %v4833_v52 = vpop.f32.mrf.mxu2 }
 0x90e   : > { %v5836_v31 = vpop.f32.mrf.mxu0 }
 0x90f   : > { %v5837_v5 = vadd.f32 %v11464_v53, %v5836_v31 }
 0x910   : > { %v11709_v62 = vpop.f32.mrf.mxu3 }
 0x911   : > { %6048 = vst.msk [vmem:[%s10781_s23 + $0x2b0] sm:$0xff] %vm477_vm0, %v5837_v5  ;;  %6901 = vmatmul.msk.f32.gmra.mxu0 %vm477_vm0, %v5143_v63 }
 0x914   : > { %v4380_v59 = vpop.xlane.xlu0 %4379 }
 0x916   : > { %v5839_v10 = vpop.f32.mrf.mxu0  ;;  %v4378_v28 = vpop.xlane.xlu2 %4377 }
 0x917   : > { %v5840_v26 = vadd.f32 %v11464_v53, %v5839_v10  ;;  %7429 = vrcp.f32 %v4378_v28 }
 0x918   : > { %7431 = vrcp.f32 %v11600_v13  ;;  %v4836_v13 = vpop.f32.mrf.mxu2 }
 0x919   : > { %6049 = vst.msk [vmem:[%s10781_s23 + $0x2b8] sm:$0xff] %vm477_vm0, %v5840_v26  ;;  %6902 = vmatmul.msk.f32.gmra.mxu0 %vm477_vm0, %v5144_v3  ;;  %7433 = vrcp.f32 %v4380_v59 }
 0x91a   : > { %7435 = vrcp.f32 %v11641_v18 }
 0x91b   : > { %7437 = vrcp.f32 %v11677_v49  ;;  %v4358_v49 = vpop.xlane.xlu1 %4357 }
 0x91d   : > { %v7430_v37 = vpop.eup %7429 }
 0x91e   : > { %v5842_v34 = vpop.f32.mrf.mxu0  ;;  %v7432_v24 = vpop.eup %7431 }
 0x91f   : > { %v5843_v23 = vadd.f32 %v11464_v53, %v5842_v34  ;;  %v7434_v14 = vpop.eup %7433  ;;  %v5147_v1 = vmul.f32 %v7432_v24, %v4830_v25 }
 0x920   : > { %v7436_v58 = vpop.eup %7435  ;;  %v4839_v33 = vpop.f32.mrf.mxu2 }
 0x921   : > { %6050 = vst.msk [vmem:[%s10781_s23 + $0x2c0] sm:$0xff] %vm477_vm0, %v5843_v23  ;;  %6903 = vmatmul.msk.f32.gmra.mxu0 %vm477_vm0, %v5145_v12  ;;  %v5148_v6 = vmul.f32 %v7436_v58, %v4833_v52  ;;  %v7438_v18 = vpop.eup %7437 }
 0x922   : > { %v5149_v7 = vmul.f32 %v7438_v18, %v4836_v13 }
 0x926   : > { %v5845_v11 = vpop.f32.mrf.mxu0  ;;  %v4889_v41 = vpop.f32.mrf.mxu3 }
 0x927   : > { %v5846_v8 = vadd.f32 %v11464_v53, %v5845_v11  ;;  %v11718_v16 = vmul.f32 %v7430_v37, %v4889_v41  ;;  %v4384_v39 = vpop.xlane.xlu2 %4383 }
 0x928   : > { %7439 = vrcp.f32 %v4384_v39 }
 0x929   : > { %6051 = vst.msk [vmem:[%s10781_s23 + $0x2c8] sm:$0xff] %vm477_vm0, %v5846_v8  ;;  %6904 = vmatmul.msk.f32.gmra.mxu0 %vm477_vm0, %v5146_v44  ;;  %7441 = vrcp.f32 %v11650_v46  ;;  %v4842_v46 = vpop.f32.mrf.mxu2 }
 0x92a   : > { %7443 = vrcp.f32 %v4358_v49 }
 0x92b   : > { %7445 = vrcp.f32 %v11686_v48  ;;  %v4364_v48 = vpop.xlane.xlu1 %4363 }
 0x92e   : > { %v5848_v29 = vpop.f32.mrf.mxu0  ;;  %v4892_v15 = vpop.f32.mrf.mxu3 }
 0x92f   : > { %v5849_v4 = vadd.f32 %v11464_v53, %v5848_v29  ;;  %v11725_v45 = vmul.f32 %v7434_v14, %v4892_v15  ;;  %v7440_v19 = vpop.eup %7439 }
 0x930   : > { %v7442_v36 = vpop.eup %7441 }
 0x931   : > { %6052 = vst.msk [vmem:[%s10781_s23 + $0x2d0] sm:$0xff] %vm477_vm0, %v5849_v4  ;;  %6905 = vmatmul.msk.f32.gmra.mxu0 %vm477_vm0, %v5147_v1  ;;  %v5150_v35 = vmul.f32 %v7442_v36, %v4839_v33  ;;  %v7444_v5 = vpop.eup %7443  ;;  %v4845_v40 = vpop.f32.mrf.mxu2 }
 0x932   : > { %v5151_v3 = vmul.f32 %v7444_v5, %v4842_v46  ;;  %v7446_v28 = vpop.eup %7445 }
 0x933   : > { %v5152_v25 = vmul.f32 %v7446_v28, %v4845_v40 }
 0x934   : > { %v4392_v34 = vpop.xlane.xlu2 %4391 }
 0x936   : > { %v5851_v22 = vpop.f32.mrf.mxu0  ;;  %v11731_v43 = vpop.f32.mrf.mxu3 }
 0x937   : > { %v5852_v17 = vadd.f32 %v11464_v53, %v5851_v22  ;;  %v4390_v55 = vpop.xlane.xlu0 %4389 }
 0x938   : > { %7447 = vrcp.f32 %v4390_v55 }
 0x939   : > { %6053 = vst.msk [vmem:[%s10781_s23 + $0x2d8] sm:$0xff] %vm477_vm0, %v5852_v17  ;;  %6906 = vmatmul.msk.f32.gmra.mxu0 %vm477_vm0, %v5148_v6  ;;  %7449 = vrcp.f32 %v11659_v20 }
 0x93a   : > { %7451 = vrcp.f32 %v4392_v34 }
 0x93b   : > { %7453 = vrcp.f32 %v4364_v48 }
 0x93c   : > { %7455 = vrcp.f32 %v11695_v27 }
 0x93d   : > { %7457 = vrcp.f32 %v11668_v9 }
 0x93e   : > { %v5854_v56 = vpop.f32.mrf.mxu0  ;;  %v4898_v42 = vpop.f32.mrf.mxu3 }
 0x93f   : > { %v5855_v2 = vadd.f32 %v11464_v53, %v5854_v56  ;;  %v11739_v54 = vmul.f32 %v7440_v19, %v4898_v42  ;;  %v7448_v23 = vpop.eup %7447 }
 0x940   : > { %v7450_v37 = vpop.eup %7449 }
 0x941   : > { %6054 = vst.msk [vmem:[%s10781_s23 + $0x2e0] sm:$0xff] %vm477_vm0, %v5855_v2  ;;  %6907 = vmatmul.msk.f32.gmra.mxu0 %vm477_vm0, %v5149_v7  ;;  %v7452_v8 = vpop.eup %7451  ;;  %v5153_v41 = vmul.f32 %v7450_v37, %v11636_v32  ;;  %v11796_v7 = vld [vmem:[%s11907_s8] ss:$0 sm:$0xff] }
 0x942   : > { %v7454_v29 = vpop.eup %7453 }
 0x943   : > { %v5154_v1 = vmul.f32 %v7454_v29, %v11645_v21  ;;  %v7456_v32 = vpop.eup %7455  ;;  %v4370_v21 = vpop.xlane.xlu1 %4369 }
 0x944   : > { %v5155_v13 = vmul.f32 %v7456_v32, %v11653_v57  ;;  %v7458_v27 = vpop.eup %7457  ;;  %7459 = vrcp.f32 %v4370_v21 }
 0x945   : > { %v5156_v22 = vmul.f32 %v7458_v27, %v11663_v61  ;;  %7461 = vrcp.f32 %v11702_v51 }
 0x946   : > { %v5857_v50 = vpop.f32.mrf.mxu0  ;;  %v11745_v63 = vpop.f32.mrf.mxu3 }
 0x947   : > { %v5858_v31 = vadd.f32 %v11464_v53, %v5857_v50 }
 0x949   : > { %6055 = vst.msk [vmem:[%s10781_s23 + $0x2e8] sm:$0xff] %vm477_vm0, %v5858_v31  ;;  %6908 = vmatmul.msk.f32.gmra.mxu0 %vm477_vm0, %v5150_v35 }
 0x94a   : > { %v7460_v57 = vpop.eup %7459 }
 0x94b   : > { %v5157_v17 = vmul.f32 %v7460_v57, %v11672_v60  ;;  %v7462_v61 = vpop.eup %7461 }
 0x94c   : > { %v5158_v19 = vmul.f32 %v7462_v61, %v11681_v47 }
 0x94e   : > { %v5860_v10 = vpop.f32.mrf.mxu0  ;;  %v11751_v26 = vpop.f32.mrf.mxu3 }
 0x94f   : > { %v5861_v0 = vadd.f32 %v11464_v53, %v5860_v10 }
 0x951   : > { %6056 = vst.msk [vmem:[%s10781_s23 + $0x2f0] sm:$0xff] %vm477_vm0, %v5861_v0  ;;  %6909 = vmatmul.msk.f32.gmra.mxu0 %vm477_vm0, %v5151_v3 }
 0x956   : > { %v5863_v12 = vpop.f32.mrf.mxu0  ;;  %v4907_v59 = vpop.f32.mrf.mxu3 }
 0x957   : > { %v5864_v38 = vadd.f32 %v11464_v53, %v5863_v12  ;;  %v5167_v11 = vmul.f32 %v7448_v23, %v4907_v59 }
 0x959   : > { %6057 = vst.msk [vmem:[%s10781_s23 + $0x2f8] sm:$0xff] %vm477_vm0, %v5864_v38  ;;  %6910 = vmatmul.msk.f32.gmra.mxu0 %vm477_vm0, %v5152_v25  ;;  %6925 = vmatmul.msk.f32.vlgmr.msrb.gmra.mxu3 %vm477_vm0, %v5167_v11 }
 0x95e   : > { %v5866_v44 = vpop.f32.mrf.mxu0  ;;  %v4910_v24 = vpop.f32.mrf.mxu3 }
 0x95f   : > { %v5867_v52 = vadd.f32 %v11464_v53, %v5866_v44  ;;  %v5168_v20 = vmul.f32 %v7452_v8, %v4910_v24 }
 0x961   : > { %6058 = vst.msk [vmem:[%s10781_s23 + $0x300] sm:$0xff] %vm477_vm0, %v5867_v52  ;;  %6911 = vmatmul.msk.f32.gmra.mxu0 %vm477_vm0, %v5153_v41  ;;  %6926 = vmatmul.msk.f32.gmra.mxu3 %vm477_vm0, %v5168_v20 }
 0x966   : > { %v5869_v14 = vpop.f32.mrf.mxu0 }
 0x967   : > { %v5870_v4 = vadd.f32 %v11464_v53, %v5869_v14 }
 0x969   : > { %6059 = vst.msk [vmem:[%s10781_s23 + $0x308] sm:$0xff] %vm477_vm0, %v5870_v4  ;;  %6912 = vmatmul.msk.f32.gmra.mxu0 %vm477_vm0, %v5154_v1 }
 0x96e   : > { %v5872_v15 = vpop.f32.mrf.mxu0 }
 0x96f   : > { %v5873_v58 = vadd.f32 %v11464_v53, %v5872_v15 }
 0x971   : > { %6060 = vst.msk [vmem:[%s10781_s23 + $0x310] sm:$0xff] %vm477_vm0, %v5873_v58  ;;  %6913 = vmatmul.msk.f32.gmra.mxu0 %vm477_vm0, %v5155_v13 }
 0x976   : > { %v5875_v39 = vpop.f32.mrf.mxu0 }
 0x977   : > { %v5876_v6 = vadd.f32 %v11464_v53, %v5875_v39 }
 0x979   : > { %6061 = vst.msk [vmem:[%s10781_s23 + $0x318] sm:$0xff] %vm477_vm0, %v5876_v6  ;;  %6914 = vmatmul.msk.f32.gmra.mxu0 %vm477_vm0, %v5156_v22 }
 0x97e   : > { %v5878_v9 = vpop.f32.mrf.mxu0 }
 0x97f   : > { %v5879_v18 = vadd.f32 %v11464_v53, %v5878_v9  ;;  %v4376_v53 = vpop.xlane.xlu1 %4375 }
 0x980   : > { %7463 = vrcp.f32 %v4376_v53 }
 0x981   : > { %6062 = vst.msk [vmem:[%s10781_s23 + $0x320] sm:$0xff] %vm477_vm0, %v5879_v18  ;;  %6915 = vmatmul.msk.f32.gmra.mxu0 %vm477_vm0, %v5157_v17 }
 0x986   : > { %v5881_v56 = vpop.f32.mrf.mxu0  ;;  %v7464_v47 = vpop.eup %7463 }
 0x987   : > { %v5882_v60 = vadd.f32 %v11796_v7, %v5881_v56  ;;  %v5160_v33 = vmul.f32 %v7464_v47, %v11709_v62 }
 0x989   : > { %6063 = vst.msk [vmem:[%s10781_s23 + $0x328] sm:$0xff] %vm477_vm0, %v5882_v60  ;;  %6916 = vmatmul.msk.f32.gmra.mxu0 %vm477_vm0, %v5158_v19 }
 0x98e   : > { %v5884_v51 = vpop.f32.mrf.mxu0 }
 0x98f   : > { %v5885_v2 = vadd.f32 %v11796_v7, %v5884_v51 }
 0x991   : > { %6064 = vst.msk [vmem:[%s10781_s23 + $0x330] sm:$0xff] %vm477_vm0, %v5885_v2  ;;  %6917 = vmatmul.msk.f32.gmra.mxu0 %vm477_vm0, %v11692_v30  ;;  %v4382_v30 = vpop.xlane.xlu1 %4381 }
 0x992   : > { %7465 = vrcp.f32 %v4382_v30 }
 0x996   : > { %v5887_v42 = vpop.f32.mrf.mxu0 }
 0x997   : > { %v5888_v49 = vadd.f32 %v11796_v7, %v5887_v42 }
 0x998   : > { %v7466_v31 = vpop.eup %7465 }
 0x999   : > { %6065 = vst.msk [vmem:[%s10781_s23 + $0x338] sm:$0xff] %vm477_vm0, %v5888_v49  ;;  %6918 = vmatmul.msk.f32.gmra.mxu0 %vm477_vm0, %v5160_v33  ;;  %v5163_v5 = vmul.f32 %v7466_v31, %v11731_v43 }
 0x99e   : > { %v5890_v36 = vpop.f32.mrf.mxu0 }
 0x99f   : > { %v5891_v50 = vadd.f32 %v11796_v7, %v5890_v36 }
 0x9a1   : > { %6066 = vst.msk [vmem:[%s10781_s23 + $0x340] sm:$0xff] %vm477_vm0, %v5891_v50  ;;  %6919 = vmatmul.msk.f32.gmra.mxu0 %vm477_vm0, %v11718_v16  ;;  %v4386_v16 = vpop.xlane.xlu1 %4385 }
 0x9a2   : > { %7467 = vrcp.f32 %v4386_v16 }
 0x9a6   : > { %v5893_v35 = vpop.f32.mrf.mxu0 }
 0x9a7   : > { %v5894_v62 = vadd.f32 %v11796_v7, %v5893_v35 }
 0x9a8   : > { %v7468_v43 = vpop.eup %7467 }
 0x9a9   : > { %6067 = vst.msk [vmem:[%s10781_s23 + $0x348] sm:$0xff] %vm477_vm0, %v5894_v62  ;;  %6920 = vmatmul.msk.f32.gmra.mxu0 %vm477_vm0, %v11725_v45  ;;  %v4388_v45 = vpop.xlane.xlu0 %4387  ;;  %v5165_v40 = vmul.f32 %v7468_v43, %v11745_v63 }
 0x9aa   : > { %7469 = vrcp.f32 %v4388_v45 }
 0x9ae   : > { %v5896_v46 = vpop.f32.mrf.mxu0 }
 0x9af   : > { %v5897_v55 = vadd.f32 %v11796_v7, %v5896_v46 }
 0x9b0   : > { %v7470_v34 = vpop.eup %7469 }
 0x9b1   : > { %6068 = vst.msk [vmem:[%s10781_s23 + $0x350] sm:$0xff] %vm477_vm0, %v5897_v55  ;;  %6921 = vmatmul.msk.f32.gmra.mxu0 %vm477_vm0, %v5163_v5 }
 0x9b6   : > { %v5899_v10 = vpop.f32.mrf.mxu0 }
 0x9b7   : > { %v5900_v3 = vadd.f32 %v11796_v7, %v5899_v10 }
 0x9b9   : > { %6069 = vst.msk [vmem:[%s10781_s23 + $0x358] sm:$0xff] %vm477_vm0, %v5900_v3  ;;  %6922 = vmatmul.msk.f32.gmra.mxu0 %vm477_vm0, %v11739_v54  ;;  %v5166_v54 = vmul.f32 %v7470_v34, %v11751_v26 }
 0x9be   : > { %v5902_v0 = vpop.f32.mrf.mxu0 }
 0x9bf   : > { %v5903_v28 = vadd.f32 %v11796_v7, %v5902_v0 }
 0x9c1   : > { %6070 = vst.msk [vmem:[%s10781_s23 + $0x360] sm:$0xff] %vm477_vm0, %v5903_v28  ;;  %6923 = vmatmul.msk.f32.gmra.mxu0 %vm477_vm0, %v5165_v40 }
 0x9c6   : > { %v5905_v12 = vpop.f32.mrf.mxu0 }
 0x9c7   : > { %v5906_v23 = vadd.f32 %v11796_v7, %v5905_v12 }
 0x9c9   : > { %6071 = vst.msk [vmem:[%s10781_s23 + $0x368] sm:$0xff] %vm477_vm0, %v5906_v23  ;;  %6924 = vmatmul.msk.f32.gmra.mxu0 %vm477_vm0, %v5166_v54 }
 0x9ce   : > { %v5908_v63 = vpop.f32.mrf.mxu0 }
 0x9cf   : > { %v5909_v25 = vadd.f32 %v11796_v7, %v5908_v63 }
 0x9d1   : > { %6072 = vst.msk [vmem:[%s10781_s23 + $0x370] sm:$0xff] %vm477_vm0, %v5909_v25 }
 0x9d6   : > { %v5911_v38 = vpop.f32.mrf.mxu0 }
 0x9d7   : > { %v5912_v59 = vadd.f32 %v11796_v7, %v5911_v38 }
 0x9d9   : > { %6073 = vst.msk [vmem:[%s10781_s23 + $0x378] sm:$0xff] %vm477_vm0, %v5912_v59 }
 0x9dc   : > { %v5956_v26 = vpop.f32.mrf.mxu3 }
 0x9dd   : > { %v5957_v11 = vadd.f32 %v11796_v7, %v5956_v26 }
 0x9de   : > { %v5914_v48 = vpop.f32.mrf.mxu0 }
 0x9df   : > { %v5915_v37 = vadd.f32 %v11796_v7, %v5914_v48  ;;  %6088 = vst.msk [vmem:[%s10781_s23 + $0x3f0] sm:$0xff] %vm477_vm0, %v5957_v11 }
 0x9e1   : > { %6074 = vst.msk [vmem:[%s10781_s23 + $0x380] sm:$0xff] %vm477_vm0, %v5915_v37 }
 0x9e4   : > { %v5959_v44 = vpop.f32.mrf.mxu3 }
 0x9e5   : > { %v5960_v8 = vadd.f32 %v11796_v7, %v5959_v44 }
 0x9e6   : > { %v5917_v41 = vpop.f32.mrf.mxu0 }
 0x9e7   : > { %v5918_v52 = vadd.f32 %v11796_v7, %v5917_v41  ;;  %6089 = vst.msk [vmem:[%s10781_s23 + $0x3f8] sm:$0xff] %vm477_vm0, %v5960_v8 }
 0x9e9   : > { %6075 = vst.msk [vmem:[%s10781_s23 + $0x388] sm:$0xff] %vm477_vm0, %v5918_v52 }
 0x9ee   : > { %v5920_v24 = vpop.f32.mrf.mxu0 }
 0x9ef   : > { %v5921_v20 = vadd.f32 %v11796_v7, %v5920_v24 }
 0x9f1   : > { %6076 = vst.msk [vmem:[%s10781_s23 + $0x390] sm:$0xff] %vm477_vm0, %v5921_v20 }
 0x9f6   : > { %v5923_v29 = vpop.f32.mrf.mxu0 }
 0x9f7   : > { %v5924_v14 = vadd.f32 %v11796_v7, %v5923_v29 }
 0x9f9   : > { %6077 = vst.msk [vmem:[%s10781_s23 + $0x398] sm:$0xff] %vm477_vm0, %v5924_v14 }
 0x9fe   : > { %v5926_v1 = vpop.f32.mrf.mxu0 }
 0x9ff   : > { %v5927_v4 = vadd.f32 %v11796_v7, %v5926_v1 }
 0xa01   : > { %6078 = vst.msk [vmem:[%s10781_s23 + $0x3a0] sm:$0xff] %vm477_vm0, %v5927_v4 }
 0xa06   : > { %v5929_v32 = vpop.f32.mrf.mxu0 }
 0xa07   : > { %v5930_v15 = vadd.f32 %v11796_v7, %v5929_v32 }
 0xa09   : > { %6079 = vst.msk [vmem:[%s10781_s23 + $0x3a8] sm:$0xff] %vm477_vm0, %v5930_v15 }
 0xa0e   : > { %v5932_v13 = vpop.f32.mrf.mxu0 }
 0xa0f   : > { %v5933_v58 = vadd.f32 %v11796_v7, %v5932_v13 }
 0xa11   : > { %6080 = vst.msk [vmem:[%s10781_s23 + $0x3b0] sm:$0xff] %vm477_vm0, %v5933_v58 }
 0xa16   : > { %v5935_v21 = vpop.f32.mrf.mxu0 }
 0xa17   : > { %v5936_v27 = vadd.f32 %v11796_v7, %v5935_v21 }
 0xa19   : > { %6081 = vst.msk [vmem:[%s10781_s23 + $0x3b8] sm:$0xff] %vm477_vm0, %v5936_v27 }
 0xa1e   : > { %v5938_v39 = vpop.f32.mrf.mxu0 }
 0xa1f   : > { %v5939_v22 = vadd.f32 %v11796_v7, %v5938_v39 }
 0xa21   : > { %6082 = vst.msk [vmem:[%s10781_s23 + $0x3c0] sm:$0xff] %vm477_vm0, %v5939_v22 }
 0xa26   : > { %v5941_v6 = vpop.f32.mrf.mxu0 }
 0xa27   : > { %v5942_v57 = vadd.f32 %v11796_v7, %v5941_v6 }
 0xa29   : > { %6083 = vst.msk [vmem:[%s10781_s23 + $0x3c8] sm:$0xff] %vm477_vm0, %v5942_v57 }
 0xa2e   : > { %v5944_v9 = vpop.f32.mrf.mxu0 }
 0xa2f   : > { %v5945_v17 = vadd.f32 %v11796_v7, %v5944_v9 }
 0xa31   : > { %6084 = vst.msk [vmem:[%s10781_s23 + $0x3d0] sm:$0xff] %vm477_vm0, %v5945_v17 }
 0xa36   : > { %v5947_v18 = vpop.f32.mrf.mxu0 }
 0xa37   : > { %v5948_v61 = vadd.f32 %v11796_v7, %v5947_v18 }
 0xa39   : > { %6085 = vst.msk [vmem:[%s10781_s23 + $0x3d8] sm:$0xff] %vm477_vm0, %v5948_v61 }
 0xa3e   : > { %v5950_v56 = vpop.f32.mrf.mxu0 }
 0xa3f   : > { %v5951_v19 = vadd.f32 %v11796_v7, %v5950_v56 }
 0xa41   : > { %6086 = vst.msk [vmem:[%s10781_s23 + $0x3e0] sm:$0xff] %vm477_vm0, %v5951_v19 }
 0xa46   : > { %v5953_v60 = vpop.f32.mrf.mxu0 }
 0xa47   : > { %v5954_v53 = vadd.f32 %v11796_v7, %v5953_v60 }
 0xa49   : > { %6087 = vst.msk [vmem:[%s10781_s23 + $0x3e8] sm:$0xff] %vm477_vm0, %v5954_v53 }
 0xa4a PF: > { %s19_s30 = sadd.s32 1, %s7583_s30  }
 0xa4b   : > { %p16_p4 = scmp.ge.s32.totalorder %s19_s30, 4  }
 0xa4d   :  { %18 = sbr.rel (!%p16_p4) target bundleno = 1 (0x1), region = 86 }

</bundles_post_ra>
